<compile_context>
chip_gen: v5e
topology: v5e:2x2
jax: 0.10.0
libtpu: 0.0.40
codegen_flags: <defaults>
</compile_context>

<pallas_src>
import functools

import jax
import jax.numpy as jnp
from jax.experimental import pallas as pl
from jax.experimental.pallas import tpu as pltpu


# ---------------------------------------------------------------------------
# Pallas kernel: fused  out = relu?(a @ b + bias)
# ---------------------------------------------------------------------------
def _mm_bias_act_kernel(a_ref, b_ref, bias_ref, o_ref, *, relu):
    acc = jnp.dot(a_ref[...], b_ref[...], preferred_element_type=jnp.float32)
    acc = acc + bias_ref[...]          # bias broadcasts over rows or lanes
    if relu:
        acc = jnp.maximum(acc, 0.0)
    o_ref[...] = acc.astype(o_ref.dtype)


def _compiler_params():
    return pltpu.CompilerParams(
        dimension_semantics=("parallel",),          # megacore sharding on v7x
        vmem_limit_bytes=32 * 1024 * 1024,          # >= v5e default, == v6e/v7x
    )


def matmul_bias_act(x, w, b, *, relu, tm_cap=512):
    """out = act(x @ w + b).  x: [M, K] (cast to bf16), w: [K, N] bf16,
    b: [N] f32.  Tiled over M; the weight/bias blocks are grid-invariant so
    they are DMA'd once and stay resident while M tiles stream through."""
    M, K = x.shape
    N = w.shape[1]
    x = x.astype(jnp.bfloat16)
    b2 = b.reshape(1, N).astype(jnp.float32)
    tm = M if M <= tm_cap else tm_cap
    grid = (pl.cdiv(M, tm),)
    cost = pl.CostEstimate(
        flops=2 * M * K * N, transcendentals=0,
        bytes_accessed=(M * K + K * N) * 2 + M * N * 4 + N * 4)
    return pl.pallas_call(
        functools.partial(_mm_bias_act_kernel, relu=relu),
        out_shape=jax.ShapeDtypeStruct((M, N), jnp.float32),
        grid=grid,
        in_specs=[
            pl.BlockSpec((tm, K), lambda i: (i, 0)),
            pl.BlockSpec((K, N), lambda i: (0, 0)),
            pl.BlockSpec((1, N), lambda i: (0, 0)),
        ],
        out_specs=pl.BlockSpec((tm, N), lambda i: (i, 0)),
        compiler_params=_compiler_params(),
        cost_estimate=cost,
    )(x, w.astype(jnp.bfloat16), b2)


def matmul_bias_act_coltiled(w, x, b, *, relu, tn_cap=512):
    """out[Nr, M] = act(w[Nr, K] @ x[K, M] + b[:, None]), tiled over M (lanes).
    Used for conv1: the big streamed operand ([9, M]) and the output ([32, M])
    are lane-dense, avoiding the 14x-padded [M, 9] tile and masked stores."""
    Nr, K = w.shape
    M = x.shape[1]
    x = x.astype(jnp.bfloat16)
    b2 = b.reshape(Nr, 1).astype(jnp.float32)
    tn = M if M <= tn_cap else tn_cap
    grid = (pl.cdiv(M, tn),)
    cost = pl.CostEstimate(
        flops=2 * M * K * Nr, transcendentals=0,
        bytes_accessed=(M * K + K * Nr) * 2 + M * Nr * 4 + Nr * 4)
    return pl.pallas_call(
        functools.partial(_mm_bias_act_kernel, relu=relu),
        out_shape=jax.ShapeDtypeStruct((Nr, M), jnp.float32),
        grid=grid,
        in_specs=[
            pl.BlockSpec((Nr, K), lambda i: (0, 0)),
            pl.BlockSpec((K, tn), lambda i: (0, i)),
            pl.BlockSpec((Nr, 1), lambda i: (0, 0)),
        ],
        out_specs=pl.BlockSpec((Nr, tn), lambda i: (0, i)),
        compiler_params=_compiler_params(),
        cost_estimate=cost,
    )(w.astype(jnp.bfloat16), x, b2)


# ---------------------------------------------------------------------------
# Conv glue (patch extraction stays in plain JAX; matmul runs in Pallas)
# ---------------------------------------------------------------------------
def _im2col(x, ksize, stride, pad):
    # x: [B, H, W, C] -> patches [B*Ho*Wo, ksize*ksize*C]; tap-major, C inner.
    B, H, W, C = x.shape
    xp = jnp.pad(x, ((0, 0), (pad, pad), (pad, pad), (0, 0)))
    Ho = (H + 2 * pad - ksize) // stride + 1
    Wo = (W + 2 * pad - ksize) // stride + 1
    cols = []
    for ki in range(ksize):
        for kj in range(ksize):
            cols.append(xp[:, ki:ki + stride * Ho:stride,
                           kj:kj + stride * Wo:stride, :])
    patches = jnp.concatenate(cols, axis=-1)  # index = (ki*K + kj)*C + c
    return patches.reshape(B * Ho * Wo, ksize * ksize * C), Ho, Wo


def conv2d_relu(x, w_mat, b, *, stride, relu=True):
    """x: [B, H, W, Cin] NHWC.  w_mat: pre-packed [9*Cin, Cout] bf16."""
    B = x.shape[0]
    Cout = w_mat.shape[1]
    patches, Ho, Wo = _im2col(x, ksize=3, stride=stride, pad=1)
    out = matmul_bias_act(patches, w_mat, b, relu=relu)
    return out.reshape(B, Ho, Wo, Cout)


def conv1_relu(x, w_co_k, b):
    """First conv (Cin=1, stride=1, pad=1) as a transposed, lane-dense matmul.
    x: [B, H, W, 1]; w_co_k: [Cout, 9] bf16 (tap index ki*3+kj); b: [Cout]."""
    B, H, W, _ = x.shape
    Cout = w_co_k.shape[0]
    xp = jnp.pad(x[..., 0], ((0, 0), (1, 1), (1, 1)))            # [B, H+2, W+2]
    cols = jnp.stack([xp[:, ki:ki + H, kj:kj + W]
                      for ki in range(3) for kj in range(3)], axis=0)
    cols = cols.reshape(9, B * H * W)                            # [9, M], lane-dense
    out_t = matmul_bias_act_coltiled(w_co_k, cols, b, relu=True)  # [Cout, M]
    # Tiny (B*28*28*32 f32) relayout back to NHWC for the next conv's im2col.
    return jnp.transpose(out_t.reshape(Cout, B, H, W), (1, 2, 3, 0))


# ---------------------------------------------------------------------------
# Parameters: PyTorch-layout init, then one-time packing (hoisted out of jit)
# ---------------------------------------------------------------------------
def init_params(key, input_channel=1, output_dim=32):
    ks = jax.random.split(key, 10)
    scale = 0.05

    def w(k, shape):
        return jax.random.normal(k, shape, jnp.float32) * scale

    return {
        "c1_w": w(ks[0], (32, input_channel, 3, 3)), "c1_b": w(ks[1], (32,)),
        "c2_w": w(ks[2], (64, 32, 3, 3)),            "c2_b": w(ks[3], (64,)),
        "c3_w": w(ks[4], (64, 64, 3, 3)),            "c3_b": w(ks[5], (64,)),
        "fc1_w": w(ks[6], (512, 64 * 7 * 7)),        "fc1_b": w(ks[7], (512,)),
        "fc2_w": w(ks[8], (output_dim, 512)),        "fc2_b": w(ks[9], (output_dim,)),
    }


def prepare_params(p):
    """One-time layout/dtype packing so the jitted forward does no weight prep:
    conv weights -> [9*Cin, Cout] bf16 (conv1 kept as [Cout, 9] for the
    transposed matmul), fc weights -> [K, N] bf16, biases stay f32."""
    bf16 = jnp.bfloat16

    def conv_pack(w):  # [Cout, Cin, 3, 3] -> [3,3,Cin,Cout] -> [9*Cin, Cout]
        return jnp.transpose(w, (2, 3, 1, 0)).reshape(-1, w.shape[0]).astype(bf16)

    return {
        "c1_wT": p["c1_w"].reshape(p["c1_w"].shape[0], 9).astype(bf16),  # [32, 9]
        "c1_b": p["c1_b"],
        "c2_w": conv_pack(p["c2_w"]), "c2_b": p["c2_b"],
        "c3_w": conv_pack(p["c3_w"]), "c3_b": p["c3_b"],
        "fc1_w": jnp.transpose(p["fc1_w"]).astype(bf16), "fc1_b": p["fc1_b"],
        "fc2_w": jnp.transpose(p["fc2_w"]).astype(bf16), "fc2_b": p["fc2_b"],
    }


# ---------------------------------------------------------------------------
# Forward pass (matches TinyNet.forward; Dropout = eval-mode identity)
# ---------------------------------------------------------------------------
@jax.jit
def tiny_net_forward(params, x_nchw):
    x = jnp.transpose(x_nchw, (0, 2, 3, 1))                         # [B,28,28,1]
    x = conv1_relu(x, params["c1_wT"], params["c1_b"])              # [B,28,28,32]
    x = conv2d_relu(x, params["c2_w"], params["c2_b"], stride=2)    # [B,14,14,64]
    x = conv2d_relu(x, params["c3_w"], params["c3_b"], stride=2)    # [B, 7, 7,64]

    # nn.Flatten() on the NCHW conv output -> flatten channel-major
    B = x.shape[0]
    x = jnp.transpose(x, (0, 3, 1, 2)).reshape(B, -1)               # [B, 3136]

    # classifier: Linear -> Dropout(eval: identity) -> ReLU -> Linear
    x = matmul_bias_act(x, params["fc1_w"], params["fc1_b"], relu=True)
    x = matmul_bias_act(x, params["fc2_w"], params["fc2_b"], relu=False)
    return x                                                        # [B, 32]


if __name__ == "__main__":
    key = jax.random.PRNGKey(0)
    pkey, xkey = jax.random.split(key)
    raw = init_params(pkey, input_channel=1, output_dim=32)
    params = prepare_params(raw)          # one-time weight packing, outside jit
    # 28x28 spatial is implied by Linear(64*7*7, 512): 28 -> 28 -> 14 -> 7
    x = jax.random.normal(xkey, (2, 1, 28, 28), jnp.float32)
    out = tiny_net_forward(params, x)
    out = jax.block_until_ready(out)
    assert out.shape == (2, 32) and out.dtype == jnp.float32
    print("KERNEL_OK")
</pallas_src>

<mosaic_0001>
module attributes {stable_mosaic.version = 11 : i64} {
  func.func @_mm_bias_act_kernel(%arg0: i32, %arg1: memref<32x9xbf16, #tpu.memory_space<vmem>>, %arg2: memref<9x512xbf16, #tpu.memory_space<vmem>>, %arg3: memref<32x1xf32, #tpu.memory_space<vmem>>, %arg4: memref<32x512xf32, #tpu.memory_space<vmem>>) attributes {dimension_semantics = [#tpu.dimension_semantics<parallel>], iteration_bounds = array<i64: 4>, scalar_prefetch = 0 : i64, scratch_operands = 0 : i64, tpu.core_type = #tpu.core_type<tc>, window_params = [{pipeline_mode = #tpu.pipeline_mode<synchronous>, transform_indices = @transform_0, window_bounds = array<i64: 32, 9>}, {transform_indices = @transform_1, window_bounds = array<i64: 9, 512>}, {pipeline_mode = #tpu.pipeline_mode<synchronous>, transform_indices = @transform_2, window_bounds = array<i64: 32, 1>}, {transform_indices = @transform_3, window_bounds = array<i64: 32, 512>}]} {
    %c0 = arith.constant 0 : index
    %c0_0 = arith.constant 0 : index
    %0 = vector.load %arg1[%c0, %c0_0] : memref<32x9xbf16, #tpu.memory_space<vmem>>, vector<32x9xbf16>
    %c0_1 = arith.constant 0 : index
    %c0_2 = arith.constant 0 : index
    %1 = vector.load %arg2[%c0_1, %c0_2] : memref<9x512xbf16, #tpu.memory_space<vmem>>, vector<9x512xbf16>
    %cst = arith.constant dense<0.000000e+00> : vector<32x512xf32>
    %2 = tpu.matmul %0, %1, %cst {dimension_numbers = #tpu.dot_dimension_numbers<[1], [0], [0], [1], [0, 0, 1, 1], [], []>} : vector<32x9xbf16>, vector<9x512xbf16>, vector<32x512xf32> -> vector<32x512xf32>
    %c0_3 = arith.constant 0 : index
    %c0_4 = arith.constant 0 : index
    %3 = vector.load %arg3[%c0_3, %c0_4] : memref<32x1xf32, #tpu.memory_space<vmem>>, vector<32x1xf32>
    %4 = vector.broadcast %3 : vector<32x1xf32> to vector<32x512xf32>
    %5 = arith.addf %2, %4 : vector<32x512xf32>
    %cst_5 = arith.constant 0.000000e+00 : f32
    %6 = vector.broadcast %cst_5 : f32 to vector<32x512xf32>
    %7 = arith.maximumf %5, %6 : vector<32x512xf32>
    %c0_6 = arith.constant 0 : index
    %c0_7 = arith.constant 0 : index
    %8 = vector.load %arg4[%c0_6, %c0_7] : memref<32x512xf32, #tpu.memory_space<vmem>>, vector<32x512xf32>
    tpu.vector_store %arg4[%c0_6, %c0_7], %7 {strides = array<i32>} : memref<32x512xf32, #tpu.memory_space<vmem>>, vector<32x512xf32>,
    return
  }
  func.func @transform_0(%arg0: i32) -> (i32, i32) {
    %c0_i32 = arith.constant 0 : i32
    %c0_i32_0 = arith.constant 0 : i32
    %c0_i32_1 = arith.constant 0 : i32
    return %c0_i32, %c0_i32_0 : i32, i32
  }
  func.func @transform_1(%arg0: i32) -> (i32, i32) {
    %c0_i32 = arith.constant 0 : i32
    %c0_i32_0 = arith.constant 0 : i32
    return %c0_i32, %arg0 : i32, i32
  }
  func.func @transform_2(%arg0: i32) -> (i32, i32) {
    %c0_i32 = arith.constant 0 : i32
    %c0_i32_0 = arith.constant 0 : i32
    %c0_i32_1 = arith.constant 0 : i32
    return %c0_i32, %c0_i32_0 : i32, i32
  }
  func.func @transform_3(%arg0: i32) -> (i32, i32) {
    %c0_i32 = arith.constant 0 : i32
    %c0_i32_0 = arith.constant 0 : i32
    return %c0_i32, %arg0 : i32, i32
  }
}

module attributes {stable_mosaic.version = 11 : i64} {
  func.func @_mm_bias_act_kernel(%arg0: i32, %arg1: memref<392x288xbf16, #tpu.memory_space<vmem>>, %arg2: memref<288x64xbf16, #tpu.memory_space<vmem>>, %arg3: memref<1x64xf32, #tpu.memory_space<vmem>>, %arg4: memref<392x64xf32, #tpu.memory_space<vmem>>) attributes {dimension_semantics = [#tpu.dimension_semantics<parallel>], iteration_bounds = array<i64: 1>, scalar_prefetch = 0 : i64, scratch_operands = 0 : i64, tpu.core_type = #tpu.core_type<tc>, window_params = [{transform_indices = @transform_0, window_bounds = array<i64: 392, 288>}, {pipeline_mode = #tpu.pipeline_mode<synchronous>, transform_indices = @transform_1, window_bounds = array<i64: 288, 64>}, {pipeline_mode = #tpu.pipeline_mode<synchronous>, transform_indices = @transform_2, window_bounds = array<i64: 1, 64>}, {transform_indices = @transform_3, window_bounds = array<i64: 392, 64>}]} {
    %c0 = arith.constant 0 : index
    %c0_0 = arith.constant 0 : index
    %0 = vector.load %arg1[%c0, %c0_0] : memref<392x288xbf16, #tpu.memory_space<vmem>>, vector<392x288xbf16>
    %c0_1 = arith.constant 0 : index
    %c0_2 = arith.constant 0 : index
    %1 = vector.load %arg2[%c0_1, %c0_2] : memref<288x64xbf16, #tpu.memory_space<vmem>>, vector<288x64xbf16>
    %cst = arith.constant dense<0.000000e+00> : vector<392x64xf32>
    %2 = tpu.matmul %0, %1, %cst {dimension_numbers = #tpu.dot_dimension_numbers<[1], [0], [0], [1], [0, 0, 1, 1], [], []>} : vector<392x288xbf16>, vector<288x64xbf16>, vector<392x64xf32> -> vector<392x64xf32>
    %c0_3 = arith.constant 0 : index
    %c0_4 = arith.constant 0 : index
    %3 = vector.load %arg3[%c0_3, %c0_4] : memref<1x64xf32, #tpu.memory_space<vmem>>, vector<1x64xf32>
    %4 = vector.broadcast %3 : vector<1x64xf32> to vector<392x64xf32>
    %5 = arith.addf %2, %4 : vector<392x64xf32>
    %cst_5 = arith.constant 0.000000e+00 : f32
    %6 = vector.broadcast %cst_5 : f32 to vector<392x64xf32>
    %7 = arith.maximumf %5, %6 : vector<392x64xf32>
    %c0_6 = arith.constant 0 : index
    %c0_7 = arith.constant 0 : index
    %8 = vector.load %arg4[%c0_6, %c0_7] : memref<392x64xf32, #tpu.memory_space<vmem>>, vector<392x64xf32>
    tpu.vector_store %arg4[%c0_6, %c0_7], %7 {strides = array<i32>} : memref<392x64xf32, #tpu.memory_space<vmem>>, vector<392x64xf32>,
    return
  }
  func.func @transform_0(%arg0: i32) -> (i32, i32) {
    %c0_i32 = arith.constant 0 : i32
    %c0_i32_0 = arith.constant 0 : i32
    return %arg0, %c0_i32 : i32, i32
  }
  func.func @transform_1(%arg0: i32) -> (i32, i32) {
    %c0_i32 = arith.constant 0 : i32
    %c0_i32_0 = arith.constant 0 : i32
    %c0_i32_1 = arith.constant 0 : i32
    return %c0_i32, %c0_i32_0 : i32, i32
  }
  func.func @transform_2(%arg0: i32) -> (i32, i32) {
    %c0_i32 = arith.constant 0 : i32
    %c0_i32_0 = arith.constant 0 : i32
    %c0_i32_1 = arith.constant 0 : i32
    return %c0_i32, %c0_i32_0 : i32, i32
  }
  func.func @transform_3(%arg0: i32) -> (i32, i32) {
    %c0_i32 = arith.constant 0 : i32
    %c0_i32_0 = arith.constant 0 : i32
    return %arg0, %c0_i32 : i32, i32
  }
}

module attributes {stable_mosaic.version = 11 : i64} {
  func.func @_mm_bias_act_kernel(%arg0: i32, %arg1: memref<98x576xbf16, #tpu.memory_space<vmem>>, %arg2: memref<576x64xbf16, #tpu.memory_space<vmem>>, %arg3: memref<1x64xf32, #tpu.memory_space<vmem>>, %arg4: memref<98x64xf32, #tpu.memory_space<vmem>>) attributes {dimension_semantics = [#tpu.dimension_semantics<parallel>], iteration_bounds = array<i64: 1>, scalar_prefetch = 0 : i64, scratch_operands = 0 : i64, tpu.core_type = #tpu.core_type<tc>, window_params = [{transform_indices = @transform_0, window_bounds = array<i64: 98, 576>}, {pipeline_mode = #tpu.pipeline_mode<synchronous>, transform_indices = @transform_1, window_bounds = array<i64: 576, 64>}, {pipeline_mode = #tpu.pipeline_mode<synchronous>, transform_indices = @transform_2, window_bounds = array<i64: 1, 64>}, {transform_indices = @transform_3, window_bounds = array<i64: 98, 64>}]} {
    %c0 = arith.constant 0 : index
    %c0_0 = arith.constant 0 : index
    %0 = vector.load %arg1[%c0, %c0_0] : memref<98x576xbf16, #tpu.memory_space<vmem>>, vector<98x576xbf16>
    %c0_1 = arith.constant 0 : index
    %c0_2 = arith.constant 0 : index
    %1 = vector.load %arg2[%c0_1, %c0_2] : memref<576x64xbf16, #tpu.memory_space<vmem>>, vector<576x64xbf16>
    %cst = arith.constant dense<0.000000e+00> : vector<98x64xf32>
    %2 = tpu.matmul %0, %1, %cst {dimension_numbers = #tpu.dot_dimension_numbers<[1], [0], [0], [1], [0, 0, 1, 1], [], []>} : vector<98x576xbf16>, vector<576x64xbf16>, vector<98x64xf32> -> vector<98x64xf32>
    %c0_3 = arith.constant 0 : index
    %c0_4 = arith.constant 0 : index
    %3 = vector.load %arg3[%c0_3, %c0_4] : memref<1x64xf32, #tpu.memory_space<vmem>>, vector<1x64xf32>
    %4 = vector.broadcast %3 : vector<1x64xf32> to vector<98x64xf32>
    %5 = arith.addf %2, %4 : vector<98x64xf32>
    %cst_5 = arith.constant 0.000000e+00 : f32
    %6 = vector.broadcast %cst_5 : f32 to vector<98x64xf32>
    %7 = arith.maximumf %5, %6 : vector<98x64xf32>
    %c0_6 = arith.constant 0 : index
    %c0_7 = arith.constant 0 : index
    %8 = vector.load %arg4[%c0_6, %c0_7] : memref<98x64xf32, #tpu.memory_space<vmem>>, vector<98x64xf32>
    tpu.vector_store %arg4[%c0_6, %c0_7], %7 {strides = array<i32>} : memref<98x64xf32, #tpu.memory_space<vmem>>, vector<98x64xf32>,
    return
  }
  func.func @transform_0(%arg0: i32) -> (i32, i32) {
    %c0_i32 = arith.constant 0 : i32
    %c0_i32_0 = arith.constant 0 : i32
    return %arg0, %c0_i32 : i32, i32
  }
  func.func @transform_1(%arg0: i32) -> (i32, i32) {
    %c0_i32 = arith.constant 0 : i32
    %c0_i32_0 = arith.constant 0 : i32
    %c0_i32_1 = arith.constant 0 : i32
    return %c0_i32, %c0_i32_0 : i32, i32
  }
  func.func @transform_2(%arg0: i32) -> (i32, i32) {
    %c0_i32 = arith.constant 0 : i32
    %c0_i32_0 = arith.constant 0 : i32
    %c0_i32_1 = arith.constant 0 : i32
    return %c0_i32, %c0_i32_0 : i32, i32
  }
  func.func @transform_3(%arg0: i32) -> (i32, i32) {
    %c0_i32 = arith.constant 0 : i32
    %c0_i32_0 = arith.constant 0 : i32
    return %arg0, %c0_i32 : i32, i32
  }
}

module attributes {stable_mosaic.version = 11 : i64} {
  func.func @_mm_bias_act_kernel(%arg0: i32, %arg1: memref<2x3136xbf16, #tpu.memory_space<vmem>>, %arg2: memref<3136x512xbf16, #tpu.memory_space<vmem>>, %arg3: memref<1x512xf32, #tpu.memory_space<vmem>>, %arg4: memref<2x512xf32, #tpu.memory_space<vmem>>) attributes {dimension_semantics = [#tpu.dimension_semantics<parallel>], iteration_bounds = array<i64: 1>, scalar_prefetch = 0 : i64, scratch_operands = 0 : i64, tpu.core_type = #tpu.core_type<tc>, window_params = [{transform_indices = @transform_0, window_bounds = array<i64: 2, 3136>}, {pipeline_mode = #tpu.pipeline_mode<synchronous>, transform_indices = @transform_1, window_bounds = array<i64: 3136, 512>}, {pipeline_mode = #tpu.pipeline_mode<synchronous>, transform_indices = @transform_2, window_bounds = array<i64: 1, 512>}, {transform_indices = @transform_3, window_bounds = array<i64: 2, 512>}]} {
    %c0 = arith.constant 0 : index
    %c0_0 = arith.constant 0 : index
    %0 = vector.load %arg1[%c0, %c0_0] : memref<2x3136xbf16, #tpu.memory_space<vmem>>, vector<2x3136xbf16>
    %c0_1 = arith.constant 0 : index
    %c0_2 = arith.constant 0 : index
    %1 = vector.load %arg2[%c0_1, %c0_2] : memref<3136x512xbf16, #tpu.memory_space<vmem>>, vector<3136x512xbf16>
    %cst = arith.constant dense<0.000000e+00> : vector<2x512xf32>
    %2 = tpu.matmul %0, %1, %cst {dimension_numbers = #tpu.dot_dimension_numbers<[1], [0], [0], [1], [0, 0, 1, 1], [], []>} : vector<2x3136xbf16>, vector<3136x512xbf16>, vector<2x512xf32> -> vector<2x512xf32>
    %c0_3 = arith.constant 0 : index
    %c0_4 = arith.constant 0 : index
    %3 = vector.load %arg3[%c0_3, %c0_4] : memref<1x512xf32, #tpu.memory_space<vmem>>, vector<1x512xf32>
    %4 = vector.broadcast %3 : vector<1x512xf32> to vector<2x512xf32>
    %5 = arith.addf %2, %4 : vector<2x512xf32>
    %cst_5 = arith.constant 0.000000e+00 : f32
    %6 = vector.broadcast %cst_5 : f32 to vector<2x512xf32>
    %7 = arith.maximumf %5, %6 : vector<2x512xf32>
    %c0_6 = arith.constant 0 : index
    %c0_7 = arith.constant 0 : index
    %8 = vector.load %arg4[%c0_6, %c0_7] : memref<2x512xf32, #tpu.memory_space<vmem>>, vector<2x512xf32>
    tpu.vector_store %arg4[%c0_6, %c0_7], %7 {strides = array<i32>} : memref<2x512xf32, #tpu.memory_space<vmem>>, vector<2x512xf32>,
    return
  }
  func.func @transform_0(%arg0: i32) -> (i32, i32) {
    %c0_i32 = arith.constant 0 : i32
    %c0_i32_0 = arith.constant 0 : i32
    return %arg0, %c0_i32 : i32, i32
  }
  func.func @transform_1(%arg0: i32) -> (i32, i32) {
    %c0_i32 = arith.constant 0 : i32
    %c0_i32_0 = arith.constant 0 : i32
    %c0_i32_1 = arith.constant 0 : i32
    return %c0_i32, %c0_i32_0 : i32, i32
  }
  func.func @transform_2(%arg0: i32) -> (i32, i32) {
    %c0_i32 = arith.constant 0 : i32
    %c0_i32_0 = arith.constant 0 : i32
    %c0_i32_1 = arith.constant 0 : i32
    return %c0_i32, %c0_i32_0 : i32, i32
  }
  func.func @transform_3(%arg0: i32) -> (i32, i32) {
    %c0_i32 = arith.constant 0 : i32
    %c0_i32_0 = arith.constant 0 : i32
    return %arg0, %c0_i32 : i32, i32
  }
}

module attributes {stable_mosaic.version = 11 : i64} {
  func.func @_mm_bias_act_kernel(%arg0: i32, %arg1: memref<2x512xbf16, #tpu.memory_space<vmem>>, %arg2: memref<512x32xbf16, #tpu.memory_space<vmem>>, %arg3: memref<1x32xf32, #tpu.memory_space<vmem>>, %arg4: memref<2x32xf32, #tpu.memory_space<vmem>>) attributes {dimension_semantics = [#tpu.dimension_semantics<parallel>], iteration_bounds = array<i64: 1>, scalar_prefetch = 0 : i64, scratch_operands = 0 : i64, tpu.core_type = #tpu.core_type<tc>, window_params = [{transform_indices = @transform_0, window_bounds = array<i64: 2, 512>}, {pipeline_mode = #tpu.pipeline_mode<synchronous>, transform_indices = @transform_1, window_bounds = array<i64: 512, 32>}, {pipeline_mode = #tpu.pipeline_mode<synchronous>, transform_indices = @transform_2, window_bounds = array<i64: 1, 32>}, {transform_indices = @transform_3, window_bounds = array<i64: 2, 32>}]} {
    %c0 = arith.constant 0 : index
    %c0_0 = arith.constant 0 : index
    %0 = vector.load %arg1[%c0, %c0_0] : memref<2x512xbf16, #tpu.memory_space<vmem>>, vector<2x512xbf16>
    %c0_1 = arith.constant 0 : index
    %c0_2 = arith.constant 0 : index
    %1 = vector.load %arg2[%c0_1, %c0_2] : memref<512x32xbf16, #tpu.memory_space<vmem>>, vector<512x32xbf16>
    %cst = arith.constant dense<0.000000e+00> : vector<2x32xf32>
    %2 = tpu.matmul %0, %1, %cst {dimension_numbers = #tpu.dot_dimension_numbers<[1], [0], [0], [1], [0, 0, 1, 1], [], []>} : vector<2x512xbf16>, vector<512x32xbf16>, vector<2x32xf32> -> vector<2x32xf32>
    %c0_3 = arith.constant 0 : index
    %c0_4 = arith.constant 0 : index
    %3 = vector.load %arg3[%c0_3, %c0_4] : memref<1x32xf32, #tpu.memory_space<vmem>>, vector<1x32xf32>
    %4 = vector.broadcast %3 : vector<1x32xf32> to vector<2x32xf32>
    %5 = arith.addf %2, %4 : vector<2x32xf32>
    %c0_5 = arith.constant 0 : index
    %c0_6 = arith.constant 0 : index
    %6 = vector.load %arg4[%c0_5, %c0_6] : memref<2x32xf32, #tpu.memory_space<vmem>>, vector<2x32xf32>
    tpu.vector_store %arg4[%c0_5, %c0_6], %5 {strides = array<i32>} : memref<2x32xf32, #tpu.memory_space<vmem>>, vector<2x32xf32>,
    return
  }
  func.func @transform_0(%arg0: i32) -> (i32, i32) {
    %c0_i32 = arith.constant 0 : i32
    %c0_i32_0 = arith.constant 0 : i32
    return %arg0, %c0_i32 : i32, i32
  }
  func.func @transform_1(%arg0: i32) -> (i32, i32) {
    %c0_i32 = arith.constant 0 : i32
    %c0_i32_0 = arith.constant 0 : i32
    %c0_i32_1 = arith.constant 0 : i32
    return %c0_i32, %c0_i32_0 : i32, i32
  }
  func.func @transform_2(%arg0: i32) -> (i32, i32) {
    %c0_i32 = arith.constant 0 : i32
    %c0_i32_0 = arith.constant 0 : i32
    %c0_i32_1 = arith.constant 0 : i32
    return %c0_i32, %c0_i32_0 : i32, i32
  }
  func.func @transform_3(%arg0: i32) -> (i32, i32) {
    %c0_i32 = arith.constant 0 : i32
    %c0_i32_0 = arith.constant 0 : i32
    return %arg0, %c0_i32 : i32, i32
  }
}

</mosaic_0001>

<bundles_post_ra>
// kernel: tiny_net_forward.5
= control target key start
LH: loop header
LB: loop body
LE: loop exit
PB: predicated region body
PF: predicated region fallthrough
CT: control target
= control target key end

     0   :  { %s1883_s12 = smov 0   ;;  %s1885_s13 = smov 0   ;;  %s2514_s0 = inlined_call_operand.vmem [shape: bf16[32,9], index: 0, kind: input, shape index: {}]   ;;  %s2515_s1 = inlined_call_operand.vmem [shape: bf16[9,1568], index: 1, kind: input, shape index: {}]   ;;  %s2516_s2 = inlined_call_operand.vmem [shape: f32[32,1], index: 2, kind: input, shape index: {}]   ;;  %s2517_s3 = inlined_call_operand.vmem [shape: f32[32,1568], index: 3, kind: output, shape index: {}]  }
   0x1   :  { %s1887_s14 = smov 0  }
   0x2 LB: > { %s1899_s15 = sadd.s32 4294967295, %s1727_s14   ;;  %s1902_s16 = sadd.s32 1, %s1727_s14   ;;  %s1727_s14 = sphi %s1887_s14, %s2546_s14   ;;  %s1723_s13 = sphi %s1885_s13, %s2545_s13   ;;  %s1719_s12 = sphi %s1883_s12, %s2544_s12  }
   0x3   : > { %s38_s17 = ssub.s32 %s1727_s14, %s1902_s16  ;;  %s41_s18 = sadd.s32 1, %s1723_s13 }
   0x4   : > { %p39_p0 = scmp.eq.s32.totalorder %s38_s17, 0  ;;  %p48_p1 = scmp.ne.s32.totalorder %s1723_s13, %s1719_s12 }
   0x5   : > { %p49_p2 = scmp.eq.s32.totalorder %s1727_s14, 0  ;;  %p99_p3 = scmp.eq.s32.totalorder %s1899_s15, 3 }
   0x6   : > { %s1912_s19 = scalar_select %p39_p0, %s1723_s13, %s41_s18  }
   0x7   : > { %p50_p4 = por %p49_p2, %p48_p1  ;;  %p1914_p5 = por %p99_p3, %p48_p1 }
   0x8   : > { %p1177_p6 = scmp.ge.s32.totalorder %s1727_s14, 4 }
   0xa   : > { %127 = sbr.rel (%p1177_p6) target bundleno = 142 (0x8e), region = 24 }
   0xf   : > { %130 = sbr.rel (!%p50_p4) target bundleno = 142 (0x8e), region = 28  ;;  %s132_s21 = sand.u32 (%p50_p4), 1, %s1723_s13  }
  0x10   : > { %s1179_s22 = sshll.u32 (%p50_p4), %s1727_s14, 2  ;;  %s1178_s23 = sshll.u32 (%p50_p4), %s132_s21, 5 }
  0x11   : > { %s136_s24 = ssub.s32 (%p50_p4), 13, %s1179_s22  ;;  %s1273_s25 = sshll.u32 (%p50_p4), %s1727_s14, 4 }
  0x12   : > { %p137_p7 = scmp.lt.s32.totalorder (%p50_p4), %s136_s24, 4  ;;  %s1925_s28 = scalar_lea.vmem (%p50_p4), %s2515_s1, %s1273_s25  }
  0x13   : > { %s1929_s4 = scalar_lea.vmem (%p50_p4), [#allocation2], %s1178_s23  }
  0x14   : > { %s2548_s24 = smov (!%p137_p7, %s136_s24), 4 }
  0x15   : > { %s1180_s29 = sshll.u32 %s2548_s24, 3  ;;  %s1927_s30 = sshll.u32 %s2548_s24, 2 }
  0x16   : > { %p1184_p8 = scmp.eq.s32.totalorder %s1180_s29, 0 }
  0x17   : > { %p147_p9 = scmp.lt.u32.totalorder (!%p1184_p8), %s1927_s30, 8 }
  0x18   : > { %146 = sbr.rel (%p1184_p8) target bundleno = 142 (0x8e), region = 32 }
  0x1d   : > { %150 = sbr.rel (%p147_p9) target bundleno = 132 (0x84), region = 36  ;;  %s1933_s5 = sand.u32 (!%p147_p9), 7, %s1927_s30  }
  0x1e   : > { %p169_p10 = scmp.eq.s32.totalorder (!%p147_p9), %s1933_s5, 0  ;;  %p1185_p11 = scmp.ne.s32.totalorder (!%p147_p9), %s1933_s5, 0 }
  0x22   : > { %172 = sbr.rel (%p1185_p11) target bundleno = 80 (0x50), region = 51  ;;  %s173_s6 = sshrl.u32 (!%p1185_p11), %s1927_s30, 3 }
  0x23   : > { %s1940_s7 = sshrl.u32 (!%p1185_p11), %s173_s6, 4 }
  0x24   : > { %p1186_p12 = scmp.le.s32.totalorder (!%p1185_p11), %s1940_s7, 0 }
  0x27   : > { %1047 = sbr.rel (%p1186_p12) target bundleno = 63 (0x3f), region = 229  ;;  %s2519_s8 = smov (!%p1186_p12), %s1929_s4 }
  0x28   : > { %s2520_s9 = smov (!%p1186_p12), %s1925_s28  ;;  %s1949_s10 = smov (!%p1186_p12), 0  }
  0x29   : > { %s1951_s11 = smov (!%p1186_p12), 0  }
  0x2c LB: >> { %v184_v0 = vld [vmem:[%s1735_s9] sm:$0xff]  ;;  %v186_v1 = vld [vmem:[%s1735_s9 + $0x8] sm:$0xff]  ;;  %v216_v2 = vld [vmem:[%s1735_s9 + $0x34] sm:$0xff]  ;;  %s248_s17 = sadd.s32 1, %s1739_s10  ;;  %s178_s11 = sadd.s32 1, %s1743_s11   ;;  %s1743_s11 = sphi %s1951_s11, %s178_s11   ;;  %s1739_s10 = sphi %s1949_s10, %s2523_s10   ;;  %s1735_s9 = sphi %s2520_s9, %s2522_s9   ;;  %s1731_s8 = sphi %s2519_s8, %s2521_s8  }
  0x2d   : >> { %185 = vst [vmem:[%s1731_s8] sm:$0xff] %v184_v0  ;;  %v218_v3 = vld [vmem:[%s1735_s9 + $0x3c] sm:$0xff]  ;;  %v220_v4 = vld [vmem:[%s1735_s9 + $0x44] sm:$0xff]  ;;  %v222_v5 = vld [vmem:[%s1735_s9 + $0x4c] sm:$0xff]  ;;  %p249_p13 = scmp.ge.s32.totalorder %s248_s17, %s1940_s7  ;;  %p177_p0 = scmp.ge.s32.totalorder %s178_s11, %s1940_s7 }
  0x2e   : >> { %187 = vst [vmem:[%s1731_s8 + $0x8] sm:$0xff] %v186_v1  ;;  %v224_v6 = vld [vmem:[%s1735_s9 + $0x54] sm:$0xff]  ;;  %v226_v7 = vld [vmem:[%s1735_s9 + $0x5c] sm:$0xff]  ;;  %v228_v8 = vld [vmem:[%s1735_s9 + $0x64] sm:$0xff] }
  0x2f   : >> { %217 = vst [vmem:[%s1731_s8 + $0x10] sm:$0xff] %v216_v2  ;;  %s2550_s17 = smov (%p249_p13, %s248_s17), 0  ;;  %v230_v9 = vld [vmem:[%s1735_s9 + $0x6c] sm:$0xff]  ;;  %v232_v10 = vld [vmem:[%s1735_s9 + $0x74] sm:$0xff]  ;;  %v234_v11 = vld [vmem:[%s1735_s9 + $0x7c] sm:$0xff] }
  0x30   : >> { %219 = vst [vmem:[%s1731_s8 + $0x18] sm:$0xff] %v218_v3  ;;  %s1187_s18 = sshll.u32 %s2550_s17, 7  ;;  %v236_v12 = vld [vmem:[%s1735_s9 + $0x84] sm:$0xff]  ;;  %v238_v13 = vld [vmem:[%s1735_s9 + $0x8c] sm:$0xff]  ;;  %v240_v14 = vld [vmem:[%s1735_s9 + $0x94] sm:$0xff]  ;;  %s2523_s10 = smov %s2550_s17 }
  0x31   : >> { %221 = vst [vmem:[%s1731_s8 + $0x20] sm:$0xff] %v220_v4  ;;  %s253_s21 = scalar_lea.vmem %s1925_s28, %s1187_s18   ;;  %s254_s22 = scalar_lea.vmem %s1929_s4, %s1187_s18 [#allocation2]   ;;  %v242_v15 = vld [vmem:[%s1735_s9 + $0x9c] sm:$0xff]  ;;  %v244_v16 = vld [vmem:[%s1735_s9 + $0xa4] sm:$0xff]  ;;  %v246_v17 = vld [vmem:[%s1735_s9 + $0xac] sm:$0xff] }
  0x32   : >> { %223 = vst [vmem:[%s1731_s8 + $0x28] sm:$0xff] %v222_v5  ;;  %s2522_s9 = smov %s253_s21 }
  0x33   : >> { %225 = vst [vmem:[%s1731_s8 + $0x30] sm:$0xff] %v224_v6 }
  0x34   : >> { %227 = vst [vmem:[%s1731_s8 + $0x38] sm:$0xff] %v226_v7 }
  0x35   : >> { %229 = vst [vmem:[%s1731_s8 + $0x40] sm:$0xff] %v228_v8 }
  0x36   : >> { %231 = vst [vmem:[%s1731_s8 + $0x48] sm:$0xff] %v230_v9 }
  0x37   : >> { %233 = vst [vmem:[%s1731_s8 + $0x50] sm:$0xff] %v232_v10 }
  0x38   : >> { %235 = vst [vmem:[%s1731_s8 + $0x58] sm:$0xff] %v234_v11 }
  0x39   : >> { %237 = vst [vmem:[%s1731_s8 + $0x60] sm:$0xff] %v236_v12 }
  0x3a   : >> { %239 = vst [vmem:[%s1731_s8 + $0x68] sm:$0xff] %v238_v13  ;;  %180 = sbr.rel (!%p177_p0) target bundleno = 44 (0x2c), region = 235 }
  0x3b   : >> { %241 = vst [vmem:[%s1731_s8 + $0x70] sm:$0xff] %v240_v14 }
  0x3c   : >> { %243 = vst [vmem:[%s1731_s8 + $0x78] sm:$0xff] %v242_v15 }
  0x3d   : >> { %245 = vst [vmem:[%s1731_s8 + $0x80] sm:$0xff] %v244_v16 }
  0x3e   : >> { %247 = vst [vmem:[%s1731_s8 + $0x88] sm:$0xff] %v246_v17  ;;  %s2521_s8 = smov %s254_s22 }
  0x3f PF: > { %s2018_s23 = sand.u32 15, %s173_s6   ;;  %s1274_s24 = sshll.u32 %s1940_s7, 7 }
  0x40   : > { %s2022_s25 = scalar_lea.vmem %s1925_s28, %s1274_s24   ;;  %s261_s26 = scalar_lea.vmem %s1929_s4, %s1274_s24 [#allocation2]  }
  0x41   : > { %p1192_p1 = scmp.le.s32.totalorder %s2018_s23, 0 }
  0x42   : > { %s1745_s27 = smov (!%p1192_p1), %s261_s26   ;;  %s1749_s29 = smov (!%p1192_p1), %s2022_s25  }
  0x43   : > { %1061 = sbr.rel (%p1192_p1) target bundleno = 80 (0x50), region = 240  ;;  %s1753_s11 = smov (!%p1192_p1), 0  }
  0x44   : > { %s1757_s17 = smov (!%p1192_p1), 0  }
  0x48 LB: >> { %v271_v18 = vld [vmem:[%s1751_s29] sm:$0xff]  ;;  %v273_v19 = vld [vmem:[%s1751_s29 + $0x34] sm:$0xff]  ;;  %s275_s6 = sadd.s32 1, %s1755_s11  ;;  %s265_s17 = sadd.s32 1, %s1759_s17   ;;  %s1759_s17 = sphi %s1757_s17, %s265_s17   ;;  %s1755_s11 = sphi %s1753_s11, %s1754_s11   ;;  %s1751_s29 = sphi %s1749_s29, %s280_s29   ;;  %s1747_s27 = sphi %s1745_s27, %s281_s27  }
  0x49   : >> { %272 = vst [vmem:[%s1747_s27] sm:$0xff] %v271_v18  ;;  %p276_p2 = scmp.ge.s32.totalorder %s275_s6, %s2018_s23  ;;  %p264_p3 = scmp.ge.s32.totalorder %s265_s17, %s2018_s23 }
  0x4a   : >> { %274 = vst [vmem:[%s1747_s27 + $0x10] sm:$0xff] %v273_v19 }
  0x4b   : >> { %s2552_s6 = smov (%p276_p2, %s275_s6), 0  ;;  %267 = sbr.rel (!%p264_p3) target bundleno = 72 (0x48), region = 246 }
  0x4c   : >> { %s1193_s7 = sshll.u32 %s2552_s6, 3  ;;  %s1754_s11 = smov %s2552_s6  }
  0x4d   : >> { %s280_s29 = scalar_lea.vmem %s2022_s25, %s1193_s7   ;;  %s281_s27 = scalar_lea.vmem %s261_s26, %s1193_s7 [#allocation2]  }
  0x50 PF: > { %284 = sbr.rel (%p169_p10) target bundleno = 132 (0x84), region = 69  ;;  %s286_s8 = ssub.s32 (!%p169_p10), %s1927_s30, %s1933_s5 }
  0x51   : > { %s290_s9 = sshrl.u32 (!%p169_p10), %s1927_s30, 3  ;;  %s2036_s10 = scalar_lea.vmem (!%p169_p10), %s1925_s28, %s286_s8 }
  0x52   : > { %s2039_s18 = scalar_lea.vmem (!%p169_p10), %s1929_s4, %s286_s8 [#allocation2]  ;;  %s2043_s21 = sshrl.u32 (!%p169_p10), %s290_s9, 4 }
  0x53   : > { %p1195_p4 = scmp.le.s32.totalorder (!%p169_p10), %s2043_s21, 0 }
  0x55   : > { %1075 = sbr.rel (%p1195_p4) target bundleno = 109 (0x6d), region = 251  ;;  %s2524_s22 = smov (!%p1195_p4), %s1929_s4 }
  0x56   : > { %s2525_s23 = smov (!%p1195_p4), %s1925_s28  ;;  %s2052_s24 = smov (!%p1195_p4), 0  }
  0x57   : > { %s2054_s25 = smov (!%p1195_p4), 0  }
  0x5a LB: >> { %v301_v20 = vld [vmem:[%s1767_s23] sm:$0xff]  ;;  %v303_v21 = vld [vmem:[%s1767_s23 + $0x8] sm:$0xff]  ;;  %v333_v22 = vld [vmem:[%s1767_s23 + $0x34] sm:$0xff]  ;;  %s365_s26 = sadd.s32 1, %s1771_s24  ;;  %s295_s25 = sadd.s32 1, %s1775_s25   ;;  %s1775_s25 = sphi %s2054_s25, %s295_s25   ;;  %s1771_s24 = sphi %s2052_s24, %s2528_s24   ;;  %s1767_s23 = sphi %s2525_s23, %s2527_s23   ;;  %s1763_s22 = sphi %s2524_s22, %s2526_s22  }
  0x5b   : >> { %302 = vst [vmem:[%s1763_s22] sm:$0xff] %v301_v20  ;;  %v335_v23 = vld [vmem:[%s1767_s23 + $0x3c] sm:$0xff]  ;;  %v337_v24 = vld [vmem:[%s1767_s23 + $0x44] sm:$0xff]  ;;  %v339_v25 = vld [vmem:[%s1767_s23 + $0x4c] sm:$0xff]  ;;  %p366_p6 = scmp.ge.s32.totalorder %s365_s26, %s2043_s21  ;;  %p294_p7 = scmp.ge.s32.totalorder %s295_s25, %s2043_s21 }
  0x5c   : >> { %304 = vst [vmem:[%s1763_s22 + $0x8] sm:$0xff] %v303_v21  ;;  %v341_v26 = vld [vmem:[%s1767_s23 + $0x54] sm:$0xff]  ;;  %v343_v27 = vld [vmem:[%s1767_s23 + $0x5c] sm:$0xff]  ;;  %v345_v28 = vld [vmem:[%s1767_s23 + $0x64] sm:$0xff] }
  0x5d   : >> { %334 = vst [vmem:[%s1763_s22 + $0x10] sm:$0xff] %v333_v22  ;;  %s2554_s26 = smov (%p366_p6, %s365_s26), 0  ;;  %v347_v29 = vld [vmem:[%s1767_s23 + $0x6c] sm:$0xff]  ;;  %v349_v30 = vld [vmem:[%s1767_s23 + $0x74] sm:$0xff]  ;;  %v351_v31 = vld [vmem:[%s1767_s23 + $0x7c] sm:$0xff] }
  0x5e   : >> { %336 = vst [vmem:[%s1763_s22 + $0x18] sm:$0xff] %v335_v23  ;;  %s1196_s27 = sshll.u32 %s2554_s26, 7  ;;  %v353_v32 = vld [vmem:[%s1767_s23 + $0x84] sm:$0xff]  ;;  %v355_v33 = vld [vmem:[%s1767_s23 + $0x8c] sm:$0xff]  ;;  %v357_v34 = vld [vmem:[%s1767_s23 + $0x94] sm:$0xff]  ;;  %s2528_s24 = smov %s2554_s26 }
  0x5f   : >> { %338 = vst [vmem:[%s1763_s22 + $0x20] sm:$0xff] %v337_v24  ;;  %s370_s29 = scalar_lea.vmem %s1925_s28, %s1196_s27   ;;  %s371_s11 = scalar_lea.vmem %s1929_s4, %s1196_s27 [#allocation2]   ;;  %v359_v35 = vld [vmem:[%s1767_s23 + $0x9c] sm:$0xff]  ;;  %v361_v36 = vld [vmem:[%s1767_s23 + $0xa4] sm:$0xff]  ;;  %v363_v37 = vld [vmem:[%s1767_s23 + $0xac] sm:$0xff] }
  0x60   : >> { %340 = vst [vmem:[%s1763_s22 + $0x28] sm:$0xff] %v339_v25  ;;  %s2527_s23 = smov %s370_s29 }
  0x61   : >> { %342 = vst [vmem:[%s1763_s22 + $0x30] sm:$0xff] %v341_v26 }
  0x62   : >> { %344 = vst [vmem:[%s1763_s22 + $0x38] sm:$0xff] %v343_v27 }
  0x63   : >> { %346 = vst [vmem:[%s1763_s22 + $0x40] sm:$0xff] %v345_v28 }
  0x64   : >> { %348 = vst [vmem:[%s1763_s22 + $0x48] sm:$0xff] %v347_v29 }
  0x65   : >> { %350 = vst [vmem:[%s1763_s22 + $0x50] sm:$0xff] %v349_v30 }
  0x66   : >> { %352 = vst [vmem:[%s1763_s22 + $0x58] sm:$0xff] %v351_v31 }
  0x67   : >> { %354 = vst [vmem:[%s1763_s22 + $0x60] sm:$0xff] %v353_v32 }
  0x68   : >> { %356 = vst [vmem:[%s1763_s22 + $0x68] sm:$0xff] %v355_v33  ;;  %297 = sbr.rel (!%p294_p7) target bundleno = 90 (0x5a), region = 257 }
  0x69   : >> { %358 = vst [vmem:[%s1763_s22 + $0x70] sm:$0xff] %v357_v34 }
  0x6a   : >> { %360 = vst [vmem:[%s1763_s22 + $0x78] sm:$0xff] %v359_v35 }
  0x6b   : >> { %362 = vst [vmem:[%s1763_s22 + $0x80] sm:$0xff] %v361_v36 }
  0x6c   : >> { %364 = vst [vmem:[%s1763_s22 + $0x88] sm:$0xff] %v363_v37  ;;  %s2526_s22 = smov %s371_s11 }
  0x6d PF: > { %s2121_s17 = sand.u32 15, %s290_s9   ;;  %s1276_s6 = sshll.u32 %s2043_s21, 7 }
  0x6e   : > { %s2125_s7 = scalar_lea.vmem %s1925_s28, %s1276_s6   ;;  %s378_s8 = scalar_lea.vmem %s1929_s4, %s1276_s6 [#allocation2]  }
  0x6f   : > { %p1201_p8 = scmp.le.s32.totalorder %s2121_s17, 0 }
  0x70   : > { %s1777_s27 = smov (!%p1201_p8), %s378_s8   ;;  %s1781_s26 = smov (!%p1201_p8), %s2125_s7  }
  0x71   : > { %1089 = sbr.rel (%p1201_p8) target bundleno = 126 (0x7e), region = 262  ;;  %s1785_s25 = smov (!%p1201_p8), 0  }
  0x72   : > { %s1789_s29 = smov (!%p1201_p8), 0  }
  0x76 LB: >> { %v388_v38 = vld [vmem:[%s1783_s26] sm:$0xff]  ;;  %v390_v39 = vld [vmem:[%s1783_s26 + $0x34] sm:$0xff]  ;;  %s392_s9 = sadd.s32 1, %s1787_s25  ;;  %s382_s29 = sadd.s32 1, %s1791_s29   ;;  %s1791_s29 = sphi %s1789_s29, %s382_s29   ;;  %s1787_s25 = sphi %s1785_s25, %s1786_s25   ;;  %s1783_s26 = sphi %s1781_s26, %s397_s26   ;;  %s1779_s27 = sphi %s1777_s27, %s398_s27  }
  0x77   : >> { %389 = vst [vmem:[%s1779_s27] sm:$0xff] %v388_v38  ;;  %p393_p9 = scmp.ge.s32.totalorder %s392_s9, %s2121_s17  ;;  %p381_p10 = scmp.ge.s32.totalorder %s382_s29, %s2121_s17 }
  0x78   : >> { %391 = vst [vmem:[%s1779_s27 + $0x10] sm:$0xff] %v390_v39 }
  0x79   : >> { %s2556_s9 = smov (%p393_p9, %s392_s9), 0  ;;  %384 = sbr.rel (!%p381_p10) target bundleno = 118 (0x76), region = 268 }
  0x7a   : >> { %s1202_s21 = sshll.u32 %s2556_s9, 3  ;;  %s1786_s25 = smov %s2556_s9  }
  0x7b   : >> { %s397_s26 = scalar_lea.vmem %s2125_s7, %s1202_s21   ;;  %s398_s27 = scalar_lea.vmem %s378_s8, %s1202_s21 [#allocation2]  }
  0x7e PF: > { %s1857_s22 = smov 1  }
  0x7f   : > { %s399_s23 = sshll.u32 %s1857_s22, %s1933_s5 }
  0x80   : > { %s1204_s24 = sadd.s32 4294967295, %s399_s23 }
  0x81   : > { %v409_v40 = vld [vmem:[%s2036_s10] sm:%s1204_s24]  ;;  %v411_v41 = vld [vmem:[%s2036_s10 + $0x34] sm:%s1204_s24] }
  0x82   : > { %410 = vst [vmem:[%s2039_s18] sm:%s1204_s24] %v409_v40 }
  0x83   : > { %412 = vst [vmem:[%s2039_s18 + $0x10] sm:%s1204_s24] %v411_v41 }
  0x84 PF: > { %p1205_p11 = scmp.ge.u32.totalorder %s1927_s30, 8 }
  0x85   : > { %s1858_s11 = smov (!%p1205_p11), 1  }
  0x86   : > { %153 = sbr.rel (%p1205_p11) target bundleno = 142 (0x8e), region = 40  ;;  %s154_s17 = sshll.u32 (!%p1205_p11), %s1858_s11, %s1927_s30 }
  0x87   : > { %s1206_s6 = sadd.s32 (!%p1205_p11), 4294967295, %s154_s17 }
  0x8b   : > { %v164_v42 = vld [vmem:[%s1925_s28] sm:%s1206_s6]  ;;  %v166_v43 = vld [vmem:[%s1925_s28 + $0x34] sm:%s1206_s6] }
  0x8c   : > { %165 = vst [vmem:[%s1929_s4] sm:%s1206_s6] %v164_v42 }
  0x8d   : > { %167 = vst [vmem:[%s1929_s4 + $0x10] sm:%s1206_s6] %v166_v43 }
  0x8e PF: > { %p1207_p12 = scmp.ge.s32.totalorder %s1727_s14, 1  ;;  %p415_p13 = scmp.lt.s32.totalorder %s1727_s14, 5 }
  0x90   : > { %p416_p0 = pnand %p1207_p12, %p415_p13 }
  0x91   : > { %s422_s5 = sand.u32 (!%p416_p0), 1, %s1719_s12  }
  0x92   : > { %419 = sbr.rel (%p416_p0) target bundleno = 478 (0x1de), region = 94  ;;  %s1208_s30 = sshll.u32 (!%p416_p0), %s422_s5, 5 }
  0x93   : > { %s424_s18 = scalar_lea.vmem (!%p416_p0), [#allocation2], %s1208_s30  ;;  %s1209_s22 = sshll.u32 (!%p416_p0), %s422_s5, 7 }
  0x94   : > { %s2177_s23 = scalar_lea.vmem (!%p416_p0), [#allocation3], %s1209_s22  }
  0x97   : > { %vm520_vm0 = vcmask 1043456   ;;  %vm521_vm1 = vcmask 1044480   ;;  %v1859_v44 = vmov 65535   ;;  %v463_v46 = vld [vmem:[%s2516_s2] sm:$0xff]  ;;  %v1860_v48 = vmov 0   ;;  %v465_v49 = vld [vmem:[%s2516_s2 + $0x10] sm:$0xff] }
  0x98   : > { %v522_v45 = vsel %vm520_vm0, 4294967295, %v1859_v44  ;;  %1575 = vset.pattern.permute.xlu0 %v1860_v48  ;;  %1576 = vset.pattern.permute.xlu1 %v1860_v48  ;;  %v1220_v50 = vld [vmem:[%s424_s18] sm:$0xf]  ;;  %v1282_v51 = vld [vmem:[%s424_s18 + $0xc] sm:$0x10]  ;;  %vm513_vm2 = vcmask 72704  }
  0x99   : > { %v523_v47 = vsel %vm521_vm1, %v522_v45, 0  ;;  %v1280_v52 = vld [vmem:[%s424_s18 + $0x4] sm:$0xf]  ;;  %469 = vperm.xlu0 %1575, %v463_v46   ;;  %479 = vperm.xlu1 %1576, %v465_v49   ;;  %v1221_v53 = vor.u32 %v1282_v51, %v1220_v50  ;;  %v1222_v54 = vld [vmem:[%s424_s18 + $0x10] sm:$0x10]  ;;  %v464_v3 = vld [vmem:[%s2516_s2 + $0x8] sm:$0xff] }
  0x9a   : > { %v1228_v55 = vld [vmem:[%s424_s18 + $0x8] sm:$0xf]  ;;  %v1283_v56 = vld [vmem:[%s424_s18 + $0x14] sm:$0x10]  ;;  %v1225_v57 = vor.u32 %v1280_v52, %v1222_v54  ;;  %v1281_v59 = vld [vmem:[%s424_s18 + $0xc] sm:$0xf] }
  0x9b   : > { %v1229_v58 = vor.u32 %v1283_v56, %v1228_v55  ;;  %v1230_v60 = vld [vmem:[%s424_s18 + $0x18] sm:$0x10]  ;;  %v525_v61 = vand.u32 %v1221_v53, %v523_v47  ;;  %v1278_v1 = vld [vmem:[%s2514_s0] sm:$0xff]  ;;  %v1279_v5 = vld [vmem:[%s2514_s0 + $0x8] sm:$0xff]  ;;  %s1243_s12 = sshll.u32 (%p1914_p5), %s1899_s15, 2  ;;  %s1284_s24 = sshll.u32 (%p1914_p5), %s1899_s15, 5 }
  0x9c   : > { %v1233_v62 = vor.u32 %v1281_v59, %v1230_v60  ;;  %v528_v63 = vand.u32 %v1225_v57, %v523_v47  ;;  %v466_v4 = vld [vmem:[%s2516_s2 + $0x18] sm:$0xff]  ;;  %s652_s11 = ssub.s32 (%p1914_p5), 13, %s1243_s12  ;;  %s2202_s5 = scalar_lea.vmem (%p1914_p5), %s2517_s3, %s1284_s24  }
  0x9d   : > { %v531_v0 = vand.u32 %v1229_v58, %v523_v47  ;;  %543 = vmatpush.bf16.msra.mxu0 %v525_v61  ;;  %p653_p1 = scmp.lt.s32.totalorder (%p1914_p5), %s652_s11, 4 }
  0x9e   : > { %v534_v2 = vand.u32 %v1233_v62, %v523_v47  ;;  %562 = vmatpush.bf16.msra.mxu1 %v528_v63 }
  0x9f   : > { %581 = vmatpush.bf16.msra.mxu2 %v531_v0 }
  0xa0   : > { %600 = vmatpush.bf16.msra.mxu3 %v534_v2  ;;  %1234 = vmatmul.msk.bf16.vlgmr.msra.gmra.mxu0 %vm513_vm2, %v1278_v1 }
  0xa1   : > { %474 = vperm.xlu0 %1575, %v464_v3   ;;  %1236 = vmatmul.msk.bf16.vlgmr.msra.gmra.mxu1 %vm513_vm2, %v1278_v1 }
  0xa2   : > { %1238 = vmatmul.msk.bf16.vlgmr.msra.gmra.mxu2 %vm513_vm2, %v1278_v1  ;;  %484 = vperm.xlu1 %1576, %v466_v4  }
  0xa3   : > { %1240 = vmatmul.msk.bf16.vlgmr.msra.gmra.mxu3 %vm513_vm2, %v1278_v1 }
  0xb0   : > { %1235 = vmatmul.msk.bf16.gmra.mxu0 %vm513_vm2, %v1279_v5 }
  0xb1   : > { %1237 = vmatmul.msk.bf16.gmra.mxu1 %vm513_vm2, %v1279_v5 }
  0xb2   : > { %1239 = vmatmul.msk.bf16.gmra.mxu2 %vm513_vm2, %v1279_v5 }
  0xb3   : > { %1241 = vmatmul.msk.bf16.gmra.mxu3 %vm513_vm2, %v1279_v5 }
 0x10b   : > { %v470_v6 = vpop.permute.xlu0 %469  ;;  %v480_v26 = vpop.permute.xlu1 %479 }
 0x113   : > { %v475_v13 = vpop.permute.xlu0 %474 }
 0x114   : > { %v485_v39 = vpop.permute.xlu1 %484 }
 0x11d   : > { %v545_v7 = vpop.f32.mrf.mxu0 }
 0x11e   : > { %v546_v8 = vadd.f32 %v545_v7, %v470_v6  ;;  %v564_v9 = vpop.f32.mrf.mxu1 }
 0x11f   : > { %v565_v10 = vadd.f32 %v564_v9, %v470_v6 }
 0x120   : > { %v612_v11 = vmax.f32 %v546_v8, 0.0 }
 0x121   : > { %v613_v12 = vmax.f32 %v565_v10, 0.0 }
 0x122   : > { %628 = vst [vmem:[%s2177_s23] sm:$0xff] %v612_v11 }
 0x123   : > { %629 = vst [vmem:[%s2177_s23 + $0x8] sm:$0xff] %v613_v12 }
 0x125   : > { %v583_v14 = vpop.f32.mrf.mxu2  ;;  %v547_v17 = vpop.f32.mrf.mxu0 }
 0x126   : > { %v584_v15 = vadd.f32 %v583_v14, %v470_v6  ;;  %v602_v16 = vpop.f32.mrf.mxu3  ;;  %v548_v19 = vadd.f32 %v547_v17, %v475_v13  ;;  %v566_v20 = vpop.f32.mrf.mxu1 }
 0x127   : > { %v603_v18 = vadd.f32 %v602_v16, %v470_v6  ;;  %v567_v22 = vadd.f32 %v566_v20, %v475_v13 }
 0x128   : > { %v614_v21 = vmax.f32 %v584_v15, 0.0  ;;  %v616_v24 = vmax.f32 %v548_v19, 0.0 }
 0x129   : > { %v615_v23 = vmax.f32 %v603_v18, 0.0  ;;  %v617_v25 = vmax.f32 %v567_v22, 0.0 }
 0x12a   : > { %630 = vst [vmem:[%s2177_s23 + $0x10] sm:$0xff] %v614_v21 }
 0x12b   : > { %631 = vst [vmem:[%s2177_s23 + $0x18] sm:$0xff] %v615_v23 }
 0x12c   : > { %632 = vst [vmem:[%s2177_s23 + $0x20] sm:$0xff] %v616_v24 }
 0x12d   : > { %633 = vst [vmem:[%s2177_s23 + $0x28] sm:$0xff] %v617_v25  ;;  %v585_v27 = vpop.f32.mrf.mxu2  ;;  %v550_v30 = vpop.f32.mrf.mxu0 }
 0x12e   : > { %v586_v28 = vadd.f32 %v585_v27, %v475_v13  ;;  %v604_v29 = vpop.f32.mrf.mxu3  ;;  %v551_v32 = vadd.f32 %v550_v30, %v480_v26  ;;  %v569_v33 = vpop.f32.mrf.mxu1 }
 0x12f   : > { %v605_v31 = vadd.f32 %v604_v29, %v475_v13  ;;  %v570_v35 = vadd.f32 %v569_v33, %v480_v26 }
 0x130   : > { %v618_v34 = vmax.f32 %v586_v28, 0.0  ;;  %v620_v37 = vmax.f32 %v551_v32, 0.0 }
 0x131   : > { %v619_v36 = vmax.f32 %v605_v31, 0.0  ;;  %v621_v38 = vmax.f32 %v570_v35, 0.0 }
 0x132   : > { %634 = vst [vmem:[%s2177_s23 + $0x30] sm:$0xff] %v618_v34 }
 0x133   : > { %635 = vst [vmem:[%s2177_s23 + $0x38] sm:$0xff] %v619_v36 }
 0x134   : > { %636 = vst [vmem:[%s2177_s23 + $0x40] sm:$0xff] %v620_v37 }
 0x135   : > { %637 = vst [vmem:[%s2177_s23 + $0x48] sm:$0xff] %v621_v38  ;;  %v588_v40 = vpop.f32.mrf.mxu2  ;;  %v552_v43 = vpop.f32.mrf.mxu0 }
 0x136   : > { %v589_v41 = vadd.f32 %v588_v40, %v480_v26  ;;  %v607_v42 = vpop.f32.mrf.mxu3  ;;  %v553_v45 = vadd.f32 %v552_v43, %v485_v39  ;;  %v571_v46 = vpop.f32.mrf.mxu1 }
 0x137   : > { %v608_v44 = vadd.f32 %v607_v42, %v480_v26  ;;  %v572_v48 = vadd.f32 %v571_v46, %v485_v39 }
 0x138   : > { %v622_v47 = vmax.f32 %v589_v41, 0.0  ;;  %v624_v50 = vmax.f32 %v553_v45, 0.0 }
 0x139   : > { %v623_v49 = vmax.f32 %v608_v44, 0.0  ;;  %v625_v51 = vmax.f32 %v572_v48, 0.0 }
 0x13a   : > { %638 = vst [vmem:[%s2177_s23 + $0x50] sm:$0xff] %v622_v47 }
 0x13b   : > { %639 = vst [vmem:[%s2177_s23 + $0x58] sm:$0xff] %v623_v49 }
 0x13c   : > { %640 = vst [vmem:[%s2177_s23 + $0x60] sm:$0xff] %v624_v50 }
 0x13d   : > { %641 = vst [vmem:[%s2177_s23 + $0x68] sm:$0xff] %v625_v51  ;;  %v590_v52 = vpop.f32.mrf.mxu2 }
 0x13e   : > { %v591_v53 = vadd.f32 %v590_v52, %v485_v39  ;;  %v609_v54 = vpop.f32.mrf.mxu3 }
 0x13f   : > { %v610_v55 = vadd.f32 %v609_v54, %v485_v39  ;;  %650 = sbr.rel (!%p1914_p5) target bundleno = 478 (0x1de), region = 102 }
 0x140   : > { %v626_v56 = vmax.f32 %v591_v53, 0.0 }
 0x141   : > { %v627_v57 = vmax.f32 %v610_v55, 0.0 }
 0x142   : > { %642 = vst [vmem:[%s2177_s23 + $0x70] sm:$0xff] %v626_v56 }
 0x143   : > { %643 = vst [vmem:[%s2177_s23 + $0x78] sm:$0xff] %v627_v57 }
 0x144   : > { %s2558_s11 = smov (!%p653_p1, %s652_s11), 4 }
 0x145   : > { %s1244_s30 = sshll.u32 %s2558_s11, 5  ;;  %s2204_s28 = sshll.u32 %s2558_s11, 3 }
 0x146   : > { %p1248_p2 = scmp.eq.s32.totalorder %s1244_s30, 0 }
 0x147   : > { %p663_p3 = scmp.lt.u32.totalorder (!%p1248_p2), %s2204_s28, 8 }
 0x148   : > { %662 = sbr.rel (%p1248_p2) target bundleno = 478 (0x1de), region = 106 }
 0x14d   : > { %666 = sbr.rel (%p663_p3) target bundleno = 466 (0x1d2), region = 110  ;;  %s2208_s20 = sand.u32 (!%p663_p3), 7, %s2204_s28  }
 0x14e   : > { %p689_p5 = scmp.eq.s32.totalorder (!%p663_p3), %s2208_s20, 0  ;;  %p1249_p4 = scmp.ne.s32.totalorder (!%p663_p3), %s2208_s20, 0 }
 0x152   : > { %692 = sbr.rel (%p1249_p4) target bundleno = 398 (0x18e), region = 125  ;;  %s693_s15 = sshrl.u32 (!%p1249_p4), %s2204_s28, 3 }
 0x153   : > { %s2215_s4 = sshrl.u32 (!%p1249_p4), %s693_s15, 3 }
 0x154   : > { %p1250_p6 = scmp.le.s32.totalorder (!%p1249_p4), %s2215_s4, 0 }
 0x157   : > { %1103 = sbr.rel (%p1250_p6) target bundleno = 381 (0x17d), region = 273  ;;  %s2529_s14 = smov (!%p1250_p6), %s2202_s5 }
 0x158   : > { %s2530_s10 = smov (!%p1250_p6), %s2177_s23  ;;  %s2224_s18 = smov (!%p1250_p6), 0  }
 0x159   : > { %s2226_s7 = smov (!%p1250_p6), 0  }
 0x15c LB: >> { %v704_v58 = vld [vmem:[%s1799_s10] sm:$0xff]  ;;  %v706_v59 = vld [vmem:[%s1799_s10 + $0x8] sm:$0xff]  ;;  %v708_v60 = vld [vmem:[%s1799_s10 + $0x10] sm:$0xff]  ;;  %s768_s8 = sadd.s32 1, %s1803_s18  ;;  %s698_s7 = sadd.s32 1, %s1807_s7   ;;  %s1807_s7 = sphi %s2226_s7, %s698_s7   ;;  %s1803_s18 = sphi %s2224_s18, %s2533_s18   ;;  %s1799_s10 = sphi %s2530_s10, %s2532_s10   ;;  %s1795_s14 = sphi %s2529_s14, %s2531_s14  }
 0x15d   : >> { %705 = vst [vmem:[%s1795_s14] sm:$0xff] %v704_v58  ;;  %v710_v61 = vld [vmem:[%s1799_s10 + $0x18] sm:$0xff]  ;;  %p769_p7 = scmp.ge.s32.totalorder %s768_s8, %s2215_s4  ;;  %v712_v62 = vld [vmem:[%s1799_s10 + $0x20] sm:$0xff]  ;;  %v714_v63 = vld [vmem:[%s1799_s10 + $0x28] sm:$0xff]  ;;  %p697_p8 = scmp.ge.s32.totalorder %s698_s7, %s2215_s4 }
 0x15e   : >> { %707 = vst [vmem:[%s1795_s14 + $0x8] sm:$0xff] %v706_v59  ;;  %v716_v0 = vld [vmem:[%s1799_s10 + $0x30] sm:$0xff]  ;;  %v718_v1 = vld [vmem:[%s1799_s10 + $0x38] sm:$0xff]  ;;  %v728_v2 = vld [vmem:[%s1799_s10 + $0x40] sm:$0xff] }
 0x15f   : >> { %709 = vst [vmem:[%s1795_s14 + $0x10] sm:$0xff] %v708_v60  ;;  %s2560_s8 = smov (%p769_p7, %s768_s8), 0  ;;  %v730_v3 = vld [vmem:[%s1799_s10 + $0x48] sm:$0xff]  ;;  %v732_v4 = vld [vmem:[%s1799_s10 + $0x50] sm:$0xff]  ;;  %v734_v5 = vld [vmem:[%s1799_s10 + $0x58] sm:$0xff] }
 0x160   : >> { %711 = vst [vmem:[%s1795_s14 + $0x18] sm:$0xff] %v710_v61  ;;  %s1251_s27 = sshll.u32 %s2560_s8, 6  ;;  %v744_v6 = vld [vmem:[%s1799_s10 + $0x60] sm:$0xff]  ;;  %v746_v7 = vld [vmem:[%s1799_s10 + $0x68] sm:$0xff]  ;;  %v748_v8 = vld [vmem:[%s1799_s10 + $0x70] sm:$0xff]  ;;  %s2533_s18 = smov %s2560_s8 }
 0x161   : >> { %713 = vst [vmem:[%s1795_s14 + $0x20] sm:$0xff] %v712_v62  ;;  %s2257_s26 = scalar_lea.vmem %s2177_s23, %s1251_s27 [#allocation3]   ;;  %s2260_s25 = scalar_lea.vmem %s2202_s5, %s1251_s27   ;;  %v750_v9 = vld [vmem:[%s1799_s10 + $0x78] sm:$0xff]  ;;  %v760_v10 = vld [vmem:[%s1799_s10 + $0x80] sm:$0xff]  ;;  %v762_v11 = vld [vmem:[%s1799_s10 + $0x88] sm:$0xff] }
 0x162   : >> { %715 = vst [vmem:[%s1795_s14 + $0x28] sm:$0xff] %v714_v63  ;;  %v764_v12 = vld [vmem:[%s1799_s10 + $0x90] sm:$0xff]  ;;  %v766_v13 = vld [vmem:[%s1799_s10 + $0x98] sm:$0xff]  ;;  %s2532_s10 = smov %s2257_s26 }
 0x163   : >> { %717 = vst [vmem:[%s1795_s14 + $0x30] sm:$0xff] %v716_v0 }
 0x164   : >> { %719 = vst [vmem:[%s1795_s14 + $0x38] sm:$0xff] %v718_v1 }
 0x165   : >> { %721 = vst [vmem:[%s1795_s14 + $0x68] sm:$0xff] %v712_v62 }
 0x166   : >> { %723 = vst [vmem:[%s1795_s14 + $0x70] sm:$0xff] %v714_v63 }
 0x167   : >> { %725 = vst [vmem:[%s1795_s14 + $0x78] sm:$0xff] %v716_v0 }
 0x168   : >> { %727 = vst [vmem:[%s1795_s14 + $0x80] sm:$0xff] %v718_v1 }
 0x169   : >> { %729 = vst [vmem:[%s1795_s14 + $0x88] sm:$0xff] %v728_v2 }
 0x16a   : >> { %731 = vst [vmem:[%s1795_s14 + $0x90] sm:$0xff] %v730_v3 }
 0x16b   : >> { %733 = vst [vmem:[%s1795_s14 + $0x98] sm:$0xff] %v732_v4 }
 0x16c   : >> { %735 = vst [vmem:[%s1795_s14 + $0xa0] sm:$0xff] %v734_v5 }
 0x16d   : >> { %737 = vst [vmem:[%s1795_s14 + $0xd0] sm:$0xff] %v728_v2 }
 0x16e   : >> { %739 = vst [vmem:[%s1795_s14 + $0xd8] sm:$0xff] %v730_v3 }
 0x16f   : >> { %741 = vst [vmem:[%s1795_s14 + $0xe0] sm:$0xff] %v732_v4 }
 0x170   : >> { %743 = vst [vmem:[%s1795_s14 + $0xe8] sm:$0xff] %v734_v5 }
 0x171   : >> { %745 = vst [vmem:[%s1795_s14 + $0xf0] sm:$0xff] %v744_v6 }
 0x172   : >> { %747 = vst [vmem:[%s1795_s14 + $0xf8] sm:$0xff] %v746_v7 }
 0x173   : >> { %749 = vst [vmem:[%s1795_s14 + $0x100] sm:$0xff] %v748_v8 }
 0x174   : >> { %751 = vst [vmem:[%s1795_s14 + $0x108] sm:$0xff] %v750_v9 }
 0x175   : >> { %753 = vst [vmem:[%s1795_s14 + $0x138] sm:$0xff] %v744_v6 }
 0x176   : >> { %755 = vst [vmem:[%s1795_s14 + $0x140] sm:$0xff] %v746_v7 }
 0x177   : >> { %757 = vst [vmem:[%s1795_s14 + $0x148] sm:$0xff] %v748_v8 }
 0x178   : >> { %759 = vst [vmem:[%s1795_s14 + $0x150] sm:$0xff] %v750_v9  ;;  %700 = sbr.rel (!%p697_p8) target bundleno = 348 (0x15c), region = 279 }
 0x179   : >> { %761 = vst [vmem:[%s1795_s14 + $0x158] sm:$0xff] %v760_v10 }
 0x17a   : >> { %763 = vst [vmem:[%s1795_s14 + $0x160] sm:$0xff] %v762_v11 }
 0x17b   : >> { %765 = vst [vmem:[%s1795_s14 + $0x168] sm:$0xff] %v764_v12 }
 0x17c   : >> { %767 = vst [vmem:[%s1795_s14 + $0x170] sm:$0xff] %v766_v13  ;;  %s2531_s14 = smov %s2260_s25 }
 0x17d PF: > { %s2315_s29 = sand.u32 7, %s693_s15   ;;  %s1285_s9 = sshll.u32 %s2215_s4, 6 }
 0x17e   : > { %s2319_s21 = scalar_lea.vmem %s2177_s23, %s1285_s9 [#allocation3]   ;;  %s2322_s22 = scalar_lea.vmem %s2202_s5, %s1285_s9  }
 0x17f   : > { %p1256_p9 = scmp.le.s32.totalorder %s2315_s29, 0 }
 0x180   : > { %s2534_s12 = smov (!%p1256_p9), %s2322_s22  ;;  %s2535_s24 = smov (!%p1256_p9), %s2319_s21 }
 0x181   : > { %1117 = sbr.rel (%p1256_p9) target bundleno = 398 (0x18e), region = 284  ;;  %s2331_s11 = smov (!%p1256_p9), 0  }
 0x182   : > { %s1821_s17 = smov (!%p1256_p9), 0  }
 0x186 LB: >> { %v791_v14 = vld [vmem:[%s1815_s24] sm:$0xff]  ;;  %s799_s6 = sadd.s32 1, %s1819_s11  ;;  %s785_s17 = sadd.s32 1, %s1823_s17   ;;  %s1823_s17 = sphi %s1821_s17, %s785_s17   ;;  %s1819_s11 = sphi %s2331_s11, %s2536_s11   ;;  %s1815_s24 = sphi %s2535_s24, %s804_s24   ;;  %s1811_s12 = sphi %s2534_s12, %s805_s12  }
 0x187   : >> { %v793_v15 = vld [vmem:[%s1815_s24 + $0x20] sm:$0xff]  ;;  %792 = vst [vmem:[%s1811_s12] sm:$0xff] %v791_v14  ;;  %p800_p10 = scmp.ge.s32.totalorder %s799_s6, %s2315_s29  ;;  %p784_p11 = scmp.ge.s32.totalorder %s785_s17, %s2315_s29 }
 0x188   : >> { %v795_v16 = vld [vmem:[%s1815_s24 + $0x40] sm:$0xff]  ;;  %794 = vst [vmem:[%s1811_s12 + $0x68] sm:$0xff] %v793_v15 }
 0x189   : >> { %v797_v17 = vld [vmem:[%s1815_s24 + $0x60] sm:$0xff]  ;;  %796 = vst [vmem:[%s1811_s12 + $0xd0] sm:$0xff] %v795_v16  ;;  %s2562_s6 = smov (%p800_p10, %s799_s6), 0  ;;  %787 = sbr.rel (!%p784_p11) target bundleno = 390 (0x186), region = 290 }
 0x18a   : >> { %798 = vst [vmem:[%s1811_s12 + $0x138] sm:$0xff] %v797_v17  ;;  %s1257_s30 = sshll.u32 %s2562_s6, 3  ;;  %s2536_s11 = smov %s2562_s6 }
 0x18b   : >> { %s804_s24 = scalar_lea.vmem %s2319_s21, %s1257_s30 [#allocation3]   ;;  %s805_s12 = scalar_lea.vmem %s2322_s22, %s1257_s30  }
 0x18e PF: > { %808 = sbr.rel (%p689_p5) target bundleno = 466 (0x1d2), region = 143  ;;  %s810_s15 = ssub.s32 (!%p689_p5), %s2204_s28, %s2208_s20 }
 0x18f   : > { %s814_s4 = sshrl.u32 (!%p689_p5), %s2204_s28, 3  ;;  %s2352_s14 = scalar_lea.vmem (!%p689_p5), %s2177_s23, %s810_s15 [#allocation3] }
 0x190   : > { %s2355_s10 = scalar_lea.vmem (!%p689_p5), %s2202_s5, %s810_s15  ;;  %s2359_s18 = sshrl.u32 (!%p689_p5), %s814_s4, 3 }
 0x191   : > { %p1259_p12 = scmp.le.s32.totalorder (!%p689_p5), %s2359_s18, 0 }
 0x193   : > { %1131 = sbr.rel (%p1259_p12) target bundleno = 441 (0x1b9), region = 295  ;;  %s2537_s7 = smov (!%p1259_p12), %s2202_s5 }
 0x194   : > { %s2538_s8 = smov (!%p1259_p12), %s2177_s23  ;;  %s2368_s27 = smov (!%p1259_p12), 0  }
 0x195   : > { %s2370_s26 = smov (!%p1259_p12), 0  }
 0x198 LB: >> { %v825_v18 = vld [vmem:[%s1831_s8] sm:$0xff]  ;;  %v827_v19 = vld [vmem:[%s1831_s8 + $0x8] sm:$0xff]  ;;  %v829_v20 = vld [vmem:[%s1831_s8 + $0x10] sm:$0xff]  ;;  %s889_s25 = sadd.s32 1, %s1835_s27  ;;  %s819_s26 = sadd.s32 1, %s1839_s26   ;;  %s1839_s26 = sphi %s2370_s26, %s819_s26   ;;  %s1835_s27 = sphi %s2368_s27, %s2541_s27   ;;  %s1831_s8 = sphi %s2538_s8, %s2540_s8   ;;  %s1827_s7 = sphi %s2537_s7, %s2539_s7  }
 0x199   : >> { %826 = vst [vmem:[%s1827_s7] sm:$0xff] %v825_v18  ;;  %v831_v21 = vld [vmem:[%s1831_s8 + $0x18] sm:$0xff]  ;;  %p890_p13 = scmp.ge.s32.totalorder %s889_s25, %s2359_s18  ;;  %v833_v22 = vld [vmem:[%s1831_s8 + $0x20] sm:$0xff]  ;;  %v835_v23 = vld [vmem:[%s1831_s8 + $0x28] sm:$0xff]  ;;  %p818_p0 = scmp.ge.s32.totalorder %s819_s26, %s2359_s18 }
 0x19a   : >> { %828 = vst [vmem:[%s1827_s7 + $0x8] sm:$0xff] %v827_v19  ;;  %v837_v24 = vld [vmem:[%s1831_s8 + $0x30] sm:$0xff]  ;;  %v839_v25 = vld [vmem:[%s1831_s8 + $0x38] sm:$0xff]  ;;  %v849_v26 = vld [vmem:[%s1831_s8 + $0x40] sm:$0xff] }
 0x19b   : >> { %830 = vst [vmem:[%s1827_s7 + $0x10] sm:$0xff] %v829_v20  ;;  %s2564_s25 = smov (%p890_p13, %s889_s25), 0  ;;  %v851_v27 = vld [vmem:[%s1831_s8 + $0x48] sm:$0xff]  ;;  %v853_v28 = vld [vmem:[%s1831_s8 + $0x50] sm:$0xff]  ;;  %v855_v29 = vld [vmem:[%s1831_s8 + $0x58] sm:$0xff] }
 0x19c   : >> { %832 = vst [vmem:[%s1827_s7 + $0x18] sm:$0xff] %v831_v21  ;;  %s1260_s29 = sshll.u32 %s2564_s25, 6  ;;  %v865_v30 = vld [vmem:[%s1831_s8 + $0x60] sm:$0xff]  ;;  %v867_v31 = vld [vmem:[%s1831_s8 + $0x68] sm:$0xff]  ;;  %v869_v32 = vld [vmem:[%s1831_s8 + $0x70] sm:$0xff]  ;;  %s2541_s27 = smov %s2564_s25 }
 0x19d   : >> { %834 = vst [vmem:[%s1827_s7 + $0x20] sm:$0xff] %v833_v22  ;;  %s2401_s9 = scalar_lea.vmem %s2177_s23, %s1260_s29 [#allocation3]   ;;  %s2404_s21 = scalar_lea.vmem %s2202_s5, %s1260_s29   ;;  %v871_v33 = vld [vmem:[%s1831_s8 + $0x78] sm:$0xff]  ;;  %v881_v34 = vld [vmem:[%s1831_s8 + $0x80] sm:$0xff]  ;;  %v883_v35 = vld [vmem:[%s1831_s8 + $0x88] sm:$0xff] }
 0x19e   : >> { %836 = vst [vmem:[%s1827_s7 + $0x28] sm:$0xff] %v835_v23  ;;  %v885_v36 = vld [vmem:[%s1831_s8 + $0x90] sm:$0xff]  ;;  %v887_v37 = vld [vmem:[%s1831_s8 + $0x98] sm:$0xff]  ;;  %s2540_s8 = smov %s2401_s9 }
 0x19f   : >> { %838 = vst [vmem:[%s1827_s7 + $0x30] sm:$0xff] %v837_v24 }
 0x1a0   : >> { %840 = vst [vmem:[%s1827_s7 + $0x38] sm:$0xff] %v839_v25 }
 0x1a1   : >> { %842 = vst [vmem:[%s1827_s7 + $0x68] sm:$0xff] %v833_v22 }
 0x1a2   : >> { %844 = vst [vmem:[%s1827_s7 + $0x70] sm:$0xff] %v835_v23 }
 0x1a3   : >> { %846 = vst [vmem:[%s1827_s7 + $0x78] sm:$0xff] %v837_v24 }
 0x1a4   : >> { %848 = vst [vmem:[%s1827_s7 + $0x80] sm:$0xff] %v839_v25 }
 0x1a5   : >> { %850 = vst [vmem:[%s1827_s7 + $0x88] sm:$0xff] %v849_v26 }
 0x1a6   : >> { %852 = vst [vmem:[%s1827_s7 + $0x90] sm:$0xff] %v851_v27 }
 0x1a7   : >> { %854 = vst [vmem:[%s1827_s7 + $0x98] sm:$0xff] %v853_v28 }
 0x1a8   : >> { %856 = vst [vmem:[%s1827_s7 + $0xa0] sm:$0xff] %v855_v29 }
 0x1a9   : >> { %858 = vst [vmem:[%s1827_s7 + $0xd0] sm:$0xff] %v849_v26 }
 0x1aa   : >> { %860 = vst [vmem:[%s1827_s7 + $0xd8] sm:$0xff] %v851_v27 }
 0x1ab   : >> { %862 = vst [vmem:[%s1827_s7 + $0xe0] sm:$0xff] %v853_v28 }
 0x1ac   : >> { %864 = vst [vmem:[%s1827_s7 + $0xe8] sm:$0xff] %v855_v29 }
 0x1ad   : >> { %866 = vst [vmem:[%s1827_s7 + $0xf0] sm:$0xff] %v865_v30 }
 0x1ae   : >> { %868 = vst [vmem:[%s1827_s7 + $0xf8] sm:$0xff] %v867_v31 }
 0x1af   : >> { %870 = vst [vmem:[%s1827_s7 + $0x100] sm:$0xff] %v869_v32 }
 0x1b0   : >> { %872 = vst [vmem:[%s1827_s7 + $0x108] sm:$0xff] %v871_v33 }
 0x1b1   : >> { %874 = vst [vmem:[%s1827_s7 + $0x138] sm:$0xff] %v865_v30 }
 0x1b2   : >> { %876 = vst [vmem:[%s1827_s7 + $0x140] sm:$0xff] %v867_v31 }
 0x1b3   : >> { %878 = vst [vmem:[%s1827_s7 + $0x148] sm:$0xff] %v869_v32 }
 0x1b4   : >> { %880 = vst [vmem:[%s1827_s7 + $0x150] sm:$0xff] %v871_v33  ;;  %821 = sbr.rel (!%p818_p0) target bundleno = 408 (0x198), region = 301 }
 0x1b5   : >> { %882 = vst [vmem:[%s1827_s7 + $0x158] sm:$0xff] %v881_v34 }
 0x1b6   : >> { %884 = vst [vmem:[%s1827_s7 + $0x160] sm:$0xff] %v883_v35 }
 0x1b7   : >> { %886 = vst [vmem:[%s1827_s7 + $0x168] sm:$0xff] %v885_v36 }
 0x1b8   : >> { %888 = vst [vmem:[%s1827_s7 + $0x170] sm:$0xff] %v887_v37  ;;  %s2539_s7 = smov %s2404_s21 }
 0x1b9 PF: > { %s2459_s22 = sand.u32 7, %s814_s4   ;;  %s1287_s12 = sshll.u32 %s2359_s18, 6 }
 0x1ba   : > { %s2463_s24 = scalar_lea.vmem %s2177_s23, %s1287_s12 [#allocation3]   ;;  %s2466_s11 = scalar_lea.vmem %s2202_s5, %s1287_s12  }
 0x1bb   : > { %p1265_p1 = scmp.le.s32.totalorder %s2459_s22, 0 }
 0x1bc   : > { %s2542_s17 = smov (!%p1265_p1), %s2466_s11  ;;  %s2543_s6 = smov (!%p1265_p1), %s2463_s24 }
 0x1bd   : > { %1145 = sbr.rel (%p1265_p1) target bundleno = 458 (0x1ca), region = 306  ;;  %s1849_s30 = smov (!%p1265_p1), 0  }
 0x1be   : > { %s1853_s15 = smov (!%p1265_p1), 0  }
 0x1c2 LB: >> { %v912_v38 = vld [vmem:[%s1847_s6] sm:$0xff]  ;;  %s920_s4 = sadd.s32 1, %s1851_s30  ;;  %s906_s15 = sadd.s32 1, %s1855_s15   ;;  %s1855_s15 = sphi %s1853_s15, %s906_s15   ;;  %s1851_s30 = sphi %s1849_s30, %s1850_s30   ;;  %s1847_s6 = sphi %s2543_s6, %s925_s6   ;;  %s1843_s17 = sphi %s2542_s17, %s926_s17  }
 0x1c3   : >> { %v914_v39 = vld [vmem:[%s1847_s6 + $0x20] sm:$0xff]  ;;  %913 = vst [vmem:[%s1843_s17] sm:$0xff] %v912_v38  ;;  %p921_p2 = scmp.ge.s32.totalorder %s920_s4, %s2459_s22  ;;  %p905_p3 = scmp.ge.s32.totalorder %s906_s15, %s2459_s22 }
 0x1c4   : >> { %v916_v40 = vld [vmem:[%s1847_s6 + $0x40] sm:$0xff]  ;;  %915 = vst [vmem:[%s1843_s17 + $0x68] sm:$0xff] %v914_v39 }
 0x1c5   : >> { %v918_v41 = vld [vmem:[%s1847_s6 + $0x60] sm:$0xff]  ;;  %917 = vst [vmem:[%s1843_s17 + $0xd0] sm:$0xff] %v916_v40  ;;  %s2566_s4 = smov (%p921_p2, %s920_s4), 0  ;;  %908 = sbr.rel (!%p905_p3) target bundleno = 450 (0x1c2), region = 312 }
 0x1c6   : >> { %919 = vst [vmem:[%s1843_s17 + $0x138] sm:$0xff] %v918_v41  ;;  %s1266_s18 = sshll.u32 %s2566_s4, 3  ;;  %s1850_s30 = smov %s2566_s4  }
 0x1c7   : >> { %s925_s6 = scalar_lea.vmem %s2463_s24, %s1266_s18 [#allocation3]   ;;  %s926_s17 = scalar_lea.vmem %s2466_s11, %s1266_s18  }
 0x1ca PF: > { %s1861_s7 = smov 1  }
 0x1cb   : > { %s927_s8 = sshll.u32 %s1861_s7, %s2208_s20 }
 0x1cc   : > { %s1268_s27 = sadd.s32 4294967295, %s927_s8 }
 0x1cd   : > { %v937_v42 = vld [vmem:[%s2352_s14] sm:%s1268_s27] }
 0x1ce   : > { %v939_v43 = vld [vmem:[%s2352_s14 + $0x20] sm:%s1268_s27]  ;;  %938 = vst [vmem:[%s2355_s10] sm:%s1268_s27] %v937_v42 }
 0x1cf   : > { %v941_v44 = vld [vmem:[%s2352_s14 + $0x40] sm:%s1268_s27]  ;;  %940 = vst [vmem:[%s2355_s10 + $0x68] sm:%s1268_s27] %v939_v43 }
 0x1d0   : > { %v943_v45 = vld [vmem:[%s2352_s14 + $0x60] sm:%s1268_s27]  ;;  %942 = vst [vmem:[%s2355_s10 + $0xd0] sm:%s1268_s27] %v941_v44 }
 0x1d1   : > { %944 = vst [vmem:[%s2355_s10 + $0x138] sm:%s1268_s27] %v943_v45 }
 0x1d2 PF: > { %p1269_p5 = scmp.ge.u32.totalorder %s2204_s28, 8 }
 0x1d3   : > { %s1862_s26 = smov (!%p1269_p5), 1  }
 0x1d4   : > { %669 = sbr.rel (%p1269_p5) target bundleno = 478 (0x1de), region = 114  ;;  %s670_s20 = sshll.u32 (!%p1269_p5), %s1862_s26, %s2204_s28 }
 0x1d5   : > { %s1270_s25 = sadd.s32 (!%p1269_p5), 4294967295, %s670_s20 }
 0x1d9   : > { %v680_v46 = vld [vmem:[%s2177_s23] sm:%s1270_s25] }
 0x1da   : > { %v682_v47 = vld [vmem:[%s2177_s23 + $0x20] sm:%s1270_s25]  ;;  %681 = vst [vmem:[%s2202_s5] sm:%s1270_s25] %v680_v46 }
 0x1db   : > { %v684_v48 = vld [vmem:[%s2177_s23 + $0x40] sm:%s1270_s25]  ;;  %683 = vst [vmem:[%s2202_s5 + $0x68] sm:%s1270_s25] %v682_v47 }
 0x1dc   : > { %v686_v49 = vld [vmem:[%s2177_s23 + $0x60] sm:%s1270_s25]  ;;  %685 = vst [vmem:[%s2202_s5 + $0xd0] sm:%s1270_s25] %v684_v48 }
 0x1dd   : > { %687 = vst [vmem:[%s2202_s5 + $0x138] sm:%s1270_s25] %v686_v49 }
 0x1de PF: > { %p10_p4 = scmp.ge.s32.totalorder %s1902_s16, 6   ;;  %s2544_s12 = smov %s1723_s13 }
 0x1df   : > { %s2545_s13 = smov %s1912_s19  ;;  %s2546_s14 = smov %s1902_s16 }
 0x1e0   :  { %12 = sbr.rel (!%p10_p4) target bundleno = 2 (0x2), region = 323 }

// kernel: tiny_net_forward.6
= control target key start
LH: loop header
LB: loop body
LE: loop exit
PB: predicated region body
PF: predicated region fallthrough
CT: control target
= control target key end

     0   :  { %vm631_vm0 = vcmask 261120   ;;  %vm1155_vm1 = vcmask 523264   ;;  %s2567_s1 = inlined_call_operand.vmem [shape: bf16[288,64], index: 1, kind: input, shape index: {}]   ;;  %s2568_s0 = inlined_call_operand.vmem [shape: bf16[392,288], index: 0, kind: input, shape index: {}]   ;;  %s2569_s2 = inlined_call_operand.vmem [shape: f32[1,64], index: 2, kind: input, shape index: {}]   ;;  %s2570_s3 = inlined_call_operand.vmem [shape: f32[392,64], index: 3, kind: output, shape index: {}]  }
   0x1   :  { %v1673_v0 = vld [vmem:[%s2567_s1 + $0x38] sm:$0xff]  ;;  %v1733_v2 = vld [vmem:[%s2567_s1 + $0x88] sm:$0xff]  ;;  %v1672_v3 = vld [vmem:[%s2567_s1 + $0x30] sm:$0xff] }
   0x2   :  { %v1681_v1 = vld [vmem:[%s2567_s1 + $0x78] sm:$0xff]  ;;  %707 = vmatpush.bf16.msra.mxu0 %v1673_v0  ;;  %1684 = vmatpush.bf16.msra.mxu3 %v1673_v0  ;;  %v1680_v4 = vld [vmem:[%s2567_s1 + $0x70] sm:$0xff]  ;;  %v1745_v5 = vld [vmem:[%s2567_s1 + $0x80] sm:$0xff] }
   0x3   :  { %840 = vmatpush.bf16.msra.mxu1 %v1681_v1  ;;  %979 = vmatpush.bf16.msra.mxu2 %v1733_v2  ;;  %v1219_v6 = vld [vmem:[%s2568_s0 + $0x8] sm:$0xf]  ;;  %v1596_v7 = vld [vmem:[%s2568_s0 + $0x10] sm:$0xf0]  ;;  %v1670_v11 = vld [vmem:[%s2567_s1 + $0x20] sm:$0xff] }
   0x4   :  { %v1220_v8 = vor.u32 %v1596_v7, %v1219_v6  ;;  %v1671_v9 = vld [vmem:[%s2567_s1 + $0x28] sm:$0xff]  ;;  %v1678_v12 = vld [vmem:[%s2567_s1 + $0x60] sm:$0xff]  ;;  %v1669_v13 = vld [vmem:[%s2567_s1 + $0x18] sm:$0xff] }
   0x5   :  { %v1679_v10 = vld [vmem:[%s2567_s1 + $0x68] sm:$0xff]  ;;  %v1677_v14 = vld [vmem:[%s2567_s1 + $0x58] sm:$0xff]  ;;  %v1668_v15 = vld [vmem:[%s2567_s1 + $0x10] sm:$0xff] }
   0x6   :  { %708 = vmatpush.bf16.msra.mxu0 %v1672_v3  ;;  %1685 = vmatpush.bf16.msra.mxu3 %v1672_v3  ;;  %v1676_v16 = vld [vmem:[%s2567_s1 + $0x50] sm:$0xff]  ;;  %v1231_v17 = vld [vmem:[%s2568_s0 + $0x20] sm:$0xf]  ;;  %v1599_v18 = vld [vmem:[%s2568_s0 + $0x28] sm:$0xf0] }
   0x7   :  { %841 = vmatpush.bf16.msra.mxu1 %v1680_v4  ;;  %980 = vmatpush.bf16.msra.mxu2 %v1745_v5  ;;  %v1232_v19 = vor.u32 %v1599_v18, %v1231_v17  ;;  %v1667_v20 = vld [vmem:[%s2567_s1 + $0x8] sm:$0xff]  ;;  %v1666_v22 = vld [vmem:[%s2567_s1] sm:$0xff]  ;;  %v1652_v27 = vld [vmem:[%s2568_s0 + $0x1d0] sm:$0xf0] }
   0x8   :  { %v1675_v21 = vld [vmem:[%s2567_s1 + $0x48] sm:$0xff]  ;;  %v1674_v23 = vld [vmem:[%s2567_s1 + $0x40] sm:$0xff]  ;;  %v1213_v29 = vld [vmem:[%s2568_s0 + $0xc] sm:$0xf0] }
   0x9   :  { %v1211_v24 = vld [vmem:[%s2568_s0] sm:$0xf]  ;;  %v1595_v25 = vld [vmem:[%s2568_s0 + $0x8] sm:$0xf0]  ;;  %v1439_v26 = vld [vmem:[%s2568_s0 + $0x1c8] sm:$0xf] }
   0xa   :  { %1569 = vmatmul.msk.bf16.vlgmr.msra.gmra.mxu2 %vm631_vm0, %v1220_v8  ;;  %709 = vmatpush.bf16.msra.mxu0 %v1671_v9  ;;  %v1594_v28 = vld [vmem:[%s2568_s0 + $0x4] sm:$0xf]  ;;  %v1212_v30 = vor.u32 %v1595_v25, %v1211_v24  ;;  %v1440_v31 = vor.u32 %v1652_v27, %v1439_v26  ;;  %v1243_v33 = vld [vmem:[%s2568_s0 + $0x38] sm:$0xf]  ;;  %v1451_v38 = vld [vmem:[%s2568_s0 + $0x1e0] sm:$0xf] }
   0xb   :  { %1686 = vmatpush.bf16.msra.mxu3 %v1671_v9  ;;  %842 = vmatpush.bf16.msra.mxu1 %v1679_v10  ;;  %v1216_v32 = vor.u32 %v1594_v28, %v1213_v29  ;;  %v1602_v34 = vld [vmem:[%s2568_s0 + $0x40] sm:$0xf0]  ;;  %v1223_v36 = vld [vmem:[%s2568_s0 + $0x18] sm:$0xf]  ;;  %v1655_v39 = vld [vmem:[%s2568_s0 + $0x1e8] sm:$0xf0] }
   0xc   :  { %v1244_v35 = vor.u32 %v1602_v34, %v1243_v33  ;;  %v1598_v37 = vld [vmem:[%s2568_s0 + $0x20] sm:$0xf0]  ;;  %v1597_v40 = vld [vmem:[%s2568_s0 + $0x1c] sm:$0xf]  ;;  %v1225_v41 = vld [vmem:[%s2568_s0 + $0x24] sm:$0xf0]  ;;  %v1452_v43 = vor.u32 %v1655_v39, %v1451_v38 }
   0xd   :  { %v1224_v42 = vor.u32 %v1598_v37, %v1223_v36  ;;  %v1228_v44 = vor.u32 %v1597_v40, %v1225_v41  ;;  %v1255_v45 = vld [vmem:[%s2568_s0 + $0x50] sm:$0xf]  ;;  %v1605_v46 = vld [vmem:[%s2568_s0 + $0x58] sm:$0xf0]  ;;  %v1463_v50 = vld [vmem:[%s2568_s0 + $0x1f8] sm:$0xf] }
   0xe   :  { %710 = vmatpush.bf16.msra.mxu0 %v1670_v11  ;;  %v1256_v47 = vor.u32 %v1605_v46, %v1255_v45  ;;  %v1235_v48 = vld [vmem:[%s2568_s0 + $0x30] sm:$0xf]  ;;  %v1601_v49 = vld [vmem:[%s2568_s0 + $0x38] sm:$0xf0]  ;;  %v1658_v51 = vld [vmem:[%s2568_s0 + $0x200] sm:$0xf0] }
   0xf   :  { %1687 = vmatpush.bf16.msra.mxu3 %v1670_v11  ;;  %843 = vmatpush.bf16.msra.mxu1 %v1678_v12  ;;  %v1600_v52 = vld [vmem:[%s2568_s0 + $0x34] sm:$0xf]  ;;  %v1237_v53 = vld [vmem:[%s2568_s0 + $0x3c] sm:$0xf0]  ;;  %v1236_v54 = vor.u32 %v1601_v49, %v1235_v48  ;;  %v1464_v55 = vor.u32 %v1658_v51, %v1463_v50  ;;  %v1267_v57 = vld [vmem:[%s2568_s0 + $0x68] sm:$0xf] }
  0x10   :  { %v1240_v56 = vor.u32 %v1600_v52, %v1237_v53  ;;  %v1608_v58 = vld [vmem:[%s2568_s0 + $0x70] sm:$0xf0]  ;;  %v1247_v60 = vld [vmem:[%s2568_s0 + $0x48] sm:$0xf]  ;;  %v1475_v62 = vld [vmem:[%s2568_s0 + $0x210] sm:$0xf] }
  0x11   :  { %v1268_v59 = vor.u32 %v1608_v58, %v1267_v57  ;;  %v1604_v61 = vld [vmem:[%s2568_s0 + $0x50] sm:$0xf0]  ;;  %v1661_v63 = vld [vmem:[%s2568_s0 + $0x218] sm:$0xf0]  ;;  %v1603_v0 = vld [vmem:[%s2568_s0 + $0x4c] sm:$0xf] }
  0x12   :  { %711 = vmatpush.bf16.msra.mxu0 %v1669_v13  ;;  %v1476_v3 = vor.u32 %v1661_v63, %v1475_v62  ;;  %v1611_v6 = vld [vmem:[%s2568_s0 + $0x88] sm:$0xf0]  ;;  %v1259_v8 = vld [vmem:[%s2568_s0 + $0x60] sm:$0xf]  ;;  %v1664_v11 = vld [vmem:[%s2568_s0 + $0x230] sm:$0xf0] }
  0x13   :  { %1688 = vmatpush.bf16.msra.mxu3 %v1669_v13  ;;  %844 = vmatpush.bf16.msra.mxu1 %v1677_v14  ;;  %v1607_v9 = vld [vmem:[%s2568_s0 + $0x68] sm:$0xf0]  ;;  %v1261_v13 = vld [vmem:[%s2568_s0 + $0x6c] sm:$0xf0]  ;;  %v1291_v17 = vld [vmem:[%s2568_s0 + $0x98] sm:$0xf] }
  0x14   :  { %v1614_v18 = vld [vmem:[%s2568_s0 + $0xa0] sm:$0xf0]  ;;  %v1609_v24 = vld [vmem:[%s2568_s0 + $0x7c] sm:$0xf]  ;;  %v1273_v25 = vld [vmem:[%s2568_s0 + $0x84] sm:$0xf0] }
  0x15   :  { %v1276_v28 = vor.u32 %v1609_v24, %v1273_v25  ;;  %v1303_v29 = vld [vmem:[%s2568_s0 + $0xb0] sm:$0xf]  ;;  %v1613_v33 = vld [vmem:[%s2568_s0 + $0x98] sm:$0xf0]  ;;  %v1612_v34 = vld [vmem:[%s2568_s0 + $0x94] sm:$0xf] }
  0x16   :  { %712 = vmatpush.bf16.msra.mxu0 %v1668_v15  ;;  %v1651_v36 = vld [vmem:[%s2568_s0 + $0x1cc] sm:$0xf]  ;;  %v1441_v37 = vld [vmem:[%s2568_s0 + $0x1d4] sm:$0xf0]  ;;  %v1315_v41 = vld [vmem:[%s2568_s0 + $0xc8] sm:$0xf] }
  0x17   :  { %1689 = vmatpush.bf16.msra.mxu3 %v1668_v15  ;;  %845 = vmatpush.bf16.msra.mxu1 %v1676_v16  ;;  %v1444_v40 = vor.u32 %v1651_v36, %v1441_v37  ;;  %v1616_v45 = vld [vmem:[%s2568_s0 + $0xb0] sm:$0xf0]  ;;  %v1615_v46 = vld [vmem:[%s2568_s0 + $0xac] sm:$0xf]  ;;  %v1654_v48 = vld [vmem:[%s2568_s0 + $0x1e4] sm:$0xf] }
  0x18   :  { %v1453_v49 = vld [vmem:[%s2568_s0 + $0x1ec] sm:$0xf0]  ;;  %v2002_v58 = vld [vmem:[%s2569_s2] ss:$0 sm:$0xff]  ;;  %v1657_v63 = vld [vmem:[%s2568_s0 + $0x1fc] sm:$0xf] }
  0x19   :  { %v1456_v53 = vor.u32 %v1654_v48, %v1453_v49  ;;  %v1309_v62 = vld [vmem:[%s2568_s0 + $0xcc] sm:$0xf0]  ;;  %v1321_v25 = vld [vmem:[%s2568_s0 + $0xe4] sm:$0xf0] }
  0x1a   :  { %1570 = vmatmul.msk.bf16.gmra.mxu2 %vm631_vm0, %v1232_v19  ;;  %713 = vmatpush.bf16.msra.mxu0 %v1667_v20  ;;  %v1292_v19 = vor.u32 %v1614_v18, %v1291_v17  ;;  %v1331_v49 = vld [vmem:[%s2568_s0 + $0xf0] sm:$0xf] }
  0x1b   :  { %1690 = vmatpush.bf16.msra.mxu3 %v1667_v20  ;;  %846 = vmatpush.bf16.msra.mxu1 %v1675_v21  ;;  %v1927_v20 = vld [vmem:[%s2568_s0 + $0x240] sm:$0xff] }
  0x1e   :  { %714 = vmatpush.bf16.msra.mxu0 %v1666_v22 }
  0x1f   :  { %1691 = vmatpush.bf16.msra.mxu3 %v1666_v22  ;;  %847 = vmatpush.bf16.msra.mxu1 %v1674_v23  ;;  %v1610_v22 = vld [vmem:[%s2568_s0 + $0x80] sm:$0xf0] }
  0x21   :  { %715 = vmatmul.bf16.vlgmr.msra.gmra.mxu0 %v1212_v30  ;;  %v1617_v30 = vld [vmem:[%s2568_s0 + $0xb8] sm:$0xf0] }
  0x22   :  { %810 = vmatmul.bf16.vlgmr.msra.gmra.mxu3 %v1440_v31  ;;  %848 = vmatmul.bf16.vlgmr.msra.gmra.mxu1 %v1216_v32  ;;  %v1304_v31 = vor.u32 %v1617_v30, %v1303_v29  ;;  %v1283_v32 = vld [vmem:[%s2568_s0 + $0x90] sm:$0xf] }
  0x23   :  { %1692 = vmatpush.bf16.msrb.mxu3 %v1681_v1  ;;  %v1249_v1 = vld [vmem:[%s2568_s0 + $0x54] sm:$0xf0]  ;;  %v1284_v38 = vor.u32 %v1613_v33, %v1283_v32 }
  0x27   :  { %1693 = vmatpush.bf16.msrb.mxu3 %v1680_v4  ;;  %v1252_v4 = vor.u32 %v1603_v0, %v1249_v1  ;;  %v1465_v0 = vld [vmem:[%s2568_s0 + $0x204] sm:$0xf0] }
  0x2a   :  { %1571 = vmatmul.msk.bf16.gmra.mxu2 %vm631_vm0, %v1244_v35  ;;  %v1285_v35 = vld [vmem:[%s2568_s0 + $0x9c] sm:$0xf0] }
  0x2b   :  { %1694 = vmatpush.bf16.msrb.mxu3 %v1679_v10  ;;  %v1487_v10 = vld [vmem:[%s2568_s0 + $0x228] sm:$0xf]  ;;  %v1288_v39 = vor.u32 %v1612_v34, %v1285_v35 }
  0x2c   :  { %v1488_v15 = vor.u32 %v1664_v11, %v1487_v10  ;;  %v1339_v10 = vld [vmem:[%s2568_s0 + $0xf8] sm:$0xf]  ;;  %v1626_v11 = vld [vmem:[%s2568_s0 + $0x100] sm:$0xf0] }
  0x2f   :  { %1695 = vmatpush.bf16.msrb.mxu3 %v1678_v12  ;;  %v1606_v12 = vld [vmem:[%s2568_s0 + $0x64] sm:$0xf] }
  0x31   :  { %720 = vmatmul.bf16.gmra.mxu0 %v1224_v42  ;;  %v1620_v42 = vld [vmem:[%s2568_s0 + $0xd0] sm:$0xf0] }
  0x32   :  { %815 = vmatmul.bf16.gmra.mxu3 %v1452_v43  ;;  %853 = vmatmul.bf16.gmra.mxu1 %v1228_v44  ;;  %v1316_v43 = vor.u32 %v1620_v42, %v1315_v41  ;;  %v1295_v44 = vld [vmem:[%s2568_s0 + $0xa8] sm:$0xf] }
  0x33   :  { %1696 = vmatpush.bf16.msrb.mxu3 %v1677_v14  ;;  %v1260_v14 = vor.u32 %v1607_v9, %v1259_v8  ;;  %v1296_v51 = vor.u32 %v1616_v45, %v1295_v44 }
  0x37   :  { %1697 = vmatpush.bf16.msrb.mxu3 %v1676_v16  ;;  %v1264_v16 = vor.u32 %v1606_v12, %v1261_v13 }
  0x3a   :  { %1572 = vmatmul.msk.bf16.gmra.mxu2 %vm631_vm0, %v1256_v47  ;;  %v1297_v47 = vld [vmem:[%s2568_s0 + $0xb4] sm:$0xf0] }
  0x3b   :  { %1698 = vmatpush.bf16.msrb.mxu3 %v1675_v21  ;;  %v1271_v21 = vld [vmem:[%s2568_s0 + $0x78] sm:$0xf]  ;;  %v1300_v52 = vor.u32 %v1615_v46, %v1297_v47 }
  0x3c   :  { %v1272_v26 = vor.u32 %v1610_v22, %v1271_v21  ;;  %v1319_v21 = vld [vmem:[%s2568_s0 + $0xd8] sm:$0xf]  ;;  %v1622_v22 = vld [vmem:[%s2568_s0 + $0xe0] sm:$0xf0] }
  0x3f   :  { %1699 = vmatpush.bf16.msrb.mxu3 %v1674_v23  ;;  %v395_v23 = vunpack.c.l.b16 %v1927_v20 }
  0x41   :  { %725 = vmatmul.bf16.gmra.mxu0 %v1236_v54  ;;  %v470_v27 = vpack.c.b16 %v395_v23, %v395_v23  ;;  %v1327_v54 = vld [vmem:[%s2568_s0 + $0xe0] sm:$0xf]  ;;  %v1621_v23 = vld [vmem:[%s2568_s0 + $0xdc] sm:$0xf] }
  0x42   :  { %820 = vmatmul.bf16.gmra.mxu3 %v1464_v55  ;;  %858 = vmatmul.bf16.gmra.mxu1 %v1240_v56  ;;  %v1623_v55 = vld [vmem:[%s2568_s0 + $0xe8] sm:$0xf0]  ;;  %v1324_v33 = vor.u32 %v1621_v23, %v1321_v25 }
  0x43   :  { %1700 = vmatpush.bf16.msra.mxu3 %v1733_v2  ;;  %v1248_v2 = vor.u32 %v1604_v61, %v1247_v60  ;;  %v1328_v57 = vor.u32 %v1623_v55, %v1327_v54  ;;  %v1619_v60 = vld [vmem:[%s2568_s0 + $0xc8] sm:$0xf0]  ;;  %v1618_v61 = vld [vmem:[%s2568_s0 + $0xc4] sm:$0xf]  ;;  %v1489_v55 = vld [vmem:[%s2568_s0 + $0x234] sm:$0xf0] }
  0x44   :  { %v1663_v54 = vld [vmem:[%s2568_s0 + $0x22c] sm:$0xf] }
  0x47   :  { %1701 = vmatpush.bf16.msra.mxu3 %v1745_v5  ;;  %v1279_v5 = vld [vmem:[%s2568_s0 + $0x80] sm:$0xf] }
  0x48   :  { %v1280_v7 = vor.u32 %v1611_v6, %v1279_v5  ;;  %v1468_v5 = vor.u32 %v1657_v63, %v1465_v0  ;;  %v1492_v63 = vor.u32 %v1663_v54, %v1489_v55 }
  0x4a   :  { %1573 = vmatmul.msk.bf16.gmra.mxu2 %vm631_vm0, %v1268_v59  ;;  %v1307_v59 = vld [vmem:[%s2568_s0 + $0xc0] sm:$0xf] }
  0x51   :  { %730 = vmatmul.bf16.gmra.mxu0 %v1248_v2  ;;  %v1308_v2 = vor.u32 %v1619_v60, %v1307_v59 }
  0x52   :  { %825 = vmatmul.bf16.gmra.mxu3 %v1476_v3  ;;  %863 = vmatmul.bf16.gmra.mxu1 %v1252_v4  ;;  %v1312_v4 = vor.u32 %v1618_v61, %v1309_v62 }
  0x5a   :  { %1574 = vmatmul.msk.bf16.gmra.mxu2 %vm631_vm0, %v1280_v7 }
  0x61   :  { %735 = vmatmul.bf16.gmra.mxu0 %v1260_v14 }
  0x62   :  { %830 = vmatmul.bf16.gmra.mxu3 %v1488_v15  ;;  %868 = vmatmul.bf16.gmra.mxu1 %v1264_v16  ;;  %v1340_v16 = vor.u32 %v1626_v11, %v1339_v10 }
  0x6a   :  { %1575 = vmatmul.msk.bf16.gmra.mxu2 %vm631_vm0, %v1292_v19 }
  0x71   :  { %740 = vmatmul.bf16.gmra.mxu0 %v1272_v26  ;;  %v1660_v26 = vld [vmem:[%s2568_s0 + $0x214] sm:$0xf] }
  0x72   :  { %835 = vmatmul.bf16.gmra.mxu3 %v470_v27  ;;  %873 = vmatmul.bf16.gmra.mxu1 %v1276_v28  ;;  %v1477_v27 = vld [vmem:[%s2568_s0 + $0x21c] sm:$0xf0] }
  0x73   :  { %v1480_v34 = vor.u32 %v1660_v26, %v1477_v27 }
  0x7a   :  { %1576 = vmatmul.msk.bf16.gmra.mxu2 %vm631_vm0, %v1304_v31  ;;  %v1320_v31 = vor.u32 %v1622_v22, %v1319_v21  ;;  %v1345_v21 = vld [vmem:[%s2568_s0 + $0x114] sm:$0xf0] }
  0x81   :  { %745 = vmatmul.bf16.gmra.mxu0 %v1284_v38 }
  0x82   :  { %878 = vmatmul.bf16.gmra.mxu1 %v1288_v39  ;;  %943 = vmatmul.bf16.vlgmr.msrb.gmra.mxu3 %v1444_v40  ;;  %v1351_v39 = vld [vmem:[%s2568_s0 + $0x110] sm:$0xf]  ;;  %v1629_v40 = vld [vmem:[%s2568_s0 + $0x118] sm:$0xf0] }
  0x83   :  { %v1352_v45 = vor.u32 %v1629_v40, %v1351_v39 }
  0x8a   :  { %1577 = vmatmul.msk.bf16.gmra.mxu2 %vm631_vm0, %v1316_v43 }
  0x8d   :  { %v982_v50 = vpop.f32.mrf.mxu2 }
  0x91   :  { %750 = vmatmul.bf16.gmra.mxu0 %v1296_v51  ;;  %v1624_v51 = vld [vmem:[%s2568_s0 + $0xf4] sm:$0xf] }
  0x92   :  { %883 = vmatmul.bf16.gmra.mxu1 %v1300_v52  ;;  %948 = vmatmul.bf16.gmra.mxu3 %v1456_v53  ;;  %v1333_v53 = vld [vmem:[%s2568_s0 + $0xfc] sm:$0xf0] }
  0x93   :  { %v1336_v62 = vor.u32 %v1624_v51, %v1333_v53 }
  0x95   :  { %v984_v56 = vpop.f32.mrf.mxu2 }
  0x9a   :  { %1578 = vmatmul.msk.bf16.gmra.mxu2 %vm631_vm0, %v1328_v57 }
  0x9d   :  { %v987_v1 = vpop.f32.mrf.mxu2 }
  0x9e   :  { %v716_v3 = vpop.f32.mrf.mxu0 }
  0x9f   :  { %v717_v6 = vadd.f32 %v2002_v58, %v716_v3  ;;  %v849_v7 = vpop.f32.mrf.mxu1 }
  0xa1   :  { %v850_v8 = vadd.f32 %v849_v7, %v717_v6  ;;  %755 = vmatmul.bf16.gmra.mxu0 %v1308_v2 }
  0xa2   :  { %888 = vmatmul.bf16.gmra.mxu1 %v1312_v4  ;;  %953 = vmatmul.bf16.gmra.mxu3 %v1468_v5  ;;  %v1363_v4 = vld [vmem:[%s2568_s0 + $0x128] sm:$0xf]  ;;  %v1632_v5 = vld [vmem:[%s2568_s0 + $0x130] sm:$0xf0] }
  0xa3   :  { %v983_v9 = vadd.f32 %v982_v50, %v850_v8  ;;  %v1625_v50 = vld [vmem:[%s2568_s0 + $0xf8] sm:$0xf0]  ;;  %v1364_v10 = vor.u32 %v1632_v5, %v1363_v4 }
  0xa4   :  { %v1332_v60 = vor.u32 %v1625_v50, %v1331_v49  ;;  %v1459_v49 = vld [vmem:[%s2568_s0 + $0x1e8] sm:$0xf]  ;;  %v1656_v50 = vld [vmem:[%s2568_s0 + $0x1f0] sm:$0xf0] }
  0xa5   :  { %v1106_v12 = vmax.f32 %v983_v9, 0.0  ;;  %v2030_v13 = vpop.f32.mrf.mxu3  ;;  %v989_v14 = vpop.f32.mrf.mxu2 }
  0xa6   :  { %v718_v15 = vpop.f32.mrf.mxu0 }
  0xa7   :  { %1156 = vst.msk [vmem:[%s2570_s3] sm:$0xff] %vm1155_vm1, %v1106_v12  ;;  %v719_v17 = vadd.f32 %v2002_v58, %v718_v15  ;;  %v851_v18 = vpop.f32.mrf.mxu1  ;;  %v1343_v15 = vld [vmem:[%s2568_s0 + $0x108] sm:$0xf] }
  0xa9   :  { %v852_v19 = vadd.f32 %v851_v18, %v719_v17  ;;  %v396_v17 = vunpack.c.h.b16 %v1927_v20 }
  0xaa   :  { %1579 = vmatmul.msk.bf16.gmra.mxu2 %vm631_vm0, %v1340_v16  ;;  %v1628_v16 = vld [vmem:[%s2568_s0 + $0x110] sm:$0xf0] }
  0xab   :  { %v985_v24 = vadd.f32 %v984_v56, %v852_v19  ;;  %v1627_v19 = vld [vmem:[%s2568_s0 + $0x10c] sm:$0xf]  ;;  %v1344_v25 = vor.u32 %v1628_v16, %v1343_v15  ;;  %v1369_v16 = vld [vmem:[%s2568_s0 + $0x144] sm:$0xf0] }
  0xac   :  { %v1348_v27 = vor.u32 %v1627_v19, %v1345_v21 }
  0xad   :  { %v1107_v28 = vmax.f32 %v985_v24, 0.0  ;;  %v2056_v29 = vpop.f32.mrf.mxu3  ;;  %v992_v30 = vpop.f32.mrf.mxu2 }
  0xae   :  { %v721_v32 = vpop.f32.mrf.mxu0 }
  0xaf   :  { %1157 = vst.msk [vmem:[%s2570_s3 + $0x8] sm:$0xff] %vm1155_vm1, %v1107_v28  ;;  %v722_v35 = vadd.f32 %v2002_v58, %v721_v32  ;;  %v854_v36 = vpop.f32.mrf.mxu1  ;;  %v471_v28 = vpack.c.b16 %v396_v17, %v396_v17  ;;  %v1471_v17 = vld [vmem:[%s2568_s0 + $0x200] sm:$0xf] }
  0xb1   :  { %v855_v37 = vadd.f32 %v854_v36, %v722_v35  ;;  %760 = vmatmul.bf16.gmra.mxu0 %v1320_v31 }
  0xb2   :  { %893 = vmatmul.bf16.gmra.mxu1 %v1324_v33  ;;  %958 = vmatmul.bf16.gmra.mxu3 %v1480_v34  ;;  %v1375_v33 = vld [vmem:[%s2568_s0 + $0x140] sm:$0xf]  ;;  %v1635_v34 = vld [vmem:[%s2568_s0 + $0x148] sm:$0xf0] }
  0xb3   :  { %v988_v38 = vadd.f32 %v987_v1, %v855_v37  ;;  %v1376_v39 = vor.u32 %v1635_v34, %v1375_v33  ;;  %v1641_v33 = vld [vmem:[%s2568_s0 + $0x178] sm:$0xf0] }
  0xb5   :  { %v1108_v41 = vmax.f32 %v988_v38, 0.0  ;;  %v2069_v42 = vpop.f32.mrf.mxu3  ;;  %v994_v43 = vpop.f32.mrf.mxu2 }
  0xb6   :  { %v723_v44 = vpop.f32.mrf.mxu0 }
  0xb7   :  { %1158 = vst.msk [vmem:[%s2570_s3 + $0x10] sm:$0xff] %vm1155_vm1, %v1108_v41  ;;  %v724_v46 = vadd.f32 %v2002_v58, %v723_v44  ;;  %v856_v47 = vpop.f32.mrf.mxu1  ;;  %v1355_v44 = vld [vmem:[%s2568_s0 + $0x120] sm:$0xf] }
  0xb9   :  { %v857_v48 = vadd.f32 %v856_v47, %v724_v46  ;;  %v1630_v46 = vld [vmem:[%s2568_s0 + $0x124] sm:$0xf] }
  0xba   :  { %1580 = vmatmul.msk.bf16.gmra.mxu2 %vm631_vm0, %v1352_v45  ;;  %v1631_v45 = vld [vmem:[%s2568_s0 + $0x128] sm:$0xf0] }
  0xbb   :  { %v990_v52 = vadd.f32 %v989_v14, %v857_v48  ;;  %v1357_v48 = vld [vmem:[%s2568_s0 + $0x12c] sm:$0xf0]  ;;  %v1356_v54 = vor.u32 %v1631_v45, %v1355_v44  ;;  %v1637_v45 = vld [vmem:[%s2568_s0 + $0x158] sm:$0xf0] }
  0xbc   :  { %v1379_v44 = vld [vmem:[%s2568_s0 + $0x150] sm:$0xf] }
  0xbd   :  { %v1109_v56 = vmax.f32 %v990_v52, 0.0  ;;  %v2095_v57 = vpop.f32.mrf.mxu3  ;;  %v997_v59 = vpop.f32.mrf.mxu2 }
  0xbe   :  { %v726_v61 = vpop.f32.mrf.mxu0 }
  0xbf   :  { %1159 = vst.msk [vmem:[%s2570_s3 + $0x18] sm:$0xff] %vm1155_vm1, %v1109_v56  ;;  %v727_v0 = vadd.f32 %v2002_v58, %v726_v61  ;;  %v859_v1 = vpop.f32.mrf.mxu1  ;;  %v1360_v56 = vor.u32 %v1630_v46, %v1357_v48  ;;  %v1636_v46 = vld [vmem:[%s2568_s0 + $0x154] sm:$0xf]  ;;  %v1381_v48 = vld [vmem:[%s2568_s0 + $0x15c] sm:$0xf0] }
  0xc1   :  { %v860_v2 = vadd.f32 %v859_v1, %v727_v0  ;;  %765 = vmatmul.bf16.gmra.mxu0 %v1332_v60  ;;  %v1387_v0 = vld [vmem:[%s2568_s0 + $0x158] sm:$0xf]  ;;  %v1638_v1 = vld [vmem:[%s2568_s0 + $0x160] sm:$0xf0] }
  0xc2   :  { %898 = vmatmul.bf16.gmra.mxu1 %v1336_v62  ;;  %963 = vmatmul.bf16.gmra.mxu3 %v1492_v63 }
  0xc3   :  { %v993_v3 = vadd.f32 %v992_v30, %v860_v2 }
  0xc5   :  { %v1110_v6 = vmax.f32 %v993_v3, 0.0  ;;  %v2108_v7 = vpop.f32.mrf.mxu3  ;;  %v999_v8 = vpop.f32.mrf.mxu2 }
  0xc6   :  { %v728_v9 = vpop.f32.mrf.mxu0 }
  0xc7   :  { %1160 = vst.msk [vmem:[%s2570_s3 + $0x20] sm:$0xff] %vm1155_vm1, %v1110_v6  ;;  %v729_v11 = vadd.f32 %v2002_v58, %v728_v9  ;;  %v861_v12 = vpop.f32.mrf.mxu1  ;;  %v1388_v6 = vor.u32 %v1638_v1, %v1387_v0  ;;  %v1411_v1 = vld [vmem:[%s2568_s0 + $0x188] sm:$0xf] }
  0xc9   :  { %v862_v14 = vadd.f32 %v861_v12, %v729_v11  ;;  %v1367_v11 = vld [vmem:[%s2568_s0 + $0x138] sm:$0xf]  ;;  %v1634_v12 = vld [vmem:[%s2568_s0 + $0x140] sm:$0xf0] }
  0xca   :  { %1581 = vmatmul.msk.bf16.gmra.mxu2 %vm631_vm0, %v1364_v10 }
  0xcb   :  { %v995_v18 = vadd.f32 %v994_v43, %v862_v14  ;;  %v1633_v14 = vld [vmem:[%s2568_s0 + $0x13c] sm:$0xf] }
  0xcd   :  { %v1111_v22 = vmax.f32 %v995_v18, 0.0  ;;  %v2129_v23 = vpop.f32.mrf.mxu3  ;;  %v1002_v24 = vpop.f32.mrf.mxu2  ;;  %v1659_v18 = vld [vmem:[%s2568_s0 + $0x208] sm:$0xf0] }
  0xce   :  { %v731_v26 = vpop.f32.mrf.mxu0 }
  0xcf   :  { %1161 = vst.msk [vmem:[%s2570_s3 + $0x28] sm:$0xff] %vm1155_vm1, %v1111_v22  ;;  %v732_v20 = vadd.f32 %v2002_v58, %v731_v26  ;;  %v864_v30 = vpop.f32.mrf.mxu1  ;;  %v1372_v26 = vor.u32 %v1633_v14, %v1369_v16  ;;  %v1640_v16 = vld [vmem:[%s2568_s0 + $0x170] sm:$0xf0] }
  0xd1   :  { %v865_v31 = vadd.f32 %v864_v30, %v732_v20  ;;  %770 = vmatmul.bf16.gmra.mxu0 %v1344_v25 }
  0xd2   :  { %903 = vmatmul.bf16.gmra.mxu1 %v1348_v27  ;;  %968 = vmatmul.bf16.gmra.mxu3 %v471_v28  ;;  %v1472_v27 = vor.u32 %v1659_v18, %v1471_v17  ;;  %v1639_v17 = vld [vmem:[%s2568_s0 + $0x16c] sm:$0xf] }
  0xd3   :  { %v998_v32 = vadd.f32 %v997_v59, %v865_v31  ;;  %v1460_v59 = vor.u32 %v1656_v50, %v1459_v49  ;;  %v1483_v49 = vld [vmem:[%s2568_s0 + $0x218] sm:$0xf]  ;;  %v1662_v50 = vld [vmem:[%s2568_s0 + $0x220] sm:$0xf0] }
  0xd5   :  { %v1112_v35 = vmax.f32 %v998_v32, 0.0  ;;  %v2142_v36 = vpop.f32.mrf.mxu3  ;;  %v1004_v37 = vpop.f32.mrf.mxu2  ;;  %v1399_v32 = vld [vmem:[%s2568_s0 + $0x170] sm:$0xf] }
  0xd6   :  { %v733_v38 = vpop.f32.mrf.mxu0 }
  0xd7   :  { %1162 = vst.msk [vmem:[%s2570_s3 + $0x30] sm:$0xff] %vm1155_vm1, %v1112_v35  ;;  %v734_v40 = vadd.f32 %v2002_v58, %v733_v38  ;;  %v866_v41 = vpop.f32.mrf.mxu1 }
  0xd9   :  { %v867_v43 = vadd.f32 %v866_v41, %v734_v40 }
  0xda   :  { %1582 = vmatmul.msk.bf16.gmra.mxu2 %vm631_vm0, %v1376_v39  ;;  %v1400_v39 = vor.u32 %v1641_v33, %v1399_v32 }
  0xdb   :  { %v1000_v47 = vadd.f32 %v999_v8, %v867_v43 }
  0xdd   :  { %v1113_v51 = vmax.f32 %v1000_v47, 0.0  ;;  %v2168_v52 = vpop.f32.mrf.mxu3  ;;  %v1007_v53 = vpop.f32.mrf.mxu2 }
  0xde   :  { %v736_v55 = vpop.f32.mrf.mxu0 }
  0xdf   :  { %1163 = vst.msk [vmem:[%s2570_s3 + $0x38] sm:$0xff] %vm1155_vm1, %v1113_v51  ;;  %v737_v60 = vadd.f32 %v2002_v58, %v736_v55  ;;  %v869_v61 = vpop.f32.mrf.mxu1  ;;  %v1380_v55 = vor.u32 %v1637_v45, %v1379_v44 }
  0xe1   :  { %v870_v62 = vadd.f32 %v869_v61, %v737_v60  ;;  %775 = vmatmul.bf16.gmra.mxu0 %v1356_v54  ;;  %v1484_v60 = vor.u32 %v1662_v50, %v1483_v49 }
  0xe2   :  { %908 = vmatmul.bf16.gmra.mxu1 %v1360_v56  ;;  %1589 = vmatmul.msk.bf16.vlgmr.msra.gmra.mxu3 %vm631_vm0, %v1460_v59  ;;  %v1384_v59 = vor.u32 %v1636_v46, %v1381_v48 }
  0xe3   :  { %v1003_v63 = vadd.f32 %v1002_v24, %v870_v62  ;;  %v1368_v24 = vor.u32 %v1634_v12, %v1367_v11 }
  0xe5   :  { %v1114_v2 = vmax.f32 %v1003_v63, 0.0  ;;  %v2182_v3 = vpop.f32.mrf.mxu3  ;;  %v1009_v4 = vpop.f32.mrf.mxu2 }
  0xe6   :  { %v738_v5 = vpop.f32.mrf.mxu0 }
  0xe7   :  { %1164 = vst.msk [vmem:[%s2570_s3 + $0x40] sm:$0xff] %vm1155_vm1, %v1114_v2  ;;  %v739_v8 = vadd.f32 %v2002_v58, %v738_v5  ;;  %v871_v9 = vpop.f32.mrf.mxu1  ;;  %v1644_v2 = vld [vmem:[%s2568_s0 + $0x190] sm:$0xf0] }
  0xe8   :  { %v1412_v11 = vor.u32 %v1644_v2, %v1411_v1 }
  0xe9   :  { %v872_v10 = vadd.f32 %v871_v9, %v739_v8 }
  0xea   :  { %1583 = vmatmul.msk.bf16.gmra.mxu2 %vm631_vm0, %v1388_v6 }
  0xeb   :  { %v1005_v15 = vadd.f32 %v1004_v37, %v872_v10 }
  0xed   :  { %v1115_v19 = vmax.f32 %v1005_v15, 0.0  ;;  %v2208_v21 = vpop.f32.mrf.mxu3  ;;  %v1012_v22 = vpop.f32.mrf.mxu2 }
  0xee   :  { %v741_v25 = vpop.f32.mrf.mxu0 }
  0xef   :  { %1165 = vst.msk [vmem:[%s2570_s3 + $0x48] sm:$0xff] %vm1155_vm1, %v1115_v19  ;;  %v742_v28 = vadd.f32 %v2002_v58, %v741_v25  ;;  %v874_v20 = vpop.f32.mrf.mxu1  ;;  %v1393_v19 = vld [vmem:[%s2568_s0 + $0x174] sm:$0xf0]  ;;  %v814_v25 = vadd.f32 %v2002_v58, %v2056_v29 }
  0xf0   :  { %v1396_v32 = vor.u32 %v1639_v17, %v1393_v19 }
  0xf1   :  { %v875_v30 = vadd.f32 %v874_v20, %v742_v28  ;;  %780 = vmatmul.bf16.gmra.mxu0 %v1368_v24  ;;  %v1665_v24 = vld [vmem:[%s2568_s0 + $0x238] sm:$0xf0] }
  0xf2   :  { %913 = vmatmul.bf16.gmra.mxu1 %v1372_v26  ;;  %1590 = vmatmul.msk.bf16.gmra.mxu3 %vm631_vm0, %v1472_v27 }
  0xf3   :  { %v1008_v31 = vadd.f32 %v1007_v53, %v875_v30 }
  0xf5   :  { %v1116_v34 = vmax.f32 %v1008_v31, 0.0  ;;  %v2222_v35 = vpop.f32.mrf.mxu3  ;;  %v1014_v37 = vpop.f32.mrf.mxu2 }
  0xf6   :  { %v743_v38 = vpop.f32.mrf.mxu0 }
  0xf7   :  { %1166 = vst.msk [vmem:[%s2570_s3 + $0x50] sm:$0xff] %vm1155_vm1, %v1116_v34  ;;  %v744_v40 = vadd.f32 %v2002_v58, %v743_v38  ;;  %v876_v41 = vpop.f32.mrf.mxu1 }
  0xf9   :  { %v877_v43 = vadd.f32 %v876_v41, %v744_v40  ;;  %v1647_v40 = vld [vmem:[%s2568_s0 + $0x1a8] sm:$0xf0]  ;;  %v817_v41 = vadd.f32 %v2002_v58, %v2069_v42 }
  0xfa   :  { %1584 = vmatmul.msk.bf16.gmra.mxu2 %vm631_vm0, %v1400_v39  ;;  %v1423_v39 = vld [vmem:[%s2568_s0 + $0x1a0] sm:$0xf] }
  0xfb   :  { %v1010_v47 = vadd.f32 %v1009_v4, %v877_v43  ;;  %v812_v4 = vadd.f32 %v2002_v58, %v2030_v13  ;;  %v1391_v13 = vld [vmem:[%s2568_s0 + $0x168] sm:$0xf]  ;;  %v1424_v48 = vor.u32 %v1647_v40, %v1423_v39 }
  0xfc   :  { %v1392_v20 = vor.u32 %v1640_v16, %v1391_v13 }
  0xfd   :  { %v1117_v51 = vmax.f32 %v1010_v47, 0.0  ;;  %v838_v53 = vpop.f32.mrf.mxu3  ;;  %v1017_v54 = vpop.f32.mrf.mxu2 }
  0xfe   :  { %v746_v56 = vpop.f32.mrf.mxu0  ;;  %v1403_v53 = vld [vmem:[%s2568_s0 + $0x180] sm:$0xf] }
  0xff   :  { %1167 = vst.msk [vmem:[%s2570_s3 + $0x58] sm:$0xff] %vm1155_vm1, %v1117_v51  ;;  %v747_v61 = vadd.f32 %v2002_v58, %v746_v56  ;;  %v879_v62 = vpop.f32.mrf.mxu1  ;;  %v112_v51 = vld [vmem:[%s2568_s0 + $0x248] sm:$0xf] }
 0x101   :  { %v880_v63 = vadd.f32 %v879_v62, %v747_v61  ;;  %785 = vmatmul.bf16.gmra.mxu0 %v1380_v55  ;;  %v397_v55 = vunpack.c.l.b16 %v112_v51  ;;  %v819_v61 = vadd.f32 %v2002_v58, %v2095_v57 }
 0x102   :  { %918 = vmatmul.bf16.gmra.mxu1 %v1384_v59  ;;  %1591 = vmatmul.msk.bf16.gmra.mxu3 %vm631_vm0, %v1484_v60  ;;  %v1642_v59 = vld [vmem:[%s2568_s0 + $0x184] sm:$0xf]  ;;  %v1405_v60 = vld [vmem:[%s2568_s0 + $0x18c] sm:$0xf0] }
 0x103   :  { %v1013_v0 = vadd.f32 %v1012_v22, %v880_v63  ;;  %v1495_v22 = vld [vmem:[%s2568_s0 + $0x230] sm:$0xf] }
 0x104   :  { %v1496_v33 = vor.u32 %v1665_v24, %v1495_v22 }
 0x105   :  { %v1118_v5 = vmax.f32 %v1013_v0, 0.0  ;;  %v944_v6 = vpop.f32.mrf.mxu3  ;;  %v1019_v8 = vpop.f32.mrf.mxu2 }
 0x106   :  { %v2262_v9 = vadd.f32 %v944_v6, %v812_v4  ;;  %v748_v10 = vpop.f32.mrf.mxu0  ;;  %v472_v6 = vpack.c.b16 %v397_v55, %v397_v55 }
 0x107   :  { %1168 = vst.msk [vmem:[%s2570_s3 + $0x60] sm:$0xff] %vm1155_vm1, %v1118_v5  ;;  %v749_v12 = vadd.f32 %v2002_v58, %v748_v10  ;;  %v881_v14 = vpop.f32.mrf.mxu1  ;;  %v1408_v5 = vor.u32 %v1642_v59, %v1405_v60  ;;  %v1649_v60 = vld [vmem:[%s2568_s0 + $0x1b8] sm:$0xf0] }
 0x109   :  { %v882_v15 = vadd.f32 %v881_v14, %v749_v12  ;;  %v1435_v12 = vld [vmem:[%s2568_s0 + $0x1b8] sm:$0xf]  ;;  %v1650_v14 = vld [vmem:[%s2568_s0 + $0x1c0] sm:$0xf0] }
 0x10a   :  { %1585 = vmatmul.msk.bf16.gmra.mxu2 %vm631_vm0, %v1412_v11  ;;  %v1436_v22 = vor.u32 %v1650_v14, %v1435_v12 }
 0x10b   :  { %v1015_v18 = vadd.f32 %v1014_v37, %v882_v15  ;;  %v822_v15 = vadd.f32 %v2002_v58, %v2108_v7  ;;  %v1415_v7 = vld [vmem:[%s2568_s0 + $0x198] sm:$0xf] }
 0x10d   :  { %v1119_v26 = vmax.f32 %v1015_v18, 0.0  ;;  %v946_v27 = vpop.f32.mrf.mxu3  ;;  %v1022_v28 = vpop.f32.mrf.mxu2 }
 0x10e   :  { %v2290_v30 = vadd.f32 %v946_v27, %v814_v25  ;;  %v751_v31 = vpop.f32.mrf.mxu0  ;;  %v1646_v27 = vld [vmem:[%s2568_s0 + $0x1a0] sm:$0xf0] }
 0x10f   :  { %1169 = vst.msk [vmem:[%s2570_s3 + $0x68] sm:$0xff] %vm1155_vm1, %v1119_v26  ;;  %v752_v34 = vadd.f32 %v2002_v58, %v751_v31  ;;  %v884_v37 = vpop.f32.mrf.mxu1  ;;  %v1417_v31 = vld [vmem:[%s2568_s0 + $0x1a4] sm:$0xf0] }
 0x111   :  { %v885_v38 = vadd.f32 %v884_v37, %v752_v34  ;;  %790 = vmatmul.bf16.gmra.mxu0 %v1392_v20  ;;  %v1645_v20 = vld [vmem:[%s2568_s0 + $0x19c] sm:$0xf] }
 0x112   :  { %923 = vmatmul.bf16.gmra.mxu1 %v1396_v32  ;;  %1592 = vmatmul.msk.bf16.gmra.mxu3 %vm631_vm0, %v1496_v33  ;;  %v824_v32 = vadd.f32 %v2002_v58, %v2129_v23  ;;  %v1420_v40 = vor.u32 %v1645_v20, %v1417_v31 }
 0x113   :  { %v1018_v29 = vadd.f32 %v1017_v54, %v885_v38  ;;  %v1643_v54 = vld [vmem:[%s2568_s0 + $0x188] sm:$0xf0]  ;;  %v1416_v38 = vor.u32 %v1646_v27, %v1415_v7  ;;  %v834_v27 = vadd.f32 %v2002_v58, %v2208_v21 }
 0x114   :  { %v1404_v1 = vor.u32 %v1643_v54, %v1403_v53 }
 0x115   :  { %v1120_v43 = vmax.f32 %v1018_v29, 0.0  ;;  %v949_v44 = vpop.f32.mrf.mxu3  ;;  %v1024_v45 = vpop.f32.mrf.mxu2 }
 0x116   :  { %v2306_v46 = vadd.f32 %v949_v44, %v817_v41  ;;  %v753_v47 = vpop.f32.mrf.mxu0 }
 0x117   :  { %1170 = vst.msk [vmem:[%s2570_s3 + $0x70] sm:$0xff] %vm1155_vm1, %v1120_v43  ;;  %v754_v49 = vadd.f32 %v2002_v58, %v753_v47  ;;  %v886_v50 = vpop.f32.mrf.mxu1  ;;  %v1653_v47 = vld [vmem:[%s2568_s0 + $0x1d8] sm:$0xf0] }
 0x119   :  { %v887_v42 = vadd.f32 %v886_v50, %v754_v49 }
 0x11a   :  { %1586 = vmatmul.msk.bf16.gmra.mxu2 %vm631_vm0, %v1424_v48  ;;  %v827_v48 = vadd.f32 %v2002_v58, %v2142_v36  ;;  %v1427_v36 = vld [vmem:[%s2568_s0 + $0x1b0] sm:$0xf] }
 0x11b   :  { %v1020_v56 = vadd.f32 %v1019_v8, %v887_v42 }
 0x11d   :  { %v1121_v62 = vmax.f32 %v1020_v56, 0.0  ;;  %v951_v63 = vpop.f32.mrf.mxu3  ;;  %v1027_v0 = vpop.f32.mrf.mxu2 }
 0x11e   :  { %v2331_v2 = vadd.f32 %v951_v63, %v819_v61  ;;  %v756_v4 = vpop.f32.mrf.mxu0  ;;  %v1429_v63 = vld [vmem:[%s2568_s0 + $0x1bc] sm:$0xf0] }
 0x11f   :  { %1171 = vst.msk [vmem:[%s2570_s3 + $0x78] sm:$0xff] %vm1155_vm1, %v1121_v62  ;;  %v757_v8 = vadd.f32 %v2002_v58, %v756_v4  ;;  %v889_v10 = vpop.f32.mrf.mxu1  ;;  %v1648_v62 = vld [vmem:[%s2568_s0 + $0x1b4] sm:$0xf] }
 0x121   :  { %v890_v11 = vadd.f32 %v889_v10, %v757_v8  ;;  %795 = vmatmul.bf16.gmra.mxu0 %v1404_v1 }
 0x122   :  { %928 = vmatmul.bf16.gmra.mxu1 %v1408_v5  ;;  %1593 = vmatmul.msk.bf16.gmra.mxu3 %vm631_vm0, %v472_v6  ;;  %v1428_v6 = vor.u32 %v1649_v60, %v1427_v36 }
 0x123   :  { %v1023_v57 = vadd.f32 %v1022_v28, %v890_v11  ;;  %v1432_v11 = vor.u32 %v1648_v62, %v1429_v63 }
 0x125   :  { %v1122_v13 = vmax.f32 %v1023_v57, 0.0  ;;  %v954_v16 = vpop.f32.mrf.mxu3  ;;  %v1029_v17 = vpop.f32.mrf.mxu2 }
 0x126   :  { %v2347_v18 = vadd.f32 %v954_v16, %v822_v15  ;;  %v758_v19 = vpop.f32.mrf.mxu0  ;;  %v832_v15 = vadd.f32 %v2002_v58, %v2182_v3 }
 0x127   :  { %1172 = vst.msk [vmem:[%s2570_s3 + $0x80] sm:$0xff] %vm1155_vm1, %v1122_v13  ;;  %v759_v24 = vadd.f32 %v2002_v58, %v758_v19  ;;  %v891_v25 = vpop.f32.mrf.mxu1 }
 0x129   :  { %v892_v26 = vadd.f32 %v891_v25, %v759_v24 }
 0x12a   :  { %1587 = vmatmul.msk.bf16.gmra.mxu2 %vm631_vm0, %v1436_v22 }
 0x12b   :  { %v1025_v28 = vadd.f32 %v1024_v45, %v892_v26  ;;  %v1447_v45 = vld [vmem:[%s2568_s0 + $0x1d0] sm:$0xf] }
 0x12c   :  { %v1448_v54 = vor.u32 %v1653_v47, %v1447_v45 }
 0x12d   :  { %v1123_v33 = vmax.f32 %v1025_v28, 0.0  ;;  %v956_v34 = vpop.f32.mrf.mxu3  ;;  %v1032_v37 = vpop.f32.mrf.mxu2 }
 0x12e   :  { %v2369_v29 = vadd.f32 %v956_v34, %v824_v32  ;;  %v761_v39 = vpop.f32.mrf.mxu0 }
 0x12f   :  { %1173 = vst.msk [vmem:[%s2570_s3 + $0x88] sm:$0xff] %vm1155_vm1, %v1123_v33  ;;  %v762_v41 = vadd.f32 %v2002_v58, %v761_v39  ;;  %v894_v43 = vpop.f32.mrf.mxu1  ;;  %v837_v39 = vadd.f32 %v2002_v58, %v2222_v35 }
 0x131   :  { %v895_v44 = vadd.f32 %v894_v43, %v762_v41  ;;  %800 = vmatmul.bf16.gmra.mxu0 %v1416_v38 }
 0x132   :  { %933 = vmatmul.bf16.gmra.mxu1 %v1420_v40 }
 0x133   :  { %v1028_v23 = vadd.f32 %v1027_v0, %v895_v44  ;;  %v829_v0 = vadd.f32 %v2002_v58, %v2168_v52 }
 0x135   :  { %v1124_v49 = vmax.f32 %v1028_v23, 0.0  ;;  %v959_v50 = vpop.f32.mrf.mxu3  ;;  %v1034_v51 = vpop.f32.mrf.mxu2 }
 0x136   :  { %v2384_v42 = vadd.f32 %v959_v50, %v827_v48  ;;  %v763_v53 = vpop.f32.mrf.mxu0 }
 0x137   :  { %1174 = vst.msk [vmem:[%s2570_s3 + $0x90] sm:$0xff] %vm1155_vm1, %v1124_v49  ;;  %v764_v55 = vadd.f32 %v2002_v58, %v763_v53  ;;  %v896_v56 = vpop.f32.mrf.mxu1 }
 0x139   :  { %v897_v59 = vadd.f32 %v896_v56, %v764_v55 }
 0x13a   :  { %1588 = vmatmul.msk.bf16.gmra.mxu2 %vm631_vm0, %v1448_v54 }
 0x13b   :  { %v1030_v61 = vadd.f32 %v1029_v17, %v897_v59 }
 0x13d   :  { %v1125_v1 = vmax.f32 %v1030_v61, 0.0  ;;  %v961_v4 = vpop.f32.mrf.mxu3  ;;  %v1037_v5 = vpop.f32.mrf.mxu2 }
 0x13e   :  { %v2406_v8 = vadd.f32 %v961_v4, %v829_v0  ;;  %v766_v10 = vpop.f32.mrf.mxu0 }
 0x13f   :  { %1175 = vst.msk [vmem:[%s2570_s3 + $0x98] sm:$0xff] %vm1155_vm1, %v1125_v1  ;;  %v767_v57 = vadd.f32 %v2002_v58, %v766_v10  ;;  %v899_v12 = vpop.f32.mrf.mxu1 }
 0x141   :  { %v900_v14 = vadd.f32 %v899_v12, %v767_v57  ;;  %805 = vmatmul.bf16.gmra.mxu0 %v1428_v6 }
 0x142   :  { %938 = vmatmul.bf16.gmra.mxu1 %v1432_v11 }
 0x143   :  { %v1033_v52 = vadd.f32 %v1032_v37, %v900_v14 }
 0x145   :  { %v1126_v13 = vmax.f32 %v1033_v52, 0.0  ;;  %v964_v16 = vpop.f32.mrf.mxu3  ;;  %v1039_v17 = vpop.f32.mrf.mxu2 }
 0x146   :  { %v2415_v19 = vadd.f32 %v964_v16, %v832_v15  ;;  %v768_v22 = vpop.f32.mrf.mxu0 }
 0x147   :  { %1176 = vst.msk [vmem:[%s2570_s3 + $0xa0] sm:$0xff] %vm1155_vm1, %v1126_v13  ;;  %v769_v24 = vadd.f32 %v2002_v58, %v768_v22  ;;  %v901_v25 = vpop.f32.mrf.mxu1 }
 0x149   :  { %v902_v26 = vadd.f32 %v901_v25, %v769_v24 }
 0x14b   :  { %v1035_v7 = vadd.f32 %v1034_v51, %v902_v26 }
 0x14d   :  { %v1127_v3 = vmax.f32 %v1035_v7, 0.0  ;;  %v966_v28 = vpop.f32.mrf.mxu3  ;;  %v1042_v20 = vpop.f32.mrf.mxu2 }
 0x14e   :  { %v2424_v31 = vadd.f32 %v966_v28, %v834_v27  ;;  %v771_v32 = vpop.f32.mrf.mxu0 }
 0x14f   :  { %1177 = vst.msk [vmem:[%s2570_s3 + $0xa8] sm:$0xff] %vm1155_vm1, %v1127_v3  ;;  %v772_v33 = vadd.f32 %v2002_v58, %v771_v32  ;;  %v904_v34 = vpop.f32.mrf.mxu1 }
 0x151   :  { %v905_v37 = vadd.f32 %v904_v34, %v772_v33 }
 0x153   :  { %v1038_v38 = vadd.f32 %v1037_v5, %v905_v37 }
 0x155   :  { %v1128_v21 = vmax.f32 %v1038_v38, 0.0  ;;  %v969_v40 = vpop.f32.mrf.mxu3  ;;  %v1044_v41 = vpop.f32.mrf.mxu2 }
 0x156   :  { %v2433_v43 = vadd.f32 %v969_v40, %v837_v39  ;;  %v773_v44 = vpop.f32.mrf.mxu0 }
 0x157   :  { %1178 = vst.msk [vmem:[%s2570_s3 + $0xb0] sm:$0xff] %vm1155_vm1, %v1128_v21  ;;  %v774_v23 = vadd.f32 %v2002_v58, %v773_v44  ;;  %v906_v45 = vpop.f32.mrf.mxu1 }
 0x159   :  { %v907_v47 = vadd.f32 %v906_v45, %v774_v23 }
 0x15b   :  { %v1040_v48 = vadd.f32 %v1039_v17, %v907_v47 }
 0x15d   :  { %v1129_v49 = vmax.f32 %v1040_v48, 0.0  ;;  %v971_v50 = vpop.f32.mrf.mxu3  ;;  %v1047_v51 = vpop.f32.mrf.mxu2 }
 0x15e   :  { %v776_v35 = vpop.f32.mrf.mxu0 }
 0x15f   :  { %1179 = vst.msk [vmem:[%s2570_s3 + $0xb8] sm:$0xff] %vm1155_vm1, %v1129_v49  ;;  %v777_v53 = vadd.f32 %v2002_v58, %v776_v35  ;;  %v909_v54 = vpop.f32.mrf.mxu1 }
 0x161   :  { %v910_v55 = vadd.f32 %v909_v54, %v777_v53 }
 0x163   :  { %v1043_v56 = vadd.f32 %v1042_v20, %v910_v55 }
 0x165   :  { %v1130_v59 = vmax.f32 %v1043_v56, 0.0  ;;  %v1049_v36 = vpop.f32.mrf.mxu2  ;;  %v1082_v60 = vpop.f32.mrf.mxu3 }
 0x166   :  { %v1083_v61 = vadd.f32 %v1082_v60, %v2306_v46  ;;  %v778_v62 = vpop.f32.mrf.mxu0 }
 0x167   :  { %1180 = vst.msk [vmem:[%s2570_s3 + $0xc0] sm:$0xff] %vm1155_vm1, %v1130_v59  ;;  %v779_v63 = vadd.f32 %v2002_v58, %v778_v62  ;;  %v911_v0 = vpop.f32.mrf.mxu1 }
 0x168   :  { %v1146_v1 = vmax.f32 %v1083_v61, 0.0 }
 0x169   :  { %v912_v4 = vadd.f32 %v911_v0, %v779_v63 }
 0x16a   :  { %1196 = vst.msk [vmem:[%s2570_s3 + $0x140] sm:$0xff] %vm1155_vm1, %v1146_v1 }
 0x16b   :  { %v1045_v5 = vadd.f32 %v1044_v41, %v912_v4 }
 0x16d   :  { %v1131_v6 = vmax.f32 %v1045_v5, 0.0  ;;  %v1052_v10 = vpop.f32.mrf.mxu2  ;;  %v1084_v46 = vpop.f32.mrf.mxu3 }
 0x16e   :  { %v1085_v11 = vadd.f32 %v1084_v46, %v2331_v2  ;;  %v781_v57 = vpop.f32.mrf.mxu0 }
 0x16f   :  { %1181 = vst.msk [vmem:[%s2570_s3 + $0xc8] sm:$0xff] %vm1155_vm1, %v1131_v6  ;;  %v782_v12 = vadd.f32 %v2002_v58, %v781_v57  ;;  %v914_v14 = vpop.f32.mrf.mxu1 }
 0x170   :  { %v1147_v52 = vmax.f32 %v1085_v11, 0.0 }
 0x171   :  { %v915_v15 = vadd.f32 %v914_v14, %v782_v12 }
 0x172   :  { %1197 = vst.msk [vmem:[%s2570_s3 + $0x148] sm:$0xff] %vm1155_vm1, %v1147_v52 }
 0x173   :  { %v1048_v13 = vadd.f32 %v1047_v51, %v915_v15 }
 0x175   :  { %v1132_v16 = vmax.f32 %v1048_v13, 0.0  ;;  %v1054_v17 = vpop.f32.mrf.mxu2  ;;  %v1087_v2 = vpop.f32.mrf.mxu3 }
 0x176   :  { %v1088_v22 = vadd.f32 %v1087_v2, %v2347_v18  ;;  %v783_v24 = vpop.f32.mrf.mxu0 }
 0x177   :  { %1182 = vst.msk [vmem:[%s2570_s3 + $0xd0] sm:$0xff] %vm1155_vm1, %v1132_v16  ;;  %v784_v25 = vadd.f32 %v2002_v58, %v783_v24  ;;  %v916_v26 = vpop.f32.mrf.mxu1 }
 0x178   :  { %v1148_v7 = vmax.f32 %v1088_v22, 0.0 }
 0x179   :  { %v917_v27 = vadd.f32 %v916_v26, %v784_v25 }
 0x17a   :  { %1198 = vst.msk [vmem:[%s2570_s3 + $0x150] sm:$0xff] %vm1155_vm1, %v1148_v7 }
 0x17b   :  { %v1050_v3 = vadd.f32 %v1049_v36, %v917_v27 }
 0x17d   :  { %v1133_v28 = vmax.f32 %v1050_v3, 0.0  ;;  %v1057_v20 = vpop.f32.mrf.mxu2  ;;  %v1089_v18 = vpop.f32.mrf.mxu3 }
 0x17e   :  { %v1090_v32 = vadd.f32 %v1089_v18, %v2369_v29  ;;  %v786_v33 = vpop.f32.mrf.mxu0 }
 0x17f   :  { %1183 = vst.msk [vmem:[%s2570_s3 + $0xd8] sm:$0xff] %vm1155_vm1, %v1133_v28  ;;  %v787_v34 = vadd.f32 %v2002_v58, %v786_v33  ;;  %v919_v37 = vpop.f32.mrf.mxu1 }
 0x180   :  { %v1149_v38 = vmax.f32 %v1090_v32, 0.0 }
 0x181   :  { %v920_v39 = vadd.f32 %v919_v37, %v787_v34 }
 0x182   :  { %1199 = vst.msk [vmem:[%s2570_s3 + $0x158] sm:$0xff] %vm1155_vm1, %v1149_v38 }
 0x183   :  { %v1053_v21 = vadd.f32 %v1052_v10, %v920_v39 }
 0x185   :  { %v1134_v40 = vmax.f32 %v1053_v21, 0.0  ;;  %v1059_v41 = vpop.f32.mrf.mxu2  ;;  %v1092_v29 = vpop.f32.mrf.mxu3 }
 0x186   :  { %v1093_v44 = vadd.f32 %v1092_v29, %v2384_v42  ;;  %v788_v23 = vpop.f32.mrf.mxu0 }
 0x187   :  { %1184 = vst.msk [vmem:[%s2570_s3 + $0xe0] sm:$0xff] %vm1155_vm1, %v1134_v40  ;;  %v789_v45 = vadd.f32 %v2002_v58, %v788_v23  ;;  %v921_v47 = vpop.f32.mrf.mxu1 }
 0x188   :  { %v1150_v48 = vmax.f32 %v1093_v44, 0.0 }
 0x189   :  { %v922_v49 = vadd.f32 %v921_v47, %v789_v45 }
 0x18a   :  { %1200 = vst.msk [vmem:[%s2570_s3 + $0x160] sm:$0xff] %vm1155_vm1, %v1150_v48 }
 0x18b   :  { %v1055_v50 = vadd.f32 %v1054_v17, %v922_v49 }
 0x18d   :  { %v1135_v51 = vmax.f32 %v1055_v50, 0.0  ;;  %v1062_v35 = vpop.f32.mrf.mxu2  ;;  %v1094_v42 = vpop.f32.mrf.mxu3 }
 0x18e   :  { %v1095_v53 = vadd.f32 %v1094_v42, %v2406_v8  ;;  %v791_v54 = vpop.f32.mrf.mxu0 }
 0x18f   :  { %1185 = vst.msk [vmem:[%s2570_s3 + $0xe8] sm:$0xff] %vm1155_vm1, %v1135_v51  ;;  %v792_v55 = vadd.f32 %v2002_v58, %v791_v54  ;;  %v924_v56 = vpop.f32.mrf.mxu1 }
 0x190   :  { %v1151_v59 = vmax.f32 %v1095_v53, 0.0 }
 0x191   :  { %v925_v36 = vadd.f32 %v924_v56, %v792_v55 }
 0x192   :  { %1201 = vst.msk [vmem:[%s2570_s3 + $0x168] sm:$0xff] %vm1155_vm1, %v1151_v59 }
 0x193   :  { %v1058_v60 = vadd.f32 %v1057_v20, %v925_v36 }
 0x195   :  { %v1136_v61 = vmax.f32 %v1058_v60, 0.0  ;;  %v1064_v62 = vpop.f32.mrf.mxu2  ;;  %v1097_v8 = vpop.f32.mrf.mxu3 }
 0x196   :  { %v1098_v63 = vadd.f32 %v1097_v8, %v2415_v19  ;;  %v793_v0 = vpop.f32.mrf.mxu0 }
 0x197   :  { %1186 = vst.msk [vmem:[%s2570_s3 + $0xf0] sm:$0xff] %vm1155_vm1, %v1136_v61  ;;  %v794_v1 = vadd.f32 %v2002_v58, %v793_v0  ;;  %v926_v4 = vpop.f32.mrf.mxu1 }
 0x198   :  { %v1152_v5 = vmax.f32 %v1098_v63, 0.0 }
 0x199   :  { %v927_v6 = vadd.f32 %v926_v4, %v794_v1 }
 0x19a   :  { %1202 = vst.msk [vmem:[%s2570_s3 + $0x170] sm:$0xff] %vm1155_vm1, %v1152_v5 }
 0x19b   :  { %v1060_v10 = vadd.f32 %v1059_v41, %v927_v6 }
 0x19d   :  { %v1137_v46 = vmax.f32 %v1060_v10, 0.0  ;;  %v1067_v11 = vpop.f32.mrf.mxu2  ;;  %v1099_v19 = vpop.f32.mrf.mxu3 }
 0x19e   :  { %v1100_v57 = vadd.f32 %v1099_v19, %v2424_v31  ;;  %v796_v12 = vpop.f32.mrf.mxu0 }
 0x19f   :  { %1187 = vst.msk [vmem:[%s2570_s3 + $0xf8] sm:$0xff] %vm1155_vm1, %v1137_v46  ;;  %v797_v14 = vadd.f32 %v2002_v58, %v796_v12  ;;  %v929_v52 = vpop.f32.mrf.mxu1  ;;  %v1703_v58 = vld [vmem:[%s2569_s2] ss:$0 sm:$0xff] }
 0x1a0   :  { %v1153_v15 = vmax.f32 %v1100_v57, 0.0 }
 0x1a1   :  { %v930_v13 = vadd.f32 %v929_v52, %v797_v14 }
 0x1a2   :  { %1203 = vst.msk [vmem:[%s2570_s3 + $0x178] sm:$0xff] %vm1155_vm1, %v1153_v15 }
 0x1a3   :  { %v1063_v16 = vadd.f32 %v1062_v35, %v930_v13 }
 0x1a5   :  { %v1138_v17 = vmax.f32 %v1063_v16, 0.0  ;;  %v1069_v2 = vpop.f32.mrf.mxu2  ;;  %v1102_v31 = vpop.f32.mrf.mxu3 }
 0x1a6   :  { %v1103_v22 = vadd.f32 %v1102_v31, %v2433_v43  ;;  %v798_v24 = vpop.f32.mrf.mxu0 }
 0x1a7   :  { %1188 = vst.msk [vmem:[%s2570_s3 + $0x100] sm:$0xff] %vm1155_vm1, %v1138_v17  ;;  %v799_v25 = vadd.f32 %v1703_v58, %v798_v24  ;;  %v931_v26 = vpop.f32.mrf.mxu1 }
 0x1a8   :  { %v1154_v7 = vmax.f32 %v1103_v22, 0.0 }
 0x1a9   :  { %v932_v27 = vadd.f32 %v931_v26, %v799_v25 }
 0x1aa   :  { %1204 = vst.msk [vmem:[%s2570_s3 + $0x180] sm:$0xff] %vm1155_vm1, %v1154_v7 }
 0x1ab   :  { %v1065_v43 = vadd.f32 %v1064_v62, %v932_v27 }
 0x1ad   :  { %v1139_v3 = vmax.f32 %v1065_v43, 0.0  ;;  %v1072_v28 = vpop.f32.mrf.mxu2  ;;  %v1104_v20 = vpop.f32.mrf.mxu3 }
 0x1ae   :  { %v801_v18 = vpop.f32.mrf.mxu0 }
 0x1af   :  { %1189 = vst.msk [vmem:[%s2570_s3 + $0x108] sm:$0xff] %vm1155_vm1, %v1139_v3  ;;  %v802_v32 = vadd.f32 %v1703_v58, %v801_v18  ;;  %v934_v33 = vpop.f32.mrf.mxu1 }
 0x1b1   :  { %v935_v34 = vadd.f32 %v934_v33, %v802_v32 }
 0x1b3   :  { %v1068_v37 = vadd.f32 %v1067_v11, %v935_v34 }
 0x1b5   :  { %v1140_v38 = vmax.f32 %v1068_v37, 0.0  ;;  %v1074_v39 = vpop.f32.mrf.mxu2 }
 0x1b6   :  { %v803_v21 = vpop.f32.mrf.mxu0 }
 0x1b7   :  { %1190 = vst.msk [vmem:[%s2570_s3 + $0x110] sm:$0xff] %vm1155_vm1, %v1140_v38  ;;  %v804_v40 = vadd.f32 %v1703_v58, %v803_v21  ;;  %v936_v41 = vpop.f32.mrf.mxu1 }
 0x1b9   :  { %v937_v29 = vadd.f32 %v936_v41, %v804_v40 }
 0x1bb   :  { %v1070_v44 = vadd.f32 %v1069_v2, %v937_v29 }
 0x1bd   :  { %v1141_v23 = vmax.f32 %v1070_v44, 0.0  ;;  %v1077_v45 = vpop.f32.mrf.mxu2 }
 0x1be   :  { %v1078_v47 = vadd.f32 %v1077_v45, %v2262_v9  ;;  %v806_v48 = vpop.f32.mrf.mxu0 }
 0x1bf   :  { %1191 = vst.msk [vmem:[%s2570_s3 + $0x118] sm:$0xff] %vm1155_vm1, %v1141_v23  ;;  %v807_v49 = vadd.f32 %v1703_v58, %v806_v48  ;;  %v939_v50 = vpop.f32.mrf.mxu1 }
 0x1c0   :  { %v1144_v51 = vmax.f32 %v1078_v47, 0.0 }
 0x1c1   :  { %v940_v35 = vadd.f32 %v939_v50, %v807_v49 }
 0x1c2   :  { %1194 = vst.msk [vmem:[%s2570_s3 + $0x130] sm:$0xff] %vm1155_vm1, %v1144_v51 }
 0x1c3   :  { %v1073_v42 = vadd.f32 %v1072_v28, %v940_v35 }
 0x1c5   :  { %v1142_v53 = vmax.f32 %v1073_v42, 0.0  ;;  %v1079_v54 = vpop.f32.mrf.mxu2 }
 0x1c6   :  { %v1080_v9 = vadd.f32 %v1079_v54, %v2290_v30  ;;  %v808_v55 = vpop.f32.mrf.mxu0 }
 0x1c7   :  { %1192 = vst.msk [vmem:[%s2570_s3 + $0x120] sm:$0xff] %vm1155_vm1, %v1142_v53  ;;  %v809_v56 = vadd.f32 %v1703_v58, %v808_v55  ;;  %v941_v36 = vpop.f32.mrf.mxu1 }
 0x1c8   :  { %v1145_v59 = vmax.f32 %v1080_v9, 0.0 }
 0x1c9   :  { %v942_v60 = vadd.f32 %v941_v36, %v809_v56 }
 0x1ca   :  { %1195 = vst.msk [vmem:[%s2570_s3 + $0x138] sm:$0xff] %vm1155_vm1, %v1145_v59 }
 0x1cb   :  { %v1075_v61 = vadd.f32 %v1074_v39, %v942_v60 }
 0x1cd   :  { %v1143_v62 = vmax.f32 %v1075_v61, 0.0 }
 0x1cf   :  { %1193 = vst.msk [vmem:[%s2570_s3 + $0x128] sm:$0xff] %vm1155_vm1, %v1143_v62 }

// kernel: tiny_net_forward.7
= control target key start
LH: loop header
LB: loop body
LE: loop exit
PB: predicated region body
PF: predicated region fallthrough
CT: control target
= control target key end

     0   :  { %vm513_vm0 = vcmask 523264   ;;  %vm775_vm1 = vcmask 517120   ;;  %s1567_s1 = inlined_call_operand.vmem [shape: bf16[576,64], index: 1, kind: input, shape index: {}]   ;;  %s1568_s2 = inlined_call_operand.vmem [shape: f32[1,64], index: 2, kind: input, shape index: {}]   ;;  %s1569_s0 = inlined_call_operand.vmem [shape: bf16[98,576], index: 0, kind: input, shape index: {}]   ;;  %s1570_s3 = inlined_call_operand.vmem [shape: f32[98,64], index: 3, kind: output, shape index: {}]  }
   0x1   :  { %v1089_v0 = vld [vmem:[%s1567_s1 + $0x38] sm:$0xff]  ;;  %v1088_v1 = vld [vmem:[%s1567_s1 + $0x30] sm:$0xff]  ;;  %v1087_v2 = vld [vmem:[%s1567_s1 + $0x28] sm:$0xff] }
   0x2   :  { %535 = vmatpush.bf16.msra.mxu0 %v1089_v0  ;;  %1118 = vmatpush.bf16.msra.mxu1 %v1089_v0  ;;  %v1086_v3 = vld [vmem:[%s1567_s1 + $0x20] sm:$0xff]  ;;  %v1085_v4 = vld [vmem:[%s1567_s1 + $0x18] sm:$0xff]  ;;  %v1084_v5 = vld [vmem:[%s1567_s1 + $0x10] sm:$0xff] }
   0x3   :  { %1119 = vmatpush.bf16.msra.mxu2 %v1089_v0  ;;  %1120 = vmatpush.bf16.msra.mxu3 %v1089_v0  ;;  %v1083_v6 = vld [vmem:[%s1567_s1 + $0x8] sm:$0xff]  ;;  %v1187_v7 = vld [vmem:[%s1569_s0 + $0xf0] sm:$0x11]  ;;  %v1082_v8 = vld [vmem:[%s1567_s1] sm:$0xff] }
   0x4   :  { %v783_v9 = vld [vmem:[%s1569_s0] sm:$0xf]  ;;  %v1054_v10 = vld [vmem:[%s1569_s0 + $0x10] sm:$0xf0]  ;;  %v823_v11 = vld [vmem:[%s1569_s0 + $0x50] sm:$0xf]  ;;  %v229_v15 = vunpack.c.l.b16 %v1187_v7 }
   0x5   :  { %v1064_v12 = vld [vmem:[%s1569_s0 + $0x60] sm:$0xf0]  ;;  %v863_v13 = vld [vmem:[%s1569_s0 + $0xa0] sm:$0xf]  ;;  %v1074_v14 = vld [vmem:[%s1569_s0 + $0xb0] sm:$0xf0]  ;;  %v784_v18 = vor.u32 %v1054_v10, %v783_v9 }
   0x6   :  { %536 = vmatpush.bf16.msra.mxu0 %v1088_v1  ;;  %1121 = vmatpush.bf16.msra.mxu1 %v1088_v1  ;;  %v1113_v16 = vld [vmem:[%s1567_s1 + $0xf8] sm:$0xff]  ;;  %v824_v19 = vor.u32 %v1064_v12, %v823_v11  ;;  %v864_v20 = vor.u32 %v1074_v14, %v863_v13  ;;  %v264_v23 = vpack.c.b16 %v229_v15, %v229_v15  ;;  %v1112_v24 = vld [vmem:[%s1567_s1 + $0xf0] sm:$0xff]  ;;  %v1111_v28 = vld [vmem:[%s1567_s1 + $0xe8] sm:$0xff] }
   0x7   :  { %1122 = vmatpush.bf16.msra.mxu2 %v1088_v1  ;;  %1123 = vmatpush.bf16.msra.mxu3 %v1088_v1  ;;  %v1105_v17 = vld [vmem:[%s1567_s1 + $0xb8] sm:$0xff]  ;;  %v1104_v25 = vld [vmem:[%s1567_s1 + $0xb0] sm:$0xff]  ;;  %v1103_v29 = vld [vmem:[%s1567_s1 + $0xa8] sm:$0xff] }
   0x8   :  { %v1097_v21 = vld [vmem:[%s1567_s1 + $0x78] sm:$0xff]  ;;  %v1096_v26 = vld [vmem:[%s1567_s1 + $0x70] sm:$0xff]  ;;  %v1095_v30 = vld [vmem:[%s1567_s1 + $0x68] sm:$0xff] }
   0x9   :  { %v1117_v22 = vld [vmem:[%s1567_s1 + $0x118] sm:$0xff]  ;;  %v1116_v27 = vld [vmem:[%s1567_s1 + $0x110] sm:$0xff]  ;;  %v1115_v31 = vld [vmem:[%s1567_s1 + $0x108] sm:$0xff] }
   0xa   :  { %537 = vmatpush.bf16.msra.mxu0 %v1087_v2  ;;  %1124 = vmatpush.bf16.msra.mxu1 %v1087_v2  ;;  %v1110_v32 = vld [vmem:[%s1567_s1 + $0xe0] sm:$0xff]  ;;  %v803_v35 = vld [vmem:[%s1569_s0 + $0x28] sm:$0xf]  ;;  %v1059_v36 = vld [vmem:[%s1569_s0 + $0x38] sm:$0xf0] }
   0xb   :  { %1125 = vmatpush.bf16.msra.mxu2 %v1087_v2  ;;  %1126 = vmatpush.bf16.msra.mxu3 %v1087_v2  ;;  %v1102_v33 = vld [vmem:[%s1567_s1 + $0xa0] sm:$0xff]  ;;  %v843_v37 = vld [vmem:[%s1569_s0 + $0x78] sm:$0xf]  ;;  %v1069_v38 = vld [vmem:[%s1569_s0 + $0x88] sm:$0xf0]  ;;  %v804_v44 = vor.u32 %v1059_v36, %v803_v35 }
   0xc   :  { %v1094_v34 = vld [vmem:[%s1567_s1 + $0x60] sm:$0xff]  ;;  %v883_v39 = vld [vmem:[%s1569_s0 + $0xc8] sm:$0xf]  ;;  %v1079_v40 = vld [vmem:[%s1569_s0 + $0xd8] sm:$0xf0]  ;;  %v844_v45 = vor.u32 %v1069_v38, %v843_v37 }
   0xd   :  { %v1114_v41 = vld [vmem:[%s1567_s1 + $0x100] sm:$0xff]  ;;  %v1109_v42 = vld [vmem:[%s1567_s1 + $0xd8] sm:$0xff]  ;;  %v884_v46 = vor.u32 %v1079_v40, %v883_v39  ;;  %v1108_v48 = vld [vmem:[%s1567_s1 + $0xd0] sm:$0xff] }
   0xe   :  { %538 = vmatpush.bf16.msra.mxu0 %v1086_v3  ;;  %1127 = vmatpush.bf16.msra.mxu1 %v1086_v3  ;;  %v1101_v43 = vld [vmem:[%s1567_s1 + $0x98] sm:$0xff]  ;;  %v1100_v49 = vld [vmem:[%s1567_s1 + $0x90] sm:$0xff]  ;;  %v1107_v51 = vld [vmem:[%s1567_s1 + $0xc8] sm:$0xff] }
   0xf   :  { %1128 = vmatpush.bf16.msra.mxu2 %v1086_v3  ;;  %1129 = vmatpush.bf16.msra.mxu3 %v1086_v3  ;;  %v1093_v47 = vld [vmem:[%s1567_s1 + $0x58] sm:$0xff]  ;;  %v1092_v50 = vld [vmem:[%s1567_s1 + $0x50] sm:$0xff]  ;;  %v1099_v52 = vld [vmem:[%s1567_s1 + $0x88] sm:$0xff] }
  0x10   :  { %v1091_v53 = vld [vmem:[%s1567_s1 + $0x48] sm:$0xff]  ;;  %v1106_v54 = vld [vmem:[%s1567_s1 + $0xc0] sm:$0xff]  ;;  %v785_v60 = vld [vmem:[%s1569_s0 + $0x14] sm:$0xf0] }
  0x11   :  { %v1098_v55 = vld [vmem:[%s1567_s1 + $0x80] sm:$0xff]  ;;  %v1053_v56 = vld [vmem:[%s1569_s0 + $0xc] sm:$0xf]  ;;  %v799_v61 = vld [vmem:[%s1569_s0 + $0x10] sm:$0xf] }
  0x12   :  { %539 = vmatpush.bf16.msra.mxu0 %v1085_v4  ;;  %1130 = vmatpush.bf16.msra.mxu1 %v1085_v4  ;;  %v793_v57 = vld [vmem:[%s1569_s0 + $0x1c] sm:$0xf0]  ;;  %v1052_v59 = vld [vmem:[%s1569_s0 + $0x4] sm:$0xf]  ;;  %v791_v0 = vld [vmem:[%s1569_s0 + $0x8] sm:$0xf] }
  0x13   :  { %1131 = vmatpush.bf16.msra.mxu2 %v1085_v4  ;;  %1132 = vmatpush.bf16.msra.mxu3 %v1085_v4  ;;  %v1090_v58 = vld [vmem:[%s1567_s1 + $0x40] sm:$0xff]  ;;  %v796_v63 = vor.u32 %v1053_v56, %v793_v57  ;;  %v1055_v1 = vld [vmem:[%s1569_s0 + $0x18] sm:$0xf0]  ;;  %v788_v2 = vor.u32 %v1052_v59, %v785_v60  ;;  %v819_v10 = vld [vmem:[%s1569_s0 + $0x38] sm:$0xf] }
  0x14   :  { %v1056_v62 = vld [vmem:[%s1569_s0 + $0x20] sm:$0xf0]  ;;  %v792_v4 = vor.u32 %v1055_v1, %v791_v0  ;;  %v805_v9 = vld [vmem:[%s1569_s0 + $0x3c] sm:$0xf0]  ;;  %v1061_v11 = vld [vmem:[%s1569_s0 + $0x48] sm:$0xf0] }
  0x15   :  { %v800_v3 = vor.u32 %v1056_v62, %v799_v61  ;;  %v811_v13 = vld [vmem:[%s1569_s0 + $0x30] sm:$0xf]  ;;  %v1060_v14 = vld [vmem:[%s1569_s0 + $0x40] sm:$0xf0]  ;;  %v1071_v35 = vld [vmem:[%s1569_s0 + $0x98] sm:$0xf0] }
  0x16   :  { %540 = vmatpush.bf16.msra.mxu0 %v1084_v5  ;;  %1133 = vmatpush.bf16.msra.mxu1 %v1084_v5  ;;  %v851_v37 = vld [vmem:[%s1569_s0 + $0x80] sm:$0xf]  ;;  %v1070_v38 = vld [vmem:[%s1569_s0 + $0x90] sm:$0xf0]  ;;  %v1077_v56 = vld [vmem:[%s1569_s0 + $0xcc] sm:$0xf] }
  0x17   :  { %1134 = vmatpush.bf16.msra.mxu2 %v1084_v5  ;;  %1135 = vmatpush.bf16.msra.mxu3 %v1084_v5  ;;  %v1058_v5 = vld [vmem:[%s1569_s0 + $0x34] sm:$0xf]  ;;  %v885_v57 = vld [vmem:[%s1569_s0 + $0xdc] sm:$0xf0]  ;;  %v1081_v59 = vld [vmem:[%s1569_s0 + $0xe8] sm:$0xf0] }
  0x18   :  { %v891_v61 = vld [vmem:[%s1569_s0 + $0xd0] sm:$0xf]  ;;  %v1080_v62 = vld [vmem:[%s1569_s0 + $0xe0] sm:$0xf0] }
  0x19   :  { %v892_v1 = vor.u32 %v1080_v62, %v891_v61 }
  0x1a   :  { %541 = vmatpush.bf16.msra.mxu0 %v1083_v6  ;;  %1136 = vmatpush.bf16.msra.mxu1 %v1083_v6 }
  0x1b   :  { %1137 = vmatpush.bf16.msra.mxu2 %v1083_v6  ;;  %1138 = vmatpush.bf16.msra.mxu3 %v1083_v6  ;;  %v813_v6 = vld [vmem:[%s1569_s0 + $0x44] sm:$0xf0] }
  0x1c   :  { %v816_v12 = vor.u32 %v1058_v5, %v813_v6  ;;  %v230_v5 = vunpack.c.h.b16 %v1187_v7 }
  0x1e   :  { %542 = vmatpush.bf16.msra.mxu0 %v1082_v8  ;;  %1139 = vmatpush.bf16.msra.mxu1 %v1082_v8 }
  0x1f   :  { %1140 = vmatpush.bf16.msra.mxu2 %v1082_v8  ;;  %1141 = vmatpush.bf16.msra.mxu3 %v1082_v8  ;;  %v1057_v8 = vld [vmem:[%s1569_s0 + $0x2c] sm:$0xf] }
  0x20   :  { %v808_v15 = vor.u32 %v1057_v8, %v805_v9 }
  0x21   :  { %543 = vmatmul.bf16.vlgmr.msra.gmra.mxu0 %v784_v18  ;;  %553 = vmatmul.bf16.vlgmr.msra.gmra.mxu1 %v824_v19  ;;  %v1063_v18 = vld [vmem:[%s1569_s0 + $0x5c] sm:$0xf]  ;;  %v833_v19 = vld [vmem:[%s1569_s0 + $0x6c] sm:$0xf0] }
  0x22   :  { %563 = vmatmul.bf16.vlgmr.msra.gmra.mxu2 %v864_v20  ;;  %578 = vmatpush.bf16.msrb.mxu1 %v1097_v21  ;;  %v1062_v20 = vld [vmem:[%s1569_s0 + $0x54] sm:$0xf]  ;;  %v825_v21 = vld [vmem:[%s1569_s0 + $0x64] sm:$0xf0] }
  0x23   :  { %664 = vmatpush.bf16.msrb.mxu3 %v1113_v16  ;;  %621 = vmatpush.bf16.msrb.mxu2 %v1105_v17  ;;  %v820_v16 = vor.u32 %v1061_v11, %v819_v10  ;;  %v812_v17 = vor.u32 %v1060_v14, %v811_v13  ;;  %v265_v10 = vpack.c.b16 %v230_v5, %v230_v5 }
  0x24   :  { %711 = vmatpush.bf16.msrb.mxu0 %v1117_v22  ;;  %573 = vmatmul.bf16.vlgmr.msra.gmra.mxu3 %v264_v23  ;;  %v839_v22 = vld [vmem:[%s1569_s0 + $0x60] sm:$0xf]  ;;  %v1066_v23 = vld [vmem:[%s1569_s0 + $0x70] sm:$0xf0] }
  0x26   :  { %579 = vmatpush.bf16.msrb.mxu1 %v1096_v26  ;;  %v1065_v26 = vld [vmem:[%s1569_s0 + $0x68] sm:$0xf0] }
  0x27   :  { %665 = vmatpush.bf16.msrb.mxu3 %v1112_v24  ;;  %622 = vmatpush.bf16.msrb.mxu2 %v1104_v25  ;;  %v836_v24 = vor.u32 %v1063_v18, %v833_v19  ;;  %v831_v25 = vld [vmem:[%s1569_s0 + $0x58] sm:$0xf] }
  0x28   :  { %712 = vmatpush.bf16.msrb.mxu0 %v1116_v27  ;;  %v828_v27 = vor.u32 %v1062_v20, %v825_v21 }
  0x2a   :  { %580 = vmatpush.bf16.msrb.mxu1 %v1095_v30  ;;  %v1068_v30 = vld [vmem:[%s1569_s0 + $0x84] sm:$0xf] }
  0x2b   :  { %666 = vmatpush.bf16.msrb.mxu3 %v1111_v28  ;;  %623 = vmatpush.bf16.msrb.mxu2 %v1103_v29  ;;  %v840_v28 = vor.u32 %v1066_v23, %v839_v22  ;;  %v832_v29 = vor.u32 %v1065_v26, %v831_v25 }
  0x2c   :  { %713 = vmatpush.bf16.msrb.mxu0 %v1115_v31  ;;  %v853_v31 = vld [vmem:[%s1569_s0 + $0x94] sm:$0xf0] }
  0x2d   :  { %v856_v36 = vor.u32 %v1068_v30, %v853_v31 }
  0x2e   :  { %581 = vmatpush.bf16.msrb.mxu1 %v1094_v34  ;;  %v859_v34 = vld [vmem:[%s1569_s0 + $0x88] sm:$0xf] }
  0x2f   :  { %667 = vmatpush.bf16.msrb.mxu3 %v1110_v32  ;;  %624 = vmatpush.bf16.msrb.mxu2 %v1102_v33  ;;  %v1067_v32 = vld [vmem:[%s1569_s0 + $0x7c] sm:$0xf]  ;;  %v845_v33 = vld [vmem:[%s1569_s0 + $0x8c] sm:$0xf0]  ;;  %v860_v40 = vor.u32 %v1071_v35, %v859_v34 }
  0x30   :  { %714 = vmatpush.bf16.msrb.mxu0 %v1114_v41  ;;  %v848_v39 = vor.u32 %v1067_v32, %v845_v33  ;;  %v852_v41 = vor.u32 %v1070_v38, %v851_v37 }
  0x31   :  { %548 = vmatmul.bf16.gmra.mxu0 %v804_v44  ;;  %558 = vmatmul.bf16.gmra.mxu1 %v844_v45  ;;  %v1072_v44 = vld [vmem:[%s1569_s0 + $0xa4] sm:$0xf]  ;;  %v865_v45 = vld [vmem:[%s1569_s0 + $0xb4] sm:$0xf0] }
  0x32   :  { %568 = vmatmul.bf16.gmra.mxu2 %v884_v46  ;;  %582 = vmatpush.bf16.msrb.mxu1 %v1093_v47  ;;  %v879_v46 = vld [vmem:[%s1569_s0 + $0xb0] sm:$0xf]  ;;  %v1076_v47 = vld [vmem:[%s1569_s0 + $0xc0] sm:$0xf0] }
  0x33   :  { %668 = vmatpush.bf16.msrb.mxu3 %v1109_v42  ;;  %625 = vmatpush.bf16.msrb.mxu2 %v1101_v43  ;;  %v1073_v42 = vld [vmem:[%s1569_s0 + $0xac] sm:$0xf]  ;;  %v873_v43 = vld [vmem:[%s1569_s0 + $0xbc] sm:$0xf0] }
  0x36   :  { %583 = vmatpush.bf16.msrb.mxu1 %v1092_v50  ;;  %v1075_v50 = vld [vmem:[%s1569_s0 + $0xb8] sm:$0xf0] }
  0x37   :  { %669 = vmatpush.bf16.msrb.mxu3 %v1108_v48  ;;  %626 = vmatpush.bf16.msrb.mxu2 %v1100_v49  ;;  %v876_v48 = vor.u32 %v1073_v42, %v873_v43  ;;  %v871_v49 = vld [vmem:[%s1569_s0 + $0xa8] sm:$0xf] }
  0x3a   :  { %584 = vmatpush.bf16.msrb.mxu1 %v1091_v53  ;;  %v872_v53 = vor.u32 %v1075_v50, %v871_v49 }
  0x3b   :  { %670 = vmatpush.bf16.msrb.mxu3 %v1107_v51  ;;  %627 = vmatpush.bf16.msrb.mxu2 %v1099_v52  ;;  %v868_v51 = vor.u32 %v1072_v44, %v865_v45  ;;  %v880_v52 = vor.u32 %v1076_v47, %v879_v46 }
  0x3e   :  { %585 = vmatpush.bf16.msrb.mxu1 %v1090_v58  ;;  %v899_v58 = vld [vmem:[%s1569_s0 + $0xd8] sm:$0xf] }
  0x3f   :  { %671 = vmatpush.bf16.msrb.mxu3 %v1106_v54  ;;  %628 = vmatpush.bf16.msrb.mxu2 %v1098_v55  ;;  %v1078_v54 = vld [vmem:[%s1569_s0 + $0xd4] sm:$0xf]  ;;  %v893_v55 = vld [vmem:[%s1569_s0 + $0xe4] sm:$0xf0]  ;;  %v900_v0 = vor.u32 %v1081_v59, %v899_v58 }
  0x40   :  { %v896_v60 = vor.u32 %v1078_v54, %v893_v55 }
  0x41   :  { %586 = vmatmul.bf16.vlgmr.msrb.gmra.mxu1 %v788_v2  ;;  %1045 = vmatmul.msk.bf16.vlgmr.msrb.gmra.mxu0 %vm513_vm0, %v800_v3  ;;  %v52_v2 = vld [vmem:[%s1569_s0 + $0xf8] sm:$0x11]  ;;  %v53_v3 = vld [vmem:[%s1569_s0 + $0x100] sm:$0x1] }
  0x42   :  { %672 = vmatmul.bf16.vlgmr.msrb.gmra.mxu3 %v796_v63  ;;  %629 = vmatmul.bf16.vlgmr.msrb.gmra.mxu2 %v792_v4  ;;  %v888_v63 = vor.u32 %v1077_v56, %v885_v57  ;;  %v232_v4 = vunpack.c.h.b16 %v52_v2  ;;  %v233_v6 = vunpack.c.l.b16 %v53_v3  ;;  %v231_v8 = vunpack.c.l.b16 %v52_v2 }
  0x44   :  { %v267_v9 = vpack.c.b16 %v232_v4, %v232_v4  ;;  %v268_v11 = vpack.c.b16 %v233_v6, %v233_v6  ;;  %v266_v14 = vpack.c.b16 %v231_v8, %v231_v8 }
  0x51   :  { %591 = vmatmul.bf16.gmra.mxu1 %v808_v15  ;;  %1046 = vmatmul.msk.bf16.gmra.mxu0 %vm513_vm0, %v820_v16  ;;  %v1476_v15 = vld [vmem:[%s1568_s2] ss:$0 sm:$0xff] }
  0x52   :  { %677 = vmatmul.bf16.gmra.mxu3 %v816_v12  ;;  %634 = vmatmul.bf16.gmra.mxu2 %v812_v17 }
  0x61   :  { %596 = vmatmul.bf16.gmra.mxu1 %v828_v27  ;;  %1047 = vmatmul.msk.bf16.gmra.mxu0 %vm513_vm0, %v840_v28 }
  0x62   :  { %682 = vmatmul.bf16.gmra.mxu3 %v836_v24  ;;  %639 = vmatmul.bf16.gmra.mxu2 %v832_v29 }
  0x71   :  { %601 = vmatmul.bf16.gmra.mxu1 %v848_v39  ;;  %1048 = vmatmul.msk.bf16.gmra.mxu0 %vm513_vm0, %v860_v40 }
  0x72   :  { %687 = vmatmul.bf16.gmra.mxu3 %v856_v36  ;;  %644 = vmatmul.bf16.gmra.mxu2 %v852_v41 }
  0x81   :  { %606 = vmatmul.bf16.gmra.mxu1 %v868_v51  ;;  %1049 = vmatmul.msk.bf16.gmra.mxu0 %vm513_vm0, %v880_v52 }
  0x82   :  { %692 = vmatmul.bf16.gmra.mxu3 %v876_v48  ;;  %649 = vmatmul.bf16.gmra.mxu2 %v872_v53 }
  0x91   :  { %611 = vmatmul.bf16.gmra.mxu1 %v888_v63  ;;  %1050 = vmatmul.msk.bf16.gmra.mxu0 %vm513_vm0, %v900_v0 }
  0x92   :  { %697 = vmatmul.bf16.gmra.mxu3 %v896_v60  ;;  %654 = vmatmul.bf16.gmra.mxu2 %v892_v1 }
  0x9e   :  { %v544_v12 = vpop.f32.mrf.mxu0  ;;  %v1470_v13 = vpop.f32.mrf.mxu1 }
  0x9f   :  { %v545_v34 = vadd.f32 %v1476_v15, %v544_v12 }
  0xa1   :  { %616 = vmatmul.bf16.gmra.mxu1 %v265_v10  ;;  %1051 = vmatmul.msk.bf16.gmra.mxu0 %vm513_vm0, %v268_v11 }
  0xa2   :  { %702 = vmatmul.bf16.gmra.mxu3 %v267_v9  ;;  %659 = vmatmul.bf16.gmra.mxu2 %v266_v14  ;;  %v555_v9 = vadd.f32 %v1476_v15, %v1470_v13 }
  0xa5   :  { %v564_v7 = vpop.f32.mrf.mxu2 }
  0xa6   :  { %v1479_v16 = vadd.f32 %v1476_v15, %v564_v7  ;;  %v546_v17 = vpop.f32.mrf.mxu0  ;;  %v1481_v18 = vpop.f32.mrf.mxu1 }
  0xa7   :  { %v574_v19 = vpop.f32.mrf.mxu3  ;;  %v547_v42 = vadd.f32 %v1476_v15, %v546_v17 }
  0xa8   :  { %v1484_v20 = vadd.f32 %v1476_v15, %v574_v19 }
  0xad   :  { %v566_v21 = vpop.f32.mrf.mxu2 }
  0xae   :  { %v1487_v22 = vadd.f32 %v1476_v15, %v566_v21  ;;  %v549_v23 = vpop.f32.mrf.mxu0  ;;  %v1489_v24 = vpop.f32.mrf.mxu1 }
  0xaf   :  { %v576_v25 = vpop.f32.mrf.mxu3  ;;  %v550_v52 = vadd.f32 %v1476_v15, %v549_v23 }
  0xb0   :  { %v557_v25 = vadd.f32 %v1476_v15, %v1481_v18 }
  0xb5   :  { %v569_v26 = vpop.f32.mrf.mxu2 }
  0xb6   :  { %v1492_v27 = vadd.f32 %v1476_v15, %v569_v26  ;;  %v551_v28 = vpop.f32.mrf.mxu0  ;;  %v1494_v29 = vpop.f32.mrf.mxu1 }
  0xb7   :  { %v552_v62 = vadd.f32 %v1476_v15, %v551_v28 }
  0xbd   :  { %v571_v30 = vpop.f32.mrf.mxu2 }
  0xbe   :  { %v1497_v31 = vadd.f32 %v1476_v15, %v571_v30  ;;  %v587_v32 = vpop.f32.mrf.mxu1  ;;  %v716_v33 = vpop.f32.mrf.mxu0 }
  0xbf   :  { %v588_v36 = vadd.f32 %v587_v32, %v545_v34 }
  0xc5   :  { %v673_v35 = vpop.f32.mrf.mxu3  ;;  %v630_v37 = vpop.f32.mrf.mxu2 }
  0xc6   :  { %v631_v38 = vadd.f32 %v630_v37, %v588_v36  ;;  %v589_v39 = vpop.f32.mrf.mxu1  ;;  %v718_v40 = vpop.f32.mrf.mxu0  ;;  %v560_v37 = vadd.f32 %v1476_v15, %v1489_v24 }
  0xc7   :  { %v590_v46 = vadd.f32 %v589_v39, %v547_v42 }
  0xc8   :  { %v674_v41 = vadd.f32 %v673_v35, %v631_v38 }
  0xca   :  { %v717_v43 = vadd.f32 %v716_v33, %v674_v41 }
  0xcc   :  { %v750_v45 = vmax.f32 %v717_v43, 0.0 }
  0xcd   :  { %v675_v44 = vpop.f32.mrf.mxu3  ;;  %v632_v47 = vpop.f32.mrf.mxu2 }
  0xce   :  { %763 = vst.msk [vmem:[%s1570_s3] sm:$0xff] %vm513_vm0, %v750_v45  ;;  %v633_v48 = vadd.f32 %v632_v47, %v590_v46  ;;  %v592_v49 = vpop.f32.mrf.mxu1  ;;  %v721_v50 = vpop.f32.mrf.mxu0  ;;  %v562_v46 = vadd.f32 %v1476_v15, %v1494_v29 }
  0xcf   :  { %v593_v56 = vadd.f32 %v592_v49, %v550_v52 }
  0xd0   :  { %v676_v51 = vadd.f32 %v675_v44, %v633_v48 }
  0xd2   :  { %v719_v53 = vadd.f32 %v718_v40, %v676_v51 }
  0xd4   :  { %v751_v55 = vmax.f32 %v719_v53, 0.0 }
  0xd5   :  { %v678_v54 = vpop.f32.mrf.mxu3  ;;  %v635_v57 = vpop.f32.mrf.mxu2 }
  0xd6   :  { %764 = vst.msk [vmem:[%s1570_s3 + $0x8] sm:$0xff] %vm513_vm0, %v751_v55  ;;  %v636_v58 = vadd.f32 %v635_v57, %v593_v56  ;;  %v594_v59 = vpop.f32.mrf.mxu1  ;;  %v723_v60 = vpop.f32.mrf.mxu0 }
  0xd7   :  { %v595_v2 = vadd.f32 %v594_v59, %v552_v62 }
  0xd8   :  { %v679_v61 = vadd.f32 %v678_v54, %v636_v58 }
  0xda   :  { %v722_v63 = vadd.f32 %v721_v50, %v679_v61 }
  0xdc   :  { %v752_v1 = vmax.f32 %v722_v63, 0.0 }
  0xdd   :  { %v680_v0 = vpop.f32.mrf.mxu3  ;;  %v637_v3 = vpop.f32.mrf.mxu2 }
  0xde   :  { %765 = vst.msk [vmem:[%s1570_s3 + $0x10] sm:$0xff] %vm513_vm0, %v752_v1  ;;  %v638_v4 = vadd.f32 %v637_v3, %v595_v2  ;;  %v597_v5 = vpop.f32.mrf.mxu1  ;;  %v726_v6 = vpop.f32.mrf.mxu0 }
  0xdf   :  { %v598_v14 = vadd.f32 %v597_v5, %v555_v9 }
  0xe0   :  { %v681_v8 = vadd.f32 %v680_v0, %v638_v4 }
  0xe2   :  { %v724_v10 = vadd.f32 %v723_v60, %v681_v8 }
  0xe4   :  { %v753_v12 = vmax.f32 %v724_v10, 0.0 }
  0xe5   :  { %v683_v11 = vpop.f32.mrf.mxu3  ;;  %v640_v7 = vpop.f32.mrf.mxu2 }
  0xe6   :  { %766 = vst.msk [vmem:[%s1570_s3 + $0x18] sm:$0xff] %vm513_vm0, %v753_v12  ;;  %v641_v17 = vadd.f32 %v640_v7, %v598_v14  ;;  %v599_v19 = vpop.f32.mrf.mxu1  ;;  %v728_v21 = vpop.f32.mrf.mxu0 }
  0xe7   :  { %v600_v30 = vadd.f32 %v599_v19, %v557_v25 }
  0xe8   :  { %v684_v23 = vadd.f32 %v683_v11, %v641_v17 }
  0xea   :  { %v727_v26 = vadd.f32 %v726_v6, %v684_v23 }
  0xec   :  { %v754_v13 = vmax.f32 %v727_v26, 0.0 }
  0xed   :  { %v685_v28 = vpop.f32.mrf.mxu3  ;;  %v642_v32 = vpop.f32.mrf.mxu2 }
  0xee   :  { %767 = vst.msk [vmem:[%s1570_s3 + $0x20] sm:$0xff] %vm513_vm0, %v754_v13  ;;  %v643_v33 = vadd.f32 %v642_v32, %v600_v30  ;;  %v602_v34 = vpop.f32.mrf.mxu1  ;;  %v731_v35 = vpop.f32.mrf.mxu0 }
  0xef   :  { %v603_v40 = vadd.f32 %v602_v34, %v560_v37 }
  0xf0   :  { %v686_v36 = vadd.f32 %v685_v28, %v643_v33 }
  0xf2   :  { %v729_v38 = vadd.f32 %v728_v21, %v686_v36 }
  0xf4   :  { %v755_v18 = vmax.f32 %v729_v38, 0.0 }
  0xf5   :  { %v688_v39 = vpop.f32.mrf.mxu3  ;;  %v645_v41 = vpop.f32.mrf.mxu2 }
  0xf6   :  { %768 = vst.msk [vmem:[%s1570_s3 + $0x28] sm:$0xff] %vm513_vm0, %v755_v18  ;;  %v646_v42 = vadd.f32 %v645_v41, %v603_v40  ;;  %v604_v43 = vpop.f32.mrf.mxu1  ;;  %v733_v44 = vpop.f32.mrf.mxu0 }
  0xf7   :  { %v605_v49 = vadd.f32 %v604_v43, %v562_v46 }
  0xf8   :  { %v689_v45 = vadd.f32 %v688_v39, %v646_v42 }
  0xfa   :  { %v732_v47 = vadd.f32 %v731_v35, %v689_v45 }
  0xfc   :  { %v756_v24 = vmax.f32 %v732_v47, 0.0 }
  0xfd   :  { %v690_v48 = vpop.f32.mrf.mxu3  ;;  %v647_v50 = vpop.f32.mrf.mxu2 }
  0xfe   :  { %769 = vst.msk [vmem:[%s1570_s3 + $0x30] sm:$0xff] %vm513_vm0, %v756_v24  ;;  %v648_v51 = vadd.f32 %v647_v50, %v605_v49  ;;  %v607_v52 = vpop.f32.mrf.mxu1  ;;  %v736_v53 = vpop.f32.mrf.mxu0 }
  0xff   :  { %v608_v58 = vadd.f32 %v607_v52, %v1479_v16 }
 0x100   :  { %v691_v54 = vadd.f32 %v690_v48, %v648_v51 }
 0x102   :  { %v734_v55 = vadd.f32 %v733_v44, %v691_v54 }
 0x104   :  { %v757_v57 = vmax.f32 %v734_v55, 0.0 }
 0x105   :  { %v693_v56 = vpop.f32.mrf.mxu3  ;;  %v650_v15 = vpop.f32.mrf.mxu2 }
 0x106   :  { %770 = vst.msk [vmem:[%s1570_s3 + $0x38] sm:$0xff] %vm513_vm0, %v757_v57  ;;  %v651_v29 = vadd.f32 %v650_v15, %v608_v58  ;;  %v609_v59 = vpop.f32.mrf.mxu1  ;;  %v738_v60 = vpop.f32.mrf.mxu0 }
 0x107   :  { %v610_v1 = vadd.f32 %v609_v59, %v1487_v22 }
 0x108   :  { %v694_v61 = vadd.f32 %v693_v56, %v651_v29 }
 0x10a   :  { %v737_v62 = vadd.f32 %v736_v53, %v694_v61 }
 0x10c   :  { %v758_v0 = vmax.f32 %v737_v62, 0.0 }
 0x10d   :  { %v695_v63 = vpop.f32.mrf.mxu3  ;;  %v652_v2 = vpop.f32.mrf.mxu2 }
 0x10e   :  { %771 = vst.msk [vmem:[%s1570_s3 + $0x40] sm:$0xff] %vm513_vm0, %v758_v0  ;;  %v653_v16 = vadd.f32 %v652_v2, %v610_v1  ;;  %v612_v3 = vpop.f32.mrf.mxu1  ;;  %v741_v4 = vpop.f32.mrf.mxu0 }
 0x10f   :  { %v613_v10 = vadd.f32 %v612_v3, %v1492_v27 }
 0x110   :  { %v696_v5 = vadd.f32 %v695_v63, %v653_v16 }
 0x112   :  { %v739_v6 = vadd.f32 %v738_v60, %v696_v5 }
 0x114   :  { %v759_v9 = vmax.f32 %v739_v6, 0.0 }
 0x115   :  { %v698_v8 = vpop.f32.mrf.mxu3  ;;  %v655_v11 = vpop.f32.mrf.mxu2 }
 0x116   :  { %772 = vst.msk [vmem:[%s1570_s3 + $0x48] sm:$0xff] %vm513_vm0, %v759_v9  ;;  %v656_v22 = vadd.f32 %v655_v11, %v613_v10  ;;  %v614_v12 = vpop.f32.mrf.mxu1  ;;  %v743_v14 = vpop.f32.mrf.mxu0 }
 0x117   :  { %v615_v23 = vadd.f32 %v614_v12, %v1497_v31 }
 0x118   :  { %v699_v7 = vadd.f32 %v698_v8, %v656_v22 }
 0x11a   :  { %v742_v17 = vadd.f32 %v741_v4, %v699_v7 }
 0x11c   :  { %v760_v21 = vmax.f32 %v742_v17, 0.0 }
 0x11d   :  { %v700_v19 = vpop.f32.mrf.mxu3  ;;  %v657_v25 = vpop.f32.mrf.mxu2 }
 0x11e   :  { %773 = vst.msk [vmem:[%s1570_s3 + $0x50] sm:$0xff] %vm513_vm0, %v760_v21  ;;  %v658_v27 = vadd.f32 %v657_v25, %v615_v23  ;;  %v617_v26 = vpop.f32.mrf.mxu1  ;;  %v746_v28 = vpop.f32.mrf.mxu0 }
 0x11f   :  { %v618_v34 = vadd.f32 %v617_v26, %v1484_v20 }
 0x120   :  { %v701_v13 = vadd.f32 %v700_v19, %v658_v27 }
 0x122   :  { %v744_v30 = vadd.f32 %v743_v14, %v701_v13 }
 0x124   :  { %v761_v33 = vmax.f32 %v744_v30, 0.0 }
 0x125   :  { %v703_v32 = vpop.f32.mrf.mxu3  ;;  %v660_v35 = vpop.f32.mrf.mxu2 }
 0x126   :  { %774 = vst.msk [vmem:[%s1570_s3 + $0x58] sm:$0xff] %vm513_vm0, %v761_v33  ;;  %v661_v31 = vadd.f32 %v660_v35, %v618_v34  ;;  %v619_v36 = vpop.f32.mrf.mxu1  ;;  %v748_v37 = vpop.f32.mrf.mxu0 }
 0x128   :  { %v704_v38 = vadd.f32 %v703_v32, %v661_v31 }
 0x12a   :  { %v747_v39 = vadd.f32 %v746_v28, %v704_v38 }
 0x12c   :  { %v762_v40 = vmax.f32 %v747_v39, 0.0 }
 0x12d   :  { %v705_v18 = vpop.f32.mrf.mxu3  ;;  %v662_v41 = vpop.f32.mrf.mxu2 }
 0x12e   :  { %776 = vst.msk [vmem:[%s1570_s3 + $0x60] sm:$0x3] %vm775_vm1, %v762_v40 }

// kernel: tiny_net_forward.9
= control target key start
LH: loop header
LB: loop body
LE: loop exit
PB: predicated region body
PF: predicated region fallthrough
CT: control target
= control target key end

     0   :  { %s670_s0 = inlined_call_operand.vmem [shape: bf16[2,512], index: 0, kind: input, shape index: {}]   ;;  %s671_s1 = inlined_call_operand.vmem [shape: bf16[512,32], index: 1, kind: input, shape index: {}]   ;;  %s672_s2 = inlined_call_operand.vmem [shape: f32[1,32], index: 2, kind: input, shape index: {}]   ;;  %s673_s3 = inlined_call_operand.hbm [shape: f32[2,32], index: 3, kind: output, shape index: {}]  }
   0x1   :  { %v491_v0 = vld [vmem:[%s671_s1 + $0x38] sm:$0xff]  ;;  %v490_v4 = vld [vmem:[%s671_s1 + $0x30] sm:$0xff]  ;;  %v489_v8 = vld [vmem:[%s671_s1 + $0x28] sm:$0xff] }
   0x2   :  { %v499_v1 = vld [vmem:[%s671_s1 + $0x78] sm:$0xff]  ;;  %286 = vmatpush.bf16.msra.mxu0 %v491_v0  ;;  %v498_v5 = vld [vmem:[%s671_s1 + $0x70] sm:$0xff]  ;;  %v497_v9 = vld [vmem:[%s671_s1 + $0x68] sm:$0xff] }
   0x3   :  { %v507_v2 = vld [vmem:[%s671_s1 + $0xb8] sm:$0xff]  ;;  %299 = vmatpush.bf16.msra.mxu1 %v499_v1  ;;  %v506_v6 = vld [vmem:[%s671_s1 + $0xb0] sm:$0xff]  ;;  %v505_v10 = vld [vmem:[%s671_s1 + $0xa8] sm:$0xff] }
   0x4   :  { %v515_v3 = vld [vmem:[%s671_s1 + $0xf8] sm:$0xff]  ;;  %312 = vmatpush.bf16.msra.mxu2 %v507_v2  ;;  %v514_v7 = vld [vmem:[%s671_s1 + $0xf0] sm:$0xff]  ;;  %v513_v11 = vld [vmem:[%s671_s1 + $0xe8] sm:$0xff] }
   0x5   :  { %325 = vmatpush.bf16.msra.mxu3 %v515_v3  ;;  %v488_v12 = vld [vmem:[%s671_s1 + $0x20] sm:$0xff] }
   0x6   :  { %287 = vmatpush.bf16.msra.mxu0 %v490_v4  ;;  %v496_v13 = vld [vmem:[%s671_s1 + $0x60] sm:$0xff] }
   0x7   :  { %300 = vmatpush.bf16.msra.mxu1 %v498_v5  ;;  %v15_v14 = vld [vmem:[%s670_s0] sm:$0xf] }
   0x8   :  { %313 = vmatpush.bf16.msra.mxu2 %v506_v6  ;;  %v504_v15 = vld [vmem:[%s671_s1 + $0xa0] sm:$0xff]  ;;  %85 = vst [vmem:[#allocation1] ss:$9 sm:$0xff] %v15_v14 }
   0x9   :  { %326 = vmatpush.bf16.msra.mxu3 %v514_v7  ;;  %v512_v16 = vld [vmem:[%s671_s1 + $0xe0] sm:$0xff] }
   0xa   :  { %288 = vmatpush.bf16.msra.mxu0 %v489_v8 }
   0xb   :  { %301 = vmatpush.bf16.msra.mxu1 %v497_v9 }
   0xc   :  { %314 = vmatpush.bf16.msra.mxu2 %v505_v10 }
   0xd   :  { %327 = vmatpush.bf16.msra.mxu3 %v513_v11 }
   0xe   :  { %8 = vsyncpa [#allocation3], 0  ;;  %289 = vmatpush.bf16.msra.mxu0 %v488_v12  ;;  %v487_v17 = vld [vmem:[%s671_s1 + $0x18] sm:$0xff]  ;;  %v486_v21 = vld [vmem:[%s671_s1 + $0x10] sm:$0xff]  ;;  %s347_s27 = sshll.u32 %s673_s3, 4  ;;  %vm338_vm0 = vcmask 254976   ;;  %s348_s27 = int_to_ptr.hbm [resolvable:$true] %s347_s27 }
   0xf   :  { %302 = vmatpush.bf16.msra.mxu1 %v496_v13  ;;  %v495_v18 = vld [vmem:[%s671_s1 + $0x58] sm:$0xff]  ;;  %v494_v22 = vld [vmem:[%s671_s1 + $0x50] sm:$0xff]  ;;  %v485_v25 = vld [vmem:[%s671_s1 + $0x8] sm:$0xff] }
  0x10   :  { %315 = vmatpush.bf16.msra.mxu2 %v504_v15  ;;  %v503_v19 = vld [vmem:[%s671_s1 + $0x98] sm:$0xff]  ;;  %v502_v23 = vld [vmem:[%s671_s1 + $0x90] sm:$0xff]  ;;  %v493_v26 = vld [vmem:[%s671_s1 + $0x48] sm:$0xff] }
  0x11   :  { %328 = vmatpush.bf16.msra.mxu3 %v512_v16  ;;  %v511_v20 = vld [vmem:[%s671_s1 + $0xd8] sm:$0xff]  ;;  %v510_v24 = vld [vmem:[%s671_s1 + $0xd0] sm:$0xff]  ;;  %v501_v27 = vld [vmem:[%s671_s1 + $0x88] sm:$0xff] }
  0x12   :  { %290 = vmatpush.bf16.msra.mxu0 %v487_v17  ;;  %v509_v28 = vld [vmem:[%s671_s1 + $0xc8] sm:$0xff]  ;;  %v484_v29 = vld [vmem:[%s671_s1] sm:$0xff]  ;;  %v88_v35 = vld [vmem:[#allocation1 + $0x12] sm:$0xff] }
  0x13   :  { %303 = vmatpush.bf16.msra.mxu1 %v495_v18  ;;  %v492_v30 = vld [vmem:[%s671_s1 + $0x40] sm:$0xff]  ;;  %v87_v34 = vld [vmem:[#allocation1 + $0x9] sm:$0xff] }
  0x14   :  { %316 = vmatpush.bf16.msra.mxu2 %v503_v19  ;;  %v500_v31 = vld [vmem:[%s671_s1 + $0x80] sm:$0xff] }
  0x15   :  { %329 = vmatpush.bf16.msra.mxu3 %v511_v20  ;;  %v508_v32 = vld [vmem:[%s671_s1 + $0xc0] sm:$0xff]  ;;  %s544_s1 = smov [#allocation2]  }
  0x16   :  { %291 = vmatpush.bf16.msra.mxu0 %v486_v21  ;;  %v86_v33 = vld [vmem:[#allocation1] sm:$0xff]  ;;  %s345_s24 = sshll.u32 %s544_s1, 4  ;;  %s346_s24 = int_to_ptr.vmem [resolvable:$true] %s345_s24 }
  0x17   :  { %304 = vmatpush.bf16.msra.mxu1 %v494_v22  ;;  %v89_v36 = vld [vmem:[#allocation1 + $0x1b] sm:$0xff] }
  0x18   :  { %317 = vmatpush.bf16.msra.mxu2 %v502_v23  ;;  %v517_v37 = vld [vmem:[%s672_s2] ss:$0 sm:$0xff] }
  0x19   :  { %330 = vmatpush.bf16.msra.mxu3 %v510_v24 }
  0x1a   :  { %292 = vmatpush.bf16.msra.mxu0 %v485_v25 }
  0x1b   :  { %305 = vmatpush.bf16.msra.mxu1 %v493_v26 }
  0x1c   :  { %318 = vmatpush.bf16.msra.mxu2 %v501_v27 }
  0x1d   :  { %331 = vmatpush.bf16.msra.mxu3 %v509_v28 }
  0x1e   :  { %293 = vmatpush.bf16.msra.mxu0 %v484_v29 }
  0x1f   :  { %306 = vmatpush.bf16.msra.mxu1 %v492_v30 }
  0x20   :  { %319 = vmatpush.bf16.msra.mxu2 %v500_v31 }
  0x21   :  { %332 = vmatpush.bf16.msra.mxu3 %v508_v32  ;;  %294 = vmatmul.bf16.vlgmr.msra.gmra.mxu0 %v86_v33 }
  0x22   :  { %307 = vmatmul.bf16.vlgmr.msra.gmra.mxu1 %v87_v34 }
  0x23   :  { %320 = vmatmul.bf16.vlgmr.msra.gmra.mxu2 %v88_v35 }
  0x24   :  { %333 = vmatmul.bf16.vlgmr.msra.gmra.mxu3 %v89_v36 }
  0x9e   :  { %v295_v38 = vpop.f32.mrf.mxu0 }
  0x9f   :  { %v308_v39 = vpop.f32.mrf.mxu1  ;;  %v296_v40 = vadd.f32 %v517_v37, %v295_v38 }
  0xa1   :  { %v309_v41 = vadd.f32 %v308_v39, %v296_v40 }
  0xa6   :  { %v321_v42 = vpop.f32.mrf.mxu2  ;;  %v297_v45 = vpop.f32.mrf.mxu0 }
  0xa7   :  { %v334_v43 = vpop.f32.mrf.mxu3  ;;  %v322_v44 = vadd.f32 %v321_v42, %v309_v41  ;;  %v310_v46 = vpop.f32.mrf.mxu1 }
  0xa9   :  { %v335_v47 = vadd.f32 %v334_v43, %v322_v44 }
  0xab   :  { %339 = vst.msk [vmem:[#allocation2] sm:$0x3] %vm338_vm0, %v335_v47 }
  0xac   :  { %350 = dma.vmem_to_hbm [thread:$0]  %s346_s24, 32, %s348_s27, [#allocation3]  }
  0xae   :  { %v323_v48 = vpop.f32.mrf.mxu2 }
  0xaf   :  { %v336_v49 = vpop.f32.mrf.mxu3 }
  0xb0   :  { %542 = dma.done.wait [#allocation3], 32  }
  0xb1   :  { %543 = vsyncadd [#allocation3], 4294967264 }
  0xb2   :  { %355 = vsyncpa [#allocation3], 1 }

// kernel: tiny_net_forward.8
= control target key start
LH: loop header
LB: loop body
LE: loop exit
PB: predicated region body
PF: predicated region fallthrough
CT: control target
= control target key end

     0   :  { %vm4790_vm0 = vcmask 523264   ;;  %vm6104_vm1 = vcmask 1041408   ;;  %vm6106_vm2 = vcmask 1045508   ;;  %vm6108_vm3 = vcmask 1043456   ;;  %s15000_s1 = inlined_call_operand.vmem [shape: bf16[3136,512], index: 1, kind: input, shape index: {}]   ;;  %s15001_s0 = inlined_call_operand.vmem [shape: bf16[2,3136], index: 0, kind: input, shape index: {}]   ;;  %s15002_s2 = inlined_call_operand.vmem [shape: f32[1,512], index: 2, kind: input, shape index: {}]   ;;  %s15003_s3 = inlined_call_operand.vmem [shape: f32[2,512], index: 3, kind: output, shape index: {}]  }
   0x1   :  { %v6230_v0 = vld [vmem:[%s15000_s1 + $0xe0] sm:$0xf]  ;;  %v9286_v1 = vld [vmem:[%s15000_s1 + $0xec] sm:$0xf0] }
   0x2   :  { %v6358_v2 = vld [vmem:[%s15000_s1 + $0x1e0] sm:$0xf]  ;;  %v6231_v3 = vor.u32 %v9286_v1, %v6230_v0  ;;  %v9318_v4 = vld [vmem:[%s15000_s1 + $0x1ec] sm:$0xf0] }
   0x3   :  { %v6486_v5 = vld [vmem:[%s15000_s1 + $0x2e0] sm:$0xf]  ;;  %v9350_v6 = vld [vmem:[%s15000_s1 + $0x2ec] sm:$0xf0]  ;;  %v6359_v7 = vor.u32 %v9318_v4, %v6358_v2 }
   0x4   :  { %v6487_v8 = vor.u32 %v9350_v6, %v6486_v5  ;;  %v6614_v9 = vld [vmem:[%s15000_s1 + $0x3e0] sm:$0xf]  ;;  %v9382_v10 = vld [vmem:[%s15000_s1 + $0x3ec] sm:$0xf0]  ;;  %4793 = vmatpush.bf16.msra.mxu0 %v6231_v3 }
   0x5   :  { %v6214_v11 = vld [vmem:[%s15000_s1 + $0xc0] sm:$0xf]  ;;  %v6615_v12 = vor.u32 %v9382_v10, %v6614_v9  ;;  %v9282_v13 = vld [vmem:[%s15000_s1 + $0xcc] sm:$0xf0]  ;;  %4806 = vmatpush.bf16.msra.mxu1 %v6359_v7 }
   0x6   :  { %v6342_v14 = vld [vmem:[%s15000_s1 + $0x1c0] sm:$0xf]  ;;  %v9314_v15 = vld [vmem:[%s15000_s1 + $0x1cc] sm:$0xf0]  ;;  %4819 = vmatpush.bf16.msra.mxu2 %v6487_v8  ;;  %v6215_v16 = vor.u32 %v9282_v13, %v6214_v11 }
   0x7   :  { %v6343_v17 = vor.u32 %v9314_v15, %v6342_v14  ;;  %v6470_v18 = vld [vmem:[%s15000_s1 + $0x2c0] sm:$0xf]  ;;  %v9346_v19 = vld [vmem:[%s15000_s1 + $0x2cc] sm:$0xf0]  ;;  %4832 = vmatpush.bf16.msra.mxu3 %v6615_v12 }
   0x8   :  { %v6598_v20 = vld [vmem:[%s15000_s1 + $0x3c0] sm:$0xf]  ;;  %v6471_v21 = vor.u32 %v9346_v19, %v6470_v18  ;;  %v9378_v22 = vld [vmem:[%s15000_s1 + $0x3cc] sm:$0xf0]  ;;  %4794 = vmatpush.bf16.msra.mxu0 %v6215_v16 }
   0x9   :  { %v6198_v23 = vld [vmem:[%s15000_s1 + $0xa0] sm:$0xf]  ;;  %v9278_v24 = vld [vmem:[%s15000_s1 + $0xac] sm:$0xf0]  ;;  %v6599_v25 = vor.u32 %v9378_v22, %v6598_v20  ;;  %4807 = vmatpush.bf16.msra.mxu1 %v6343_v17 }
   0xa   :  { %v6326_v26 = vld [vmem:[%s15000_s1 + $0x1a0] sm:$0xf]  ;;  %v9310_v27 = vld [vmem:[%s15000_s1 + $0x1ac] sm:$0xf0]  ;;  %v6199_v29 = vor.u32 %v9278_v24, %v6198_v23  ;;  %4820 = vmatpush.bf16.msra.mxu2 %v6471_v21 }
   0xb   :  { %v6454_v28 = vld [vmem:[%s15000_s1 + $0x2a0] sm:$0xf]  ;;  %v9342_v30 = vld [vmem:[%s15000_s1 + $0x2ac] sm:$0xf0]  ;;  %v6327_v33 = vor.u32 %v9310_v27, %v6326_v26  ;;  %4833 = vmatpush.bf16.msra.mxu3 %v6599_v25 }
   0xc   :  { %v6582_v31 = vld [vmem:[%s15000_s1 + $0x3a0] sm:$0xf]  ;;  %v9374_v32 = vld [vmem:[%s15000_s1 + $0x3ac] sm:$0xf0]  ;;  %v6455_v34 = vor.u32 %v9342_v30, %v6454_v28  ;;  %4795 = vmatpush.bf16.msra.mxu0 %v6199_v29 }
   0xd   :  { %v6182_v35 = vld [vmem:[%s15000_s1 + $0x80] sm:$0xf]  ;;  %v9274_v36 = vld [vmem:[%s15000_s1 + $0x8c] sm:$0xf0]  ;;  %v6583_v38 = vor.u32 %v9374_v32, %v6582_v31  ;;  %4808 = vmatpush.bf16.msra.mxu1 %v6327_v33 }
   0xe   :  { %v6310_v37 = vld [vmem:[%s15000_s1 + $0x180] sm:$0xf]  ;;  %v9306_v39 = vld [vmem:[%s15000_s1 + $0x18c] sm:$0xf0]  ;;  %v6183_v44 = vor.u32 %v9274_v36, %v6182_v35  ;;  %4821 = vmatpush.bf16.msra.mxu2 %v6455_v34 }
   0xf   :  { %v6438_v40 = vld [vmem:[%s15000_s1 + $0x280] sm:$0xf]  ;;  %v9338_v41 = vld [vmem:[%s15000_s1 + $0x28c] sm:$0xf0]  ;;  %v6311_v45 = vor.u32 %v9306_v39, %v6310_v37  ;;  %4834 = vmatpush.bf16.msra.mxu3 %v6583_v38 }
  0x10   :  { %v6566_v42 = vld [vmem:[%s15000_s1 + $0x380] sm:$0xf]  ;;  %v9370_v43 = vld [vmem:[%s15000_s1 + $0x38c] sm:$0xf0]  ;;  %v6439_v46 = vor.u32 %v9338_v41, %v6438_v40  ;;  %4796 = vmatpush.bf16.msra.mxu0 %v6183_v44 }
  0x11   :  { %v6166_v47 = vld [vmem:[%s15000_s1 + $0x60] sm:$0xf]  ;;  %v9270_v48 = vld [vmem:[%s15000_s1 + $0x6c] sm:$0xf0]  ;;  %v6567_v50 = vor.u32 %v9370_v43, %v6566_v42  ;;  %4809 = vmatpush.bf16.msra.mxu1 %v6311_v45 }
  0x12   :  { %v6294_v49 = vld [vmem:[%s15000_s1 + $0x160] sm:$0xf]  ;;  %v9302_v51 = vld [vmem:[%s15000_s1 + $0x16c] sm:$0xf0]  ;;  %v6167_v56 = vor.u32 %v9270_v48, %v6166_v47  ;;  %4822 = vmatpush.bf16.msra.mxu2 %v6439_v46 }
  0x13   :  { %v6422_v52 = vld [vmem:[%s15000_s1 + $0x260] sm:$0xf]  ;;  %v9334_v53 = vld [vmem:[%s15000_s1 + $0x26c] sm:$0xf0]  ;;  %v6295_v57 = vor.u32 %v9302_v51, %v6294_v49  ;;  %4835 = vmatpush.bf16.msra.mxu3 %v6567_v50 }
  0x14   :  { %v6550_v54 = vld [vmem:[%s15000_s1 + $0x360] sm:$0xf]  ;;  %v9366_v55 = vld [vmem:[%s15000_s1 + $0x36c] sm:$0xf0]  ;;  %v6423_v58 = vor.u32 %v9334_v53, %v6422_v52  ;;  %4797 = vmatpush.bf16.msra.mxu0 %v6167_v56 }
  0x15   :  { %v6150_v59 = vld [vmem:[%s15000_s1 + $0x40] sm:$0xf]  ;;  %v9266_v60 = vld [vmem:[%s15000_s1 + $0x4c] sm:$0xf0]  ;;  %v6551_v62 = vor.u32 %v9366_v55, %v6550_v54  ;;  %4810 = vmatpush.bf16.msra.mxu1 %v6295_v57 }
  0x16   :  { %v6278_v61 = vld [vmem:[%s15000_s1 + $0x140] sm:$0xf]  ;;  %v9298_v63 = vld [vmem:[%s15000_s1 + $0x14c] sm:$0xf0]  ;;  %v6151_v4 = vor.u32 %v9266_v60, %v6150_v59  ;;  %4823 = vmatpush.bf16.msra.mxu2 %v6423_v58 }
  0x17   :  { %v6406_v0 = vld [vmem:[%s15000_s1 + $0x240] sm:$0xf]  ;;  %v9330_v1 = vld [vmem:[%s15000_s1 + $0x24c] sm:$0xf0]  ;;  %v6279_v5 = vor.u32 %v9298_v63, %v6278_v61  ;;  %4836 = vmatpush.bf16.msra.mxu3 %v6551_v62 }
  0x18   :  { %v6534_v2 = vld [vmem:[%s15000_s1 + $0x340] sm:$0xf]  ;;  %v9362_v3 = vld [vmem:[%s15000_s1 + $0x34c] sm:$0xf0]  ;;  %v6407_v6 = vor.u32 %v9330_v1, %v6406_v0  ;;  %4798 = vmatpush.bf16.msra.mxu0 %v6151_v4 }
  0x19   :  { %v6134_v7 = vld [vmem:[%s15000_s1 + $0x20] sm:$0xf]  ;;  %v9262_v8 = vld [vmem:[%s15000_s1 + $0x2c] sm:$0xf0]  ;;  %v6535_v10 = vor.u32 %v9362_v3, %v6534_v2  ;;  %4811 = vmatpush.bf16.msra.mxu1 %v6279_v5 }
  0x1a   :  { %v6262_v9 = vld [vmem:[%s15000_s1 + $0x120] sm:$0xf]  ;;  %v9294_v11 = vld [vmem:[%s15000_s1 + $0x12c] sm:$0xf0]  ;;  %v6135_v16 = vor.u32 %v9262_v8, %v6134_v7  ;;  %4824 = vmatpush.bf16.msra.mxu2 %v6407_v6 }
  0x1b   :  { %v6390_v12 = vld [vmem:[%s15000_s1 + $0x220] sm:$0xf]  ;;  %v9326_v13 = vld [vmem:[%s15000_s1 + $0x22c] sm:$0xf0]  ;;  %v6263_v19 = vor.u32 %v9294_v11, %v6262_v9  ;;  %4837 = vmatpush.bf16.msra.mxu3 %v6535_v10 }
  0x1c   :  { %v6518_v14 = vld [vmem:[%s15000_s1 + $0x320] sm:$0xf]  ;;  %v9358_v15 = vld [vmem:[%s15000_s1 + $0x32c] sm:$0xf0]  ;;  %v6391_v20 = vor.u32 %v9326_v13, %v6390_v12  ;;  %4799 = vmatpush.bf16.msra.mxu0 %v6135_v16 }
  0x1d   :  { %v6118_v17 = vld [vmem:[%s15000_s1] sm:$0xf]  ;;  %v9258_v18 = vld [vmem:[%s15000_s1 + $0xc] sm:$0xf0]  ;;  %v6519_v24 = vor.u32 %v9358_v15, %v6518_v14  ;;  %4812 = vmatpush.bf16.msra.mxu1 %v6263_v19 }
  0x1e   :  { %v6246_v21 = vld [vmem:[%s15000_s1 + $0x100] sm:$0xf]  ;;  %v9290_v22 = vld [vmem:[%s15000_s1 + $0x10c] sm:$0xf0]  ;;  %v6119_v31 = vor.u32 %v9258_v18, %v6118_v17  ;;  %4825 = vmatpush.bf16.msra.mxu2 %v6391_v20 }
  0x1f   :  { %v6374_v23 = vld [vmem:[%s15000_s1 + $0x200] sm:$0xf]  ;;  %v9322_v25 = vld [vmem:[%s15000_s1 + $0x20c] sm:$0xf0]  ;;  %v6247_v35 = vor.u32 %v9290_v22, %v6246_v21  ;;  %4838 = vmatpush.bf16.msra.mxu3 %v6519_v24 }
  0x20   :  { %v6502_v26 = vld [vmem:[%s15000_s1 + $0x300] sm:$0xf]  ;;  %v9354_v27 = vld [vmem:[%s15000_s1 + $0x30c] sm:$0xf0]  ;;  %v6375_v36 = vor.u32 %v9322_v25, %v6374_v23  ;;  %4800 = vmatpush.bf16.msra.mxu0 %v6119_v31 }
  0x21   :  { %v6742_v28 = vld [vmem:[%s15000_s1 + $0x4e0] sm:$0xf]  ;;  %v9414_v29 = vld [vmem:[%s15000_s1 + $0x4ec] sm:$0xf0]  ;;  %v6503_v39 = vor.u32 %v9354_v27, %v6502_v26  ;;  %4813 = vmatpush.bf16.msra.mxu1 %v6247_v35 }
  0x22   :  { %v6870_v30 = vld [vmem:[%s15000_s1 + $0x5e0] sm:$0xf]  ;;  %v9446_v32 = vld [vmem:[%s15000_s1 + $0x5ec] sm:$0xf0]  ;;  %v6743_v40 = vor.u32 %v9414_v29, %v6742_v28  ;;  %4826 = vmatpush.bf16.msra.mxu2 %v6375_v36 }
  0x23   :  { %v6998_v33 = vld [vmem:[%s15000_s1 + $0x6e0] sm:$0xf]  ;;  %v9478_v34 = vld [vmem:[%s15000_s1 + $0x6ec] sm:$0xf0]  ;;  %v6871_v41 = vor.u32 %v9446_v32, %v6870_v30  ;;  %4839 = vmatpush.bf16.msra.mxu3 %v6503_v39 }
  0x24   :  { %v7126_v37 = vld [vmem:[%s15000_s1 + $0x7e0] sm:$0xf]  ;;  %v9510_v38 = vld [vmem:[%s15000_s1 + $0x7ec] sm:$0xf0]  ;;  %v6999_v42 = vor.u32 %v9478_v34, %v6998_v33  ;;  %4845 = vmatpush.bf16.msrb.mxu0 %v6743_v40 }
  0x25   :  { %v6726_v43 = vld [vmem:[%s15000_s1 + $0x4c0] sm:$0xf]  ;;  %v9410_v44 = vld [vmem:[%s15000_s1 + $0x4cc] sm:$0xf0]  ;;  %v7127_v46 = vor.u32 %v9510_v38, %v7126_v37  ;;  %4858 = vmatpush.bf16.msrb.mxu1 %v6871_v41 }
  0x26   :  { %v6854_v45 = vld [vmem:[%s15000_s1 + $0x5c0] sm:$0xf]  ;;  %v9442_v47 = vld [vmem:[%s15000_s1 + $0x5cc] sm:$0xf0]  ;;  %v6727_v52 = vor.u32 %v9410_v44, %v6726_v43  ;;  %4871 = vmatpush.bf16.msrb.mxu2 %v6999_v42  ;;  %v16_v43 = vld [vmem:[%s15001_s0 + $0x8] sm:$0xff] }
  0x27   :  { %v6982_v48 = vld [vmem:[%s15000_s1 + $0x6c0] sm:$0xf]  ;;  %v9474_v49 = vld [vmem:[%s15000_s1 + $0x6cc] sm:$0xf0]  ;;  %v6855_v55 = vor.u32 %v9442_v47, %v6854_v45  ;;  %4884 = vmatpush.bf16.msrb.mxu3 %v7127_v46 }
  0x28   :  { %v7110_v50 = vld [vmem:[%s15000_s1 + $0x7c0] sm:$0xf]  ;;  %v9506_v51 = vld [vmem:[%s15000_s1 + $0x7cc] sm:$0xf0]  ;;  %v6983_v56 = vor.u32 %v9474_v49, %v6982_v48  ;;  %4846 = vmatpush.bf16.msrb.mxu0 %v6727_v52 }
  0x29   :  { %v6710_v53 = vld [vmem:[%s15000_s1 + $0x4a0] sm:$0xf]  ;;  %v9406_v54 = vld [vmem:[%s15000_s1 + $0x4ac] sm:$0xf0]  ;;  %v7111_v60 = vor.u32 %v9506_v51, %v7110_v50  ;;  %4859 = vmatpush.bf16.msrb.mxu1 %v6855_v55 }
  0x2a   :  { %v6838_v57 = vld [vmem:[%s15000_s1 + $0x5a0] sm:$0xf]  ;;  %v9438_v58 = vld [vmem:[%s15000_s1 + $0x5ac] sm:$0xf0]  ;;  %v6711_v1 = vor.u32 %v9406_v54, %v6710_v53  ;;  %4872 = vmatpush.bf16.msrb.mxu2 %v6983_v56 }
  0x2b   :  { %v15_v59 = vld [vmem:[%s15001_s0] sm:$0xff]  ;;  %v9470_v62 = vld [vmem:[%s15000_s1 + $0x6ac] sm:$0xf0]  ;;  %v6839_v2 = vor.u32 %v9438_v58, %v6838_v57  ;;  %4885 = vmatpush.bf16.msrb.mxu3 %v7111_v60 }
  0x2c   :  { %v6966_v61 = vld [vmem:[%s15000_s1 + $0x6a0] sm:$0xf]  ;;  %814 = vst [vmem:[#allocation1] ss:$9 sm:$0xff] %v15_v59  ;;  %v9502_v0 = vld [vmem:[%s15000_s1 + $0x7ac] sm:$0xf0]  ;;  %4847 = vmatpush.bf16.msrb.mxu0 %v6711_v1 }
  0x2d   :  { %v7094_v63 = vld [vmem:[%s15000_s1 + $0x7a0] sm:$0xf]  ;;  %v6967_v3 = vor.u32 %v9470_v62, %v6966_v61  ;;  %v9402_v5 = vld [vmem:[%s15000_s1 + $0x48c] sm:$0xf0]  ;;  %4860 = vmatpush.bf16.msrb.mxu1 %v6839_v2 }
  0x2e   :  { %v6694_v4 = vld [vmem:[%s15000_s1 + $0x480] sm:$0xf]  ;;  %v7095_v7 = vor.u32 %v9502_v0, %v7094_v63  ;;  %v9434_v8 = vld [vmem:[%s15000_s1 + $0x58c] sm:$0xf0] }
  0x2f   :  { %v6822_v6 = vld [vmem:[%s15000_s1 + $0x580] sm:$0xf]  ;;  %v9466_v10 = vld [vmem:[%s15000_s1 + $0x68c] sm:$0xf0]  ;;  %v6695_v14 = vor.u32 %v9402_v5, %v6694_v4  ;;  %4873 = vmatpush.bf16.msrb.mxu2 %v6967_v3 }
  0x30   :  { %v6950_v9 = vld [vmem:[%s15000_s1 + $0x680] sm:$0xf]  ;;  %v9498_v12 = vld [vmem:[%s15000_s1 + $0x78c] sm:$0xf0]  ;;  %v6823_v18 = vor.u32 %v9434_v8, %v6822_v6  ;;  %4886 = vmatpush.bf16.msrb.mxu3 %v7095_v7 }
  0x31   :  { %v7078_v11 = vld [vmem:[%s15000_s1 + $0x780] sm:$0xf]  ;;  %v9398_v15 = vld [vmem:[%s15000_s1 + $0x46c] sm:$0xf0]  ;;  %v6951_v19 = vor.u32 %v9466_v10, %v6950_v9  ;;  %4848 = vmatpush.bf16.msrb.mxu0 %v6695_v14 }
  0x32   :  { %v6678_v13 = vld [vmem:[%s15000_s1 + $0x460] sm:$0xf]  ;;  %v9430_v17 = vld [vmem:[%s15000_s1 + $0x56c] sm:$0xf0]  ;;  %v7079_v23 = vor.u32 %v9498_v12, %v7078_v11  ;;  %4861 = vmatpush.bf16.msrb.mxu1 %v6823_v18 }
  0x33   :  { %v6806_v16 = vld [vmem:[%s15000_s1 + $0x560] sm:$0xf]  ;;  %v10369_v20 = vld [vmem:[#allocation1 + $0x12] sm:$0xff]  ;;  %v10382_v26 = vld [vmem:[#allocation1 + $0x9] sm:$0xff]  ;;  %v6679_v29 = vor.u32 %v9398_v15, %v6678_v13  ;;  %4874 = vmatpush.bf16.msrb.mxu2 %v6951_v19 }
  0x34   :  { %v10371_v21 = vld [vmem:[#allocation1] sm:$0xff]  ;;  %v9462_v25 = vld [vmem:[%s15000_s1 + $0x66c] sm:$0xf0]  ;;  %4827 = vmatmul.bf16.vlgmr.msra.gmra.mxu2 %v10369_v20  ;;  %4814 = vmatmul.bf16.vlgmr.msra.gmra.mxu1 %v10382_v26  ;;  %v6807_v30 = vor.u32 %v9430_v17, %v6806_v16  ;;  %v10462_v61 = vld [vmem:[#allocation1 + $0x36] sm:$0xff] }
  0x35   :  { %v10373_v22 = vld [vmem:[#allocation1 + $0x1b] sm:$0xff]  ;;  %v9494_v28 = vld [vmem:[%s15000_s1 + $0x76c] sm:$0xf0]  ;;  %4801 = vmatmul.bf16.vlgmr.msra.gmra.mxu0 %v10371_v21  ;;  %4887 = vmatpush.bf16.msrb.mxu3 %v7079_v23  ;;  %v10464_v0 = vld [vmem:[#allocation1 + $0x24] sm:$0xff] }
  0x36   :  { %v6934_v24 = vld [vmem:[%s15000_s1 + $0x660] sm:$0xf]  ;;  %4840 = vmatmul.bf16.vlgmr.msra.gmra.mxu3 %v10373_v22  ;;  %v9394_v33 = vld [vmem:[%s15000_s1 + $0x44c] sm:$0xf0]  ;;  %4849 = vmatpush.bf16.msrb.mxu0 %v6679_v29 }
  0x37   :  { %v7062_v27 = vld [vmem:[%s15000_s1 + $0x760] sm:$0xf]  ;;  %v6935_v31 = vor.u32 %v9462_v25, %v6934_v24  ;;  %v9426_v36 = vld [vmem:[%s15000_s1 + $0x54c] sm:$0xf0]  ;;  %4862 = vmatpush.bf16.msrb.mxu1 %v6807_v30 }
  0x38   :  { %v6662_v32 = vld [vmem:[%s15000_s1 + $0x440] sm:$0xf]  ;;  %v7063_v35 = vor.u32 %v9494_v28, %v7062_v27  ;;  %v9458_v38 = vld [vmem:[%s15000_s1 + $0x64c] sm:$0xf0] }
  0x39   :  { %v6790_v34 = vld [vmem:[%s15000_s1 + $0x540] sm:$0xf]  ;;  %v9490_v40 = vld [vmem:[%s15000_s1 + $0x74c] sm:$0xf0]  ;;  %v6663_v41 = vor.u32 %v9394_v33, %v6662_v32  ;;  %4875 = vmatpush.bf16.msrb.mxu2 %v6935_v31 }
  0x3a   :  { %v6918_v37 = vld [vmem:[%s15000_s1 + $0x640] sm:$0xf]  ;;  %v6791_v44 = vor.u32 %v9426_v36, %v6790_v34  ;;  %v9390_v46 = vld [vmem:[%s15000_s1 + $0x42c] sm:$0xf0]  ;;  %4888 = vmatpush.bf16.msrb.mxu3 %v7063_v35 }
  0x3b   :  { %v7046_v39 = vld [vmem:[%s15000_s1 + $0x740] sm:$0xf]  ;;  %v6919_v45 = vor.u32 %v9458_v38, %v6918_v37  ;;  %v9422_v48 = vld [vmem:[%s15000_s1 + $0x52c] sm:$0xf0]  ;;  %4850 = vmatpush.bf16.msrb.mxu0 %v6663_v41 }
  0x3c   :  { %v6646_v42 = vld [vmem:[%s15000_s1 + $0x420] sm:$0xf]  ;;  %v7047_v49 = vor.u32 %v9490_v40, %v7046_v39  ;;  %v9454_v51 = vld [vmem:[%s15000_s1 + $0x62c] sm:$0xf0]  ;;  %4863 = vmatpush.bf16.msrb.mxu1 %v6791_v44 }
  0x3d   :  { %v6774_v47 = vld [vmem:[%s15000_s1 + $0x520] sm:$0xf]  ;;  %v9486_v53 = vld [vmem:[%s15000_s1 + $0x72c] sm:$0xf0]  ;;  %v6647_v56 = vor.u32 %v9390_v46, %v6646_v42  ;;  %4876 = vmatpush.bf16.msrb.mxu2 %v6919_v45 }
  0x3e   :  { %v6902_v50 = vld [vmem:[%s15000_s1 + $0x620] sm:$0xf]  ;;  %v9386_v55 = vld [vmem:[%s15000_s1 + $0x40c] sm:$0xf0]  ;;  %v6775_v62 = vor.u32 %v9422_v48, %v6774_v47  ;;  %4889 = vmatpush.bf16.msrb.mxu3 %v7047_v49 }
  0x3f   :  { %v7030_v52 = vld [vmem:[%s15000_s1 + $0x720] sm:$0xf]  ;;  %v9418_v58 = vld [vmem:[%s15000_s1 + $0x50c] sm:$0xf0]  ;;  %v6903_v63 = vor.u32 %v9454_v51, %v6902_v50  ;;  %4851 = vmatpush.bf16.msrb.mxu0 %v6647_v56 }
  0x40   :  { %v6630_v54 = vld [vmem:[%s15000_s1 + $0x400] sm:$0xf]  ;;  %v9450_v60 = vld [vmem:[%s15000_s1 + $0x60c] sm:$0xf0]  ;;  %v7031_v3 = vor.u32 %v9486_v53, %v7030_v52  ;;  %4864 = vmatpush.bf16.msrb.mxu1 %v6775_v62 }
  0x41   :  { %v6758_v57 = vld [vmem:[%s15000_s1 + $0x500] sm:$0xf]  ;;  %v10468_v2 = vld [vmem:[#allocation1 + $0x2d] sm:$0xff]  ;;  %v6631_v9 = vor.u32 %v9386_v55, %v6630_v54  ;;  %4877 = vmatpush.bf16.msrb.mxu2 %v6903_v63 }
  0x42   :  { %v6886_v59 = vld [vmem:[%s15000_s1 + $0x600] sm:$0xf]  ;;  %v9482_v5 = vld [vmem:[%s15000_s1 + $0x70c] sm:$0xf0]  ;;  %v6759_v13 = vor.u32 %v9418_v58, %v6758_v57  ;;  %4890 = vmatpush.bf16.msrb.mxu3 %v7031_v3 }
  0x43   :  { %v10466_v1 = vld [vmem:[#allocation1 + $0x3f] sm:$0xff]  ;;  %v9542_v7 = vld [vmem:[%s15000_s1 + $0x8ec] sm:$0xf0]  ;;  %v6887_v14 = vor.u32 %v9450_v60, %v6886_v59  ;;  %4852 = vmatpush.bf16.msrb.mxu0 %v6631_v9 }
  0x44   :  { %v7014_v4 = vld [vmem:[%s15000_s1 + $0x700] sm:$0xf]  ;;  %824 = vst [vmem:[#allocation1] ss:$9 sm:$0xff] %v16_v43  ;;  %v9574_v10 = vld [vmem:[%s15000_s1 + $0x9ec] sm:$0xf0]  ;;  %4865 = vmatpush.bf16.msrb.mxu1 %v6759_v13 }
  0x45   :  { %v7254_v6 = vld [vmem:[%s15000_s1 + $0x8e0] sm:$0xf]  ;;  %v9606_v12 = vld [vmem:[%s15000_s1 + $0xaec] sm:$0xf0]  ;;  %v7015_v17 = vor.u32 %v9482_v5, %v7014_v4  ;;  %4878 = vmatpush.bf16.msrb.mxu2 %v6887_v14 }
  0x46   :  { %v7382_v8 = vld [vmem:[%s15000_s1 + $0x9e0] sm:$0xf]  ;;  %v9638_v16 = vld [vmem:[%s15000_s1 + $0xbec] sm:$0xf0]  ;;  %v7255_v18 = vor.u32 %v9542_v7, %v7254_v6  ;;  %4853 = vmatmul.bf16.vlgmr.msrb.gmra.mxu0 %v10464_v0 }
  0x47   :  { %v7510_v11 = vld [vmem:[%s15000_s1 + $0xae0] sm:$0xf]  ;;  %v7383_v19 = vor.u32 %v9574_v10, %v7382_v8  ;;  %v9538_v25 = vld [vmem:[%s15000_s1 + $0x8cc] sm:$0xf0]  ;;  %4891 = vmatpush.bf16.msrb.mxu3 %v7015_v17  ;;  %4866 = vmatmul.bf16.vlgmr.msrb.gmra.mxu1 %v10468_v2 }
  0x48   :  { %v7638_v15 = vld [vmem:[%s15000_s1 + $0xbe0] sm:$0xf]  ;;  %v7511_v23 = vor.u32 %v9606_v12, %v7510_v11  ;;  %v9570_v29 = vld [vmem:[%s15000_s1 + $0x9cc] sm:$0xf0]  ;;  %4897 = vmatpush.bf16.msra.mxu0 %v7255_v18  ;;  %4879 = vmatmul.bf16.vlgmr.msrb.gmra.mxu2 %v10462_v61 }
  0x49   :  { %v7238_v24 = vld [vmem:[%s15000_s1 + $0x8c0] sm:$0xf]  ;;  %v7639_v28 = vor.u32 %v9638_v16, %v7638_v15  ;;  %v9602_v31 = vld [vmem:[%s15000_s1 + $0xacc] sm:$0xf0]  ;;  %4910 = vmatpush.bf16.msra.mxu1 %v7383_v19 }
  0x4a   :  { %v7366_v27 = vld [vmem:[%s15000_s1 + $0x9c0] sm:$0xf]  ;;  %v9634_v33 = vld [vmem:[%s15000_s1 + $0xbcc] sm:$0xf0]  ;;  %v7239_v34 = vor.u32 %v9538_v25, %v7238_v24  ;;  %4923 = vmatpush.bf16.msra.mxu2 %v7511_v23  ;;  %4892 = vmatmul.bf16.vlgmr.msrb.gmra.mxu3 %v10466_v1 }
  0x4b   :  { %v7494_v30 = vld [vmem:[%s15000_s1 + $0xac0] sm:$0xf]  ;;  %v7367_v35 = vor.u32 %v9570_v29, %v7366_v27  ;;  %v9534_v38 = vld [vmem:[%s15000_s1 + $0x8ac] sm:$0xf0]  ;;  %4936 = vmatpush.bf16.msra.mxu3 %v7639_v28 }
  0x4c   :  { %v7622_v32 = vld [vmem:[%s15000_s1 + $0xbc0] sm:$0xf]  ;;  %v7495_v36 = vor.u32 %v9602_v31, %v7494_v30  ;;  %v9566_v41 = vld [vmem:[%s15000_s1 + $0x9ac] sm:$0xf0]  ;;  %4898 = vmatpush.bf16.msra.mxu0 %v7239_v34 }
  0x4d   :  { %v7222_v37 = vld [vmem:[%s15000_s1 + $0x8a0] sm:$0xf]  ;;  %v7623_v40 = vor.u32 %v9634_v33, %v7622_v32  ;;  %v9598_v43 = vld [vmem:[%s15000_s1 + $0xaac] sm:$0xf0]  ;;  %4911 = vmatpush.bf16.msra.mxu1 %v7367_v35 }
  0x4e   :  { %v7350_v39 = vld [vmem:[%s15000_s1 + $0x9a0] sm:$0xf]  ;;  %v9630_v45 = vld [vmem:[%s15000_s1 + $0xbac] sm:$0xf0]  ;;  %v7223_v46 = vor.u32 %v9534_v38, %v7222_v37  ;;  %4924 = vmatpush.bf16.msra.mxu2 %v7495_v36 }
  0x4f   :  { %v7478_v42 = vld [vmem:[%s15000_s1 + $0xaa0] sm:$0xf]  ;;  %v7351_v47 = vor.u32 %v9566_v41, %v7350_v39  ;;  %v9530_v50 = vld [vmem:[%s15000_s1 + $0x88c] sm:$0xf0]  ;;  %4937 = vmatpush.bf16.msra.mxu3 %v7623_v40 }
  0x50   :  { %v7606_v44 = vld [vmem:[%s15000_s1 + $0xba0] sm:$0xf]  ;;  %v7479_v48 = vor.u32 %v9598_v43, %v7478_v42  ;;  %v9562_v53 = vld [vmem:[%s15000_s1 + $0x98c] sm:$0xf0]  ;;  %4899 = vmatpush.bf16.msra.mxu0 %v7223_v46 }
  0x51   :  { %v7206_v49 = vld [vmem:[%s15000_s1 + $0x880] sm:$0xf]  ;;  %v7607_v52 = vor.u32 %v9630_v45, %v7606_v44  ;;  %v9594_v55 = vld [vmem:[%s15000_s1 + $0xa8c] sm:$0xf0]  ;;  %4912 = vmatpush.bf16.msra.mxu1 %v7351_v47 }
  0x52   :  { %v7334_v51 = vld [vmem:[%s15000_s1 + $0x980] sm:$0xf]  ;;  %v9626_v57 = vld [vmem:[%s15000_s1 + $0xb8c] sm:$0xf0]  ;;  %v7207_v58 = vor.u32 %v9530_v50, %v7206_v49  ;;  %4925 = vmatpush.bf16.msra.mxu2 %v7479_v48 }
  0x53   :  { %v7462_v54 = vld [vmem:[%s15000_s1 + $0xa80] sm:$0xf]  ;;  %v7335_v59 = vor.u32 %v9562_v53, %v7334_v51  ;;  %v9526_v63 = vld [vmem:[%s15000_s1 + $0x86c] sm:$0xf0]  ;;  %4938 = vmatpush.bf16.msra.mxu3 %v7607_v52 }
  0x54   :  { %v7590_v56 = vld [vmem:[%s15000_s1 + $0xb80] sm:$0xf]  ;;  %v7463_v60 = vor.u32 %v9594_v55, %v7462_v54  ;;  %v9558_v5 = vld [vmem:[%s15000_s1 + $0x96c] sm:$0xf0]  ;;  %4900 = vmatpush.bf16.msra.mxu0 %v7207_v58 }
  0x55   :  { %v7190_v62 = vld [vmem:[%s15000_s1 + $0x860] sm:$0xf]  ;;  %v7591_v4 = vor.u32 %v9626_v57, %v7590_v56  ;;  %v9590_v7 = vld [vmem:[%s15000_s1 + $0xa6c] sm:$0xf0]  ;;  %4913 = vmatpush.bf16.msra.mxu1 %v7335_v59 }
  0x56   :  { %v7318_v3 = vld [vmem:[%s15000_s1 + $0x960] sm:$0xf]  ;;  %v9622_v9 = vld [vmem:[%s15000_s1 + $0xb6c] sm:$0xf0]  ;;  %v7191_v10 = vor.u32 %v9526_v63, %v7190_v62  ;;  %4926 = vmatpush.bf16.msra.mxu2 %v7463_v60 }
  0x57   :  { %v7446_v6 = vld [vmem:[%s15000_s1 + $0xa60] sm:$0xf]  ;;  %v7319_v11 = vor.u32 %v9558_v5, %v7318_v3  ;;  %v9522_v14 = vld [vmem:[%s15000_s1 + $0x84c] sm:$0xf0]  ;;  %4939 = vmatpush.bf16.msra.mxu3 %v7591_v4 }
  0x58   :  { %v7574_v8 = vld [vmem:[%s15000_s1 + $0xb60] sm:$0xf]  ;;  %v7447_v12 = vor.u32 %v9590_v7, %v7446_v6  ;;  %v9554_v17 = vld [vmem:[%s15000_s1 + $0x94c] sm:$0xf0]  ;;  %4901 = vmatpush.bf16.msra.mxu0 %v7191_v10 }
  0x59   :  { %v7174_v13 = vld [vmem:[%s15000_s1 + $0x840] sm:$0xf]  ;;  %v7575_v16 = vor.u32 %v9622_v9, %v7574_v8  ;;  %v9586_v19 = vld [vmem:[%s15000_s1 + $0xa4c] sm:$0xf0]  ;;  %4914 = vmatpush.bf16.msra.mxu1 %v7319_v11 }
  0x5a   :  { %v7302_v15 = vld [vmem:[%s15000_s1 + $0x940] sm:$0xf]  ;;  %v9618_v24 = vld [vmem:[%s15000_s1 + $0xb4c] sm:$0xf0]  ;;  %v7175_v25 = vor.u32 %v9522_v14, %v7174_v13  ;;  %4927 = vmatpush.bf16.msra.mxu2 %v7447_v12 }
  0x5b   :  { %v7430_v18 = vld [vmem:[%s15000_s1 + $0xa40] sm:$0xf]  ;;  %v7303_v27 = vor.u32 %v9554_v17, %v7302_v15  ;;  %v9518_v30 = vld [vmem:[%s15000_s1 + $0x82c] sm:$0xf0]  ;;  %4940 = vmatpush.bf16.msra.mxu3 %v7575_v16 }
  0x5c   :  { %v7558_v23 = vld [vmem:[%s15000_s1 + $0xb40] sm:$0xf]  ;;  %v7431_v28 = vor.u32 %v9586_v19, %v7430_v18  ;;  %v9550_v33 = vld [vmem:[%s15000_s1 + $0x92c] sm:$0xf0]  ;;  %4902 = vmatpush.bf16.msra.mxu0 %v7175_v25 }
  0x5d   :  { %v7158_v29 = vld [vmem:[%s15000_s1 + $0x820] sm:$0xf]  ;;  %v7559_v32 = vor.u32 %v9618_v24, %v7558_v23  ;;  %v9582_v35 = vld [vmem:[%s15000_s1 + $0xa2c] sm:$0xf0]  ;;  %4915 = vmatpush.bf16.msra.mxu1 %v7303_v27 }
  0x5e   :  { %v7286_v31 = vld [vmem:[%s15000_s1 + $0x920] sm:$0xf]  ;;  %v9614_v37 = vld [vmem:[%s15000_s1 + $0xb2c] sm:$0xf0]  ;;  %v7159_v38 = vor.u32 %v9518_v30, %v7158_v29  ;;  %4928 = vmatpush.bf16.msra.mxu2 %v7431_v28  ;;  %v10743_v28 = vld [vmem:[#allocation1 + $0x24] sm:$0xff] }
  0x5f   :  { %v7414_v34 = vld [vmem:[%s15000_s1 + $0xa20] sm:$0xf]  ;;  %v9514_v40 = vld [vmem:[%s15000_s1 + $0x80c] sm:$0xf0]  ;;  %v7287_v41 = vor.u32 %v9550_v33, %v7286_v31  ;;  %4941 = vmatpush.bf16.msra.mxu3 %v7559_v32  ;;  %v10745_v31 = vld [vmem:[#allocation1 + $0x36] sm:$0xff] }
  0x60   :  { %v7542_v36 = vld [vmem:[%s15000_s1 + $0xb20] sm:$0xf]  ;;  %v7415_v42 = vor.u32 %v9582_v35, %v7414_v34  ;;  %v9546_v44 = vld [vmem:[%s15000_s1 + $0x90c] sm:$0xf0]  ;;  %4903 = vmatpush.bf16.msra.mxu0 %v7159_v38 }
  0x61   :  { %v7142_v39 = vld [vmem:[%s15000_s1 + $0x800] sm:$0xf]  ;;  %v7543_v46 = vor.u32 %v9614_v37, %v7542_v36  ;;  %v9578_v47 = vld [vmem:[%s15000_s1 + $0xa0c] sm:$0xf0]  ;;  %4916 = vmatpush.bf16.msra.mxu1 %v7287_v41 }
  0x62   :  { %v7270_v43 = vld [vmem:[%s15000_s1 + $0x900] sm:$0xf]  ;;  %v9610_v49 = vld [vmem:[%s15000_s1 + $0xb0c] sm:$0xf0]  ;;  %v7143_v53 = vor.u32 %v9514_v40, %v7142_v39  ;;  %4929 = vmatpush.bf16.msra.mxu2 %v7415_v42 }
  0x63   :  { %v7398_v45 = vld [vmem:[%s15000_s1 + $0xa00] sm:$0xf]  ;;  %v9670_v51 = vld [vmem:[%s15000_s1 + $0xcec] sm:$0xf0]  ;;  %v7271_v57 = vor.u32 %v9546_v44, %v7270_v43  ;;  %4942 = vmatpush.bf16.msra.mxu3 %v7543_v46 }
  0x64   :  { %v7526_v48 = vld [vmem:[%s15000_s1 + $0xb00] sm:$0xf]  ;;  %v9702_v54 = vld [vmem:[%s15000_s1 + $0xdec] sm:$0xf0]  ;;  %v7399_v58 = vor.u32 %v9578_v47, %v7398_v45  ;;  %4904 = vmatpush.bf16.msra.mxu0 %v7143_v53 }
  0x65   :  { %v7766_v50 = vld [vmem:[%s15000_s1 + $0xce0] sm:$0xf]  ;;  %v9734_v56 = vld [vmem:[%s15000_s1 + $0xeec] sm:$0xf0]  ;;  %v7527_v62 = vor.u32 %v9610_v49, %v7526_v48  ;;  %4917 = vmatpush.bf16.msra.mxu1 %v7271_v57 }
  0x66   :  { %v7894_v52 = vld [vmem:[%s15000_s1 + $0xde0] sm:$0xf]  ;;  %v9766_v60 = vld [vmem:[%s15000_s1 + $0xfec] sm:$0xf0]  ;;  %v7767_v63 = vor.u32 %v9670_v51, %v7766_v50  ;;  %4930 = vmatpush.bf16.msra.mxu2 %v7399_v58 }
  0x67   :  { %v8022_v55 = vld [vmem:[%s15000_s1 + $0xee0] sm:$0xf]  ;;  %v17_v4 = vld [vmem:[%s15001_s0 + $0x10] sm:$0xff]  ;;  %v7895_v5 = vor.u32 %v9702_v54, %v7894_v52  ;;  %4943 = vmatpush.bf16.msra.mxu3 %v7527_v62 }
  0x68   :  { %v8150_v59 = vld [vmem:[%s15000_s1 + $0xfe0] sm:$0xf]  ;;  %v8023_v6 = vor.u32 %v9734_v56, %v8022_v55  ;;  %v9666_v8 = vld [vmem:[%s15000_s1 + $0xccc] sm:$0xf0]  ;;  %4949 = vmatpush.bf16.msrb.mxu0 %v7767_v63 }
  0x69   :  { %v7750_v3 = vld [vmem:[%s15000_s1 + $0xcc0] sm:$0xf]  ;;  %v9698_v10 = vld [vmem:[%s15000_s1 + $0xdcc] sm:$0xf0]  ;;  %v8151_v11 = vor.u32 %v9766_v60, %v8150_v59  ;;  %4962 = vmatpush.bf16.msrb.mxu1 %v7895_v5 }
  0x6a   :  { %v10702_v7 = vld [vmem:[#allocation1] sm:$0xff]  ;;  %v10713_v12 = vld [vmem:[#allocation1 + $0x12] sm:$0xff]  ;;  %v10715_v13 = vld [vmem:[#allocation1 + $0x9] sm:$0xff]  ;;  %v7751_v24 = vor.u32 %v9666_v8, %v7750_v3  ;;  %4975 = vmatpush.bf16.msrb.mxu2 %v8023_v6 }
  0x6b   :  { %v7878_v9 = vld [vmem:[%s15000_s1 + $0xdc0] sm:$0xf]  ;;  %v9730_v15 = vld [vmem:[%s15000_s1 + $0xecc] sm:$0xf0]  ;;  %4988 = vmatpush.bf16.msrb.mxu3 %v8151_v11  ;;  %4905 = vmatmul.bf16.vlgmr.msra.gmra.mxu0 %v10702_v7 }
  0x6c   :  { %v8006_v14 = vld [vmem:[%s15000_s1 + $0xec0] sm:$0xf]  ;;  %v9762_v18 = vld [vmem:[%s15000_s1 + $0xfcc] sm:$0xf0]  ;;  %v7879_v29 = vor.u32 %v9698_v10, %v7878_v9  ;;  %4931 = vmatmul.bf16.vlgmr.msra.gmra.mxu2 %v10713_v12  ;;  %4918 = vmatmul.bf16.vlgmr.msra.gmra.mxu1 %v10715_v13 }
  0x6d   :  { %v8134_v16 = vld [vmem:[%s15000_s1 + $0xfc0] sm:$0xf]  ;;  %v9662_v23 = vld [vmem:[%s15000_s1 + $0xcac] sm:$0xf0]  ;;  %v8007_v30 = vor.u32 %v9730_v15, %v8006_v14  ;;  %4950 = vmatpush.bf16.msrb.mxu0 %v7751_v24 }
  0x6e   :  { %v10726_v17 = vld [vmem:[#allocation1 + $0x1b] sm:$0xff]  ;;  %v9694_v27 = vld [vmem:[%s15000_s1 + $0xdac] sm:$0xf0]  ;;  %v8135_v34 = vor.u32 %v9762_v18, %v8134_v16  ;;  %4963 = vmatpush.bf16.msrb.mxu1 %v7879_v29 }
  0x6f   :  { %v7734_v19 = vld [vmem:[%s15000_s1 + $0xca0] sm:$0xf]  ;;  %v10747_v32 = vld [vmem:[#allocation1 + $0x2d] sm:$0xff]  ;;  %4944 = vmatmul.bf16.vlgmr.msra.gmra.mxu3 %v10726_v17  ;;  %4976 = vmatpush.bf16.msrb.mxu2 %v8007_v30 }
  0x70   :  { %v7862_v25 = vld [vmem:[%s15000_s1 + $0xda0] sm:$0xf]  ;;  %v9726_v36 = vld [vmem:[%s15000_s1 + $0xeac] sm:$0xf0]  ;;  %v7735_v39 = vor.u32 %v9662_v23, %v7734_v19  ;;  %4989 = vmatpush.bf16.msrb.mxu3 %v8135_v34 }
  0x71   :  { %v10749_v33 = vld [vmem:[#allocation1 + $0x3f] sm:$0xff]  ;;  %v9758_v38 = vld [vmem:[%s15000_s1 + $0xfac] sm:$0xf0]  ;;  %v7863_v40 = vor.u32 %v9694_v27, %v7862_v25 }
  0x72   :  { %v7990_v35 = vld [vmem:[%s15000_s1 + $0xea0] sm:$0xf]  ;;  %834 = vst [vmem:[#allocation1] ss:$9 sm:$0xff] %v17_v4  ;;  %v9658_v43 = vld [vmem:[%s15000_s1 + $0xc8c] sm:$0xf0]  ;;  %4951 = vmatpush.bf16.msrb.mxu0 %v7735_v39 }
  0x73   :  { %v8118_v37 = vld [vmem:[%s15000_s1 + $0xfa0] sm:$0xf]  ;;  %v7991_v41 = vor.u32 %v9726_v36, %v7990_v35  ;;  %v9690_v46 = vld [vmem:[%s15000_s1 + $0xd8c] sm:$0xf0]  ;;  %4964 = vmatpush.bf16.msrb.mxu1 %v7863_v40 }
  0x74   :  { %v7718_v42 = vld [vmem:[%s15000_s1 + $0xc80] sm:$0xf]  ;;  %v8119_v45 = vor.u32 %v9758_v38, %v8118_v37  ;;  %v9722_v48 = vld [vmem:[%s15000_s1 + $0xe8c] sm:$0xf0] }
  0x75   :  { %v7846_v44 = vld [vmem:[%s15000_s1 + $0xd80] sm:$0xf]  ;;  %v9754_v50 = vld [vmem:[%s15000_s1 + $0xf8c] sm:$0xf0]  ;;  %v7719_v51 = vor.u32 %v9658_v43, %v7718_v42  ;;  %4977 = vmatpush.bf16.msrb.mxu2 %v7991_v41 }
  0x76   :  { %v7974_v47 = vld [vmem:[%s15000_s1 + $0xe80] sm:$0xf]  ;;  %v7847_v52 = vor.u32 %v9690_v46, %v7846_v44  ;;  %v9654_v55 = vld [vmem:[%s15000_s1 + $0xc6c] sm:$0xf0]  ;;  %4990 = vmatpush.bf16.msrb.mxu3 %v8119_v45 }
  0x77   :  { %v8102_v49 = vld [vmem:[%s15000_s1 + $0xf80] sm:$0xf]  ;;  %v7975_v53 = vor.u32 %v9722_v48, %v7974_v47  ;;  %v9686_v58 = vld [vmem:[%s15000_s1 + $0xd6c] sm:$0xf0]  ;;  %4952 = vmatpush.bf16.msrb.mxu0 %v7719_v51 }
  0x78   :  { %v7702_v54 = vld [vmem:[%s15000_s1 + $0xc60] sm:$0xf]  ;;  %v8103_v57 = vor.u32 %v9754_v50, %v8102_v49  ;;  %v9718_v60 = vld [vmem:[%s15000_s1 + $0xe6c] sm:$0xf0]  ;;  %4965 = vmatpush.bf16.msrb.mxu1 %v7847_v52 }
  0x79   :  { %v7830_v56 = vld [vmem:[%s15000_s1 + $0xd60] sm:$0xf]  ;;  %v9750_v63 = vld [vmem:[%s15000_s1 + $0xf6c] sm:$0xf0]  ;;  %v7703_v3 = vor.u32 %v9654_v55, %v7702_v54  ;;  %4978 = vmatpush.bf16.msrb.mxu2 %v7975_v53 }
  0x7a   :  { %v7958_v59 = vld [vmem:[%s15000_s1 + $0xe60] sm:$0xf]  ;;  %v7831_v4 = vor.u32 %v9686_v58, %v7830_v56  ;;  %v9650_v8 = vld [vmem:[%s15000_s1 + $0xc4c] sm:$0xf0]  ;;  %4991 = vmatpush.bf16.msrb.mxu3 %v8103_v57 }
  0x7b   :  { %v8086_v62 = vld [vmem:[%s15000_s1 + $0xf60] sm:$0xf]  ;;  %v7959_v5 = vor.u32 %v9718_v60, %v7958_v59  ;;  %v9682_v11 = vld [vmem:[%s15000_s1 + $0xd4c] sm:$0xf0]  ;;  %4953 = vmatpush.bf16.msrb.mxu0 %v7703_v3 }
  0x7c   :  { %v7686_v6 = vld [vmem:[%s15000_s1 + $0xc40] sm:$0xf]  ;;  %v8087_v10 = vor.u32 %v9750_v63, %v8086_v62  ;;  %v9714_v15 = vld [vmem:[%s15000_s1 + $0xe4c] sm:$0xf0]  ;;  %4966 = vmatpush.bf16.msrb.mxu1 %v7831_v4 }
  0x7d   :  { %v7814_v9 = vld [vmem:[%s15000_s1 + $0xd40] sm:$0xf]  ;;  %v9746_v18 = vld [vmem:[%s15000_s1 + $0xf4c] sm:$0xf0]  ;;  %v7687_v19 = vor.u32 %v9650_v8, %v7686_v6  ;;  %4979 = vmatpush.bf16.msrb.mxu2 %v7959_v5 }
  0x7e   :  { %v7942_v14 = vld [vmem:[%s15000_s1 + $0xe40] sm:$0xf]  ;;  %v7815_v23 = vor.u32 %v9682_v11, %v7814_v9  ;;  %v9646_v27 = vld [vmem:[%s15000_s1 + $0xc2c] sm:$0xf0]  ;;  %4992 = vmatpush.bf16.msrb.mxu3 %v8087_v10 }
  0x7f   :  { %v8070_v16 = vld [vmem:[%s15000_s1 + $0xf40] sm:$0xf]  ;;  %v7943_v24 = vor.u32 %v9714_v15, %v7942_v14  ;;  %v9678_v34 = vld [vmem:[%s15000_s1 + $0xd2c] sm:$0xf0]  ;;  %4954 = vmatpush.bf16.msrb.mxu0 %v7687_v19 }
  0x80   :  { %v7670_v25 = vld [vmem:[%s15000_s1 + $0xc20] sm:$0xf]  ;;  %v8071_v30 = vor.u32 %v9746_v18, %v8070_v16  ;;  %v9710_v36 = vld [vmem:[%s15000_s1 + $0xe2c] sm:$0xf0]  ;;  %4967 = vmatpush.bf16.msrb.mxu1 %v7815_v23 }
  0x81   :  { %v7798_v29 = vld [vmem:[%s15000_s1 + $0xd20] sm:$0xf]  ;;  %v9742_v38 = vld [vmem:[%s15000_s1 + $0xf2c] sm:$0xf0]  ;;  %v7671_v39 = vor.u32 %v9646_v27, %v7670_v25  ;;  %4980 = vmatpush.bf16.msrb.mxu2 %v7943_v24 }
  0x82   :  { %v7926_v35 = vld [vmem:[%s15000_s1 + $0xe20] sm:$0xf]  ;;  %v9642_v41 = vld [vmem:[%s15000_s1 + $0xc0c] sm:$0xf0]  ;;  %v7799_v42 = vor.u32 %v9678_v34, %v7798_v29  ;;  %4993 = vmatpush.bf16.msrb.mxu3 %v8071_v30 }
  0x83   :  { %v8054_v37 = vld [vmem:[%s15000_s1 + $0xf20] sm:$0xf]  ;;  %v7927_v43 = vor.u32 %v9710_v36, %v7926_v35  ;;  %v9674_v45 = vld [vmem:[%s15000_s1 + $0xd0c] sm:$0xf0]  ;;  %4955 = vmatpush.bf16.msrb.mxu0 %v7671_v39 }
  0x84   :  { %v7654_v40 = vld [vmem:[%s15000_s1 + $0xc00] sm:$0xf]  ;;  %v8055_v47 = vor.u32 %v9742_v38, %v8054_v37  ;;  %v9706_v48 = vld [vmem:[%s15000_s1 + $0xe0c] sm:$0xf0]  ;;  %4968 = vmatpush.bf16.msrb.mxu1 %v7799_v42 }
  0x85   :  { %v7782_v44 = vld [vmem:[%s15000_s1 + $0xd00] sm:$0xf]  ;;  %v9738_v50 = vld [vmem:[%s15000_s1 + $0xf0c] sm:$0xf0]  ;;  %v7655_v54 = vor.u32 %v9642_v41, %v7654_v40  ;;  %4981 = vmatpush.bf16.msrb.mxu2 %v7927_v43 }
  0x86   :  { %v7910_v46 = vld [vmem:[%s15000_s1 + $0xe00] sm:$0xf]  ;;  %v9798_v52 = vld [vmem:[%s15000_s1 + $0x10ec] sm:$0xf0]  ;;  %v7783_v58 = vor.u32 %v9674_v45, %v7782_v44  ;;  %4994 = vmatpush.bf16.msrb.mxu3 %v8055_v47 }
  0x87   :  { %v8038_v49 = vld [vmem:[%s15000_s1 + $0xf00] sm:$0xf]  ;;  %v9830_v55 = vld [vmem:[%s15000_s1 + $0x11ec] sm:$0xf0]  ;;  %v7911_v59 = vor.u32 %v9706_v48, %v7910_v46  ;;  %4956 = vmatpush.bf16.msrb.mxu0 %v7655_v54 }
  0x88   :  { %v8278_v51 = vld [vmem:[%s15000_s1 + $0x10e0] sm:$0xf]  ;;  %v9862_v57 = vld [vmem:[%s15000_s1 + $0x12ec] sm:$0xf0]  ;;  %v8039_v63 = vor.u32 %v9738_v50, %v8038_v49  ;;  %4969 = vmatpush.bf16.msrb.mxu1 %v7783_v58 }
  0x89   :  { %v8406_v53 = vld [vmem:[%s15000_s1 + $0x11e0] sm:$0xf]  ;;  %v9894_v62 = vld [vmem:[%s15000_s1 + $0x13ec] sm:$0xf0]  ;;  %v8279_v3 = vor.u32 %v9798_v52, %v8278_v51  ;;  %4982 = vmatpush.bf16.msrb.mxu2 %v7911_v59 }
  0x8a   :  { %v8534_v56 = vld [vmem:[%s15000_s1 + $0x12e0] sm:$0xf]  ;;  %v8407_v4 = vor.u32 %v9830_v55, %v8406_v53  ;;  %v9794_v8 = vld [vmem:[%s15000_s1 + $0x10cc] sm:$0xf0]  ;;  %4995 = vmatpush.bf16.msrb.mxu3 %v8039_v63  ;;  %4957 = vmatmul.bf16.vlgmr.msrb.gmra.mxu0 %v10743_v28 }
  0x8b   :  { %v8662_v60 = vld [vmem:[%s15000_s1 + $0x13e0] sm:$0xf]  ;;  %v8535_v5 = vor.u32 %v9862_v57, %v8534_v56  ;;  %v9826_v11 = vld [vmem:[%s15000_s1 + $0x11cc] sm:$0xf0]  ;;  %5001 = vmatpush.bf16.msra.mxu0 %v8279_v3  ;;  %4970 = vmatmul.bf16.vlgmr.msrb.gmra.mxu1 %v10747_v32 }
  0x8c   :  { %v8262_v6 = vld [vmem:[%s15000_s1 + $0x10c0] sm:$0xf]  ;;  %v8663_v10 = vor.u32 %v9894_v62, %v8662_v60  ;;  %v9858_v15 = vld [vmem:[%s15000_s1 + $0x12cc] sm:$0xf0]  ;;  %5014 = vmatpush.bf16.msra.mxu1 %v8407_v4  ;;  %4983 = vmatmul.bf16.vlgmr.msrb.gmra.mxu2 %v10745_v31 }
  0x8d   :  { %v8390_v9 = vld [vmem:[%s15000_s1 + $0x11c0] sm:$0xf]  ;;  %v9890_v18 = vld [vmem:[%s15000_s1 + $0x13cc] sm:$0xf0]  ;;  %v8263_v19 = vor.u32 %v9794_v8, %v8262_v6  ;;  %5027 = vmatpush.bf16.msra.mxu2 %v8535_v5  ;;  %4996 = vmatmul.bf16.vlgmr.msrb.gmra.mxu3 %v10749_v33 }
  0x8e   :  { %v8518_v14 = vld [vmem:[%s15000_s1 + $0x12c0] sm:$0xf]  ;;  %v8391_v23 = vor.u32 %v9826_v11, %v8390_v9  ;;  %v9790_v27 = vld [vmem:[%s15000_s1 + $0x10ac] sm:$0xf0]  ;;  %5040 = vmatpush.bf16.msra.mxu3 %v8663_v10 }
  0x8f   :  { %v8646_v16 = vld [vmem:[%s15000_s1 + $0x13c0] sm:$0xf]  ;;  %v8519_v24 = vor.u32 %v9858_v15, %v8518_v14  ;;  %v9822_v34 = vld [vmem:[%s15000_s1 + $0x11ac] sm:$0xf0]  ;;  %5002 = vmatpush.bf16.msra.mxu0 %v8263_v19 }
  0x90   :  { %v8246_v25 = vld [vmem:[%s15000_s1 + $0x10a0] sm:$0xf]  ;;  %v8647_v30 = vor.u32 %v9890_v18, %v8646_v16  ;;  %v9854_v36 = vld [vmem:[%s15000_s1 + $0x12ac] sm:$0xf0]  ;;  %5015 = vmatpush.bf16.msra.mxu1 %v8391_v23 }
  0x91   :  { %v8374_v29 = vld [vmem:[%s15000_s1 + $0x11a0] sm:$0xf]  ;;  %v9886_v38 = vld [vmem:[%s15000_s1 + $0x13ac] sm:$0xf0]  ;;  %v8247_v39 = vor.u32 %v9790_v27, %v8246_v25  ;;  %5028 = vmatpush.bf16.msra.mxu2 %v8519_v24 }
  0x92   :  { %v8502_v35 = vld [vmem:[%s15000_s1 + $0x12a0] sm:$0xf]  ;;  %v8375_v40 = vor.u32 %v9822_v34, %v8374_v29  ;;  %v9786_v43 = vld [vmem:[%s15000_s1 + $0x108c] sm:$0xf0]  ;;  %5041 = vmatpush.bf16.msra.mxu3 %v8647_v30 }
  0x93   :  { %v8630_v37 = vld [vmem:[%s15000_s1 + $0x13a0] sm:$0xf]  ;;  %v8503_v41 = vor.u32 %v9854_v36, %v8502_v35  ;;  %v9818_v46 = vld [vmem:[%s15000_s1 + $0x118c] sm:$0xf0]  ;;  %5003 = vmatpush.bf16.msra.mxu0 %v8247_v39 }
  0x94   :  { %v8230_v42 = vld [vmem:[%s15000_s1 + $0x1080] sm:$0xf]  ;;  %v8631_v45 = vor.u32 %v9886_v38, %v8630_v37  ;;  %v9850_v48 = vld [vmem:[%s15000_s1 + $0x128c] sm:$0xf0]  ;;  %5016 = vmatpush.bf16.msra.mxu1 %v8375_v40 }
  0x95   :  { %v8358_v44 = vld [vmem:[%s15000_s1 + $0x1180] sm:$0xf]  ;;  %v9882_v50 = vld [vmem:[%s15000_s1 + $0x138c] sm:$0xf0]  ;;  %v8231_v51 = vor.u32 %v9786_v43, %v8230_v42  ;;  %5029 = vmatpush.bf16.msra.mxu2 %v8503_v41 }
  0x96   :  { %v8486_v47 = vld [vmem:[%s15000_s1 + $0x1280] sm:$0xf]  ;;  %v8359_v52 = vor.u32 %v9818_v46, %v8358_v44  ;;  %v9782_v55 = vld [vmem:[%s15000_s1 + $0x106c] sm:$0xf0]  ;;  %5042 = vmatpush.bf16.msra.mxu3 %v8631_v45 }
  0x97   :  { %v8614_v49 = vld [vmem:[%s15000_s1 + $0x1380] sm:$0xf]  ;;  %v8487_v53 = vor.u32 %v9850_v48, %v8486_v47  ;;  %v9814_v58 = vld [vmem:[%s15000_s1 + $0x116c] sm:$0xf0]  ;;  %5004 = vmatpush.bf16.msra.mxu0 %v8231_v51 }
  0x98   :  { %v8214_v54 = vld [vmem:[%s15000_s1 + $0x1060] sm:$0xf]  ;;  %v8615_v57 = vor.u32 %v9882_v50, %v8614_v49  ;;  %v9846_v60 = vld [vmem:[%s15000_s1 + $0x126c] sm:$0xf0]  ;;  %5017 = vmatpush.bf16.msra.mxu1 %v8359_v52 }
  0x99   :  { %v8342_v56 = vld [vmem:[%s15000_s1 + $0x1160] sm:$0xf]  ;;  %v9878_v63 = vld [vmem:[%s15000_s1 + $0x136c] sm:$0xf0]  ;;  %v8215_v3 = vor.u32 %v9782_v55, %v8214_v54  ;;  %5030 = vmatpush.bf16.msra.mxu2 %v8487_v53 }
  0x9a   :  { %v8470_v59 = vld [vmem:[%s15000_s1 + $0x1260] sm:$0xf]  ;;  %v8343_v4 = vor.u32 %v9814_v58, %v8342_v56  ;;  %v9778_v8 = vld [vmem:[%s15000_s1 + $0x104c] sm:$0xf0]  ;;  %5043 = vmatpush.bf16.msra.mxu3 %v8615_v57 }
  0x9b   :  { %v8598_v62 = vld [vmem:[%s15000_s1 + $0x1360] sm:$0xf]  ;;  %v8471_v5 = vor.u32 %v9846_v60, %v8470_v59  ;;  %v9810_v11 = vld [vmem:[%s15000_s1 + $0x114c] sm:$0xf0]  ;;  %5005 = vmatpush.bf16.msra.mxu0 %v8215_v3 }
  0x9c   :  { %v8198_v6 = vld [vmem:[%s15000_s1 + $0x1040] sm:$0xf]  ;;  %v8599_v10 = vor.u32 %v9878_v63, %v8598_v62  ;;  %v9842_v15 = vld [vmem:[%s15000_s1 + $0x124c] sm:$0xf0]  ;;  %5018 = vmatpush.bf16.msra.mxu1 %v8343_v4 }
  0x9d   :  { %v8326_v9 = vld [vmem:[%s15000_s1 + $0x1140] sm:$0xf]  ;;  %v9874_v18 = vld [vmem:[%s15000_s1 + $0x134c] sm:$0xf0]  ;;  %v8199_v19 = vor.u32 %v9778_v8, %v8198_v6  ;;  %5031 = vmatpush.bf16.msra.mxu2 %v8471_v5  ;;  %v18_v5 = vld [vmem:[%s15001_s0 + $0x18] sm:$0x1] }
  0x9e   :  { %v8454_v14 = vld [vmem:[%s15000_s1 + $0x1240] sm:$0xf]  ;;  %v8327_v23 = vor.u32 %v9810_v11, %v8326_v9  ;;  %v9774_v27 = vld [vmem:[%s15000_s1 + $0x102c] sm:$0xf0]  ;;  %5044 = vmatpush.bf16.msra.mxu3 %v8599_v10 }
  0x9f   :  { %v8582_v16 = vld [vmem:[%s15000_s1 + $0x1340] sm:$0xf]  ;;  %v8455_v24 = vor.u32 %v9842_v15, %v8454_v14  ;;  %v9806_v34 = vld [vmem:[%s15000_s1 + $0x112c] sm:$0xf0]  ;;  %5006 = vmatpush.bf16.msra.mxu0 %v8199_v19 }
  0xa0   :  { %v8182_v25 = vld [vmem:[%s15000_s1 + $0x1020] sm:$0xf]  ;;  %v8583_v30 = vor.u32 %v9874_v18, %v8582_v16  ;;  %v9838_v36 = vld [vmem:[%s15000_s1 + $0x122c] sm:$0xf0]  ;;  %5019 = vmatpush.bf16.msra.mxu1 %v8327_v23 }
  0xa1   :  { %v8310_v29 = vld [vmem:[%s15000_s1 + $0x1120] sm:$0xf]  ;;  %v9870_v38 = vld [vmem:[%s15000_s1 + $0x132c] sm:$0xf0]  ;;  %v8183_v39 = vor.u32 %v9774_v27, %v8182_v25  ;;  %5032 = vmatpush.bf16.msra.mxu2 %v8455_v24 }
  0xa2   :  { %v8438_v35 = vld [vmem:[%s15000_s1 + $0x1220] sm:$0xf]  ;;  %v9770_v41 = vld [vmem:[%s15000_s1 + $0x100c] sm:$0xf0]  ;;  %v8311_v42 = vor.u32 %v9806_v34, %v8310_v29  ;;  %5045 = vmatpush.bf16.msra.mxu3 %v8583_v30 }
  0xa3   :  { %v8566_v37 = vld [vmem:[%s15000_s1 + $0x1320] sm:$0xf]  ;;  %v8439_v43 = vor.u32 %v9838_v36, %v8438_v35  ;;  %v9802_v45 = vld [vmem:[%s15000_s1 + $0x110c] sm:$0xf0]  ;;  %5007 = vmatpush.bf16.msra.mxu0 %v8183_v39 }
  0xa4   :  { %v8166_v40 = vld [vmem:[%s15000_s1 + $0x1000] sm:$0xf]  ;;  %v8567_v47 = vor.u32 %v9870_v38, %v8566_v37  ;;  %v9834_v48 = vld [vmem:[%s15000_s1 + $0x120c] sm:$0xf0]  ;;  %5020 = vmatpush.bf16.msra.mxu1 %v8311_v42  ;;  %v11154_v37 = vld [vmem:[#allocation1 + $0x24] sm:$0xff] }
  0xa5   :  { %v8294_v44 = vld [vmem:[%s15000_s1 + $0x1100] sm:$0xf]  ;;  %v9866_v50 = vld [vmem:[%s15000_s1 + $0x130c] sm:$0xf0]  ;;  %v8167_v54 = vor.u32 %v9770_v41, %v8166_v40  ;;  %5033 = vmatpush.bf16.msra.mxu2 %v8439_v43  ;;  %v11156_v40 = vld [vmem:[#allocation1 + $0x36] sm:$0xff] }
  0xa6   :  { %v8422_v46 = vld [vmem:[%s15000_s1 + $0x1200] sm:$0xf]  ;;  %v9926_v52 = vld [vmem:[%s15000_s1 + $0x14ec] sm:$0xf0]  ;;  %v8295_v58 = vor.u32 %v9802_v45, %v8294_v44  ;;  %5046 = vmatpush.bf16.msra.mxu3 %v8567_v47 }
  0xa7   :  { %v8550_v49 = vld [vmem:[%s15000_s1 + $0x1300] sm:$0xf]  ;;  %v9958_v55 = vld [vmem:[%s15000_s1 + $0x15ec] sm:$0xf0]  ;;  %v8423_v59 = vor.u32 %v9834_v48, %v8422_v46  ;;  %5008 = vmatpush.bf16.msra.mxu0 %v8167_v54 }
  0xa8   :  { %v8790_v51 = vld [vmem:[%s15000_s1 + $0x14e0] sm:$0xf]  ;;  %v9990_v57 = vld [vmem:[%s15000_s1 + $0x16ec] sm:$0xf0]  ;;  %v8551_v63 = vor.u32 %v9866_v50, %v8550_v49  ;;  %5021 = vmatpush.bf16.msra.mxu1 %v8295_v58 }
  0xa9   :  { %v8918_v53 = vld [vmem:[%s15000_s1 + $0x15e0] sm:$0xf]  ;;  %v10022_v62 = vld [vmem:[%s15000_s1 + $0x17ec] sm:$0xf0]  ;;  %v8791_v3 = vor.u32 %v9926_v52, %v8790_v51  ;;  %5034 = vmatpush.bf16.msra.mxu2 %v8423_v59 }
  0xaa   :  { %v9046_v56 = vld [vmem:[%s15000_s1 + $0x16e0] sm:$0xf]  ;;  %v8919_v6 = vor.u32 %v9958_v55, %v8918_v53  ;;  %v9922_v10 = vld [vmem:[%s15000_s1 + $0x14cc] sm:$0xf0]  ;;  %5047 = vmatpush.bf16.msra.mxu3 %v8551_v63 }
  0xab   :  { %v9174_v60 = vld [vmem:[%s15000_s1 + $0x17e0] sm:$0xf]  ;;  %v9047_v8 = vor.u32 %v9990_v57, %v9046_v56  ;;  %v9954_v14 = vld [vmem:[%s15000_s1 + $0x15cc] sm:$0xf0]  ;;  %5053 = vmatpush.bf16.msrb.mxu0 %v8791_v3 }
  0xac   :  { %v8774_v4 = vld [vmem:[%s15000_s1 + $0x14c0] sm:$0xf]  ;;  %v9175_v15 = vor.u32 %v10022_v62, %v9174_v60  ;;  %v11124_v16 = vld [vmem:[#allocation1 + $0x12] sm:$0xff]  ;;  %v11126_v18 = vld [vmem:[#allocation1 + $0x9] sm:$0xff]  ;;  %5066 = vmatpush.bf16.msrb.mxu1 %v8919_v6 }
  0xad   :  { %v11113_v9 = vld [vmem:[#allocation1] sm:$0xff]  ;;  %v9986_v23 = vld [vmem:[%s15000_s1 + $0x16cc] sm:$0xf0]  ;;  %v8775_v34 = vor.u32 %v9922_v10, %v8774_v4  ;;  %5079 = vmatpush.bf16.msrb.mxu2 %v9047_v8  ;;  %5022 = vmatmul.bf16.vlgmr.msra.gmra.mxu1 %v11126_v18 }
  0xae   :  { %v8902_v11 = vld [vmem:[%s15000_s1 + $0x15c0] sm:$0xf]  ;;  %v10018_v27 = vld [vmem:[%s15000_s1 + $0x17cc] sm:$0xf0]  ;;  %5092 = vmatpush.bf16.msrb.mxu3 %v9175_v15  ;;  %5009 = vmatmul.bf16.vlgmr.msra.gmra.mxu0 %v11113_v9 }
  0xaf   :  { %v9030_v19 = vld [vmem:[%s15000_s1 + $0x16c0] sm:$0xf]  ;;  %v9918_v30 = vld [vmem:[%s15000_s1 + $0x14ac] sm:$0xf0]  ;;  %v8903_v38 = vor.u32 %v9954_v14, %v8902_v11  ;;  %5035 = vmatmul.bf16.vlgmr.msra.gmra.mxu2 %v11124_v16  ;;  %5054 = vmatpush.bf16.msrb.mxu0 %v8775_v34 }
  0xb0   :  { %v9158_v24 = vld [vmem:[%s15000_s1 + $0x17c0] sm:$0xf]  ;;  %v9950_v36 = vld [vmem:[%s15000_s1 + $0x15ac] sm:$0xf0]  ;;  %v9031_v39 = vor.u32 %v9986_v23, %v9030_v19 }
  0xb1   :  { %v11137_v25 = vld [vmem:[#allocation1 + $0x1b] sm:$0xff]  ;;  %v11158_v41 = vld [vmem:[#allocation1 + $0x2d] sm:$0xff]  ;;  %v9159_v43 = vor.u32 %v10018_v27, %v9158_v24  ;;  %5067 = vmatpush.bf16.msrb.mxu1 %v8903_v38 }
  0xb2   :  { %v8758_v29 = vld [vmem:[%s15000_s1 + $0x14a0] sm:$0xf]  ;;  %v9982_v45 = vld [vmem:[%s15000_s1 + $0x16ac] sm:$0xf0]  ;;  %5048 = vmatmul.bf16.vlgmr.msra.gmra.mxu3 %v11137_v25  ;;  %5080 = vmatpush.bf16.msrb.mxu2 %v9031_v39 }
  0xb3   :  { %v8886_v35 = vld [vmem:[%s15000_s1 + $0x15a0] sm:$0xf]  ;;  %v10014_v47 = vld [vmem:[%s15000_s1 + $0x17ac] sm:$0xf0]  ;;  %v8759_v48 = vor.u32 %v9918_v30, %v8758_v29  ;;  %5093 = vmatpush.bf16.msrb.mxu3 %v9159_v43 }
  0xb4   :  { %v11160_v42 = vld [vmem:[#allocation1 + $0x3f] sm:$0xff]  ;;  %v8887_v49 = vor.u32 %v9950_v36, %v8886_v35  ;;  %v9914_v52 = vld [vmem:[%s15000_s1 + $0x148c] sm:$0xf0] }
  0xb5   :  { %v9014_v44 = vld [vmem:[%s15000_s1 + $0x16a0] sm:$0xf]  ;;  %844 = vst [vmem:[#allocation1] ss:$9 sm:$0xff] %v18_v5  ;;  %v9946_v55 = vld [vmem:[%s15000_s1 + $0x158c] sm:$0xf0]  ;;  %5055 = vmatpush.bf16.msrb.mxu0 %v8759_v48 }
  0xb6   :  { %v9142_v46 = vld [vmem:[%s15000_s1 + $0x17a0] sm:$0xf]  ;;  %v9015_v50 = vor.u32 %v9982_v45, %v9014_v44  ;;  %v9978_v57 = vld [vmem:[%s15000_s1 + $0x168c] sm:$0xf0]  ;;  %5068 = vmatpush.bf16.msrb.mxu1 %v8887_v49 }
  0xb7   :  { %v8742_v51 = vld [vmem:[%s15000_s1 + $0x1480] sm:$0xf]  ;;  %v9143_v54 = vor.u32 %v10014_v47, %v9142_v46  ;;  %v10010_v59 = vld [vmem:[%s15000_s1 + $0x178c] sm:$0xf0]  ;;  %v4802_v47 = vpop.f32.mrf.mxu0 }
  0xb8   :  { %v8870_v53 = vld [vmem:[%s15000_s1 + $0x1580] sm:$0xf]  ;;  %v8743_v60 = vor.u32 %v9914_v52, %v8742_v51  ;;  %5081 = vmatpush.bf16.msrb.mxu2 %v9015_v50  ;;  %v9910_v4 = vld [vmem:[%s15000_s1 + $0x146c] sm:$0xf0] }
  0xb9   :  { %v8998_v56 = vld [vmem:[%s15000_s1 + $0x1680] sm:$0xf]  ;;  %v8871_v63 = vor.u32 %v9946_v55, %v8870_v53  ;;  %v9942_v6 = vld [vmem:[%s15000_s1 + $0x156c] sm:$0xf0]  ;;  %5094 = vmatpush.bf16.msrb.mxu3 %v9143_v54  ;;  %v4815_v54 = vpop.f32.mrf.mxu1 }
  0xba   :  { %v9126_v58 = vld [vmem:[%s15000_s1 + $0x1780] sm:$0xf]  ;;  %v8999_v3 = vor.u32 %v9978_v57, %v8998_v56  ;;  %v9974_v11 = vld [vmem:[%s15000_s1 + $0x166c] sm:$0xf0]  ;;  %5056 = vmatpush.bf16.msrb.mxu0 %v8743_v60 }
  0xbb   :  { %v8726_v62 = vld [vmem:[%s15000_s1 + $0x1460] sm:$0xf]  ;;  %v9127_v8 = vor.u32 %v10010_v59, %v9126_v58  ;;  %v10006_v19 = vld [vmem:[%s15000_s1 + $0x176c] sm:$0xf0]  ;;  %5069 = vmatpush.bf16.msrb.mxu1 %v8871_v63 }
  0xbc   :  { %v8854_v5 = vld [vmem:[%s15000_s1 + $0x1560] sm:$0xf]  ;;  %v8727_v23 = vor.u32 %v9910_v4, %v8726_v62  ;;  %5082 = vmatpush.bf16.msrb.mxu2 %v8999_v3  ;;  %v9906_v30 = vld [vmem:[%s15000_s1 + $0x144c] sm:$0xf0] }
  0xbd   :  { %v8982_v10 = vld [vmem:[%s15000_s1 + $0x1660] sm:$0xf]  ;;  %v8855_v27 = vor.u32 %v9942_v6, %v8854_v5  ;;  %5095 = vmatpush.bf16.msrb.mxu3 %v9127_v8  ;;  %v9938_v38 = vld [vmem:[%s15000_s1 + $0x154c] sm:$0xf0] }
  0xbe   :  { %v803_v14 = vld [vmem:[%s15002_s2] sm:$0xf]  ;;  %v8983_v29 = vor.u32 %v9974_v11, %v8982_v10  ;;  %v9970_v43 = vld [vmem:[%s15000_s1 + $0x164c] sm:$0xf0]  ;;  %5057 = vmatpush.bf16.msrb.mxu0 %v8727_v23 }
  0xbf   :  { %v9110_v15 = vld [vmem:[%s15000_s1 + $0x1760] sm:$0xf]  ;;  %v805_v35 = vperm.slane %v803_v14, 0  ;;  %v10002_v45 = vld [vmem:[%s15000_s1 + $0x174c] sm:$0xf0]  ;;  %5070 = vmatpush.bf16.msrb.mxu1 %v8855_v27  ;;  %v4828_v14 = vpop.f32.mrf.mxu2 }
  0xc0   :  { %v8710_v24 = vld [vmem:[%s15000_s1 + $0x1440] sm:$0xf]  ;;  %v9111_v36 = vor.u32 %v10006_v19, %v9110_v15  ;;  %5083 = vmatpush.bf16.msrb.mxu2 %v8983_v29  ;;  %v9902_v51 = vld [vmem:[%s15000_s1 + $0x142c] sm:$0xf0]  ;;  %v4841_v29 = vpop.f32.mrf.mxu3 }
  0xc1   :  { %v8838_v34 = vld [vmem:[%s15000_s1 + $0x1540] sm:$0xf]  ;;  %v8711_v46 = vor.u32 %v9906_v30, %v8710_v24  ;;  %v4803_v53 = vadd.f32 %v4802_v47, %v805_v35  ;;  %v9934_v56 = vld [vmem:[%s15000_s1 + $0x152c] sm:$0xf0]  ;;  %v9284_v35 = vld [vmem:[%s15000_s1 + $0xe4] sm:$0xf] }
  0xc2   :  { %v8966_v39 = vld [vmem:[%s15000_s1 + $0x1640] sm:$0xf]  ;;  %v8839_v48 = vor.u32 %v9938_v38, %v8838_v34  ;;  %5096 = vmatpush.bf16.msrb.mxu3 %v9111_v36  ;;  %v9966_v58 = vld [vmem:[%s15000_s1 + $0x162c] sm:$0xf0]  ;;  %v6232_v38 = vld [vmem:[%s15000_s1 + $0xf0] sm:$0xf0] }
  0xc3   :  { %v9094_v44 = vld [vmem:[%s15000_s1 + $0x1740] sm:$0xf]  ;;  %v8967_v49 = vor.u32 %v9970_v43, %v8966_v39  ;;  %v9998_v60 = vld [vmem:[%s15000_s1 + $0x172c] sm:$0xf0]  ;;  %v4816_v62 = vadd.f32 %v4815_v54, %v4803_v53  ;;  %5058 = vmatpush.bf16.msrb.mxu0 %v8711_v46  ;;  %v9316_v39 = vld [vmem:[%s15000_s1 + $0x1e4] sm:$0xf]  ;;  %v6235_v53 = vor.u32 %v9284_v35, %v6232_v38 }
  0xc4   :  { %v8694_v50 = vld [vmem:[%s15000_s1 + $0x1420] sm:$0xf]  ;;  %v9095_v55 = vor.u32 %v10002_v45, %v9094_v44  ;;  %v9898_v4 = vld [vmem:[%s15000_s1 + $0x140c] sm:$0xf0]  ;;  %5071 = vmatpush.bf16.msrb.mxu1 %v8839_v48  ;;  %v6360_v43 = vld [vmem:[%s15000_s1 + $0x1f0] sm:$0xf0]  ;;  %v4804_v45 = vpop.f32.mrf.mxu0 }
  0xc5   :  { %v8822_v52 = vld [vmem:[%s15000_s1 + $0x1520] sm:$0xf]  ;;  %v8695_v63 = vor.u32 %v9902_v51, %v8694_v50  ;;  %5084 = vmatpush.bf16.msrb.mxu2 %v8967_v49  ;;  %v9930_v10 = vld [vmem:[%s15000_s1 + $0x150c] sm:$0xf0]  ;;  %v4829_v27 = vadd.f32 %v4828_v14, %v4816_v62  ;;  %v9348_v48 = vld [vmem:[%s15000_s1 + $0x2e4] sm:$0xf]  ;;  %v4817_v50 = vpop.f32.mrf.mxu1  ;;  %v6363_v54 = vor.u32 %v9316_v39, %v6360_v43 }
  0xc6   :  { %v8950_v57 = vld [vmem:[%s15000_s1 + $0x1620] sm:$0xf]  ;;  %v8823_v5 = vor.u32 %v9934_v56, %v8822_v52  ;;  %5097 = vmatpush.bf16.msrb.mxu3 %v9095_v55  ;;  %v9962_v19 = vld [vmem:[%s15000_s1 + $0x160c] sm:$0xf0]  ;;  %v6488_v49 = vld [vmem:[%s15000_s1 + $0x2f0] sm:$0xf0] }
  0xc7   :  { %v9078_v59 = vld [vmem:[%s15000_s1 + $0x1720] sm:$0xf]  ;;  %v8951_v6 = vor.u32 %v9966_v58, %v8950_v57  ;;  %v9994_v24 = vld [vmem:[%s15000_s1 + $0x170c] sm:$0xf0]  ;;  %5059 = vmatpush.bf16.msrb.mxu0 %v8695_v63  ;;  %v11319_v44 = vadd.f32 %v4841_v29, %v4829_v27  ;;  %v9280_v57 = vld [vmem:[%s15000_s1 + $0xc4] sm:$0xf]  ;;  %v6491_v58 = vor.u32 %v9348_v48, %v6488_v49 }
  0xc8   :  { %v8678_v3 = vld [vmem:[%s15000_s1 + $0x1400] sm:$0xf]  ;;  %v9079_v15 = vor.u32 %v9998_v60, %v9078_v59  ;;  %v10038_v34 = vld [vmem:[%s15000_s1 + $0x186c] sm:$0xf0]  ;;  %5072 = vmatpush.bf16.msrb.mxu1 %v8823_v5  ;;  %v6216_v59 = vld [vmem:[%s15000_s1 + $0xd0] sm:$0xf0] }
  0xc9   :  { %v8806_v8 = vld [vmem:[%s15000_s1 + $0x1500] sm:$0xf]  ;;  %v8679_v36 = vor.u32 %v9898_v4, %v8678_v3  ;;  %5085 = vmatpush.bf16.msrb.mxu2 %v8951_v6  ;;  %v10034_v56 = vld [vmem:[%s15000_s1 + $0x184c] sm:$0xf0]  ;;  %v9312_v60 = vld [vmem:[%s15000_s1 + $0x1c4] sm:$0xf]  ;;  %v4830_v4 = vpop.f32.mrf.mxu2  ;;  %v4843_v6 = vpop.f32.mrf.mxu3 }
  0xca   :  { %v8934_v11 = vld [vmem:[%s15000_s1 + $0x1600] sm:$0xf]  ;;  %v8807_v46 = vor.u32 %v9930_v10, %v8806_v8  ;;  %5098 = vmatpush.bf16.msrb.mxu3 %v9079_v15  ;;  %v6344_v62 = vld [vmem:[%s15000_s1 + $0x1d0] sm:$0xf0]  ;;  %v9344_v63 = vld [vmem:[%s15000_s1 + $0x2c4] sm:$0xf]  ;;  %v6219_v8 = vor.u32 %v9280_v57, %v6216_v59 }
  0xcb   :  { %v9062_v23 = vld [vmem:[%s15000_s1 + $0x1700] sm:$0xf]  ;;  %v8935_v47 = vor.u32 %v9962_v19, %v8934_v11  ;;  %5060 = vmatpush.bf16.msrb.mxu0 %v8679_v36  ;;  %v6472_v3 = vld [vmem:[%s15000_s1 + $0x2d0] sm:$0xf0]  ;;  %v6347_v10 = vor.u32 %v9312_v60, %v6344_v62  ;;  %v10030_v14 = vld [vmem:[%s15000_s1 + $0x182c] sm:$0xf0] }
  0xcc   :  { %v9238_v30 = vld [vmem:[%s15000_s1 + $0x1860] sm:$0xf]  ;;  %v9063_v51 = vor.u32 %v9994_v24, %v9062_v23  ;;  %5073 = vmatpush.bf16.msrb.mxu1 %v8807_v46  ;;  %v9276_v15 = vld [vmem:[%s15000_s1 + $0xa4] sm:$0xf]  ;;  %v6475_v19 = vor.u32 %v9344_v63, %v6472_v3  ;;  %v6200_v23 = vld [vmem:[%s15000_s1 + $0xb0] sm:$0xf0] }
  0xcd   :  { %v9239_v52 = vor.u32 %v10038_v34, %v9238_v30  ;;  %v9222_v55 = vld [vmem:[%s15000_s1 + $0x1840] sm:$0xf]  ;;  %5086 = vmatpush.bf16.msrb.mxu2 %v8935_v47  ;;  %v9308_v24 = vld [vmem:[%s15000_s1 + $0x1a4] sm:$0xf]  ;;  %v6328_v27 = vld [vmem:[%s15000_s1 + $0x1b0] sm:$0xf0]  ;;  %v6203_v36 = vor.u32 %v9276_v15, %v6200_v23  ;;  %v4867_v60 = vpop.f32.mrf.mxu1 }
  0xce   :  { %5099 = vmatpush.bf16.msrb.mxu3 %v9063_v51  ;;  %v9223_v5 = vor.u32 %v10034_v56, %v9222_v55  ;;  %v9206_v11 = vld [vmem:[%s15000_s1 + $0x1820] sm:$0xf]  ;;  %5061 = vmatmul.bf16.vlgmr.msrb.gmra.mxu0 %v11154_v37  ;;  %v9340_v29 = vld [vmem:[%s15000_s1 + $0x2a4] sm:$0xf]  ;;  %v6456_v30 = vld [vmem:[%s15000_s1 + $0x2b0] sm:$0xf0]  ;;  %v6331_v38 = vor.u32 %v9308_v24, %v6328_v27 }
  0xcf   :  { %5109 = vmatpush.bf16.msra.mxu0 %v9239_v52  ;;  %5074 = vmatmul.bf16.vlgmr.msrb.gmra.mxu1 %v11158_v41  ;;  %v9207_v34 = vor.u32 %v10030_v14, %v9206_v11  ;;  %v9190_v35 = vld [vmem:[%s15000_s1 + $0x1800] sm:$0xf]  ;;  %v10026_v39 = vld [vmem:[%s15000_s1 + $0x180c] sm:$0xf0]  ;;  %v9272_v43 = vld [vmem:[%s15000_s1 + $0x84] sm:$0xf]  ;;  %v6459_v46 = vor.u32 %v9340_v29, %v6456_v30 }
  0xd0   :  { %5118 = vmatpush.bf16.msra.mxu1 %v6235_v53  ;;  %5087 = vmatmul.bf16.vlgmr.msrb.gmra.mxu2 %v11156_v40  ;;  %v6184_v45 = vld [vmem:[%s15000_s1 + $0x90] sm:$0xf0]  ;;  %v9304_v47 = vld [vmem:[%s15000_s1 + $0x184] sm:$0xf]  ;;  %v9191_v53 = vor.u32 %v10026_v39, %v9190_v35 }
  0xd1   :  { %5131 = vmatpush.bf16.msra.mxu2 %v6363_v54  ;;  %5100 = vmatmul.bf16.vlgmr.msrb.gmra.mxu3 %v11160_v42  ;;  %v6312_v48 = vld [vmem:[%s15000_s1 + $0x190] sm:$0xf0]  ;;  %v9336_v49 = vld [vmem:[%s15000_s1 + $0x284] sm:$0xf]  ;;  %v4854_v54 = vpop.f32.mrf.mxu0  ;;  %v6187_v55 = vor.u32 %v9272_v43, %v6184_v45  ;;  %v4880_v23 = vpop.f32.mrf.mxu2 }
  0xd2   :  { %5144 = vmatpush.bf16.msra.mxu3 %v6491_v58  ;;  %v6440_v50 = vld [vmem:[%s15000_s1 + $0x290] sm:$0xf0]  ;;  %v9380_v51 = vld [vmem:[%s15000_s1 + $0x3e4] sm:$0xf]  ;;  %v6315_v56 = vor.u32 %v9304_v47, %v6312_v48  ;;  %v4855_v59 = vadd.f32 %v4854_v54, %v11319_v44 }
  0xd3   :  { %5110 = vmatpush.bf16.msra.mxu0 %v9223_v5  ;;  %v6616_v52 = vld [vmem:[%s15000_s1 + $0x3f0] sm:$0xf0]  ;;  %v9268_v57 = vld [vmem:[%s15000_s1 + $0x64] sm:$0xf]  ;;  %v6443_v62 = vor.u32 %v9336_v49, %v6440_v50 }
  0xd4   :  { %5119 = vmatpush.bf16.msra.mxu1 %v6219_v8  ;;  %v6168_v58 = vld [vmem:[%s15000_s1 + $0x70] sm:$0xf0]  ;;  %v6619_v63 = vor.u32 %v9380_v51, %v6616_v52  ;;  %v9300_v3 = vld [vmem:[%s15000_s1 + $0x164] sm:$0xf] }
  0xd5   :  { %5132 = vmatpush.bf16.msra.mxu2 %v6347_v10  ;;  %v6296_v4 = vld [vmem:[%s15000_s1 + $0x170] sm:$0xf0]  ;;  %v9332_v5 = vld [vmem:[%s15000_s1 + $0x264] sm:$0xf]  ;;  %v4868_v10 = vadd.f32 %v4867_v60, %v4855_v59  ;;  %v6171_v11 = vor.u32 %v9268_v57, %v6168_v58  ;;  %v4869_v52 = vpop.f32.mrf.mxu1 }
  0xd6   :  { %5145 = vmatpush.bf16.msra.mxu3 %v6475_v19  ;;  %v6424_v44 = vld [vmem:[%s15000_s1 + $0x270] sm:$0xf0]  ;;  %v9376_v6 = vld [vmem:[%s15000_s1 + $0x3c4] sm:$0xf]  ;;  %v6299_v14 = vor.u32 %v9300_v3, %v6296_v4 }
  0xd7   :  { %5111 = vmatpush.bf16.msra.mxu0 %v9207_v34  ;;  %v6600_v8 = vld [vmem:[%s15000_s1 + $0x3d0] sm:$0xf0]  ;;  %v9264_v15 = vld [vmem:[%s15000_s1 + $0x44] sm:$0xf]  ;;  %v6427_v24 = vor.u32 %v9332_v5, %v6424_v44  ;;  %v4881_v35 = vadd.f32 %v4880_v23, %v4868_v10 }
  0xd8   :  { %5120 = vmatpush.bf16.msra.mxu1 %v6203_v36  ;;  %v6152_v19 = vld [vmem:[%s15000_s1 + $0x50] sm:$0xf0]  ;;  %v6603_v27 = vor.u32 %v9376_v6, %v6600_v8  ;;  %v9296_v29 = vld [vmem:[%s15000_s1 + $0x144] sm:$0xf]  ;;  %v4893_v36 = vpop.f32.mrf.mxu3 }
  0xd9   :  { %5133 = vmatpush.bf16.msra.mxu2 %v6331_v38  ;;  %v6280_v30 = vld [vmem:[%s15000_s1 + $0x150] sm:$0xf0]  ;;  %v9328_v34 = vld [vmem:[%s15000_s1 + $0x244] sm:$0xf]  ;;  %v4856_v47 = vpop.f32.mrf.mxu0  ;;  %v6155_v48 = vor.u32 %v9264_v15, %v6152_v19  ;;  %v4882_v44 = vpop.f32.mrf.mxu2 }
  0xda   :  { %5146 = vmatpush.bf16.msra.mxu3 %v6459_v46  ;;  %v6408_v38 = vld [vmem:[%s15000_s1 + $0x250] sm:$0xf0]  ;;  %v9372_v39 = vld [vmem:[%s15000_s1 + $0x3a4] sm:$0xf]  ;;  %v11458_v46 = vadd.f32 %v4893_v36, %v4881_v35  ;;  %v6283_v49 = vor.u32 %v9296_v29, %v6280_v30 }
  0xdb   :  { %5112 = vmatpush.bf16.msra.mxu0 %v9191_v53  ;;  %v6584_v43 = vld [vmem:[%s15000_s1 + $0x3b0] sm:$0xf0]  ;;  %v845_v45 = vld [vmem:[#allocation1] sm:$0xff]  ;;  %v6411_v53 = vor.u32 %v9328_v34, %v6408_v38 }
  0xdc   :  { %5121 = vmatpush.bf16.msra.mxu1 %v6187_v55  ;;  %v9260_v50 = vld [vmem:[%s15000_s1 + $0x24] sm:$0xf]  ;;  %v6136_v51 = vld [vmem:[%s15000_s1 + $0x30] sm:$0xf0]  ;;  %v6587_v54 = vor.u32 %v9372_v39, %v6584_v43 }
  0xdd   :  { %5134 = vmatpush.bf16.msra.mxu2 %v6315_v56  ;;  %v9292_v55 = vld [vmem:[%s15000_s1 + $0x124] sm:$0xf]  ;;  %v6264_v56 = vld [vmem:[%s15000_s1 + $0x130] sm:$0xf0] }
  0xde   :  { %5147 = vmatpush.bf16.msra.mxu3 %v6443_v62  ;;  %v9324_v57 = vld [vmem:[%s15000_s1 + $0x224] sm:$0xf]  ;;  %9252 = vmatmul.msk.bf16.vlgmr.msra.gmra.mxu0 %vm4790_vm0, %v845_v45  ;;  %v6392_v58 = vld [vmem:[%s15000_s1 + $0x230] sm:$0xf0]  ;;  %v6139_v62 = vor.u32 %v9260_v50, %v6136_v51 }
  0xdf   :  { %5157 = vmatpush.bf16.msrb.mxu0 %v6619_v63  ;;  %v9368_v59 = vld [vmem:[%s15000_s1 + $0x384] sm:$0xf]  ;;  %v6568_v60 = vld [vmem:[%s15000_s1 + $0x390] sm:$0xf0]  ;;  %v6267_v63 = vor.u32 %v9292_v55, %v6264_v56  ;;  %v6395_v6 = vor.u32 %v9324_v57, %v6392_v58 }
  0xe0   :  { %5122 = vmatpush.bf16.msra.mxu1 %v6171_v11  ;;  %v9256_v3 = vld [vmem:[%s15000_s1 + $0x4] sm:$0xf]  ;;  %v6120_v4 = vld [vmem:[%s15000_s1 + $0x10] sm:$0xf0]  ;;  %v6571_v8 = vor.u32 %v9368_v59, %v6568_v60  ;;  %v4895_v15 = vpop.f32.mrf.mxu3 }
  0xe1   :  { %5135 = vmatpush.bf16.msra.mxu2 %v6299_v14  ;;  %v9288_v5 = vld [vmem:[%s15000_s1 + $0x104] sm:$0xf]  ;;  %v6248_v10 = vld [vmem:[%s15000_s1 + $0x110] sm:$0xf0]  ;;  %v6123_v34 = vor.u32 %v9256_v3, %v6120_v4 }
  0xe2   :  { %5148 = vmatpush.bf16.msra.mxu3 %v6427_v24  ;;  %v9320_v11 = vld [vmem:[%s15000_s1 + $0x204] sm:$0xf]  ;;  %v6376_v14 = vld [vmem:[%s15000_s1 + $0x210] sm:$0xf0]  ;;  %v6251_v35 = vor.u32 %v9288_v5, %v6248_v10 }
  0xe3   :  { %5158 = vmatpush.bf16.msrb.mxu0 %v6603_v27  ;;  %v9364_v19 = vld [vmem:[%s15000_s1 + $0x364] sm:$0xf]  ;;  %v6552_v23 = vld [vmem:[%s15000_s1 + $0x370] sm:$0xf0]  ;;  %v6379_v39 = vor.u32 %v9320_v11, %v6376_v14 }
  0xe4   :  { %5123 = vmatpush.bf16.msra.mxu1 %v6155_v48  ;;  %v9412_v24 = vld [vmem:[%s15000_s1 + $0x4e4] sm:$0xf]  ;;  %v6744_v27 = vld [vmem:[%s15000_s1 + $0x4f0] sm:$0xf0]  ;;  %v6555_v43 = vor.u32 %v9364_v19, %v6552_v23 }
  0xe5   :  { %5136 = vmatpush.bf16.msra.mxu2 %v6283_v49  ;;  %v9444_v29 = vld [vmem:[%s15000_s1 + $0x5e4] sm:$0xf]  ;;  %v6872_v30 = vld [vmem:[%s15000_s1 + $0x5f0] sm:$0xf0]  ;;  %v6747_v45 = vor.u32 %v9412_v24, %v6744_v27 }
  0xe6   :  { %5149 = vmatpush.bf16.msra.mxu3 %v6411_v53  ;;  %v9476_v36 = vld [vmem:[%s15000_s1 + $0x6e4] sm:$0xf]  ;;  %v7000_v38 = vld [vmem:[%s15000_s1 + $0x6f0] sm:$0xf0]  ;;  %v6875_v47 = vor.u32 %v9444_v29, %v6872_v30 }
  0xe7   :  { %5159 = vmatpush.bf16.msrb.mxu0 %v6587_v54  ;;  %v9360_v48 = vld [vmem:[%s15000_s1 + $0x344] sm:$0xf]  ;;  %v6536_v49 = vld [vmem:[%s15000_s1 + $0x350] sm:$0xf0]  ;;  %v7003_v51 = vor.u32 %v9476_v36, %v7000_v38 }
  0xe8   :  { %5124 = vmatpush.bf16.msra.mxu1 %v6139_v62  ;;  %v9408_v50 = vld [vmem:[%s15000_s1 + $0x4c4] sm:$0xf]  ;;  %v6728_v52 = vld [vmem:[%s15000_s1 + $0x4d0] sm:$0xf0]  ;;  %v6539_v57 = vor.u32 %v9360_v48, %v6536_v49 }
  0xe9   :  { %5137 = vmatpush.bf16.msra.mxu2 %v6267_v63  ;;  %v9440_v53 = vld [vmem:[%s15000_s1 + $0x5c4] sm:$0xf]  ;;  %v6856_v54 = vld [vmem:[%s15000_s1 + $0x5d0] sm:$0xf0]  ;;  %v6731_v58 = vor.u32 %v9408_v50, %v6728_v52 }
  0xea   :  { %5150 = vmatpush.bf16.msra.mxu3 %v6395_v6  ;;  %v9472_v55 = vld [vmem:[%s15000_s1 + $0x6c4] sm:$0xf]  ;;  %v6984_v56 = vld [vmem:[%s15000_s1 + $0x6d0] sm:$0xf0]  ;;  %v6859_v59 = vor.u32 %v9440_v53, %v6856_v54 }
  0xeb   :  { %5160 = vmatpush.bf16.msrb.mxu0 %v6571_v8  ;;  %v9356_v60 = vld [vmem:[%s15000_s1 + $0x324] sm:$0xf]  ;;  %v6520_v62 = vld [vmem:[%s15000_s1 + $0x330] sm:$0xf0]  ;;  %v6987_v3 = vor.u32 %v9472_v55, %v6984_v56 }
  0xec   :  { %5125 = vmatpush.bf16.msra.mxu1 %v6123_v34  ;;  %v9404_v63 = vld [vmem:[%s15000_s1 + $0x4a4] sm:$0xf]  ;;  %v6712_v4 = vld [vmem:[%s15000_s1 + $0x4b0] sm:$0xf0]  ;;  %v6523_v10 = vor.u32 %v9356_v60, %v6520_v62 }
  0xed   :  { %5138 = vmatpush.bf16.msra.mxu2 %v6251_v35  ;;  %v9436_v5 = vld [vmem:[%s15000_s1 + $0x5a4] sm:$0xf]  ;;  %v6840_v44 = vld [vmem:[%s15000_s1 + $0x5b0] sm:$0xf0]  ;;  %v6715_v14 = vor.u32 %v9404_v63, %v6712_v4  ;;  %v4906_v35 = vpop.f32.mrf.mxu0 }
  0xee   :  { %5151 = vmatpush.bf16.msra.mxu3 %v6379_v39  ;;  %v9468_v6 = vld [vmem:[%s15000_s1 + $0x6a4] sm:$0xf]  ;;  %v6968_v8 = vld [vmem:[%s15000_s1 + $0x6b0] sm:$0xf0]  ;;  %v6843_v15 = vor.u32 %v9436_v5, %v6840_v44 }
  0xef   :  { %5161 = vmatpush.bf16.msrb.mxu0 %v6555_v43  ;;  %5126 = vmatmul.bf16.vlgmr.msra.gmra.mxu1 %v10371_v21  ;;  %v9352_v11 = vld [vmem:[%s15000_s1 + $0x304] sm:$0xf]  ;;  %v6504_v19 = vld [vmem:[%s15000_s1 + $0x310] sm:$0xf0]  ;;  %v6971_v27 = vor.u32 %v9468_v6, %v6968_v8  ;;  %v4907_v43 = vadd.f32 %v4906_v35, %v11458_v46  ;;  %v4932_v5 = vpop.f32.mrf.mxu2 }
  0xf0   :  { %5170 = vmatpush.bf16.msrb.mxu1 %v6747_v45  ;;  %5139 = vmatmul.bf16.vlgmr.msra.gmra.mxu2 %v10382_v26  ;;  %v9400_v23 = vld [vmem:[%s15000_s1 + $0x484] sm:$0xf]  ;;  %v6696_v24 = vld [vmem:[%s15000_s1 + $0x490] sm:$0xf0]  ;;  %v6507_v45 = vor.u32 %v9352_v11, %v6504_v19 }
  0xf1   :  { %5183 = vmatpush.bf16.msrb.mxu2 %v6875_v47  ;;  %5152 = vmatmul.bf16.vlgmr.msra.gmra.mxu3 %v10369_v20  ;;  %v9432_v29 = vld [vmem:[%s15000_s1 + $0x584] sm:$0xf]  ;;  %v6824_v30 = vld [vmem:[%s15000_s1 + $0x590] sm:$0xf0]  ;;  %v4919_v47 = vpop.f32.mrf.mxu1  ;;  %v6699_v48 = vor.u32 %v9400_v23, %v6696_v24 }
  0xf2   :  { %5196 = vmatpush.bf16.msrb.mxu3 %v7003_v51  ;;  %v9464_v34 = vld [vmem:[%s15000_s1 + $0x684] sm:$0xf]  ;;  %v6952_v36 = vld [vmem:[%s15000_s1 + $0x690] sm:$0xf0]  ;;  %v6827_v49 = vor.u32 %v9432_v29, %v6824_v30  ;;  %v4920_v53 = vadd.f32 %v4919_v47, %v4907_v43 }
  0xf3   :  { %5162 = vmatpush.bf16.msrb.mxu0 %v6539_v57  ;;  %v9508_v38 = vld [vmem:[%s15000_s1 + $0x7e4] sm:$0xf]  ;;  %v7128_v39 = vld [vmem:[%s15000_s1 + $0x7f0] sm:$0xf0]  ;;  %v6955_v52 = vor.u32 %v9464_v34, %v6952_v36 }
  0xf4   :  { %5171 = vmatpush.bf16.msrb.mxu1 %v6731_v58  ;;  %v9396_v50 = vld [vmem:[%s15000_s1 + $0x464] sm:$0xf]  ;;  %v6680_v51 = vld [vmem:[%s15000_s1 + $0x470] sm:$0xf0]  ;;  %v7131_v54 = vor.u32 %v9508_v38, %v7128_v39  ;;  %v4933_v11 = vadd.f32 %v4932_v5, %v4920_v53 }
  0xf5   :  { %5184 = vmatpush.bf16.msrb.mxu2 %v6859_v59  ;;  %v9428_v46 = vld [vmem:[%s15000_s1 + $0x564] sm:$0xf]  ;;  %v6808_v55 = vld [vmem:[%s15000_s1 + $0x570] sm:$0xf0]  ;;  %v6683_v60 = vor.u32 %v9396_v50, %v6680_v51  ;;  %v4908_v24 = vpop.f32.mrf.mxu0 }
  0xf6   :  { %5197 = vmatpush.bf16.msrb.mxu3 %v6987_v3  ;;  %v9460_v56 = vld [vmem:[%s15000_s1 + $0x664] sm:$0xf]  ;;  %v6936_v57 = vld [vmem:[%s15000_s1 + $0x670] sm:$0xf0]  ;;  %v6811_v62 = vor.u32 %v9428_v46, %v6808_v55 }
  0xf7   :  { %5163 = vmatpush.bf16.msrb.mxu0 %v6523_v10  ;;  %v9504_v58 = vld [vmem:[%s15000_s1 + $0x7c4] sm:$0xf]  ;;  %v7112_v59 = vld [vmem:[%s15000_s1 + $0x7d0] sm:$0xf0]  ;;  %v6939_v4 = vor.u32 %v9460_v56, %v6936_v57 }
  0xf8   :  { %5172 = vmatpush.bf16.msrb.mxu1 %v6715_v14  ;;  %v9392_v63 = vld [vmem:[%s15000_s1 + $0x444] sm:$0xf]  ;;  %v6664_v3 = vld [vmem:[%s15000_s1 + $0x450] sm:$0xf0]  ;;  %v7115_v44 = vor.u32 %v9504_v58, %v7112_v59  ;;  %v4945_v14 = vpop.f32.mrf.mxu3 }
  0xf9   :  { %5185 = vmatpush.bf16.msrb.mxu2 %v6843_v15  ;;  %v9424_v6 = vld [vmem:[%s15000_s1 + $0x544] sm:$0xf]  ;;  %v6792_v8 = vld [vmem:[%s15000_s1 + $0x550] sm:$0xf0]  ;;  %v11658_v29 = vadd.f32 %v4945_v14, %v4933_v11  ;;  %v6667_v30 = vor.u32 %v9392_v63, %v6664_v3 }
  0xfa   :  { %5198 = vmatpush.bf16.msrb.mxu3 %v6971_v27  ;;  %v9456_v10 = vld [vmem:[%s15000_s1 + $0x644] sm:$0xf]  ;;  %v6920_v15 = vld [vmem:[%s15000_s1 + $0x650] sm:$0xf0]  ;;  %v4921_v27 = vpop.f32.mrf.mxu1  ;;  %v6795_v34 = vor.u32 %v9424_v6, %v6792_v8 }
  0xfb   :  { %5164 = vmatpush.bf16.msrb.mxu0 %v6507_v45  ;;  %v9500_v19 = vld [vmem:[%s15000_s1 + $0x7a4] sm:$0xf]  ;;  %v7096_v23 = vld [vmem:[%s15000_s1 + $0x7b0] sm:$0xf0]  ;;  %v6923_v38 = vor.u32 %v9456_v10, %v6920_v15 }
  0xfc   :  { %5173 = vmatpush.bf16.msrb.mxu1 %v6699_v48  ;;  %v9388_v35 = vld [vmem:[%s15000_s1 + $0x424] sm:$0xf]  ;;  %v6648_v36 = vld [vmem:[%s15000_s1 + $0x430] sm:$0xf0]  ;;  %v7099_v39 = vor.u32 %v9500_v19, %v7096_v23 }
  0xfd   :  { %5186 = vmatpush.bf16.msrb.mxu2 %v6827_v49  ;;  %v9420_v43 = vld [vmem:[%s15000_s1 + $0x524] sm:$0xf]  ;;  %v6776_v45 = vld [vmem:[%s15000_s1 + $0x530] sm:$0xf0]  ;;  %v6651_v51 = vor.u32 %v9388_v35, %v6648_v36 }
  0xfe   :  { %5199 = vmatpush.bf16.msrb.mxu3 %v6955_v52  ;;  %5165 = vmatmul.bf16.vlgmr.msrb.gmra.mxu0 %v10373_v22  ;;  %v9452_v47 = vld [vmem:[%s15000_s1 + $0x624] sm:$0xf]  ;;  %v6904_v48 = vld [vmem:[%s15000_s1 + $0x630] sm:$0xf0]  ;;  %v6779_v52 = vor.u32 %v9420_v43, %v6776_v45 }
  0xff   :  { %5209 = vmatpush.bf16.msra.mxu0 %v7131_v54  ;;  %v9496_v49 = vld [vmem:[%s15000_s1 + $0x784] sm:$0xf]  ;;  %v7080_v50 = vld [vmem:[%s15000_s1 + $0x790] sm:$0xf0]  ;;  %v6907_v55 = vor.u32 %v9452_v47, %v6904_v48 }
 0x100   :  { %5174 = vmatpush.bf16.msrb.mxu1 %v6683_v60  ;;  %v9384_v53 = vld [vmem:[%s15000_s1 + $0x404] sm:$0xf]  ;;  %v6632_v54 = vld [vmem:[%s15000_s1 + $0x410] sm:$0xf0]  ;;  %v7083_v56 = vor.u32 %v9496_v49, %v7080_v50  ;;  %v4934_v60 = vpop.f32.mrf.mxu2 }
 0x101   :  { %5187 = vmatpush.bf16.msrb.mxu2 %v6811_v62  ;;  %v9416_v46 = vld [vmem:[%s15000_s1 + $0x504] sm:$0xf]  ;;  %v6760_v57 = vld [vmem:[%s15000_s1 + $0x510] sm:$0xf0]  ;;  %v6635_v8 = vor.u32 %v9384_v53, %v6632_v54 }
 0x102   :  { %5200 = vmatpush.bf16.msrb.mxu3 %v6939_v4  ;;  %v9448_v58 = vld [vmem:[%s15000_s1 + $0x604] sm:$0xf]  ;;  %v6888_v59 = vld [vmem:[%s15000_s1 + $0x610] sm:$0xf0]  ;;  %v4947_v4 = vpop.f32.mrf.mxu3  ;;  %v6763_v10 = vor.u32 %v9416_v46, %v6760_v57 }
 0x103   :  { %5210 = vmatpush.bf16.msra.mxu0 %v7115_v44  ;;  %v9492_v62 = vld [vmem:[%s15000_s1 + $0x764] sm:$0xf]  ;;  %v7064_v63 = vld [vmem:[%s15000_s1 + $0x770] sm:$0xf0]  ;;  %v6891_v15 = vor.u32 %v9448_v58, %v6888_v59 }
 0x104   :  { %5175 = vmatpush.bf16.msrb.mxu1 %v6667_v30  ;;  %v9540_v3 = vld [vmem:[%s15000_s1 + $0x8e4] sm:$0xf]  ;;  %v7256_v5 = vld [vmem:[%s15000_s1 + $0x8f0] sm:$0xf0]  ;;  %v7067_v19 = vor.u32 %v9492_v62, %v7064_v63 }
 0x105   :  { %5188 = vmatpush.bf16.msrb.mxu2 %v6795_v34  ;;  %v9572_v44 = vld [vmem:[%s15000_s1 + $0x9e4] sm:$0xf]  ;;  %v7384_v6 = vld [vmem:[%s15000_s1 + $0x9f0] sm:$0xf0]  ;;  %v7259_v23 = vor.u32 %v9540_v3, %v7256_v5 }
 0x106   :  { %5201 = vmatpush.bf16.msrb.mxu3 %v6923_v38  ;;  %v9604_v11 = vld [vmem:[%s15000_s1 + $0xae4] sm:$0xf]  ;;  %v7512_v14 = vld [vmem:[%s15000_s1 + $0xaf0] sm:$0xf0]  ;;  %v7387_v24 = vor.u32 %v9572_v44, %v7384_v6 }
 0x107   :  { %5211 = vmatpush.bf16.msra.mxu0 %v7099_v39  ;;  %v9488_v27 = vld [vmem:[%s15000_s1 + $0x744] sm:$0xf]  ;;  %v7048_v30 = vld [vmem:[%s15000_s1 + $0x750] sm:$0xf0]  ;;  %v7515_v35 = vor.u32 %v9604_v11, %v7512_v14 }
 0x108   :  { %5176 = vmatpush.bf16.msrb.mxu1 %v6651_v51  ;;  %v9536_v34 = vld [vmem:[%s15000_s1 + $0x8c4] sm:$0xf]  ;;  %v7240_v36 = vld [vmem:[%s15000_s1 + $0x8d0] sm:$0xf0]  ;;  %v7051_v47 = vor.u32 %v9488_v27, %v7048_v30 }
 0x109   :  { %5189 = vmatpush.bf16.msrb.mxu2 %v6779_v52  ;;  %v9568_v38 = vld [vmem:[%s15000_s1 + $0x9c4] sm:$0xf]  ;;  %v7368_v39 = vld [vmem:[%s15000_s1 + $0x9d0] sm:$0xf0]  ;;  %v7243_v48 = vor.u32 %v9536_v34, %v7240_v36 }
 0x10a   :  { %5202 = vmatpush.bf16.msrb.mxu3 %v6907_v55  ;;  %v9600_v43 = vld [vmem:[%s15000_s1 + $0xac4] sm:$0xf]  ;;  %v7496_v45 = vld [vmem:[%s15000_s1 + $0xad0] sm:$0xf0]  ;;  %v7371_v49 = vor.u32 %v9568_v38, %v7368_v39 }
 0x10b   :  { %5212 = vmatpush.bf16.msra.mxu0 %v7083_v56  ;;  %v9484_v50 = vld [vmem:[%s15000_s1 + $0x724] sm:$0xf]  ;;  %v7032_v51 = vld [vmem:[%s15000_s1 + $0x730] sm:$0xf0]  ;;  %v7499_v53 = vor.u32 %v9600_v43, %v7496_v45 }
 0x10c   :  { %5177 = vmatpush.bf16.msrb.mxu1 %v6635_v8  ;;  %v9532_v52 = vld [vmem:[%s15000_s1 + $0x8a4] sm:$0xf]  ;;  %v7224_v54 = vld [vmem:[%s15000_s1 + $0x8b0] sm:$0xf0]  ;;  %v7035_v58 = vor.u32 %v9484_v50, %v7032_v51 }
 0x10d   :  { %5190 = vmatpush.bf16.msrb.mxu2 %v6763_v10  ;;  %v9564_v46 = vld [vmem:[%s15000_s1 + $0x9a4] sm:$0xf]  ;;  %v7352_v55 = vld [vmem:[%s15000_s1 + $0x9b0] sm:$0xf0]  ;;  %v7227_v60 = vor.u32 %v9532_v52, %v7224_v54  ;;  %v4958_v10 = vpop.f32.mrf.mxu0 }
 0x10e   :  { %5203 = vmatpush.bf16.msrb.mxu3 %v6891_v15  ;;  %v9596_v56 = vld [vmem:[%s15000_s1 + $0xaa4] sm:$0xf]  ;;  %v7480_v57 = vld [vmem:[%s15000_s1 + $0xab0] sm:$0xf0]  ;;  %v7355_v62 = vor.u32 %v9564_v46, %v7352_v55 }
 0x10f   :  { %5213 = vmatpush.bf16.msra.mxu0 %v7067_v19  ;;  %5178 = vmatmul.bf16.vlgmr.msrb.gmra.mxu1 %v10464_v0  ;;  %v9480_v59 = vld [vmem:[%s15000_s1 + $0x704] sm:$0xf]  ;;  %v7016_v63 = vld [vmem:[%s15000_s1 + $0x710] sm:$0xf0]  ;;  %v7483_v5 = vor.u32 %v9596_v56, %v7480_v57  ;;  %v4959_v19 = vadd.f32 %v4958_v10, %v11658_v29  ;;  %v4984_v46 = vpop.f32.mrf.mxu2 }
 0x110   :  { %5222 = vmatpush.bf16.msra.mxu1 %v7259_v23  ;;  %5191 = vmatmul.bf16.vlgmr.msrb.gmra.mxu2 %v10468_v2  ;;  %v9528_v3 = vld [vmem:[%s15000_s1 + $0x884] sm:$0xf]  ;;  %v7208_v4 = vld [vmem:[%s15000_s1 + $0x890] sm:$0xf0]  ;;  %v7019_v23 = vor.u32 %v9480_v59, %v7016_v63 }
 0x111   :  { %5235 = vmatpush.bf16.msra.mxu2 %v7387_v24  ;;  %5204 = vmatmul.bf16.vlgmr.msrb.gmra.mxu3 %v10462_v61  ;;  %v9560_v44 = vld [vmem:[%s15000_s1 + $0x984] sm:$0xf]  ;;  %v7336_v6 = vld [vmem:[%s15000_s1 + $0x990] sm:$0xf0]  ;;  %v4971_v24 = vpop.f32.mrf.mxu1  ;;  %v7211_v27 = vor.u32 %v9528_v3, %v7208_v4 }
 0x112   :  { %5248 = vmatpush.bf16.msra.mxu3 %v7515_v35  ;;  %v9592_v8 = vld [vmem:[%s15000_s1 + $0xa84] sm:$0xf]  ;;  %v7464_v11 = vld [vmem:[%s15000_s1 + $0xa90] sm:$0xf0]  ;;  %v7339_v30 = vor.u32 %v9560_v44, %v7336_v6  ;;  %v4972_v38 = vadd.f32 %v4971_v24, %v4959_v19 }
 0x113   :  { %5214 = vmatpush.bf16.msra.mxu0 %v7051_v47  ;;  %v9636_v14 = vld [vmem:[%s15000_s1 + $0xbe4] sm:$0xf]  ;;  %v7640_v15 = vld [vmem:[%s15000_s1 + $0xbf0] sm:$0xf0]  ;;  %v7467_v36 = vor.u32 %v9592_v8, %v7464_v11 }
 0x114   :  { %5223 = vmatpush.bf16.msra.mxu1 %v7243_v48  ;;  %v9524_v34 = vld [vmem:[%s15000_s1 + $0x864] sm:$0xf]  ;;  %v7192_v35 = vld [vmem:[%s15000_s1 + $0x870] sm:$0xf0]  ;;  %v7643_v39 = vor.u32 %v9636_v14, %v7640_v15  ;;  %v4985_v59 = vadd.f32 %v4984_v46, %v4972_v38 }
 0x115   :  { %5236 = vmatpush.bf16.msra.mxu2 %v7371_v49  ;;  %v9556_v29 = vld [vmem:[%s15000_s1 + $0x964] sm:$0xf]  ;;  %v7320_v43 = vld [vmem:[%s15000_s1 + $0x970] sm:$0xf0]  ;;  %v7195_v50 = vor.u32 %v9524_v34, %v7192_v35  ;;  %v4960_v4 = vpop.f32.mrf.mxu0 }
 0x116   :  { %5249 = vmatpush.bf16.msra.mxu3 %v7499_v53  ;;  %v9588_v45 = vld [vmem:[%s15000_s1 + $0xa64] sm:$0xf]  ;;  %v7448_v47 = vld [vmem:[%s15000_s1 + $0xa70] sm:$0xf0]  ;;  %v7323_v51 = vor.u32 %v9556_v29, %v7320_v43 }
 0x117   :  { %5215 = vmatpush.bf16.msra.mxu0 %v7035_v58  ;;  %v9632_v48 = vld [vmem:[%s15000_s1 + $0xbc4] sm:$0xf]  ;;  %v7624_v49 = vld [vmem:[%s15000_s1 + $0xbd0] sm:$0xf0]  ;;  %v7451_v54 = vor.u32 %v9588_v45, %v7448_v47 }
 0x118   :  { %5224 = vmatpush.bf16.msra.mxu1 %v7227_v60  ;;  %v9520_v52 = vld [vmem:[%s15000_s1 + $0x844] sm:$0xf]  ;;  %v7176_v53 = vld [vmem:[%s15000_s1 + $0x850] sm:$0xf0]  ;;  %v7627_v55 = vor.u32 %v9632_v48, %v7624_v49  ;;  %v4997_v60 = vpop.f32.mrf.mxu3 }
 0x119   :  { %5237 = vmatpush.bf16.msra.mxu2 %v7355_v62  ;;  %v9552_v56 = vld [vmem:[%s15000_s1 + $0x944] sm:$0xf]  ;;  %v7304_v57 = vld [vmem:[%s15000_s1 + $0x950] sm:$0xf0]  ;;  %v11857_v44 = vadd.f32 %v4997_v60, %v4985_v59  ;;  %v7179_v6 = vor.u32 %v9520_v52, %v7176_v53 }
 0x11a   :  { %5250 = vmatpush.bf16.msra.mxu3 %v7483_v5  ;;  %v9584_v58 = vld [vmem:[%s15000_s1 + $0xa44] sm:$0xf]  ;;  %v7432_v62 = vld [vmem:[%s15000_s1 + $0xa50] sm:$0xf0]  ;;  %v4973_v5 = vpop.f32.mrf.mxu1  ;;  %v7307_v8 = vor.u32 %v9552_v56, %v7304_v57 }
 0x11b   :  { %5216 = vmatpush.bf16.msra.mxu0 %v7019_v23  ;;  %v9628_v63 = vld [vmem:[%s15000_s1 + $0xba4] sm:$0xf]  ;;  %v7608_v3 = vld [vmem:[%s15000_s1 + $0xbb0] sm:$0xf0]  ;;  %v7435_v14 = vor.u32 %v9584_v58, %v7432_v62 }
 0x11c   :  { %5225 = vmatpush.bf16.msra.mxu1 %v7211_v27  ;;  %v9516_v10 = vld [vmem:[%s15000_s1 + $0x824] sm:$0xf]  ;;  %v7160_v11 = vld [vmem:[%s15000_s1 + $0x830] sm:$0xf0]  ;;  %v7611_v15 = vor.u32 %v9628_v63, %v7608_v3 }
 0x11d   :  { %5238 = vmatpush.bf16.msra.mxu2 %v7339_v30  ;;  %v9548_v19 = vld [vmem:[%s15000_s1 + $0x924] sm:$0xf]  ;;  %v7288_v23 = vld [vmem:[%s15000_s1 + $0x930] sm:$0xf0]  ;;  %v7163_v35 = vor.u32 %v9516_v10, %v7160_v11 }
 0x11e   :  { %5251 = vmatpush.bf16.msra.mxu3 %v7467_v36  ;;  %5217 = vmatmul.bf16.vlgmr.msra.gmra.mxu0 %v10466_v1  ;;  %v9580_v24 = vld [vmem:[%s15000_s1 + $0xa24] sm:$0xf]  ;;  %v7416_v27 = vld [vmem:[%s15000_s1 + $0xa30] sm:$0xf0]  ;;  %v7291_v36 = vor.u32 %v9548_v19, %v7288_v23 }
 0x11f   :  { %5261 = vmatpush.bf16.msrb.mxu0 %v7643_v39  ;;  %v9624_v30 = vld [vmem:[%s15000_s1 + $0xb84] sm:$0xf]  ;;  %v7592_v34 = vld [vmem:[%s15000_s1 + $0xb90] sm:$0xf0]  ;;  %v7419_v43 = vor.u32 %v9580_v24, %v7416_v27 }
 0x120   :  { %5226 = vmatpush.bf16.msra.mxu1 %v7195_v50  ;;  %v9512_v38 = vld [vmem:[%s15000_s1 + $0x804] sm:$0xf]  ;;  %v7144_v39 = vld [vmem:[%s15000_s1 + $0x810] sm:$0xf0]  ;;  %v7595_v45 = vor.u32 %v9624_v30, %v7592_v34  ;;  %v4986_v50 = vpop.f32.mrf.mxu2 }
 0x121   :  { %5239 = vmatpush.bf16.msra.mxu2 %v7323_v51  ;;  %v9544_v29 = vld [vmem:[%s15000_s1 + $0x904] sm:$0xf]  ;;  %v7272_v47 = vld [vmem:[%s15000_s1 + $0x910] sm:$0xf0]  ;;  %v7147_v57 = vor.u32 %v9512_v38, %v7144_v39 }
 0x122   :  { %5252 = vmatpush.bf16.msra.mxu3 %v7451_v54  ;;  %v9576_v48 = vld [vmem:[%s15000_s1 + $0xa04] sm:$0xf]  ;;  %v7400_v49 = vld [vmem:[%s15000_s1 + $0xa10] sm:$0xf0]  ;;  %v4999_v54 = vpop.f32.mrf.mxu3  ;;  %v7275_v58 = vor.u32 %v9544_v29, %v7272_v47 }
 0x123   :  { %5262 = vmatpush.bf16.msrb.mxu0 %v7627_v55  ;;  %v9620_v51 = vld [vmem:[%s15000_s1 + $0xb64] sm:$0xf]  ;;  %v7576_v52 = vld [vmem:[%s15000_s1 + $0xb70] sm:$0xf0]  ;;  %v7403_v62 = vor.u32 %v9576_v48, %v7400_v49 }
 0x124   :  { %5227 = vmatpush.bf16.msra.mxu1 %v7179_v6  ;;  %v9668_v53 = vld [vmem:[%s15000_s1 + $0xce4] sm:$0xf]  ;;  %v7768_v46 = vld [vmem:[%s15000_s1 + $0xcf0] sm:$0xf0]  ;;  %v7579_v63 = vor.u32 %v9620_v51, %v7576_v52 }
 0x125   :  { %5240 = vmatpush.bf16.msra.mxu2 %v7307_v8  ;;  %v9700_v55 = vld [vmem:[%s15000_s1 + $0xde4] sm:$0xf]  ;;  %v7896_v56 = vld [vmem:[%s15000_s1 + $0xdf0] sm:$0xf0]  ;;  %v7771_v3 = vor.u32 %v9668_v53, %v7768_v46 }
 0x126   :  { %5253 = vmatpush.bf16.msra.mxu3 %v7435_v14  ;;  %v9732_v59 = vld [vmem:[%s15000_s1 + $0xee4] sm:$0xf]  ;;  %v8024_v60 = vld [vmem:[%s15000_s1 + $0xef0] sm:$0xf0]  ;;  %v7899_v4 = vor.u32 %v9700_v55, %v7896_v56 }
 0x127   :  { %5263 = vmatpush.bf16.msrb.mxu0 %v7611_v15  ;;  %v9616_v5 = vld [vmem:[%s15000_s1 + $0xb44] sm:$0xf]  ;;  %v7560_v6 = vld [vmem:[%s15000_s1 + $0xb50] sm:$0xf0]  ;;  %v8027_v10 = vor.u32 %v9732_v59, %v8024_v60 }
 0x128   :  { %5228 = vmatpush.bf16.msra.mxu1 %v7163_v35  ;;  %v9664_v8 = vld [vmem:[%s15000_s1 + $0xcc4] sm:$0xf]  ;;  %v7752_v11 = vld [vmem:[%s15000_s1 + $0xcd0] sm:$0xf0]  ;;  %v7563_v24 = vor.u32 %v9616_v5, %v7560_v6 }
 0x129   :  { %5241 = vmatpush.bf16.msra.mxu2 %v7291_v36  ;;  %v9696_v14 = vld [vmem:[%s15000_s1 + $0xdc4] sm:$0xf]  ;;  %v7880_v15 = vld [vmem:[%s15000_s1 + $0xdd0] sm:$0xf0]  ;;  %v7755_v27 = vor.u32 %v9664_v8, %v7752_v11 }
 0x12a   :  { %5254 = vmatpush.bf16.msra.mxu3 %v7419_v43  ;;  %v9728_v19 = vld [vmem:[%s15000_s1 + $0xec4] sm:$0xf]  ;;  %v8008_v23 = vld [vmem:[%s15000_s1 + $0xed0] sm:$0xf0]  ;;  %v7883_v30 = vor.u32 %v9696_v14, %v7880_v15 }
 0x12b   :  { %5264 = vmatpush.bf16.msrb.mxu0 %v7595_v45  ;;  %v9612_v34 = vld [vmem:[%s15000_s1 + $0xb24] sm:$0xf]  ;;  %v7544_v35 = vld [vmem:[%s15000_s1 + $0xb30] sm:$0xf0]  ;;  %v8011_v38 = vor.u32 %v9728_v19, %v8008_v23 }
 0x12c   :  { %5229 = vmatpush.bf16.msra.mxu1 %v7147_v57  ;;  %v9660_v36 = vld [vmem:[%s15000_s1 + $0xca4] sm:$0xf]  ;;  %v7736_v39 = vld [vmem:[%s15000_s1 + $0xcb0] sm:$0xf0]  ;;  %v7547_v48 = vor.u32 %v9612_v34, %v7544_v35 }
 0x12d   :  { %5242 = vmatpush.bf16.msra.mxu2 %v7275_v58  ;;  %v9692_v29 = vld [vmem:[%s15000_s1 + $0xda4] sm:$0xf]  ;;  %v7864_v43 = vld [vmem:[%s15000_s1 + $0xdb0] sm:$0xf0]  ;;  %v7739_v50 = vor.u32 %v9660_v36, %v7736_v39  ;;  %v5010_v58 = vpop.f32.mrf.mxu0 }
 0x12e   :  { %5255 = vmatpush.bf16.msra.mxu3 %v7403_v62  ;;  %v9724_v45 = vld [vmem:[%s15000_s1 + $0xea4] sm:$0xf]  ;;  %v7992_v47 = vld [vmem:[%s15000_s1 + $0xeb0] sm:$0xf0]  ;;  %v7867_v51 = vor.u32 %v9692_v29, %v7864_v43 }
 0x12f   :  { %5265 = vmatpush.bf16.msrb.mxu0 %v7579_v63  ;;  %5230 = vmatmul.bf16.vlgmr.msra.gmra.mxu1 %v10702_v7  ;;  %v9608_v49 = vld [vmem:[%s15000_s1 + $0xb04] sm:$0xf]  ;;  %v7528_v52 = vld [vmem:[%s15000_s1 + $0xb10] sm:$0xf0]  ;;  %v7995_v46 = vor.u32 %v9724_v45, %v7992_v47  ;;  %v5011_v63 = vadd.f32 %v5010_v58, %v11857_v44 }
 0x130   :  { %5274 = vmatpush.bf16.msrb.mxu1 %v7771_v3  ;;  %5243 = vmatmul.bf16.vlgmr.msra.gmra.mxu2 %v10715_v13  ;;  %v9656_v53 = vld [vmem:[%s15000_s1 + $0xc84] sm:$0xf]  ;;  %v7720_v54 = vld [vmem:[%s15000_s1 + $0xc90] sm:$0xf0]  ;;  %v7531_v3 = vor.u32 %v9608_v49, %v7528_v52 }
 0x131   :  { %5287 = vmatpush.bf16.msrb.mxu2 %v7899_v4  ;;  %5256 = vmatmul.bf16.vlgmr.msra.gmra.mxu3 %v10713_v12  ;;  %v9688_v55 = vld [vmem:[%s15000_s1 + $0xd84] sm:$0xf]  ;;  %v7848_v56 = vld [vmem:[%s15000_s1 + $0xd90] sm:$0xf0]  ;;  %v5023_v4 = vpop.f32.mrf.mxu1  ;;  %v7723_v5 = vor.u32 %v9656_v53, %v7720_v54 }
 0x132   :  { %5300 = vmatpush.bf16.msrb.mxu3 %v8027_v10  ;;  %v9720_v57 = vld [vmem:[%s15000_s1 + $0xe84] sm:$0xf]  ;;  %v7976_v59 = vld [vmem:[%s15000_s1 + $0xe90] sm:$0xf0]  ;;  %v7851_v6 = vor.u32 %v9688_v55, %v7848_v56  ;;  %v5024_v14 = vadd.f32 %v5023_v4, %v5011_v63  ;;  %v5036_v29 = vpop.f32.mrf.mxu2 }
 0x133   :  { %5266 = vmatpush.bf16.msrb.mxu0 %v7563_v24  ;;  %v9764_v60 = vld [vmem:[%s15000_s1 + $0xfe4] sm:$0xf]  ;;  %v8152_v62 = vld [vmem:[%s15000_s1 + $0xff0] sm:$0xf0]  ;;  %v7979_v11 = vor.u32 %v9720_v57, %v7976_v59 }
 0x134   :  { %5275 = vmatpush.bf16.msrb.mxu1 %v7755_v27  ;;  %v9652_v8 = vld [vmem:[%s15000_s1 + $0xc64] sm:$0xf]  ;;  %v7704_v10 = vld [vmem:[%s15000_s1 + $0xc70] sm:$0xf0]  ;;  %v8155_v15 = vor.u32 %v9764_v60, %v8152_v62  ;;  %v5037_v49 = vadd.f32 %v5036_v29, %v5024_v14 }
 0x135   :  { %5288 = vmatpush.bf16.msrb.mxu2 %v7883_v30  ;;  %v9684_v44 = vld [vmem:[%s15000_s1 + $0xd64] sm:$0xf]  ;;  %v7832_v19 = vld [vmem:[%s15000_s1 + $0xd70] sm:$0xf0]  ;;  %v7707_v34 = vor.u32 %v9652_v8, %v7704_v10  ;;  %v5012_v54 = vpop.f32.mrf.mxu0 }
 0x136   :  { %5301 = vmatpush.bf16.msrb.mxu3 %v8011_v38  ;;  %v9716_v23 = vld [vmem:[%s15000_s1 + $0xe64] sm:$0xf]  ;;  %v7960_v24 = vld [vmem:[%s15000_s1 + $0xe70] sm:$0xf0]  ;;  %v7835_v35 = vor.u32 %v9684_v44, %v7832_v19 }
 0x137   :  { %5267 = vmatpush.bf16.msrb.mxu0 %v7547_v48  ;;  %v9760_v27 = vld [vmem:[%s15000_s1 + $0xfc4] sm:$0xf]  ;;  %v8136_v30 = vld [vmem:[%s15000_s1 + $0xfd0] sm:$0xf0]  ;;  %v7963_v39 = vor.u32 %v9716_v23, %v7960_v24 }
 0x138   :  { %5276 = vmatpush.bf16.msrb.mxu1 %v7739_v50  ;;  %v9648_v36 = vld [vmem:[%s15000_s1 + $0xc44] sm:$0xf]  ;;  %v7688_v38 = vld [vmem:[%s15000_s1 + $0xc50] sm:$0xf0]  ;;  %v8139_v43 = vor.u32 %v9760_v27, %v8136_v30  ;;  %v5049_v50 = vpop.f32.mrf.mxu3 }
 0x139   :  { %5289 = vmatpush.bf16.msrb.mxu2 %v7867_v51  ;;  %v9680_v45 = vld [vmem:[%s15000_s1 + $0xd44] sm:$0xf]  ;;  %v7816_v47 = vld [vmem:[%s15000_s1 + $0xd50] sm:$0xf0]  ;;  %v12056_v55 = vadd.f32 %v5049_v50, %v5037_v49  ;;  %v7691_v56 = vor.u32 %v9648_v36, %v7688_v38 }
 0x13a   :  { %5302 = vmatpush.bf16.msrb.mxu3 %v7995_v46  ;;  %v9712_v48 = vld [vmem:[%s15000_s1 + $0xe44] sm:$0xf]  ;;  %v7944_v51 = vld [vmem:[%s15000_s1 + $0xe50] sm:$0xf0]  ;;  %v5025_v46 = vpop.f32.mrf.mxu1  ;;  %v7819_v57 = vor.u32 %v9680_v45, %v7816_v47 }
 0x13b   :  { %5268 = vmatpush.bf16.msrb.mxu0 %v7531_v3  ;;  %v9756_v52 = vld [vmem:[%s15000_s1 + $0xfa4] sm:$0xf]  ;;  %v8120_v53 = vld [vmem:[%s15000_s1 + $0xfb0] sm:$0xf0]  ;;  %v7947_v60 = vor.u32 %v9712_v48, %v7944_v51 }
 0x13c   :  { %5277 = vmatpush.bf16.msrb.mxu1 %v7723_v5  ;;  %v9644_v58 = vld [vmem:[%s15000_s1 + $0xc24] sm:$0xf]  ;;  %v7672_v59 = vld [vmem:[%s15000_s1 + $0xc30] sm:$0xf0]  ;;  %v8123_v62 = vor.u32 %v9756_v52, %v8120_v53 }
 0x13d   :  { %5290 = vmatpush.bf16.msrb.mxu2 %v7851_v6  ;;  %v9676_v63 = vld [vmem:[%s15000_s1 + $0xd24] sm:$0xf]  ;;  %v7800_v3 = vld [vmem:[%s15000_s1 + $0xd30] sm:$0xf0]  ;;  %v7675_v10 = vor.u32 %v9644_v58, %v7672_v59 }
 0x13e   :  { %5303 = vmatpush.bf16.msrb.mxu3 %v7979_v11  ;;  %5269 = vmatmul.bf16.vlgmr.msrb.gmra.mxu0 %v10726_v17  ;;  %v9708_v4 = vld [vmem:[%s15000_s1 + $0xe24] sm:$0xf]  ;;  %v7928_v5 = vld [vmem:[%s15000_s1 + $0xe30] sm:$0xf0]  ;;  %v7803_v11 = vor.u32 %v9676_v63, %v7800_v3 }
 0x13f   :  { %5313 = vmatpush.bf16.msra.mxu0 %v8155_v15  ;;  %v9752_v6 = vld [vmem:[%s15000_s1 + $0xf84] sm:$0xf]  ;;  %v8104_v8 = vld [vmem:[%s15000_s1 + $0xf90] sm:$0xf0]  ;;  %v7931_v19 = vor.u32 %v9708_v4, %v7928_v5 }
 0x140   :  { %5278 = vmatpush.bf16.msrb.mxu1 %v7707_v34  ;;  %v9640_v14 = vld [vmem:[%s15000_s1 + $0xc04] sm:$0xf]  ;;  %v7656_v15 = vld [vmem:[%s15000_s1 + $0xc10] sm:$0xf0]  ;;  %v8107_v23 = vor.u32 %v9752_v6, %v8104_v8  ;;  %v5038_v34 = vpop.f32.mrf.mxu2 }
 0x141   :  { %5291 = vmatpush.bf16.msrb.mxu2 %v7835_v35  ;;  %v9672_v44 = vld [vmem:[%s15000_s1 + $0xd04] sm:$0xf]  ;;  %v7784_v24 = vld [vmem:[%s15000_s1 + $0xd10] sm:$0xf0]  ;;  %v7659_v47 = vor.u32 %v9640_v14, %v7656_v15 }
 0x142   :  { %5304 = vmatpush.bf16.msrb.mxu3 %v7963_v39  ;;  %v9704_v27 = vld [vmem:[%s15000_s1 + $0xe04] sm:$0xf]  ;;  %v7912_v30 = vld [vmem:[%s15000_s1 + $0xe10] sm:$0xf0]  ;;  %v5051_v39 = vpop.f32.mrf.mxu3  ;;  %v7787_v48 = vor.u32 %v9672_v44, %v7784_v24 }
 0x143   :  { %5314 = vmatpush.bf16.msra.mxu0 %v8139_v43  ;;  %v9748_v35 = vld [vmem:[%s15000_s1 + $0xf64] sm:$0xf]  ;;  %v8088_v36 = vld [vmem:[%s15000_s1 + $0xf70] sm:$0xf0]  ;;  %v7915_v51 = vor.u32 %v9704_v27, %v7912_v30 }
 0x144   :  { %5279 = vmatpush.bf16.msrb.mxu1 %v7691_v56  ;;  %v9796_v38 = vld [vmem:[%s15000_s1 + $0x10e4] sm:$0xf]  ;;  %v8280_v29 = vld [vmem:[%s15000_s1 + $0x10f0] sm:$0xf0]  ;;  %v8091_v52 = vor.u32 %v9748_v35, %v8088_v36 }
 0x145   :  { %5292 = vmatpush.bf16.msrb.mxu2 %v7819_v57  ;;  %v9828_v43 = vld [vmem:[%s15000_s1 + $0x11e4] sm:$0xf]  ;;  %v8408_v45 = vld [vmem:[%s15000_s1 + $0x11f0] sm:$0xf0]  ;;  %v8283_v53 = vor.u32 %v9796_v38, %v8280_v29 }
 0x146   :  { %5305 = vmatpush.bf16.msrb.mxu3 %v7947_v60  ;;  %v9860_v49 = vld [vmem:[%s15000_s1 + $0x12e4] sm:$0xf]  ;;  %v8536_v50 = vld [vmem:[%s15000_s1 + $0x12f0] sm:$0xf0]  ;;  %v8411_v54 = vor.u32 %v9828_v43, %v8408_v45 }
 0x147   :  { %5315 = vmatpush.bf16.msra.mxu0 %v8123_v62  ;;  %v9744_v46 = vld [vmem:[%s15000_s1 + $0xf44] sm:$0xf]  ;;  %v8072_v56 = vld [vmem:[%s15000_s1 + $0xf50] sm:$0xf0]  ;;  %v8539_v58 = vor.u32 %v9860_v49, %v8536_v50 }
 0x148   :  { %5280 = vmatpush.bf16.msrb.mxu1 %v7675_v10  ;;  %v9792_v57 = vld [vmem:[%s15000_s1 + $0x10c4] sm:$0xf]  ;;  %v8264_v59 = vld [vmem:[%s15000_s1 + $0x10d0] sm:$0xf0]  ;;  %v8075_v4 = vor.u32 %v9744_v46, %v8072_v56 }
 0x149   :  { %5293 = vmatpush.bf16.msrb.mxu2 %v7803_v11  ;;  %v9824_v60 = vld [vmem:[%s15000_s1 + $0x11c4] sm:$0xf]  ;;  %v8392_v62 = vld [vmem:[%s15000_s1 + $0x11d0] sm:$0xf0]  ;;  %v8267_v5 = vor.u32 %v9792_v57, %v8264_v59 }
 0x14a   :  { %5306 = vmatpush.bf16.msrb.mxu3 %v7931_v19  ;;  %v9856_v63 = vld [vmem:[%s15000_s1 + $0x12c4] sm:$0xf]  ;;  %v8520_v3 = vld [vmem:[%s15000_s1 + $0x12d0] sm:$0xf0]  ;;  %v8395_v6 = vor.u32 %v9824_v60, %v8392_v62 }
 0x14b   :  { %5316 = vmatpush.bf16.msra.mxu0 %v8107_v23  ;;  %v9740_v8 = vld [vmem:[%s15000_s1 + $0xf24] sm:$0xf]  ;;  %v8056_v10 = vld [vmem:[%s15000_s1 + $0xf30] sm:$0xf0]  ;;  %v8523_v14 = vor.u32 %v9856_v63, %v8520_v3 }
 0x14c   :  { %5281 = vmatpush.bf16.msrb.mxu1 %v7659_v47  ;;  %v9788_v11 = vld [vmem:[%s15000_s1 + $0x10a4] sm:$0xf]  ;;  %v8248_v15 = vld [vmem:[%s15000_s1 + $0x10b0] sm:$0xf0]  ;;  %v8059_v27 = vor.u32 %v9740_v8, %v8056_v10 }
 0x14d   :  { %5294 = vmatpush.bf16.msrb.mxu2 %v7787_v48  ;;  %v9820_v44 = vld [vmem:[%s15000_s1 + $0x11a4] sm:$0xf]  ;;  %v8376_v19 = vld [vmem:[%s15000_s1 + $0x11b0] sm:$0xf0]  ;;  %v8251_v34 = vor.u32 %v9788_v11, %v8248_v15  ;;  %v5062_v48 = vpop.f32.mrf.mxu0 }
 0x14e   :  { %5307 = vmatpush.bf16.msrb.mxu3 %v7915_v51  ;;  %v9852_v23 = vld [vmem:[%s15000_s1 + $0x12a4] sm:$0xf]  ;;  %v8504_v24 = vld [vmem:[%s15000_s1 + $0x12b0] sm:$0xf0]  ;;  %v8379_v35 = vor.u32 %v9820_v44, %v8376_v19 }
 0x14f   :  { %5317 = vmatpush.bf16.msra.mxu0 %v8091_v52  ;;  %5282 = vmatmul.bf16.vlgmr.msrb.gmra.mxu1 %v10743_v28  ;;  %v9736_v30 = vld [vmem:[%s15000_s1 + $0xf04] sm:$0xf]  ;;  %v8040_v36 = vld [vmem:[%s15000_s1 + $0xf10] sm:$0xf0]  ;;  %v8507_v29 = vor.u32 %v9852_v23, %v8504_v24  ;;  %v5063_v52 = vadd.f32 %v5062_v48, %v12056_v55 }
 0x150   :  { %5326 = vmatpush.bf16.msra.mxu1 %v8283_v53  ;;  %5295 = vmatmul.bf16.vlgmr.msrb.gmra.mxu2 %v10747_v32  ;;  %v9784_v38 = vld [vmem:[%s15000_s1 + $0x1084] sm:$0xf]  ;;  %v8232_v39 = vld [vmem:[%s15000_s1 + $0x1090] sm:$0xf0]  ;;  %v8043_v53 = vor.u32 %v9736_v30, %v8040_v36 }
 0x151   :  { %5339 = vmatpush.bf16.msra.mxu2 %v8411_v54  ;;  %5308 = vmatmul.bf16.vlgmr.msrb.gmra.mxu3 %v10745_v31  ;;  %v9816_v43 = vld [vmem:[%s15000_s1 + $0x1184] sm:$0xf]  ;;  %v8360_v45 = vld [vmem:[%s15000_s1 + $0x1190] sm:$0xf0]  ;;  %v5075_v54 = vpop.f32.mrf.mxu1  ;;  %v8235_v46 = vor.u32 %v9784_v38, %v8232_v39 }
 0x152   :  { %5352 = vmatpush.bf16.msra.mxu3 %v8539_v58  ;;  %v9848_v47 = vld [vmem:[%s15000_s1 + $0x1284] sm:$0xf]  ;;  %v8488_v49 = vld [vmem:[%s15000_s1 + $0x1290] sm:$0xf0]  ;;  %v8363_v56 = vor.u32 %v9816_v43, %v8360_v45  ;;  %v5076_v60 = vadd.f32 %v5075_v54, %v5063_v52 }
 0x153   :  { %5318 = vmatpush.bf16.msra.mxu0 %v8075_v4  ;;  %v9892_v50 = vld [vmem:[%s15000_s1 + $0x13e4] sm:$0xf]  ;;  %v8664_v51 = vld [vmem:[%s15000_s1 + $0x13f0] sm:$0xf0]  ;;  %v8491_v59 = vor.u32 %v9848_v47, %v8488_v49  ;;  %v5088_v44 = vpop.f32.mrf.mxu2 }
 0x154   :  { %5327 = vmatpush.bf16.msra.mxu1 %v8267_v5  ;;  %v9780_v57 = vld [vmem:[%s15000_s1 + $0x1064] sm:$0xf]  ;;  %v8216_v58 = vld [vmem:[%s15000_s1 + $0x1070] sm:$0xf0]  ;;  %v8667_v62 = vor.u32 %v9892_v50, %v8664_v51  ;;  %v5089_v30 = vadd.f32 %v5088_v44, %v5076_v60 }
 0x155   :  { %5340 = vmatpush.bf16.msra.mxu2 %v8395_v6  ;;  %v9812_v55 = vld [vmem:[%s15000_s1 + $0x1164] sm:$0xf]  ;;  %v8344_v63 = vld [vmem:[%s15000_s1 + $0x1170] sm:$0xf0]  ;;  %v8219_v8 = vor.u32 %v9780_v57, %v8216_v58 }
 0x156   :  { %5353 = vmatpush.bf16.msra.mxu3 %v8523_v14  ;;  %v9844_v3 = vld [vmem:[%s15000_s1 + $0x1264] sm:$0xf]  ;;  %v8472_v4 = vld [vmem:[%s15000_s1 + $0x1270] sm:$0xf0]  ;;  %v8347_v10 = vor.u32 %v9812_v55, %v8344_v63 }
 0x157   :  { %5319 = vmatpush.bf16.msra.mxu0 %v8059_v27  ;;  %v9888_v5 = vld [vmem:[%s15000_s1 + $0x13c4] sm:$0xf]  ;;  %v8648_v6 = vld [vmem:[%s15000_s1 + $0x13d0] sm:$0xf0]  ;;  %v8475_v15 = vor.u32 %v9844_v3, %v8472_v4 }
 0x158   :  { %5328 = vmatpush.bf16.msra.mxu1 %v8251_v34  ;;  %v9776_v11 = vld [vmem:[%s15000_s1 + $0x1044] sm:$0xf]  ;;  %v8200_v14 = vld [vmem:[%s15000_s1 + $0x1050] sm:$0xf0]  ;;  %v8651_v19 = vor.u32 %v9888_v5, %v8648_v6  ;;  %v5064_v34 = vpop.f32.mrf.mxu0 }
 0x159   :  { %5341 = vmatpush.bf16.msra.mxu2 %v8379_v35  ;;  %v9808_v23 = vld [vmem:[%s15000_s1 + $0x1144] sm:$0xf]  ;;  %v8328_v24 = vld [vmem:[%s15000_s1 + $0x1150] sm:$0xf0]  ;;  %v5101_v35 = vpop.f32.mrf.mxu3  ;;  %v8203_v45 = vor.u32 %v9776_v11, %v8200_v14 }
 0x15a   :  { %5354 = vmatpush.bf16.msra.mxu3 %v8507_v29  ;;  %v9840_v27 = vld [vmem:[%s15000_s1 + $0x1244] sm:$0xf]  ;;  %v8456_v36 = vld [vmem:[%s15000_s1 + $0x1250] sm:$0xf0]  ;;  %v5077_v29 = vpop.f32.mrf.mxu1  ;;  %v5102_v43 = vadd.f32 %v5101_v35, %v5089_v30  ;;  %v8331_v47 = vor.u32 %v9808_v23, %v8328_v24 }
 0x15b   :  { %5320 = vmatpush.bf16.msra.mxu0 %v8043_v53  ;;  %v9884_v38 = vld [vmem:[%s15000_s1 + $0x13a4] sm:$0xf]  ;;  %v8632_v39 = vld [vmem:[%s15000_s1 + $0x13b0] sm:$0xf0]  ;;  %v8459_v50 = vor.u32 %v9840_v27, %v8456_v36 }
 0x15c   :  { %5329 = vmatpush.bf16.msra.mxu1 %v8235_v46  ;;  %v9772_v48 = vld [vmem:[%s15000_s1 + $0x1024] sm:$0xf]  ;;  %v8184_v49 = vld [vmem:[%s15000_s1 + $0x1030] sm:$0xf0]  ;;  %v8635_v51 = vor.u32 %v9884_v38, %v8632_v39 }
 0x15d   :  { %5342 = vmatpush.bf16.msra.mxu2 %v8363_v56  ;;  %v9804_v52 = vld [vmem:[%s15000_s1 + $0x1124] sm:$0xf]  ;;  %v8312_v53 = vld [vmem:[%s15000_s1 + $0x1130] sm:$0xf0]  ;;  %v8187_v58 = vor.u32 %v9772_v48, %v8184_v49 }
 0x15e   :  { %5355 = vmatpush.bf16.msra.mxu3 %v8491_v59  ;;  %5321 = vmatmul.bf16.vlgmr.msra.gmra.mxu0 %v10749_v33  ;;  %v9836_v54 = vld [vmem:[%s15000_s1 + $0x1224] sm:$0xf]  ;;  %v8440_v46 = vld [vmem:[%s15000_s1 + $0x1230] sm:$0xf0]  ;;  %v8315_v59 = vor.u32 %v9804_v52, %v8312_v53 }
 0x15f   :  { %5365 = vmatpush.bf16.msrb.mxu0 %v8667_v62  ;;  %v9880_v56 = vld [vmem:[%s15000_s1 + $0x1384] sm:$0xf]  ;;  %v8616_v57 = vld [vmem:[%s15000_s1 + $0x1390] sm:$0xf0]  ;;  %v8443_v63 = vor.u32 %v9836_v54, %v8440_v46 }
 0x160   :  { %5330 = vmatpush.bf16.msra.mxu1 %v8219_v8  ;;  %v9768_v60 = vld [vmem:[%s15000_s1 + $0x1004] sm:$0xf]  ;;  %v8168_v62 = vld [vmem:[%s15000_s1 + $0x1010] sm:$0xf0]  ;;  %v8619_v3 = vor.u32 %v9880_v56, %v8616_v57  ;;  %v5090_v8 = vpop.f32.mrf.mxu2  ;;  %v5114_v44 = vpop.f32.mrf.mxu0 }
 0x161   :  { %5343 = vmatpush.bf16.msra.mxu2 %v8347_v10  ;;  %v9800_v55 = vld [vmem:[%s15000_s1 + $0x1104] sm:$0xf]  ;;  %v8296_v4 = vld [vmem:[%s15000_s1 + $0x1110] sm:$0xf0]  ;;  %v12315_v27 = vadd.f32 %v5114_v44, %v5102_v43  ;;  %v8171_v30 = vor.u32 %v9768_v60, %v8168_v62 }
 0x162   :  { %5356 = vmatpush.bf16.msra.mxu3 %v8475_v15  ;;  %v9832_v5 = vld [vmem:[%s15000_s1 + $0x1204] sm:$0xf]  ;;  %v8424_v6 = vld [vmem:[%s15000_s1 + $0x1210] sm:$0xf0]  ;;  %v5103_v15 = vpop.f32.mrf.mxu3  ;;  %v8299_v34 = vor.u32 %v9800_v55, %v8296_v4 }
 0x163   :  { %5366 = vmatpush.bf16.msrb.mxu0 %v8651_v19  ;;  %v9876_v10 = vld [vmem:[%s15000_s1 + $0x1364] sm:$0xf]  ;;  %v8600_v11 = vld [vmem:[%s15000_s1 + $0x1370] sm:$0xf0]  ;;  %v8427_v38 = vor.u32 %v9832_v5, %v8424_v6 }
 0x164   :  { %5331 = vmatpush.bf16.msra.mxu1 %v8203_v45  ;;  %v9924_v14 = vld [vmem:[%s15000_s1 + $0x14e4] sm:$0xf]  ;;  %v8792_v19 = vld [vmem:[%s15000_s1 + $0x14f0] sm:$0xf0]  ;;  %v8603_v39 = vor.u32 %v9876_v10, %v8600_v11 }
 0x165   :  { %5344 = vmatpush.bf16.msra.mxu2 %v8331_v47  ;;  %v9956_v23 = vld [vmem:[%s15000_s1 + $0x15e4] sm:$0xf]  ;;  %v8920_v24 = vld [vmem:[%s15000_s1 + $0x15f0] sm:$0xf0]  ;;  %v8795_v29 = vor.u32 %v9924_v14, %v8792_v19 }
 0x166   :  { %5357 = vmatpush.bf16.msra.mxu3 %v8459_v50  ;;  %v9988_v35 = vld [vmem:[%s15000_s1 + $0x16e4] sm:$0xf]  ;;  %v9048_v36 = vld [vmem:[%s15000_s1 + $0x16f0] sm:$0xf0]  ;;  %v8923_v45 = vor.u32 %v9956_v23, %v8920_v24 }
 0x167   :  { %5367 = vmatpush.bf16.msrb.mxu0 %v8635_v51  ;;  %v9872_v43 = vld [vmem:[%s15000_s1 + $0x1344] sm:$0xf]  ;;  %v8584_v47 = vld [vmem:[%s15000_s1 + $0x1350] sm:$0xf0]  ;;  %v9051_v49 = vor.u32 %v9988_v35, %v9048_v36  ;;  %v10040_v35 = vld [vmem:[%s15002_s2] sm:$0xf] }
 0x168   :  { %5332 = vmatpush.bf16.msra.mxu1 %v8187_v58  ;;  %v9920_v48 = vld [vmem:[%s15000_s1 + $0x14c4] sm:$0xf]  ;;  %v8776_v50 = vld [vmem:[%s15000_s1 + $0x14d0] sm:$0xf0]  ;;  %v8587_v46 = vor.u32 %v9872_v43, %v8584_v47  ;;  %v5116_v4 = vpop.f32.mrf.mxu0  ;;  %v806_v36 = vperm.slane %v10040_v35, 1 }
 0x169   :  { %5345 = vmatpush.bf16.msra.mxu2 %v8315_v59  ;;  %v9952_v51 = vld [vmem:[%s15000_s1 + $0x15c4] sm:$0xf]  ;;  %v8904_v52 = vld [vmem:[%s15000_s1 + $0x15d0] sm:$0xf0]  ;;  %v8779_v56 = vor.u32 %v9920_v48, %v8776_v50 }
 0x16a   :  { %5358 = vmatpush.bf16.msra.mxu3 %v8443_v63  ;;  %v9984_v53 = vld [vmem:[%s15000_s1 + $0x16c4] sm:$0xf]  ;;  %v9032_v54 = vld [vmem:[%s15000_s1 + $0x16d0] sm:$0xf0]  ;;  %v8907_v57 = vor.u32 %v9952_v51, %v8904_v52 }
 0x16b   :  { %5368 = vmatpush.bf16.msrb.mxu0 %v8619_v3  ;;  %v9868_v58 = vld [vmem:[%s15000_s1 + $0x1324] sm:$0xf]  ;;  %v8568_v59 = vld [vmem:[%s15000_s1 + $0x1330] sm:$0xf0]  ;;  %v9035_v62 = vor.u32 %v9984_v53, %v9032_v54 }
 0x16c   :  { %5333 = vmatpush.bf16.msra.mxu1 %v8171_v30  ;;  %v9916_v60 = vld [vmem:[%s15000_s1 + $0x14a4] sm:$0xf]  ;;  %v8760_v55 = vld [vmem:[%s15000_s1 + $0x14b0] sm:$0xf0]  ;;  %v8571_v8 = vor.u32 %v9868_v58, %v8568_v59  ;;  %v5127_v43 = vpop.f32.mrf.mxu1 }
 0x16d   :  { %5346 = vmatpush.bf16.msra.mxu2 %v8299_v34  ;;  %v9948_v63 = vld [vmem:[%s15000_s1 + $0x15a4] sm:$0xf]  ;;  %v8888_v3 = vld [vmem:[%s15000_s1 + $0x15b0] sm:$0xf0]  ;;  %v8763_v14 = vor.u32 %v9916_v60, %v8760_v55 }
 0x16e   :  { %5359 = vmatpush.bf16.msra.mxu3 %v8427_v38  ;;  %v9980_v5 = vld [vmem:[%s15000_s1 + $0x16a4] sm:$0xf]  ;;  %v9016_v6 = vld [vmem:[%s15000_s1 + $0x16b0] sm:$0xf0]  ;;  %v8891_v15 = vor.u32 %v9948_v63, %v8888_v3 }
 0x16f   :  { %5369 = vmatpush.bf16.msrb.mxu0 %v8603_v39  ;;  %5334 = vmatmul.bf16.vlgmr.msra.gmra.mxu1 %v11113_v9  ;;  %v9864_v10 = vld [vmem:[%s15000_s1 + $0x1304] sm:$0xf]  ;;  %v8552_v11 = vld [vmem:[%s15000_s1 + $0x1310] sm:$0xf0]  ;;  %v9019_v24 = vor.u32 %v9980_v5, %v9016_v6 }
 0x170   :  { %5378 = vmatpush.bf16.msrb.mxu1 %v8795_v29  ;;  %5347 = vmatmul.bf16.vlgmr.msra.gmra.mxu2 %v11126_v18  ;;  %v9912_v44 = vld [vmem:[%s15000_s1 + $0x1484] sm:$0xf]  ;;  %v8744_v19 = vld [vmem:[%s15000_s1 + $0x1490] sm:$0xf0] }
 0x171   :  { %5391 = vmatpush.bf16.msrb.mxu2 %v8923_v45  ;;  %5360 = vmatmul.bf16.vlgmr.msra.gmra.mxu3 %v11124_v16  ;;  %v9944_v23 = vld [vmem:[%s15000_s1 + $0x1584] sm:$0xf]  ;;  %v8872_v30 = vld [vmem:[%s15000_s1 + $0x1590] sm:$0xf0]  ;;  %v8555_v45 = vor.u32 %v9864_v10, %v8552_v11  ;;  %v8747_v47 = vor.u32 %v9912_v44, %v8744_v19 }
 0x172   :  { %5404 = vmatpush.bf16.msrb.mxu3 %v9051_v49  ;;  %v9976_v34 = vld [vmem:[%s15000_s1 + $0x1684] sm:$0xf]  ;;  %v9000_v38 = vld [vmem:[%s15000_s1 + $0x1690] sm:$0xf0]  ;;  %v8875_v48 = vor.u32 %v9944_v23, %v8872_v30 }
 0x173   :  { %5370 = vmatpush.bf16.msrb.mxu0 %v8587_v46  ;;  %v10020_v39 = vld [vmem:[%s15000_s1 + $0x17e4] sm:$0xf]  ;;  %v9176_v29 = vld [vmem:[%s15000_s1 + $0x17f0] sm:$0xf0]  ;;  %v9003_v51 = vor.u32 %v9976_v34, %v9000_v38  ;;  %v5140_v3 = vpop.f32.mrf.mxu2 }
 0x174   :  { %5379 = vmatpush.bf16.msrb.mxu1 %v8779_v56  ;;  %v9908_v49 = vld [vmem:[%s15000_s1 + $0x1464] sm:$0xf]  ;;  %v8728_v50 = vld [vmem:[%s15000_s1 + $0x1470] sm:$0xf0]  ;;  %v9179_v52 = vor.u32 %v10020_v39, %v9176_v29  ;;  %v5128_v56 = vadd.f32 %v5127_v43, %v806_v36 }
 0x175   :  { %5392 = vmatpush.bf16.msrb.mxu2 %v8907_v57  ;;  %v9940_v53 = vld [vmem:[%s15000_s1 + $0x1564] sm:$0xf]  ;;  %v8856_v54 = vld [vmem:[%s15000_s1 + $0x1570] sm:$0xf0]  ;;  %v8731_v60 = vor.u32 %v9908_v49, %v8728_v50 }
 0x176   :  { %5405 = vmatpush.bf16.msrb.mxu3 %v9035_v62  ;;  %v9972_v46 = vld [vmem:[%s15000_s1 + $0x1664] sm:$0xf]  ;;  %v8984_v57 = vld [vmem:[%s15000_s1 + $0x1670] sm:$0xf0]  ;;  %v8859_v62 = vor.u32 %v9940_v53, %v8856_v54  ;;  %v5141_v11 = vadd.f32 %v5140_v3, %v5128_v56 }
 0x177   :  { %5371 = vmatpush.bf16.msrb.mxu0 %v8571_v8  ;;  %v10016_v58 = vld [vmem:[%s15000_s1 + $0x17c4] sm:$0xf]  ;;  %v9160_v59 = vld [vmem:[%s15000_s1 + $0x17d0] sm:$0xf0]  ;;  %v8987_v4 = vor.u32 %v9972_v46, %v8984_v57 }
 0x178   :  { %5380 = vmatpush.bf16.msrb.mxu1 %v8763_v14  ;;  %v9904_v55 = vld [vmem:[%s15000_s1 + $0x1444] sm:$0xf]  ;;  %v8712_v63 = vld [vmem:[%s15000_s1 + $0x1450] sm:$0xf0]  ;;  %v9163_v5 = vor.u32 %v10016_v58, %v9160_v59  ;;  %v5153_v14 = vpop.f32.mrf.mxu3 }
 0x179   :  { %5393 = vmatpush.bf16.msrb.mxu2 %v8891_v15  ;;  %v9936_v6 = vld [vmem:[%s15000_s1 + $0x1544] sm:$0xf]  ;;  %v8840_v8 = vld [vmem:[%s15000_s1 + $0x1550] sm:$0xf0]  ;;  %v5154_v23 = vadd.f32 %v5153_v14, %v5141_v11  ;;  %v8715_v30 = vor.u32 %v9904_v55, %v8712_v63 }
 0x17a   :  { %5406 = vmatpush.bf16.msrb.mxu3 %v9019_v24  ;;  %v9968_v10 = vld [vmem:[%s15000_s1 + $0x1644] sm:$0xf]  ;;  %v8968_v15 = vld [vmem:[%s15000_s1 + $0x1650] sm:$0xf0]  ;;  %v5129_v24 = vpop.f32.mrf.mxu1  ;;  %v8843_v34 = vor.u32 %v9936_v6, %v8840_v8  ;;  %v6238_v8 = vld [vmem:[%s15000_s1 + $0xe8] sm:$0xf] }
 0x17b   :  { %5372 = vmatpush.bf16.msrb.mxu0 %v8555_v45  ;;  %v10012_v44 = vld [vmem:[%s15000_s1 + $0x17a4] sm:$0xf]  ;;  %v9144_v19 = vld [vmem:[%s15000_s1 + $0x17b0] sm:$0xf0]  ;;  %v8971_v38 = vor.u32 %v9968_v10, %v8968_v15  ;;  %v5166_v50 = vpop.f32.mrf.mxu0  ;;  %v5142_v57 = vpop.f32.mrf.mxu2  ;;  %v9287_v10 = vld [vmem:[%s15000_s1 + $0xf4] sm:$0xf0] }
 0x17c   :  { %5381 = vmatpush.bf16.msrb.mxu1 %v8747_v47  ;;  %v9900_v35 = vld [vmem:[%s15000_s1 + $0x1424] sm:$0xf]  ;;  %v8696_v36 = vld [vmem:[%s15000_s1 + $0x1430] sm:$0xf0]  ;;  %v9147_v39 = vor.u32 %v10012_v44, %v9144_v19  ;;  %v12489_v56 = vadd.f32 %v5166_v50, %v5154_v23  ;;  %v6366_v15 = vld [vmem:[%s15000_s1 + $0x1e8] sm:$0xf] }
 0x17d   :  { %5394 = vmatpush.bf16.msrb.mxu2 %v8875_v48  ;;  %v9932_v29 = vld [vmem:[%s15000_s1 + $0x1524] sm:$0xf]  ;;  %v8824_v45 = vld [vmem:[%s15000_s1 + $0x1530] sm:$0xf0]  ;;  %v9319_v44 = vld [vmem:[%s15000_s1 + $0x1f4] sm:$0xf0] }
 0x17e   :  { %5407 = vmatpush.bf16.msrb.mxu3 %v9003_v51  ;;  %5373 = vmatmul.bf16.vlgmr.msrb.gmra.mxu0 %v11137_v25  ;;  %v9964_v43 = vld [vmem:[%s15000_s1 + $0x1624] sm:$0xf]  ;;  %v8952_v47 = vld [vmem:[%s15000_s1 + $0x1630] sm:$0xf0]  ;;  %v8699_v51 = vor.u32 %v9900_v35, %v8696_v36 }
 0x17f   :  { %5417 = vmatpush.bf16.msra.mxu0 %v9179_v52  ;;  %v10008_v48 = vld [vmem:[%s15000_s1 + $0x1784] sm:$0xf]  ;;  %v9128_v49 = vld [vmem:[%s15000_s1 + $0x1790] sm:$0xf0]  ;;  %v8827_v52 = vor.u32 %v9932_v29, %v8824_v45  ;;  %v8955_v58 = vor.u32 %v9964_v43, %v8952_v47  ;;  %v6222_v29 = vld [vmem:[%s15000_s1 + $0xc8] sm:$0xf] }
 0x180   :  { %5382 = vmatpush.bf16.msrb.mxu1 %v8731_v60  ;;  %v9896_v53 = vld [vmem:[%s15000_s1 + $0x1404] sm:$0xf]  ;;  %v8680_v54 = vld [vmem:[%s15000_s1 + $0x1410] sm:$0xf0]  ;;  %v9131_v59 = vor.u32 %v10008_v48, %v9128_v49  ;;  %v5155_v63 = vpop.f32.mrf.mxu3  ;;  %v9283_v45 = vld [vmem:[%s15000_s1 + $0xd4] sm:$0xf0] }
 0x181   :  { %5395 = vmatpush.bf16.msrb.mxu2 %v8859_v62  ;;  %v9928_v46 = vld [vmem:[%s15000_s1 + $0x1504] sm:$0xf]  ;;  %v8808_v60 = vld [vmem:[%s15000_s1 + $0x1510] sm:$0xf0]  ;;  %v8683_v11 = vor.u32 %v9896_v53, %v8680_v54  ;;  %v6350_v47 = vld [vmem:[%s15000_s1 + $0x1c8] sm:$0xf] }
 0x182   :  { %5408 = vmatpush.bf16.msrb.mxu3 %v8987_v4  ;;  %v9960_v62 = vld [vmem:[%s15000_s1 + $0x1604] sm:$0xf]  ;;  %v8936_v55 = vld [vmem:[%s15000_s1 + $0x1610] sm:$0xf0]  ;;  %v8811_v14 = vor.u32 %v9928_v46, %v8808_v60  ;;  %v9315_v48 = vld [vmem:[%s15000_s1 + $0x1d4] sm:$0xf0] }
 0x183   :  { %5418 = vmatpush.bf16.msra.mxu0 %v9163_v5  ;;  %v10004_v3 = vld [vmem:[%s15000_s1 + $0x1764] sm:$0xf]  ;;  %v9112_v4 = vld [vmem:[%s15000_s1 + $0x1770] sm:$0xf0]  ;;  %v8939_v19 = vor.u32 %v9960_v62, %v8936_v55  ;;  %v5168_v43 = vpop.f32.mrf.mxu0  ;;  %v6351_v46 = vor.u32 %v9315_v48, %v6350_v47  ;;  %v6334_v60 = vld [vmem:[%s15000_s1 + $0x1a8] sm:$0xf] }
 0x184   :  { %5383 = vmatpush.bf16.msrb.mxu1 %v8715_v30  ;;  %v10036_v5 = vld [vmem:[%s15000_s1 + $0x1864] sm:$0xf]  ;;  %v9240_v6 = vld [vmem:[%s15000_s1 + $0x1870] sm:$0xf0]  ;;  %v9115_v23 = vor.u32 %v10004_v3, %v9112_v4  ;;  %v6239_v30 = vor.u32 %v9287_v10, %v6238_v8  ;;  %v9311_v62 = vld [vmem:[%s15000_s1 + $0x1b4] sm:$0xf0] }
 0x185   :  { %5396 = vmatpush.bf16.msrb.mxu2 %v8843_v34  ;;  %v9243_v24 = vor.u32 %v10036_v5, %v9240_v6  ;;  %v10000_v34 = vld [vmem:[%s15000_s1 + $0x1744] sm:$0xf]  ;;  %v9096_v35 = vld [vmem:[%s15000_s1 + $0x1750] sm:$0xf0]  ;;  %v6335_v10 = vor.u32 %v9311_v62, %v6334_v60  ;;  %v6174_v43 = vld [vmem:[%s15000_s1 + $0x68] sm:$0xf] }
 0x186   :  { %5409 = vmatpush.bf16.msrb.mxu3 %v8971_v38  ;;  %v10032_v36 = vld [vmem:[%s15000_s1 + $0x1844] sm:$0xf]  ;;  %v6367_v38 = vor.u32 %v9319_v44, %v6366_v15  ;;  %v9099_v49 = vor.u32 %v10000_v34, %v9096_v35  ;;  %v9080_v53 = vld [vmem:[%s15000_s1 + $0x1730] sm:$0xf0]  ;;  %v6318_v15 = vld [vmem:[%s15000_s1 + $0x188] sm:$0xf] }
 0x187   :  { %5419 = vmatpush.bf16.msra.mxu0 %v9147_v39  ;;  %v9224_v39 = vld [vmem:[%s15000_s1 + $0x1850] sm:$0xf0]  ;;  %v10028_v54 = vld [vmem:[%s15000_s1 + $0x1824] sm:$0xf]  ;;  %v9307_v44 = vld [vmem:[%s15000_s1 + $0x194] sm:$0xf0] }
 0x188   :  { %5384 = vmatpush.bf16.msrb.mxu1 %v8699_v51  ;;  %v9227_v50 = vor.u32 %v10032_v36, %v9224_v39  ;;  %v6223_v51 = vor.u32 %v9283_v45, %v6222_v29  ;;  %v9208_v57 = vld [vmem:[%s15000_s1 + $0x1830] sm:$0xf0]  ;;  %v9992_v63 = vld [vmem:[%s15000_s1 + $0x1704] sm:$0xf]  ;;  %v9383_v34 = vld [vmem:[%s15000_s1 + $0x3f4] sm:$0xf0]  ;;  %v6319_v29 = vor.u32 %v9307_v44, %v6318_v15 }
 0x189   :  { %5397 = vmatpush.bf16.msrb.mxu2 %v8827_v52  ;;  %v9996_v52 = vld [vmem:[%s15000_s1 + $0x1724] sm:$0xf]  ;;  %v9211_v3 = vor.u32 %v10028_v54, %v9208_v57  ;;  %v9064_v5 = vld [vmem:[%s15000_s1 + $0x1710] sm:$0xf0]  ;;  %v9271_v47 = vld [vmem:[%s15000_s1 + $0x74] sm:$0xf0] }
 0x18a   :  { %5410 = vmatpush.bf16.msrb.mxu3 %v8955_v58  ;;  %v6206_v58 = vld [vmem:[%s15000_s1 + $0xa8] sm:$0xf]  ;;  %v9083_v55 = vor.u32 %v9996_v52, %v9080_v53  ;;  %v10024_v6 = vld [vmem:[%s15000_s1 + $0x1804] sm:$0xf]  ;;  %v9192_v8 = vld [vmem:[%s15000_s1 + $0x1810] sm:$0xf0]  ;;  %v6175_v54 = vor.u32 %v9271_v47, %v6174_v43 }
 0x18b   :  { %5420 = vmatpush.bf16.msra.mxu0 %v9131_v59  ;;  %v9279_v59 = vld [vmem:[%s15000_s1 + $0xb4] sm:$0xf0]  ;;  %v9195_v36 = vor.u32 %v10024_v6, %v9192_v8  ;;  %v6302_v48 = vld [vmem:[%s15000_s1 + $0x168] sm:$0xf] }
 0x18c   :  { %5385 = vmatpush.bf16.msrb.mxu1 %v8683_v11  ;;  %v6207_v4 = vor.u32 %v9279_v59, %v6206_v58  ;;  %v6190_v11 = vld [vmem:[%s15000_s1 + $0x88] sm:$0xf]  ;;  %v5179_v35 = vpop.f32.mrf.mxu1  ;;  %v9379_v53 = vld [vmem:[%s15000_s1 + $0x3d4] sm:$0xf0] }
 0x18d   :  { %5398 = vmatpush.bf16.msrb.mxu2 %v8811_v14  ;;  %v9275_v14 = vld [vmem:[%s15000_s1 + $0x94] sm:$0xf0]  ;;  %v5180_v39 = vadd.f32 %v5179_v35, %v12489_v56  ;;  %v6606_v52 = vld [vmem:[%s15000_s1 + $0x3c8] sm:$0xf] }
 0x18e   :  { %5411 = vmatpush.bf16.msrb.mxu3 %v8939_v19  ;;  %v6494_v19 = vld [vmem:[%s15000_s1 + $0x2e8] sm:$0xf]  ;;  %v9303_v56 = vld [vmem:[%s15000_s1 + $0x174] sm:$0xf0] }
 0x18f   :  { %5421 = vmatpush.bf16.msra.mxu0 %v9115_v23  ;;  %5386 = vmatmul.bf16.vlgmr.msrb.gmra.mxu1 %v11154_v37  ;;  %v9351_v23 = vld [vmem:[%s15000_s1 + $0x2f4] sm:$0xf0]  ;;  %v6303_v57 = vor.u32 %v9303_v56, %v6302_v48  ;;  %v6158_v59 = vld [vmem:[%s15000_s1 + $0x48] sm:$0xf] }
 0x190   :  { %5434 = vmatpush.bf16.msra.mxu1 %v9243_v24  ;;  %5399 = vmatmul.bf16.vlgmr.msrb.gmra.mxu2 %v11158_v41  ;;  %v9067_v24 = vor.u32 %v9992_v63, %v9064_v5  ;;  %v6495_v45 = vor.u32 %v9351_v23, %v6494_v19  ;;  %v9267_v60 = vld [vmem:[%s15000_s1 + $0x54] sm:$0xf0]  ;;  %v6286_v62 = vld [vmem:[%s15000_s1 + $0x148] sm:$0xf] }
 0x191   :  { %5443 = vmatpush.bf16.msra.mxu2 %v6239_v30  ;;  %5412 = vmatmul.bf16.vlgmr.msrb.gmra.mxu3 %v11156_v40  ;;  %v6622_v30 = vld [vmem:[%s15000_s1 + $0x3e8] sm:$0xf]  ;;  %v9343_v6 = vld [vmem:[%s15000_s1 + $0x2b4] sm:$0xf0]  ;;  %v6159_v15 = vor.u32 %v9267_v60, %v6158_v59 }
 0x192   :  { %5456 = vmatpush.bf16.msra.mxu3 %v6367_v38  ;;  %v6191_v38 = vor.u32 %v9275_v14, %v6190_v11  ;;  %v6462_v5 = vld [vmem:[%s15000_s1 + $0x2a8] sm:$0xf]  ;;  %v9295_v35 = vld [vmem:[%s15000_s1 + $0x134] sm:$0xf0] }
 0x193   :  { %5422 = vmatpush.bf16.msra.mxu0 %v9099_v49  ;;  %v6623_v49 = vor.u32 %v9383_v34, %v6622_v30  ;;  %v6590_v8 = vld [vmem:[%s15000_s1 + $0x3a8] sm:$0xf]  ;;  %v6463_v19 = vor.u32 %v9343_v6, %v6462_v5  ;;  %v9371_v43 = vld [vmem:[%s15000_s1 + $0x394] sm:$0xf0] }
 0x194   :  { %5435 = vmatpush.bf16.msra.mxu1 %v9227_v50  ;;  %v6478_v50 = vld [vmem:[%s15000_s1 + $0x2c8] sm:$0xf]  ;;  %v5205_v63 = vpop.f32.mrf.mxu3  ;;  %v5181_v14 = vpop.f32.mrf.mxu1  ;;  %v9335_v59 = vld [vmem:[%s15000_s1 + $0x274] sm:$0xf0] }
 0x195   :  { %5444 = vmatpush.bf16.msra.mxu2 %v6223_v51  ;;  %v9347_v51 = vld [vmem:[%s15000_s1 + $0x2d4] sm:$0xf0]  ;;  %v6142_v23 = vld [vmem:[%s15000_s1 + $0x28] sm:$0xf] }
 0x196   :  { %5457 = vmatpush.bf16.msra.mxu3 %v6351_v46  ;;  %v5192_v46 = vpop.f32.mrf.mxu2  ;;  %v6479_v58 = vor.u32 %v9347_v51, %v6478_v50  ;;  %v6270_v30 = vld [vmem:[%s15000_s1 + $0x128] sm:$0xf]  ;;  %v9447_v5 = vld [vmem:[%s15000_s1 + $0x5f4] sm:$0xf0] }
 0x197   :  { %5423 = vmatpush.bf16.msra.mxu0 %v9083_v55  ;;  %v5193_v55 = vadd.f32 %v5192_v46, %v5180_v39  ;;  %v10041_v39 = vld [vmem:[#allocation1] sm:$0xff]  ;;  %v6271_v50 = vor.u32 %v9295_v35, %v6270_v30  ;;  %v6558_v60 = vld [vmem:[%s15000_s1 + $0x368] sm:$0xf]  ;;  %v9411_v30 = vld [vmem:[%s15000_s1 + $0x4d4] sm:$0xf0] }
 0x198   :  { %5436 = vmatpush.bf16.msra.mxu1 %v9211_v3  ;;  %v6607_v3 = vor.u32 %v9379_v53, %v6606_v52  ;;  %v9259_v52 = vld [vmem:[%s15000_s1 + $0x14] sm:$0xf0]  ;;  %v6254_v53 = vld [vmem:[%s15000_s1 + $0x108] sm:$0xf] }
 0x199   :  { %5445 = vmatpush.bf16.msra.mxu2 %v6207_v4  ;;  %v9299_v4 = vld [vmem:[%s15000_s1 + $0x154] sm:$0xf0]  ;;  %v5206_v11 = vadd.f32 %v5205_v63, %v5193_v55  ;;  %v6750_v55 = vld [vmem:[%s15000_s1 + $0x4e8] sm:$0xf] }
 0x19a   :  { %5458 = vmatpush.bf16.msra.mxu3 %v6335_v10  ;;  %v9375_v10 = vld [vmem:[%s15000_s1 + $0x3b4] sm:$0xf0]  ;;  %v6287_v44 = vor.u32 %v9299_v4, %v6286_v62  ;;  %v6878_v4 = vld [vmem:[%s15000_s1 + $0x5e8] sm:$0xf] }
 0x19b   :  { %5424 = vmatpush.bf16.msra.mxu0 %v9067_v24  ;;  %v9263_v24 = vld [vmem:[%s15000_s1 + $0x34] sm:$0xf0]  ;;  %v6591_v34 = vor.u32 %v9375_v10, %v6590_v8  ;;  %v6414_v14 = vld [vmem:[%s15000_s1 + $0x248] sm:$0xf] }
 0x19c   :  { %5437 = vmatpush.bf16.msra.mxu1 %v9195_v36  ;;  %v6446_v36 = vld [vmem:[%s15000_s1 + $0x288] sm:$0xf]  ;;  %v6143_v47 = vor.u32 %v9263_v24, %v6142_v23  ;;  %v5207_v46 = vpop.f32.mrf.mxu3  ;;  %v9367_v62 = vld [vmem:[%s15000_s1 + $0x374] sm:$0xf0] }
 0x19d   :  { %5446 = vmatpush.bf16.msra.mxu2 %v6191_v38  ;;  %v9339_v38 = vld [vmem:[%s15000_s1 + $0x294] sm:$0xf0]  ;;  %v6559_v10 = vor.u32 %v9367_v62, %v6558_v60  ;;  %v6734_v24 = vld [vmem:[%s15000_s1 + $0x4c8] sm:$0xf] }
 0x19e   :  { %5459 = vmatpush.bf16.msra.mxu3 %v6319_v29  ;;  %5425 = vmatmul.bf16.vlgmr.msra.gmra.mxu0 %v11160_v42  ;;  %v5218_v29 = vpop.f32.mrf.mxu0  ;;  %v5194_v56 = vpop.f32.mrf.mxu2  ;;  %v6447_v51 = vor.u32 %v9339_v38, %v6446_v36  ;;  %v9415_v63 = vld [vmem:[%s15000_s1 + $0x4f4] sm:$0xf0]  ;;  %v6862_v35 = vld [vmem:[%s15000_s1 + $0x5c8] sm:$0xf] }
 0x19f   :  { %5469 = vmatpush.bf16.msrb.mxu0 %v6495_v45  ;;  %9253 = vmatmul.msk.bf16.vlgmr.msra.gmra.mxu1 %vm4790_vm0, %v10041_v39  ;;  %v6574_v45 = vld [vmem:[%s15000_s1 + $0x388] sm:$0xf]  ;;  %v12686_v48 = vadd.f32 %v5218_v29, %v5206_v11  ;;  %v6751_v11 = vor.u32 %v9415_v63, %v6750_v55  ;;  %v9363_v23 = vld [vmem:[%s15000_s1 + $0x354] sm:$0xf0]  ;;  %v6735_v29 = vor.u32 %v9411_v30, %v6734_v24 }
 0x1a0   :  { %5482 = vmatpush.bf16.msrb.mxu1 %v6623_v49  ;;  %v6126_v49 = vld [vmem:[%s15000_s1 + $0x8] sm:$0xf]  ;;  %v9443_v36 = vld [vmem:[%s15000_s1 + $0x5d4] sm:$0xf0] }
 0x1a1   :  { %5447 = vmatpush.bf16.msra.mxu2 %v6175_v54  ;;  %v9291_v54 = vld [vmem:[%s15000_s1 + $0x114] sm:$0xf0]  ;;  %v6382_v46 = vld [vmem:[%s15000_s1 + $0x208] sm:$0xf] }
 0x1a2   :  { %5460 = vmatpush.bf16.msra.mxu3 %v6303_v57  ;;  %v6575_v57 = vor.u32 %v9371_v43, %v6574_v45  ;;  %v6255_v6 = vor.u32 %v9291_v54, %v6254_v53  ;;  %v6398_v45 = vld [vmem:[%s15000_s1 + $0x228] sm:$0xf]  ;;  %v9327_v43 = vld [vmem:[%s15000_s1 + $0x234] sm:$0xf0] }
 0x1a3   :  { %5470 = vmatpush.bf16.msrb.mxu0 %v6479_v58  ;;  %v6430_v58 = vld [vmem:[%s15000_s1 + $0x268] sm:$0xf]  ;;  %v9359_v56 = vld [vmem:[%s15000_s1 + $0x334] sm:$0xf0]  ;;  %v6399_v54 = vor.u32 %v9327_v43, %v6398_v45 }
 0x1a4   :  { %5483 = vmatpush.bf16.msrb.mxu1 %v6607_v3  ;;  %v6127_v3 = vor.u32 %v9259_v52, %v6126_v49  ;;  %v6431_v8 = vor.u32 %v9335_v59, %v6430_v58  ;;  %v6863_v49 = vor.u32 %v9443_v36, %v6862_v35  ;;  %v6846_v52 = vld [vmem:[%s15000_s1 + $0x5a8] sm:$0xf]  ;;  %v9439_v53 = vld [vmem:[%s15000_s1 + $0x5b4] sm:$0xf0] }
 0x1a5   :  { %5448 = vmatpush.bf16.msra.mxu2 %v6159_v15  ;;  %v9331_v15 = vld [vmem:[%s15000_s1 + $0x254] sm:$0xf0]  ;;  %v6510_v60 = vld [vmem:[%s15000_s1 + $0x308] sm:$0xf]  ;;  %v6847_v55 = vor.u32 %v9439_v53, %v6846_v52 }
 0x1a6   :  { %5461 = vmatpush.bf16.msra.mxu3 %v6287_v44  ;;  %v6542_v44 = vld [vmem:[%s15000_s1 + $0x348] sm:$0xf]  ;;  %v6415_v38 = vor.u32 %v9331_v15, %v6414_v14  ;;  %v9323_v59 = vld [vmem:[%s15000_s1 + $0x214] sm:$0xf0] }
 0x1a7   :  { %5471 = vmatpush.bf16.msrb.mxu0 %v6463_v19  ;;  %v6879_v19 = vor.u32 %v9447_v5, %v6878_v4  ;;  %v6543_v39 = vor.u32 %v9363_v23, %v6542_v44  ;;  %v9355_v62 = vld [vmem:[%s15000_s1 + $0x314] sm:$0xf0]  ;;  %v6702_v63 = vld [vmem:[%s15000_s1 + $0x488] sm:$0xf]  ;;  %v6383_v14 = vor.u32 %v9323_v59, %v6382_v46 }
 0x1a8   :  { %5484 = vmatpush.bf16.msrb.mxu1 %v6591_v34  ;;  %v5220_v34 = vpop.f32.mrf.mxu0  ;;  %v6830_v4 = vld [vmem:[%s15000_s1 + $0x588] sm:$0xf]  ;;  %v9511_v44 = vld [vmem:[%s15000_s1 + $0x7f4] sm:$0xf0] }
 0x1a9   :  { %5449 = vmatpush.bf16.msra.mxu2 %v6143_v47  ;;  %v6526_v47 = vld [vmem:[%s15000_s1 + $0x328] sm:$0xf]  ;;  %v9399_v34 = vld [vmem:[%s15000_s1 + $0x474] sm:$0xf0] }
 0x1aa   :  { %5462 = vmatpush.bf16.msra.mxu3 %v6271_v50  ;;  %v6718_v50 = vld [vmem:[%s15000_s1 + $0x4a8] sm:$0xf]  ;;  %v9507_v43 = vld [vmem:[%s15000_s1 + $0x7d4] sm:$0xf0] }
 0x1ab   :  { %5472 = vmatpush.bf16.msrb.mxu0 %v6447_v51  ;;  %v9407_v51 = vld [vmem:[%s15000_s1 + $0x4b4] sm:$0xf0]  ;;  %v7134_v15 = vld [vmem:[%s15000_s1 + $0x7e8] sm:$0xf] }
 0x1ac   :  { %5485 = vmatpush.bf16.msrb.mxu1 %v6575_v57  ;;  %v6527_v57 = vor.u32 %v9359_v56, %v6526_v47  ;;  %v6719_v58 = vor.u32 %v9407_v51, %v6718_v50  ;;  %v5231_v5 = vpop.f32.mrf.mxu1  ;;  %v6814_v35 = vld [vmem:[%s15000_s1 + $0x568] sm:$0xf]  ;;  %v7135_v36 = vor.u32 %v9511_v44, %v7134_v15  ;;  %v9395_v53 = vld [vmem:[%s15000_s1 + $0x454] sm:$0xf0] }
 0x1ad   :  { %5450 = vmatpush.bf16.msra.mxu2 %v6127_v3  ;;  %v9403_v3 = vld [vmem:[%s15000_s1 + $0x494] sm:$0xf0]  ;;  %v7118_v45 = vld [vmem:[%s15000_s1 + $0x7c8] sm:$0xf] }
 0x1ae   :  { %5463 = vmatpush.bf16.msra.mxu3 %v6255_v6  ;;  %v9435_v6 = vld [vmem:[%s15000_s1 + $0x594] sm:$0xf0]  ;;  %v6703_v23 = vor.u32 %v9403_v3, %v6702_v63  ;;  %v6670_v52 = vld [vmem:[%s15000_s1 + $0x448] sm:$0xf] }
 0x1af   :  { %5473 = vmatpush.bf16.msrb.mxu0 %v6431_v8  ;;  %v7006_v8 = vld [vmem:[%s15000_s1 + $0x6e8] sm:$0xf]  ;;  %v6831_v24 = vor.u32 %v9435_v6, %v6830_v4  ;;  %v9503_v63 = vld [vmem:[%s15000_s1 + $0x7b4] sm:$0xf0]  ;;  %v6671_v4 = vor.u32 %v9395_v53, %v6670_v52 }
 0x1b0   :  { %5486 = vmatpush.bf16.msrb.mxu1 %v6559_v10  ;;  %5451 = vmatmul.bf16.vlgmr.msra.gmra.mxu2 %v10371_v21  ;;  %v9479_v10 = vld [vmem:[%s15000_s1 + $0x6f4] sm:$0xf0]  ;;  %v6974_v59 = vld [vmem:[%s15000_s1 + $0x6a8] sm:$0xf] }
 0x1b1   :  { %5495 = vmatpush.bf16.msrb.mxu2 %v6751_v11  ;;  %5464 = vmatmul.bf16.vlgmr.msra.gmra.mxu3 %v10382_v26  ;;  %v5232_v11 = vadd.f32 %v5231_v5, %v12686_v48  ;;  %v7007_v30 = vor.u32 %v9479_v10, %v7006_v8  ;;  %v6686_v48 = vld [vmem:[%s15000_s1 + $0x468] sm:$0xf]  ;;  %v9391_v10 = vld [vmem:[%s15000_s1 + $0x434] sm:$0xf0] }
 0x1b2   :  { %5508 = vmatpush.bf16.msrb.mxu3 %v6879_v19  ;;  %v6511_v19 = vor.u32 %v9355_v62, %v6510_v60  ;;  %v6687_v47 = vor.u32 %v9399_v34, %v6686_v48  ;;  %v9471_v60 = vld [vmem:[%s15000_s1 + $0x6b4] sm:$0xf0]  ;;  %v6654_v8 = vld [vmem:[%s15000_s1 + $0x428] sm:$0xf] }
 0x1b3   :  { %5474 = vmatpush.bf16.msrb.mxu0 %v6415_v38  ;;  %v9431_v38 = vld [vmem:[%s15000_s1 + $0x574] sm:$0xf0]  ;;  %v5244_v56 = vpop.f32.mrf.mxu2  ;;  %v6975_v6 = vor.u32 %v9471_v60, %v6974_v59  ;;  %v6958_v44 = vld [vmem:[%s15000_s1 + $0x688] sm:$0xf]  ;;  %v6655_v34 = vor.u32 %v9391_v10, %v6654_v8 }
 0x1b4   :  { %5487 = vmatpush.bf16.msrb.mxu1 %v6543_v39  ;;  %v6990_v39 = vld [vmem:[%s15000_s1 + $0x6c8] sm:$0xf]  ;;  %v5257_v51 = vpop.f32.mrf.mxu3  ;;  %v5245_v46 = vadd.f32 %v5244_v56, %v5232_v11  ;;  %v5233_v62 = vpop.f32.mrf.mxu1  ;;  %v9423_v15 = vld [vmem:[%s15000_s1 + $0x534] sm:$0xf0] }
 0x1b5   :  { %5496 = vmatpush.bf16.msrb.mxu2 %v6735_v29  ;;  %v9475_v29 = vld [vmem:[%s15000_s1 + $0x6d4] sm:$0xf0]  ;;  %v6782_v11 = vld [vmem:[%s15000_s1 + $0x528] sm:$0xf] }
 0x1b6   :  { %5509 = vmatpush.bf16.msrb.mxu3 %v6863_v49  ;;  %v6815_v49 = vor.u32 %v9431_v38, %v6814_v35  ;;  %v6991_v50 = vor.u32 %v9475_v29, %v6990_v39  ;;  %v5258_v3 = vadd.f32 %v5257_v51, %v5245_v46  ;;  %v6638_v35 = vld [vmem:[%s15000_s1 + $0x408] sm:$0xf]  ;;  %v9387_v39 = vld [vmem:[%s15000_s1 + $0x414] sm:$0xf0] }
 0x1b7   :  { %5475 = vmatpush.bf16.msrb.mxu0 %v6399_v54  ;;  %v6798_v54 = vld [vmem:[%s15000_s1 + $0x548] sm:$0xf]  ;;  %v9495_v52 = vld [vmem:[%s15000_s1 + $0x774] sm:$0xf0]  ;;  %v6639_v46 = vor.u32 %v9387_v39, %v6638_v35 }
 0x1b8   :  { %5488 = vmatpush.bf16.msrb.mxu1 %v6527_v57  ;;  %v7119_v57 = vor.u32 %v9507_v43, %v7118_v45  ;;  %v6766_v29 = vld [vmem:[%s15000_s1 + $0x508] sm:$0xf]  ;;  %v9419_v45 = vld [vmem:[%s15000_s1 + $0x514] sm:$0xf0] }
 0x1b9   :  { %5497 = vmatpush.bf16.msrb.mxu2 %v6719_v58  ;;  %v9427_v58 = vld [vmem:[%s15000_s1 + $0x554] sm:$0xf0]  ;;  %v6942_v56 = vld [vmem:[%s15000_s1 + $0x668] sm:$0xf]  ;;  %v6767_v59 = vor.u32 %v9419_v45, %v6766_v29 }
 0x1ba   :  { %5510 = vmatpush.bf16.msrb.mxu3 %v6847_v55  ;;  %v7102_v55 = vld [vmem:[%s15000_s1 + $0x7a8] sm:$0xf]  ;;  %v6799_v5 = vor.u32 %v9427_v58, %v6798_v54  ;;  %v9543_v54 = vld [vmem:[%s15000_s1 + $0x8f4] sm:$0xf0] }
 0x1bb   :  { %5476 = vmatpush.bf16.msrb.mxu0 %v6383_v14  ;;  %v7103_v14 = vor.u32 %v9503_v63, %v7102_v55  ;;  %v5246_v43 = vpop.f32.mrf.mxu2  ;;  %v7070_v51 = vld [vmem:[%s15000_s1 + $0x768] sm:$0xf]  ;;  %v9575_v58 = vld [vmem:[%s15000_s1 + $0x9f4] sm:$0xf0] }
 0x1bc   :  { %5489 = vmatpush.bf16.msrb.mxu1 %v6511_v19  ;;  %v9467_v19 = vld [vmem:[%s15000_s1 + $0x694] sm:$0xf0]  ;;  %v7262_v53 = vld [vmem:[%s15000_s1 + $0x8e8] sm:$0xf]  ;;  %v7071_v62 = vor.u32 %v9495_v52, %v7070_v51 }
 0x1bd   :  { %5498 = vmatpush.bf16.msrb.mxu2 %v6703_v23  ;;  %v5270_v23 = vpop.f32.mrf.mxu0  ;;  %v6959_v38 = vor.u32 %v9467_v19, %v6958_v44  ;;  %v7263_v55 = vor.u32 %v9543_v54, %v7262_v53  ;;  %v6926_v63 = vld [vmem:[%s15000_s1 + $0x648] sm:$0xf]  ;;  %v9539_v10 = vld [vmem:[%s15000_s1 + $0x8d4] sm:$0xf0] }
 0x1be   :  { %5511 = vmatpush.bf16.msrb.mxu3 %v6831_v24  ;;  %5477 = vmatmul.bf16.vlgmr.msrb.gmra.mxu0 %v10369_v20  ;;  %v7086_v24 = vld [vmem:[%s15000_s1 + $0x788] sm:$0xf]  ;;  %v12885_v48 = vadd.f32 %v5270_v23, %v5258_v3  ;;  %v9459_v3 = vld [vmem:[%s15000_s1 + $0x654] sm:$0xf0] }
 0x1bf   :  { %5521 = vmatpush.bf16.msra.mxu0 %v7007_v30  ;;  %5490 = vmatmul.bf16.vlgmr.msrb.gmra.mxu1 %v10373_v22  ;;  %v9499_v30 = vld [vmem:[%s15000_s1 + $0x794] sm:$0xf0]  ;;  %v7246_v8 = vld [vmem:[%s15000_s1 + $0x8c8] sm:$0xf]  ;;  %v6927_v44 = vor.u32 %v9459_v3, %v6926_v63 }
 0x1c0   :  { %5534 = vmatpush.bf16.msra.mxu1 %v7135_v36  ;;  %v6783_v36 = vor.u32 %v9423_v15, %v6782_v11  ;;  %v9571_v15 = vld [vmem:[%s15000_s1 + $0x9d4] sm:$0xf0]  ;;  %v7247_v23 = vor.u32 %v9539_v10, %v7246_v8  ;;  %v7358_v29 = vld [vmem:[%s15000_s1 + $0x9a8] sm:$0xf] }
 0x1c1   :  { %5499 = vmatpush.bf16.msrb.mxu2 %v6687_v47  ;;  %v5259_v47 = vpop.f32.mrf.mxu3  ;;  %v9535_v39 = vld [vmem:[%s15000_s1 + $0x8b4] sm:$0xf0]  ;;  %v7022_v51 = vld [vmem:[%s15000_s1 + $0x708] sm:$0xf] }
 0x1c2   :  { %5512 = vmatpush.bf16.msrb.mxu3 %v6815_v49  ;;  %v7087_v49 = vor.u32 %v9499_v30, %v7086_v24  ;;  %v6910_v24 = vld [vmem:[%s15000_s1 + $0x628] sm:$0xf]  ;;  %v9455_v30 = vld [vmem:[%s15000_s1 + $0x634] sm:$0xf0] }
 0x1c3   :  { %5522 = vmatpush.bf16.msra.mxu0 %v6991_v50  ;;  %v9463_v50 = vld [vmem:[%s15000_s1 + $0x674] sm:$0xf0]  ;;  %v6911_v43 = vor.u32 %v9455_v30, %v6910_v24  ;;  %v6894_v47 = vld [vmem:[%s15000_s1 + $0x608] sm:$0xf] }
 0x1c4   :  { %5535 = vmatpush.bf16.msra.mxu1 %v7119_v57  ;;  %v7390_v57 = vld [vmem:[%s15000_s1 + $0x9e8] sm:$0xf]  ;;  %v6943_v60 = vor.u32 %v9463_v50, %v6942_v56  ;;  %v9567_v45 = vld [vmem:[%s15000_s1 + $0x9b4] sm:$0xf0] }
 0x1c5   :  { %5500 = vmatpush.bf16.msrb.mxu2 %v6671_v4  ;;  %v7054_v4 = vld [vmem:[%s15000_s1 + $0x748] sm:$0xf]  ;;  %v5272_v11 = vpop.f32.mrf.mxu0  ;;  %v9451_v50 = vld [vmem:[%s15000_s1 + $0x614] sm:$0xf0]  ;;  %v7359_v53 = vor.u32 %v9567_v45, %v7358_v29 }
 0x1c6   :  { %5513 = vmatpush.bf16.msrb.mxu3 %v6799_v5  ;;  %v7391_v5 = vor.u32 %v9575_v58, %v7390_v57  ;;  %v9483_v52 = vld [vmem:[%s15000_s1 + $0x714] sm:$0xf0]  ;;  %v7214_v54 = vld [vmem:[%s15000_s1 + $0x888] sm:$0xf]  ;;  %v6895_v63 = vor.u32 %v9451_v50, %v6894_v47 }
 0x1c7   :  { %5523 = vmatpush.bf16.msra.mxu0 %v6975_v6  ;;  %v9491_v6 = vld [vmem:[%s15000_s1 + $0x754] sm:$0xf0]  ;;  %v7342_v57 = vld [vmem:[%s15000_s1 + $0x988] sm:$0xf] }
 0x1c8   :  { %5536 = vmatpush.bf16.msra.mxu1 %v7103_v14  ;;  %v7374_v14 = vld [vmem:[%s15000_s1 + $0x9c8] sm:$0xf]  ;;  %v7055_v19 = vor.u32 %v9491_v6, %v7054_v4  ;;  %v9639_v4 = vld [vmem:[%s15000_s1 + $0xbf4] sm:$0xf0] }
 0x1c9   :  { %5501 = vmatpush.bf16.msrb.mxu2 %v6655_v34  ;;  %v7038_v34 = vld [vmem:[%s15000_s1 + $0x728] sm:$0xf]  ;;  %v7375_v35 = vor.u32 %v9571_v15, %v7374_v14  ;;  %v9527_v11 = vld [vmem:[%s15000_s1 + $0x874] sm:$0xf0] }
 0x1ca   :  { %5514 = vmatpush.bf16.msrb.mxu3 %v6783_v36  ;;  %v9487_v36 = vld [vmem:[%s15000_s1 + $0x734] sm:$0xf0]  ;;  %v7646_v3 = vld [vmem:[%s15000_s1 + $0xbe8] sm:$0xf] }
 0x1cb   :  { %5524 = vmatpush.bf16.msra.mxu0 %v6959_v38  ;;  %v7230_v38 = vld [vmem:[%s15000_s1 + $0x8a8] sm:$0xf]  ;;  %v7647_v15 = vor.u32 %v9639_v4, %v7646_v3  ;;  %v9635_v30 = vld [vmem:[%s15000_s1 + $0xbd4] sm:$0xf0] }
 0x1cc   :  { %5537 = vmatpush.bf16.msra.mxu1 %v7087_v49  ;;  %v7039_v49 = vor.u32 %v9487_v36, %v7038_v34  ;;  %v7231_v56 = vor.u32 %v9535_v39, %v7230_v38  ;;  %v5283_v58 = vpop.f32.mrf.mxu1  ;;  %v7326_v14 = vld [vmem:[%s15000_s1 + $0x968] sm:$0xf]  ;;  %v9523_v45 = vld [vmem:[%s15000_s1 + $0x854] sm:$0xf0] }
 0x1cd   :  { %5502 = vmatpush.bf16.msrb.mxu2 %v6639_v46  ;;  %v9531_v46 = vld [vmem:[%s15000_s1 + $0x894] sm:$0xf0]  ;;  %v7630_v24 = vld [vmem:[%s15000_s1 + $0xbc8] sm:$0xf] }
 0x1ce   :  { %5515 = vmatpush.bf16.msrb.mxu3 %v6767_v59  ;;  %v9563_v59 = vld [vmem:[%s15000_s1 + $0x994] sm:$0xf0]  ;;  %v7215_v6 = vor.u32 %v9531_v46, %v7214_v54  ;;  %v7182_v29 = vld [vmem:[%s15000_s1 + $0x848] sm:$0xf] }
 0x1cf   :  { %5525 = vmatpush.bf16.msra.mxu0 %v6943_v60  ;;  %v7518_v60 = vld [vmem:[%s15000_s1 + $0xae8] sm:$0xf]  ;;  %v7343_v8 = vor.u32 %v9563_v59, %v7342_v57  ;;  %v9631_v54 = vld [vmem:[%s15000_s1 + $0xbb4] sm:$0xf0]  ;;  %v7183_v57 = vor.u32 %v9523_v45, %v7182_v29 }
 0x1d0   :  { %5538 = vmatpush.bf16.msra.mxu1 %v7071_v62  ;;  %5503 = vmatmul.bf16.vlgmr.msrb.gmra.mxu2 %v10464_v0  ;;  %v9607_v62 = vld [vmem:[%s15000_s1 + $0xaf4] sm:$0xf0]  ;;  %v7486_v50 = vld [vmem:[%s15000_s1 + $0xaa8] sm:$0xf] }
 0x1d1   :  { %5547 = vmatpush.bf16.msra.mxu2 %v7263_v55  ;;  %5516 = vmatmul.bf16.vlgmr.msrb.gmra.mxu3 %v10468_v2  ;;  %v5284_v55 = vadd.f32 %v5283_v58, %v12885_v48  ;;  %v7519_v10 = vor.u32 %v9607_v62, %v7518_v60  ;;  %v7198_v48 = vld [vmem:[%s15000_s1 + $0x868] sm:$0xf]  ;;  %v9519_v62 = vld [vmem:[%s15000_s1 + $0x834] sm:$0xf0] }
 0x1d2   :  { %5560 = vmatpush.bf16.msra.mxu3 %v7391_v5  ;;  %v7023_v5 = vor.u32 %v9483_v52, %v7022_v51  ;;  %v7199_v34 = vor.u32 %v9527_v11, %v7198_v48  ;;  %v9599_v51 = vld [vmem:[%s15000_s1 + $0xab4] sm:$0xf0]  ;;  %v7166_v60 = vld [vmem:[%s15000_s1 + $0x828] sm:$0xf] }
 0x1d3   :  { %5526 = vmatpush.bf16.msra.mxu0 %v6927_v44  ;;  %v9559_v44 = vld [vmem:[%s15000_s1 + $0x974] sm:$0xf0]  ;;  %v5296_v36 = vpop.f32.mrf.mxu2  ;;  %v7487_v59 = vor.u32 %v9599_v51, %v7486_v50  ;;  %v7470_v4 = vld [vmem:[%s15000_s1 + $0xa88] sm:$0xf]  ;;  %v7167_v11 = vor.u32 %v9519_v62, %v7166_v60 }
 0x1d4   :  { %5539 = vmatpush.bf16.msra.mxu1 %v7055_v19  ;;  %v7502_v19 = vld [vmem:[%s15000_s1 + $0xac8] sm:$0xf]  ;;  %v5309_v39 = vpop.f32.mrf.mxu3  ;;  %v5297_v47 = vadd.f32 %v5296_v36, %v5284_v55  ;;  %v5285_v52 = vpop.f32.mrf.mxu1  ;;  %v9551_v3 = vld [vmem:[%s15000_s1 + $0x934] sm:$0xf0] }
 0x1d5   :  { %5548 = vmatpush.bf16.msra.mxu2 %v7247_v23  ;;  %v9603_v23 = vld [vmem:[%s15000_s1 + $0xad4] sm:$0xf0]  ;;  %v7294_v55 = vld [vmem:[%s15000_s1 + $0x928] sm:$0xf] }
 0x1d6   :  { %5561 = vmatpush.bf16.msra.mxu3 %v7375_v35  ;;  %v7327_v35 = vor.u32 %v9559_v44, %v7326_v14  ;;  %v7503_v38 = vor.u32 %v9603_v23, %v7502_v19  ;;  %v5310_v46 = vadd.f32 %v5309_v39, %v5297_v47  ;;  %v7150_v14 = vld [vmem:[%s15000_s1 + $0x808] sm:$0xf]  ;;  %v9515_v19 = vld [vmem:[%s15000_s1 + $0x814] sm:$0xf0] }
 0x1d7   :  { %5527 = vmatpush.bf16.msra.mxu0 %v6911_v43  ;;  %v7310_v43 = vld [vmem:[%s15000_s1 + $0x948] sm:$0xf]  ;;  %v9623_v29 = vld [vmem:[%s15000_s1 + $0xb74] sm:$0xf0]  ;;  %v7151_v47 = vor.u32 %v9515_v19, %v7150_v14 }
 0x1d8   :  { %5540 = vmatpush.bf16.msra.mxu1 %v7039_v49  ;;  %v7631_v49 = vor.u32 %v9635_v30, %v7630_v24  ;;  %v7278_v23 = vld [vmem:[%s15000_s1 + $0x908] sm:$0xf]  ;;  %v9547_v24 = vld [vmem:[%s15000_s1 + $0x914] sm:$0xf0] }
 0x1d9   :  { %5549 = vmatpush.bf16.msra.mxu2 %v7231_v56  ;;  %v9555_v56 = vld [vmem:[%s15000_s1 + $0x954] sm:$0xf0]  ;;  %v7454_v36 = vld [vmem:[%s15000_s1 + $0xa68] sm:$0xf]  ;;  %v7279_v50 = vor.u32 %v9547_v24, %v7278_v23 }
 0x1da   :  { %5562 = vmatpush.bf16.msra.mxu3 %v7359_v53  ;;  %v7614_v53 = vld [vmem:[%s15000_s1 + $0xba8] sm:$0xf]  ;;  %v7311_v58 = vor.u32 %v9555_v56, %v7310_v43  ;;  %v9671_v43 = vld [vmem:[%s15000_s1 + $0xcf4] sm:$0xf0] }
 0x1db   :  { %5528 = vmatpush.bf16.msra.mxu0 %v6895_v63  ;;  %v7615_v63 = vor.u32 %v9631_v54, %v7614_v53  ;;  %v5298_v30 = vpop.f32.mrf.mxu2  ;;  %v7582_v39 = vld [vmem:[%s15000_s1 + $0xb68] sm:$0xf]  ;;  %v9703_v56 = vld [vmem:[%s15000_s1 + $0xdf4] sm:$0xf0] }
 0x1dc   :  { %5541 = vmatpush.bf16.msra.mxu1 %v7023_v5  ;;  %v9595_v5 = vld [vmem:[%s15000_s1 + $0xa94] sm:$0xf0]  ;;  %v7774_v45 = vld [vmem:[%s15000_s1 + $0xce8] sm:$0xf]  ;;  %v7583_v52 = vor.u32 %v9623_v29, %v7582_v39 }
 0x1dd   :  { %5550 = vmatpush.bf16.msra.mxu2 %v7215_v6  ;;  %v5322_v6 = vpop.f32.mrf.mxu0  ;;  %v7471_v44 = vor.u32 %v9595_v5, %v7470_v4  ;;  %v7775_v53 = vor.u32 %v9671_v43, %v7774_v45  ;;  %v7438_v54 = vld [vmem:[%s15000_s1 + $0xa48] sm:$0xf]  ;;  %v9667_v62 = vld [vmem:[%s15000_s1 + $0xcd4] sm:$0xf0] }
 0x1de   :  { %5563 = vmatpush.bf16.msra.mxu3 %v7343_v8  ;;  %5529 = vmatmul.bf16.vlgmr.msra.gmra.mxu0 %v10462_v61  ;;  %v7598_v8 = vld [vmem:[%s15000_s1 + $0xb88] sm:$0xf]  ;;  %v13084_v48 = vadd.f32 %v5322_v6, %v5310_v46  ;;  %v9587_v46 = vld [vmem:[%s15000_s1 + $0xa54] sm:$0xf0] }
 0x1df   :  { %5573 = vmatpush.bf16.msrb.mxu0 %v7519_v10  ;;  %5542 = vmatmul.bf16.vlgmr.msra.gmra.mxu1 %v10466_v1  ;;  %v9627_v10 = vld [vmem:[%s15000_s1 + $0xb94] sm:$0xf0]  ;;  %v7758_v60 = vld [vmem:[%s15000_s1 + $0xcc8] sm:$0xf]  ;;  %v7439_v4 = vor.u32 %v9587_v46, %v7438_v54 }
 0x1e0   :  { %5586 = vmatpush.bf16.msrb.mxu1 %v7647_v15  ;;  %v7295_v15 = vor.u32 %v9551_v3, %v7294_v55  ;;  %v9699_v3 = vld [vmem:[%s15000_s1 + $0xdd4] sm:$0xf0]  ;;  %v7759_v6 = vor.u32 %v9667_v62, %v7758_v60  ;;  %v7870_v23 = vld [vmem:[%s15000_s1 + $0xda8] sm:$0xf] }
 0x1e1   :  { %5551 = vmatpush.bf16.msra.mxu2 %v7199_v34  ;;  %v5311_v34 = vpop.f32.mrf.mxu3  ;;  %v9663_v19 = vld [vmem:[%s15000_s1 + $0xcb4] sm:$0xf0]  ;;  %v7534_v39 = vld [vmem:[%s15000_s1 + $0xb08] sm:$0xf] }
 0x1e2   :  { %5564 = vmatpush.bf16.msra.mxu3 %v7327_v35  ;;  %v7599_v35 = vor.u32 %v9627_v10, %v7598_v8  ;;  %v7422_v8 = vld [vmem:[%s15000_s1 + $0xa28] sm:$0xf]  ;;  %v9583_v10 = vld [vmem:[%s15000_s1 + $0xa34] sm:$0xf0] }
 0x1e3   :  { %5574 = vmatpush.bf16.msrb.mxu0 %v7503_v38  ;;  %v9591_v38 = vld [vmem:[%s15000_s1 + $0xa74] sm:$0xf0]  ;;  %v7423_v30 = vor.u32 %v9583_v10, %v7422_v8  ;;  %v7406_v34 = vld [vmem:[%s15000_s1 + $0xa08] sm:$0xf] }
 0x1e4   :  { %5587 = vmatpush.bf16.msrb.mxu1 %v7631_v49  ;;  %v7902_v49 = vld [vmem:[%s15000_s1 + $0xde8] sm:$0xf]  ;;  %v7455_v51 = vor.u32 %v9591_v38, %v7454_v36  ;;  %v9695_v24 = vld [vmem:[%s15000_s1 + $0xdb4] sm:$0xf0] }
 0x1e5   :  { %5552 = vmatpush.bf16.msra.mxu2 %v7183_v57  ;;  %v7566_v57 = vld [vmem:[%s15000_s1 + $0xb48] sm:$0xf]  ;;  %v5324_v55 = vpop.f32.mrf.mxu0  ;;  %v9579_v38 = vld [vmem:[%s15000_s1 + $0xa14] sm:$0xf0]  ;;  %v7871_v45 = vor.u32 %v9695_v24, %v7870_v23 }
 0x1e6   :  { %5565 = vmatpush.bf16.msra.mxu3 %v7311_v58  ;;  %v7903_v58 = vor.u32 %v9703_v56, %v7902_v49  ;;  %v9611_v29 = vld [vmem:[%s15000_s1 + $0xb14] sm:$0xf0]  ;;  %v7726_v43 = vld [vmem:[%s15000_s1 + $0xc88] sm:$0xf]  ;;  %v7407_v54 = vor.u32 %v9579_v38, %v7406_v34 }
 0x1e7   :  { %5575 = vmatpush.bf16.msrb.mxu0 %v7487_v59  ;;  %v9619_v59 = vld [vmem:[%s15000_s1 + $0xb54] sm:$0xf0]  ;;  %v7854_v49 = vld [vmem:[%s15000_s1 + $0xd88] sm:$0xf] }
 0x1e8   :  { %5588 = vmatpush.bf16.msrb.mxu1 %v7615_v63  ;;  %v7886_v63 = vld [vmem:[%s15000_s1 + $0xdc8] sm:$0xf]  ;;  %v7567_v5 = vor.u32 %v9619_v59, %v7566_v57  ;;  %v9767_v57 = vld [vmem:[%s15000_s1 + $0xff4] sm:$0xf0] }
 0x1e9   :  { %5553 = vmatpush.bf16.msra.mxu2 %v7167_v11  ;;  %v7550_v11 = vld [vmem:[%s15000_s1 + $0xb28] sm:$0xf]  ;;  %v7887_v14 = vor.u32 %v9699_v3, %v7886_v63  ;;  %v9655_v55 = vld [vmem:[%s15000_s1 + $0xc74] sm:$0xf0] }
 0x1ea   :  { %5566 = vmatpush.bf16.msra.mxu3 %v7295_v15  ;;  %v9615_v15 = vld [vmem:[%s15000_s1 + $0xb34] sm:$0xf0]  ;;  %v8158_v46 = vld [vmem:[%s15000_s1 + $0xfe8] sm:$0xf] }
 0x1eb   :  { %5576 = vmatpush.bf16.msrb.mxu0 %v7471_v44  ;;  %v7742_v44 = vld [vmem:[%s15000_s1 + $0xca8] sm:$0xf]  ;;  %v8159_v3 = vor.u32 %v9767_v57, %v8158_v46  ;;  %v9763_v10 = vld [vmem:[%s15000_s1 + $0xfd4] sm:$0xf0] }
 0x1ec   :  { %5589 = vmatpush.bf16.msrb.mxu1 %v7599_v35  ;;  %v7551_v35 = vor.u32 %v9615_v15, %v7550_v11  ;;  %v7743_v36 = vor.u32 %v9663_v19, %v7742_v44  ;;  %v5335_v56 = vpop.f32.mrf.mxu1  ;;  %v7838_v63 = vld [vmem:[%s15000_s1 + $0xd68] sm:$0xf]  ;;  %v9651_v24 = vld [vmem:[%s15000_s1 + $0xc54] sm:$0xf0] }
 0x1ed   :  { %5554 = vmatpush.bf16.msra.mxu2 %v7151_v47  ;;  %v9659_v47 = vld [vmem:[%s15000_s1 + $0xc94] sm:$0xf0]  ;;  %v8142_v8 = vld [vmem:[%s15000_s1 + $0xfc8] sm:$0xf] }
 0x1ee   :  { %5567 = vmatpush.bf16.msra.mxu3 %v7279_v50  ;;  %v9691_v50 = vld [vmem:[%s15000_s1 + $0xd94] sm:$0xf0]  ;;  %v7727_v59 = vor.u32 %v9659_v47, %v7726_v43  ;;  %v7694_v23 = vld [vmem:[%s15000_s1 + $0xc48] sm:$0xf] }
 0x1ef   :  { %5577 = vmatpush.bf16.msrb.mxu0 %v7455_v51  ;;  %v8030_v51 = vld [vmem:[%s15000_s1 + $0xee8] sm:$0xf]  ;;  %v7855_v60 = vor.u32 %v9691_v50, %v7854_v49  ;;  %v9759_v43 = vld [vmem:[%s15000_s1 + $0xfb4] sm:$0xf0]  ;;  %v7695_v49 = vor.u32 %v9651_v24, %v7694_v23 }
 0x1f0   :  { %5590 = vmatpush.bf16.msrb.mxu1 %v7583_v52  ;;  %5555 = vmatmul.bf16.vlgmr.msra.gmra.mxu2 %v10702_v7  ;;  %v9735_v52 = vld [vmem:[%s15000_s1 + $0xef4] sm:$0xf0]  ;;  %v7998_v38 = vld [vmem:[%s15000_s1 + $0xea8] sm:$0xf] }
 0x1f1   :  { %5599 = vmatpush.bf16.msrb.mxu2 %v7775_v53  ;;  %5568 = vmatmul.bf16.vlgmr.msra.gmra.mxu3 %v10715_v13  ;;  %v5336_v53 = vadd.f32 %v5335_v56, %v13084_v48  ;;  %v8031_v62 = vor.u32 %v9735_v52, %v8030_v51  ;;  %v7710_v48 = vld [vmem:[%s15000_s1 + $0xc68] sm:$0xf]  ;;  %v9647_v52 = vld [vmem:[%s15000_s1 + $0xc34] sm:$0xf0] }
 0x1f2   :  { %5612 = vmatpush.bf16.msrb.mxu3 %v7903_v58  ;;  %v7535_v58 = vor.u32 %v9611_v29, %v7534_v39  ;;  %v7711_v11 = vor.u32 %v9655_v55, %v7710_v48  ;;  %v9727_v39 = vld [vmem:[%s15000_s1 + $0xeb4] sm:$0xf0]  ;;  %v7678_v51 = vld [vmem:[%s15000_s1 + $0xc28] sm:$0xf] }
 0x1f3   :  { %5578 = vmatpush.bf16.msrb.mxu0 %v7439_v4  ;;  %v9687_v4 = vld [vmem:[%s15000_s1 + $0xd74] sm:$0xf0]  ;;  %v5348_v15 = vpop.f32.mrf.mxu2  ;;  %v7999_v50 = vor.u32 %v9727_v39, %v7998_v38  ;;  %v7982_v57 = vld [vmem:[%s15000_s1 + $0xe88] sm:$0xf]  ;;  %v7679_v55 = vor.u32 %v9647_v52, %v7678_v51 }
 0x1f4   :  { %5591 = vmatpush.bf16.msrb.mxu1 %v7567_v5  ;;  %v8014_v5 = vld [vmem:[%s15000_s1 + $0xec8] sm:$0xf]  ;;  %v5361_v19 = vpop.f32.mrf.mxu3  ;;  %v5349_v34 = vadd.f32 %v5348_v15, %v5336_v53  ;;  %v5337_v29 = vpop.f32.mrf.mxu1  ;;  %v9679_v46 = vld [vmem:[%s15000_s1 + $0xd34] sm:$0xf0] }
 0x1f5   :  { %5600 = vmatpush.bf16.msrb.mxu2 %v7759_v6  ;;  %v9731_v6 = vld [vmem:[%s15000_s1 + $0xed4] sm:$0xf0]  ;;  %v7806_v53 = vld [vmem:[%s15000_s1 + $0xd28] sm:$0xf] }
 0x1f6   :  { %5613 = vmatpush.bf16.msrb.mxu3 %v7887_v14  ;;  %v7839_v14 = vor.u32 %v9687_v4, %v7838_v63  ;;  %v8015_v44 = vor.u32 %v9731_v6, %v8014_v5  ;;  %v5362_v47 = vadd.f32 %v5361_v19, %v5349_v34  ;;  %v7662_v63 = vld [vmem:[%s15000_s1 + $0xc08] sm:$0xf]  ;;  %v9643_v5 = vld [vmem:[%s15000_s1 + $0xc14] sm:$0xf0] }
 0x1f7   :  { %5579 = vmatpush.bf16.msrb.mxu0 %v7423_v30  ;;  %v7822_v30 = vld [vmem:[%s15000_s1 + $0xd48] sm:$0xf]  ;;  %v9751_v23 = vld [vmem:[%s15000_s1 + $0xf74] sm:$0xf0]  ;;  %v7663_v34 = vor.u32 %v9643_v5, %v7662_v63 }
 0x1f8   :  { %5592 = vmatpush.bf16.msrb.mxu1 %v7551_v35  ;;  %v8143_v35 = vor.u32 %v9763_v10, %v8142_v8  ;;  %v7790_v6 = vld [vmem:[%s15000_s1 + $0xd08] sm:$0xf]  ;;  %v9675_v8 = vld [vmem:[%s15000_s1 + $0xd14] sm:$0xf0] }
 0x1f9   :  { %5601 = vmatpush.bf16.msrb.mxu2 %v7743_v36  ;;  %v9683_v36 = vld [vmem:[%s15000_s1 + $0xd54] sm:$0xf0]  ;;  %v7966_v15 = vld [vmem:[%s15000_s1 + $0xe68] sm:$0xf]  ;;  %v7791_v38 = vor.u32 %v9675_v8, %v7790_v6 }
 0x1fa   :  { %5614 = vmatpush.bf16.msrb.mxu3 %v7871_v45  ;;  %v8126_v45 = vld [vmem:[%s15000_s1 + $0xfa8] sm:$0xf]  ;;  %v7823_v56 = vor.u32 %v9683_v36, %v7822_v30  ;;  %v9799_v30 = vld [vmem:[%s15000_s1 + $0x10f4] sm:$0xf0] }
 0x1fb   :  { %5580 = vmatpush.bf16.msrb.mxu0 %v7407_v54  ;;  %v8127_v54 = vor.u32 %v9759_v43, %v8126_v45  ;;  %v5350_v10 = vpop.f32.mrf.mxu2  ;;  %v8094_v19 = vld [vmem:[%s15000_s1 + $0xf68] sm:$0xf]  ;;  %v9831_v36 = vld [vmem:[%s15000_s1 + $0x11f4] sm:$0xf0] }
 0x1fc   :  { %5593 = vmatpush.bf16.msrb.mxu1 %v7535_v58  ;;  %v9723_v58 = vld [vmem:[%s15000_s1 + $0xe94] sm:$0xf0]  ;;  %v8286_v24 = vld [vmem:[%s15000_s1 + $0x10e8] sm:$0xf]  ;;  %v8095_v29 = vor.u32 %v9751_v23, %v8094_v19 }
 0x1fd   :  { %5602 = vmatpush.bf16.msrb.mxu2 %v7727_v59  ;;  %v5374_v59 = vpop.f32.mrf.mxu0  ;;  %v7983_v4 = vor.u32 %v9723_v58, %v7982_v57  ;;  %v8287_v45 = vor.u32 %v9799_v30, %v8286_v24  ;;  %v7950_v43 = vld [vmem:[%s15000_s1 + $0xe48] sm:$0xf]  ;;  %v9795_v52 = vld [vmem:[%s15000_s1 + $0x10d4] sm:$0xf0] }
 0x1fe   :  { %5615 = vmatpush.bf16.msrb.mxu3 %v7855_v60  ;;  %5581 = vmatmul.bf16.vlgmr.msrb.gmra.mxu0 %v10713_v12  ;;  %v8110_v60 = vld [vmem:[%s15000_s1 + $0xf88] sm:$0xf]  ;;  %v13283_v48 = vadd.f32 %v5374_v59, %v5362_v47  ;;  %v9715_v47 = vld [vmem:[%s15000_s1 + $0xe54] sm:$0xf0] }
 0x1ff   :  { %5625 = vmatpush.bf16.msra.mxu0 %v8031_v62  ;;  %5594 = vmatmul.bf16.vlgmr.msrb.gmra.mxu1 %v10726_v17  ;;  %v9755_v62 = vld [vmem:[%s15000_s1 + $0xf94] sm:$0xf0]  ;;  %v8270_v51 = vld [vmem:[%s15000_s1 + $0x10c8] sm:$0xf]  ;;  %v7951_v57 = vor.u32 %v9715_v47, %v7950_v43 }
 0x200   :  { %5638 = vmatpush.bf16.msra.mxu1 %v8159_v3  ;;  %v7807_v3 = vor.u32 %v9679_v46, %v7806_v53  ;;  %v9827_v46 = vld [vmem:[%s15000_s1 + $0x11d4] sm:$0xf0]  ;;  %v8271_v59 = vor.u32 %v9795_v52, %v8270_v51  ;;  %v8382_v6 = vld [vmem:[%s15000_s1 + $0x11a8] sm:$0xf] }
 0x201   :  { %5603 = vmatpush.bf16.msrb.mxu2 %v7711_v11  ;;  %v5363_v11 = vpop.f32.mrf.mxu3  ;;  %v9791_v5 = vld [vmem:[%s15000_s1 + $0x10b4] sm:$0xf0]  ;;  %v8046_v19 = vld [vmem:[%s15000_s1 + $0xf08] sm:$0xf] }
 0x202   :  { %5616 = vmatpush.bf16.msrb.mxu3 %v7839_v14  ;;  %v8111_v14 = vor.u32 %v9755_v62, %v8110_v60  ;;  %v7934_v60 = vld [vmem:[%s15000_s1 + $0xe28] sm:$0xf]  ;;  %v9711_v62 = vld [vmem:[%s15000_s1 + $0xe34] sm:$0xf0] }
 0x203   :  { %5626 = vmatpush.bf16.msra.mxu0 %v8015_v44  ;;  %v9719_v44 = vld [vmem:[%s15000_s1 + $0xe74] sm:$0xf0]  ;;  %v7935_v10 = vor.u32 %v9711_v62, %v7934_v60  ;;  %v7918_v11 = vld [vmem:[%s15000_s1 + $0xe08] sm:$0xf] }
 0x204   :  { %5639 = vmatpush.bf16.msra.mxu1 %v8143_v35  ;;  %v8414_v35 = vld [vmem:[%s15000_s1 + $0x11e8] sm:$0xf]  ;;  %v7967_v39 = vor.u32 %v9719_v44, %v7966_v15  ;;  %v9823_v8 = vld [vmem:[%s15000_s1 + $0x11b4] sm:$0xf0] }
 0x205   :  { %5604 = vmatpush.bf16.msrb.mxu2 %v7695_v49  ;;  %v8078_v49 = vld [vmem:[%s15000_s1 + $0xf48] sm:$0xf]  ;;  %v5376_v53 = vpop.f32.mrf.mxu0  ;;  %v9707_v44 = vld [vmem:[%s15000_s1 + $0xe14] sm:$0xf0]  ;;  %v8383_v24 = vor.u32 %v9823_v8, %v8382_v6 }
 0x206   :  { %5617 = vmatpush.bf16.msrb.mxu3 %v7823_v56  ;;  %v8415_v56 = vor.u32 %v9831_v36, %v8414_v35  ;;  %v9739_v23 = vld [vmem:[%s15000_s1 + $0xf14] sm:$0xf0]  ;;  %v8238_v30 = vld [vmem:[%s15000_s1 + $0x1088] sm:$0xf]  ;;  %v7919_v43 = vor.u32 %v9707_v44, %v7918_v11 }
 0x207   :  { %5627 = vmatpush.bf16.msra.mxu0 %v7999_v50  ;;  %v9747_v50 = vld [vmem:[%s15000_s1 + $0xf54] sm:$0xf0]  ;;  %v8366_v35 = vld [vmem:[%s15000_s1 + $0x1188] sm:$0xf] }
 0x208   :  { %5640 = vmatpush.bf16.msra.mxu1 %v8127_v54  ;;  %v8398_v54 = vld [vmem:[%s15000_s1 + $0x11c8] sm:$0xf]  ;;  %v8079_v58 = vor.u32 %v9747_v50, %v8078_v49  ;;  %v9895_v49 = vld [vmem:[%s15000_s1 + $0x13f4] sm:$0xf0] }
 0x209   :  { %5605 = vmatpush.bf16.msrb.mxu2 %v7679_v55  ;;  %v8062_v55 = vld [vmem:[%s15000_s1 + $0xf28] sm:$0xf]  ;;  %v8399_v63 = vor.u32 %v9827_v46, %v8398_v54  ;;  %v9783_v53 = vld [vmem:[%s15000_s1 + $0x1074] sm:$0xf0] }
 0x20a   :  { %5618 = vmatpush.bf16.msrb.mxu3 %v7807_v3  ;;  %v9743_v3 = vld [vmem:[%s15000_s1 + $0xf34] sm:$0xf0]  ;;  %v8670_v47 = vld [vmem:[%s15000_s1 + $0x13e8] sm:$0xf] }
 0x20b   :  { %5628 = vmatpush.bf16.msra.mxu0 %v7983_v4  ;;  %v8254_v4 = vld [vmem:[%s15000_s1 + $0x10a8] sm:$0xf]  ;;  %v8671_v46 = vor.u32 %v9895_v49, %v8670_v47  ;;  %v9891_v62 = vld [vmem:[%s15000_s1 + $0x13d4] sm:$0xf0] }
 0x20c   :  { %5641 = vmatpush.bf16.msra.mxu1 %v8111_v14  ;;  %v8063_v14 = vor.u32 %v9743_v3, %v8062_v55  ;;  %v8255_v15 = vor.u32 %v9791_v5, %v8254_v4  ;;  %v5387_v36 = vpop.f32.mrf.mxu1  ;;  %v8350_v54 = vld [vmem:[%s15000_s1 + $0x1168] sm:$0xf]  ;;  %v9779_v8 = vld [vmem:[%s15000_s1 + $0x1054] sm:$0xf0] }
 0x20d   :  { %5606 = vmatpush.bf16.msrb.mxu2 %v7663_v34  ;;  %v9787_v34 = vld [vmem:[%s15000_s1 + $0x1094] sm:$0xf0]  ;;  %v8654_v60 = vld [vmem:[%s15000_s1 + $0x13c8] sm:$0xf] }
 0x20e   :  { %5619 = vmatpush.bf16.msrb.mxu3 %v7791_v38  ;;  %v9819_v38 = vld [vmem:[%s15000_s1 + $0x1194] sm:$0xf0]  ;;  %v8239_v50 = vor.u32 %v9787_v34, %v8238_v30  ;;  %v8206_v6 = vld [vmem:[%s15000_s1 + $0x1048] sm:$0xf] }
 0x20f   :  { %5629 = vmatpush.bf16.msra.mxu0 %v7967_v39  ;;  %v8542_v39 = vld [vmem:[%s15000_s1 + $0x12e8] sm:$0xf]  ;;  %v8367_v51 = vor.u32 %v9819_v38, %v8366_v35  ;;  %v9811_v44 = vld [vmem:[%s15000_s1 + $0x1154] sm:$0xf0]  ;;  %v8207_v35 = vor.u32 %v9779_v8, %v8206_v6 }
 0x210   :  { %5642 = vmatpush.bf16.msra.mxu1 %v8095_v29  ;;  %5607 = vmatmul.bf16.vlgmr.msrb.gmra.mxu2 %v10743_v28  ;;  %v9863_v29 = vld [vmem:[%s15000_s1 + $0x12f4] sm:$0xf0]  ;;  %v8494_v49 = vld [vmem:[%s15000_s1 + $0x1288] sm:$0xf] }
 0x211   :  { %5651 = vmatpush.bf16.msra.mxu2 %v8287_v45  ;;  %5620 = vmatmul.bf16.vlgmr.msrb.gmra.mxu3 %v10747_v32  ;;  %v5388_v45 = vadd.f32 %v5387_v36, %v13283_v48  ;;  %v8543_v52 = vor.u32 %v9863_v29, %v8542_v39  ;;  %v8222_v48 = vld [vmem:[%s15000_s1 + $0x1068] sm:$0xf]  ;;  %v9887_v30 = vld [vmem:[%s15000_s1 + $0x13b4] sm:$0xf0] }
 0x212   :  { %5664 = vmatpush.bf16.msra.mxu3 %v8415_v56  ;;  %v8047_v56 = vor.u32 %v9739_v23, %v8046_v19  ;;  %v8223_v55 = vor.u32 %v9783_v53, %v8222_v48  ;;  %v8510_v19 = vld [vmem:[%s15000_s1 + $0x12a8] sm:$0xf]  ;;  %v9855_v23 = vld [vmem:[%s15000_s1 + $0x12b4] sm:$0xf0] }
 0x213   :  { %5630 = vmatpush.bf16.msra.mxu0 %v7951_v57  ;;  %v9815_v57 = vld [vmem:[%s15000_s1 + $0x1174] sm:$0xf0]  ;;  %v5400_v3 = vpop.f32.mrf.mxu2  ;;  %v8511_v38 = vor.u32 %v9855_v23, %v8510_v19  ;;  %v8190_v39 = vld [vmem:[%s15000_s1 + $0x1028] sm:$0xf] }
 0x214   :  { %5643 = vmatpush.bf16.msra.mxu1 %v8079_v58  ;;  %v8526_v58 = vld [vmem:[%s15000_s1 + $0x12c8] sm:$0xf]  ;;  %v5413_v5 = vpop.f32.mrf.mxu3  ;;  %v5401_v11 = vadd.f32 %v5400_v3, %v5388_v45  ;;  %v9775_v29 = vld [vmem:[%s15000_s1 + $0x1034] sm:$0xf0] }
 0x215   :  { %5652 = vmatpush.bf16.msra.mxu2 %v8271_v59  ;;  %v9859_v59 = vld [vmem:[%s15000_s1 + $0x12d4] sm:$0xf0]  ;;  %v8318_v45 = vld [vmem:[%s15000_s1 + $0x1128] sm:$0xf]  ;;  %v8191_v53 = vor.u32 %v9775_v29, %v8190_v39 }
 0x216   :  { %5665 = vmatpush.bf16.msra.mxu3 %v8399_v63  ;;  %v8351_v63 = vor.u32 %v9815_v57, %v8350_v54  ;;  %v8527_v4 = vor.u32 %v9859_v59, %v8526_v58  ;;  %v5414_v34 = vadd.f32 %v5413_v5, %v5401_v11  ;;  %v9807_v47 = vld [vmem:[%s15000_s1 + $0x1134] sm:$0xf0]  ;;  %v8174_v54 = vld [vmem:[%s15000_s1 + $0x1008] sm:$0xf] }
 0x217   :  { %5631 = vmatpush.bf16.msra.mxu0 %v7935_v10  ;;  %v8334_v10 = vld [vmem:[%s15000_s1 + $0x1148] sm:$0xf]  ;;  %v9771_v58 = vld [vmem:[%s15000_s1 + $0x1014] sm:$0xf0] }
 0x218   :  { %5644 = vmatpush.bf16.msra.mxu1 %v8063_v14  ;;  %v8655_v14 = vor.u32 %v9891_v62, %v8654_v60  ;;  %v8335_v36 = vor.u32 %v9811_v44, %v8334_v10  ;;  %v8302_v59 = vld [vmem:[%s15000_s1 + $0x1108] sm:$0xf]  ;;  %v9803_v60 = vld [vmem:[%s15000_s1 + $0x1114] sm:$0xf0] }
 0x219   :  { %5653 = vmatpush.bf16.msra.mxu2 %v8255_v15  ;;  %v5389_v15 = vpop.f32.mrf.mxu1  ;;  %v8478_v3 = vld [vmem:[%s15000_s1 + $0x1268] sm:$0xf]  ;;  %v9879_v6 = vld [vmem:[%s15000_s1 + $0x1374] sm:$0xf0]  ;;  %v8303_v23 = vor.u32 %v9803_v60, %v8302_v59 }
 0x21a   :  { %5666 = vmatpush.bf16.msra.mxu3 %v8383_v24  ;;  %v8638_v24 = vld [vmem:[%s15000_s1 + $0x13a8] sm:$0xf]  ;;  %v9927_v10 = vld [vmem:[%s15000_s1 + $0x14f4] sm:$0xf0] }
 0x21b   :  { %5632 = vmatpush.bf16.msra.mxu0 %v7919_v43  ;;  %v8639_v43 = vor.u32 %v9887_v30, %v8638_v24  ;;  %v8606_v5 = vld [vmem:[%s15000_s1 + $0x1368] sm:$0xf]  ;;  %v9959_v44 = vld [vmem:[%s15000_s1 + $0x15f4] sm:$0xf0] }
 0x21c   :  { %5645 = vmatpush.bf16.msra.mxu1 %v8047_v56  ;;  %v9851_v56 = vld [vmem:[%s15000_s1 + $0x1294] sm:$0xf0]  ;;  %v5415_v62 = vpop.f32.mrf.mxu3  ;;  %v8798_v8 = vld [vmem:[%s15000_s1 + $0x14e8] sm:$0xf] }
 0x21d   :  { %5654 = vmatpush.bf16.msra.mxu2 %v8239_v50  ;;  %v5426_v50 = vpop.f32.mrf.mxu0  ;;  %v8495_v57 = vor.u32 %v9851_v56, %v8494_v49  ;;  %v8926_v15 = vld [vmem:[%s15000_s1 + $0x15e8] sm:$0xf]  ;;  %v9875_v39 = vld [vmem:[%s15000_s1 + $0x1354] sm:$0xf0] }
 0x21e   :  { %5667 = vmatpush.bf16.msra.mxu3 %v8367_v51  ;;  %5633 = vmatmul.bf16.vlgmr.msra.gmra.mxu0 %v10745_v31  ;;  %v8622_v51 = vld [vmem:[%s15000_s1 + $0x1388] sm:$0xf]  ;;  %v5427_v48 = vadd.f32 %v5426_v50, %v5414_v34  ;;  %v8607_v34 = vor.u32 %v9879_v6, %v8606_v5  ;;  %v9955_v50 = vld [vmem:[%s15000_s1 + $0x15d4] sm:$0xf0] }
 0x21f   :  { %5677 = vmatpush.bf16.msrb.mxu0 %v8543_v52  ;;  %5646 = vmatmul.bf16.vlgmr.msra.gmra.mxu1 %v10749_v33  ;;  %v9883_v52 = vld [vmem:[%s15000_s1 + $0x1394] sm:$0xf0]  ;;  %v8462_v30 = vld [vmem:[%s15000_s1 + $0x1248] sm:$0xf] }
 0x220   :  { %5690 = vmatpush.bf16.msrb.mxu1 %v8671_v46  ;;  %v8319_v46 = vor.u32 %v9807_v47, %v8318_v45  ;;  %v8927_v45 = vor.u32 %v9959_v44, %v8926_v15  ;;  %v9923_v47 = vld [vmem:[%s15000_s1 + $0x14d4] sm:$0xf0]  ;;  %v8910_v56 = vld [vmem:[%s15000_s1 + $0x15c8] sm:$0xf] }
 0x221   :  { %5655 = vmatpush.bf16.msra.mxu2 %v8223_v55  ;;  %v5402_v55 = vpop.f32.mrf.mxu2  ;;  %v5439_v11 = vpop.f32.mrf.mxu1  ;;  %v8911_v59 = vor.u32 %v9955_v50, %v8910_v56  ;;  %v9871_v60 = vld [vmem:[%s15000_s1 + $0x1334] sm:$0xf0]  ;;  %v8766_v62 = vld [vmem:[%s15000_s1 + $0x14a8] sm:$0xf] }
 0x222   :  { %5668 = vmatpush.bf16.msra.mxu3 %v8351_v63  ;;  %v8623_v63 = vor.u32 %v9883_v52, %v8622_v51  ;;  %v5440_v19 = vadd.f32 %v5439_v11, %v5427_v48  ;;  %v6093_v51 = vmax.f32 %v12315_v27, 0.0  ;;  %v8574_v27 = vld [vmem:[%s15000_s1 + $0x1328] sm:$0xf]  ;;  %v9919_v55 = vld [vmem:[%s15000_s1 + $0x14b4] sm:$0xf0] }
 0x223   :  { %5678 = vmatpush.bf16.msrb.mxu0 %v8527_v4  ;;  %v9847_v4 = vld [vmem:[%s15000_s1 + $0x1274] sm:$0xf0]  ;;  %v8430_v6 = vld [vmem:[%s15000_s1 + $0x1208] sm:$0xf] }
 0x224   :  { %5691 = vmatpush.bf16.msrb.mxu1 %v8655_v14  ;;  %v8175_v14 = vor.u32 %v9771_v58, %v8174_v54  ;;  %v8479_v24 = vor.u32 %v9847_v4, %v8478_v3  ;;  %v6094_v29 = vmax.f32 %v5440_v19, 0.0  ;;  %v9951_v3 = vld [vmem:[%s15000_s1 + $0x15b4] sm:$0xf0]  ;;  %v8750_v19 = vld [vmem:[%s15000_s1 + $0x1488] sm:$0xf] }
 0x225   :  { %5656 = vmatpush.bf16.msra.mxu2 %v8207_v35  ;;  %v8799_v35 = vor.u32 %v9927_v10, %v8798_v8  ;;  %v5428_v49 = vpop.f32.mrf.mxu0  ;;  %v8575_v8 = vor.u32 %v9871_v60, %v8574_v27  ;;  %v8767_v10 = vor.u32 %v9919_v55, %v8766_v62  ;;  %v9835_v11 = vld [vmem:[%s15000_s1 + $0x1214] sm:$0xf0]  ;;  %v8862_v50 = vld [vmem:[%s15000_s1 + $0x1568] sm:$0xf] }
 0x226   :  { %5669 = vmatpush.bf16.msra.mxu3 %v8335_v36  ;;  %v9843_v36 = vld [vmem:[%s15000_s1 + $0x1254] sm:$0xf0]  ;;  %v6101_v52 = vrot.slane %v6094_v29, 6 }
 0x227   :  { %5679 = vmatpush.bf16.msrb.mxu0 %v8511_v38  ;;  %v8590_v38 = vld [vmem:[%s15000_s1 + $0x1348] sm:$0xf]  ;;  %v8463_v48 = vor.u32 %v9843_v36, %v8462_v30  ;;  %v9867_v15 = vld [vmem:[%s15000_s1 + $0x1314] sm:$0xf0]  ;;  %v8431_v36 = vor.u32 %v9835_v11, %v8430_v6 }
 0x228   :  { %5692 = vmatpush.bf16.msrb.mxu1 %v8639_v43  ;;  %v8782_v43 = vld [vmem:[%s15000_s1 + $0x14c8] sm:$0xf]  ;;  %v13553_v58 = vsel %vm6104_vm1, %v6093_v51, %v6101_v52  ;;  %v9947_v30 = vld [vmem:[%s15000_s1 + $0x1594] sm:$0xf0]  ;;  %v10042_v51 = vld [vmem:[%s15002_s2] sm:$0xf] }
 0x229   :  { %5657 = vmatpush.bf16.msra.mxu2 %v8191_v53  ;;  %v8591_v53 = vor.u32 %v9875_v39, %v8590_v38  ;;  %v8783_v54 = vor.u32 %v9923_v47, %v8782_v43  ;;  %v5441_v4 = vpop.f32.mrf.mxu1  ;;  %v9182_v38 = vld [vmem:[%s15000_s1 + $0x17e8] sm:$0xf]  ;;  %v10023_v39 = vld [vmem:[%s15000_s1 + $0x17f4] sm:$0xf0]  ;;  %v807_v52 = vperm.slane %v10042_v51, 2 }
 0x22a   :  { %5670 = vmatpush.bf16.msra.mxu3 %v8319_v46  ;;  %v8446_v46 = vld [vmem:[%s15000_s1 + $0x1228] sm:$0xf]  ;;  %v9911_v56 = vld [vmem:[%s15000_s1 + $0x1474] sm:$0xf0] }
 0x22b   :  { %5680 = vmatpush.bf16.msrb.mxu0 %v8495_v57  ;;  %v9839_v57 = vld [vmem:[%s15000_s1 + $0x1234] sm:$0xf0]  ;;  %v8734_v43 = vld [vmem:[%s15000_s1 + $0x1468] sm:$0xf] }
 0x22c   :  { %5693 = vmatpush.bf16.msrb.mxu1 %v8623_v63  ;;  %v8894_v63 = vld [vmem:[%s15000_s1 + $0x15a8] sm:$0xf]  ;;  %v8447_v5 = vor.u32 %v9839_v57, %v8446_v46  ;;  %v9987_v46 = vld [vmem:[%s15000_s1 + $0x16d4] sm:$0xf0] }
 0x22d   :  { %5658 = vmatpush.bf16.msra.mxu2 %v8175_v14  ;;  %v8558_v14 = vld [vmem:[%s15000_s1 + $0x1308] sm:$0xf]  ;;  %v8895_v44 = vor.u32 %v9951_v3, %v8894_v63  ;;  %v10019_v27 = vld [vmem:[%s15000_s1 + $0x17d4] sm:$0xf0] }
 0x22e   :  { %5671 = vmatpush.bf16.msra.mxu3 %v8303_v23  ;;  %v9915_v23 = vld [vmem:[%s15000_s1 + $0x1494] sm:$0xf0]  ;;  %v8559_v29 = vor.u32 %v9867_v15, %v8558_v14  ;;  %v9166_v57 = vld [vmem:[%s15000_s1 + $0x17c8] sm:$0xf] }
 0x22f   :  { %5681 = vmatpush.bf16.msrb.mxu0 %v8479_v24  ;;  %v8878_v24 = vld [vmem:[%s15000_s1 + $0x1588] sm:$0xf]  ;;  %v9907_v3 = vld [vmem:[%s15000_s1 + $0x1454] sm:$0xf0] }
 0x230   :  { %5694 = vmatpush.bf16.msrb.mxu1 %v8607_v34  ;;  %5659 = vmatmul.bf16.vlgmr.msra.gmra.mxu2 %v11113_v9  ;;  %v9054_v34 = vld [vmem:[%s15000_s1 + $0x16e8] sm:$0xf]  ;;  %v8879_v47 = vor.u32 %v9947_v30, %v8878_v24  ;;  %v9983_v14 = vld [vmem:[%s15000_s1 + $0x16b4] sm:$0xf0] }
 0x231   :  { %5703 = vmatpush.bf16.msrb.mxu2 %v8799_v35  ;;  %5672 = vmatmul.bf16.vlgmr.msra.gmra.mxu3 %v11126_v18  ;;  %v9991_v35 = vld [vmem:[%s15000_s1 + $0x16f4] sm:$0xf0]  ;;  %v8718_v63 = vld [vmem:[%s15000_s1 + $0x1448] sm:$0xf] }
 0x232   :  { %5716 = vmatpush.bf16.msrb.mxu3 %v8927_v45  ;;  %v8751_v45 = vor.u32 %v9915_v23, %v8750_v19  ;;  %v9055_v49 = vor.u32 %v9991_v35, %v9054_v34  ;;  %v8846_v4 = vld [vmem:[%s15000_s1 + $0x1548] sm:$0xf]  ;;  %v8719_v23 = vor.u32 %v9907_v3, %v8718_v63  ;;  %v9903_v35 = vld [vmem:[%s15000_s1 + $0x1434] sm:$0xf0] }
 0x233   :  { %5682 = vmatpush.bf16.msrb.mxu0 %v8463_v48  ;;  %v9183_v48 = vor.u32 %v10023_v39, %v9182_v38  ;;  %v5452_v60 = vpop.f32.mrf.mxu2  ;;  %v9022_v11 = vld [vmem:[%s15000_s1 + $0x16a8] sm:$0xf]  ;;  %v9935_v39 = vld [vmem:[%s15000_s1 + $0x1534] sm:$0xf0] }
 0x234   :  { %5695 = vmatpush.bf16.msrb.mxu1 %v8591_v53  ;;  %v9943_v53 = vld [vmem:[%s15000_s1 + $0x1574] sm:$0xf0]  ;;  %v5465_v6 = vpop.f32.mrf.mxu3  ;;  %v9150_v15 = vld [vmem:[%s15000_s1 + $0x17a8] sm:$0xf]  ;;  %v9023_v30 = vor.u32 %v9983_v14, %v9022_v11  ;;  %v6240_v11 = vld [vmem:[%s15000_s1 + $0xf8] sm:$0xf0] }
 0x235   :  { %5704 = vmatpush.bf16.msrb.mxu2 %v8783_v54  ;;  %v9038_v54 = vld [vmem:[%s15000_s1 + $0x16c8] sm:$0xf]  ;;  %v8863_v62 = vor.u32 %v9943_v53, %v8862_v50 }
 0x236   :  { %5717 = vmatpush.bf16.msrb.mxu3 %v8911_v59  ;;  %v8735_v59 = vor.u32 %v9911_v56, %v8734_v43  ;;  %v9039_v55 = vor.u32 %v9987_v46, %v9038_v54  ;;  %v8702_v34 = vld [vmem:[%s15000_s1 + $0x1428] sm:$0xf]  ;;  %v9899_v46 = vld [vmem:[%s15000_s1 + $0x1414] sm:$0xf0] }
 0x237   :  { %5683 = vmatpush.bf16.msrb.mxu0 %v8447_v5  ;;  %v5453_v5 = vadd.f32 %v5452_v60, %v807_v52  ;;  %v9134_v43 = vld [vmem:[%s15000_s1 + $0x1788] sm:$0xf]  ;;  %v8703_v56 = vor.u32 %v9903_v35, %v8702_v34  ;;  %v10003_v35 = vld [vmem:[%s15000_s1 + $0x1754] sm:$0xf0] }
 0x238   :  { %5696 = vmatpush.bf16.msrb.mxu1 %v8575_v8  ;;  %v9167_v8 = vor.u32 %v10019_v27, %v9166_v57  ;;  %v8686_v50 = vld [vmem:[%s15000_s1 + $0x1408] sm:$0xf]  ;;  %v9931_v27 = vld [vmem:[%s15000_s1 + $0x1514] sm:$0xf0] }
 0x239   :  { %5705 = vmatpush.bf16.msrb.mxu2 %v8767_v10  ;;  %v9939_v10 = vld [vmem:[%s15000_s1 + $0x1554] sm:$0xf0]  ;;  %v5466_v19 = vadd.f32 %v5465_v6, %v5453_v5  ;;  %v8814_v57 = vld [vmem:[%s15000_s1 + $0x1508] sm:$0xf] }
 0x23a   :  { %5718 = vmatpush.bf16.msrb.mxu3 %v8895_v44  ;;  %v10015_v44 = vld [vmem:[%s15000_s1 + $0x17b4] sm:$0xf0]  ;;  %v8847_v24 = vor.u32 %v9939_v10, %v8846_v4  ;;  %v9118_v63 = vld [vmem:[%s15000_s1 + $0x1768] sm:$0xf]  ;;  %v9285_v10 = vld [vmem:[%s15000_s1 + $0xec] sm:$0xf]  ;;  %v8815_v14 = vor.u32 %v9931_v27, %v8814_v57 }
 0x23b   :  { %5684 = vmatpush.bf16.msrb.mxu0 %v8431_v36  ;;  %v8830_v36 = vld [vmem:[%s15000_s1 + $0x1528] sm:$0xf]  ;;  %v9151_v38 = vor.u32 %v10015_v44, %v9150_v15  ;;  %v10007_v4 = vld [vmem:[%s15000_s1 + $0x1774] sm:$0xf0]  ;;  %v6243_v34 = vor.u32 %v9285_v10, %v6240_v11  ;;  %v9277_v57 = vld [vmem:[%s15000_s1 + $0xac] sm:$0xf] }
 0x23c   :  { %5697 = vmatpush.bf16.msrb.mxu1 %v8559_v29  ;;  %v9006_v29 = vld [vmem:[%s15000_s1 + $0x1688] sm:$0xf]  ;;  %v5491_v52 = vpop.f32.mrf.mxu1  ;;  %v8831_v53 = vor.u32 %v9935_v39, %v8830_v36  ;;  %v10039_v6 = vld [vmem:[%s15000_s1 + $0x1874] sm:$0xf0]  ;;  %v9119_v44 = vor.u32 %v10007_v4, %v9118_v63  ;;  %v6208_v27 = vld [vmem:[%s15000_s1 + $0xb8] sm:$0xf0] }
 0x23d   :  { %5706 = vmatpush.bf16.msrb.mxu2 %v8751_v45  ;;  %v9979_v45 = vld [vmem:[%s15000_s1 + $0x1694] sm:$0xf0]  ;;  %v9246_v5 = vld [vmem:[%s15000_s1 + $0x1868] sm:$0xf]  ;;  %v9273_v11 = vld [vmem:[%s15000_s1 + $0x8c] sm:$0xf] }
 0x23e   :  { %5719 = vmatpush.bf16.msrb.mxu3 %v8879_v47  ;;  %5685 = vmatmul.bf16.vlgmr.msrb.gmra.mxu0 %v11124_v16  ;;  %v10011_v47 = vld [vmem:[%s15000_s1 + $0x1794] sm:$0xf0]  ;;  %v9007_v54 = vor.u32 %v9979_v45, %v9006_v29  ;;  %v9230_v36 = vld [vmem:[%s15000_s1 + $0x1848] sm:$0xf]  ;;  %v9281_v29 = vld [vmem:[%s15000_s1 + $0xcc] sm:$0xf] }
 0x23f   :  { %5729 = vmatpush.bf16.msra.mxu0 %v9055_v49  ;;  %5698 = vmatmul.bf16.vlgmr.msrb.gmra.mxu1 %v11137_v25  ;;  %v5478_v49 = vpop.f32.mrf.mxu0  ;;  %v9135_v60 = vor.u32 %v10011_v47, %v9134_v43  ;;  %v6224_v45 = vld [vmem:[%s15000_s1 + $0xd8] sm:$0xf0]  ;;  %v9070_v4 = vld [vmem:[%s15000_s1 + $0x1708] sm:$0xf]  ;;  %v10027_v10 = vld [vmem:[%s15000_s1 + $0x1814] sm:$0xf0] }
 0x240   :  { %5742 = vmatpush.bf16.msra.mxu1 %v9183_v48  ;;  %v5479_v51 = vadd.f32 %v5478_v49, %v5466_v19  ;;  %v5454_v48 = vpop.f32.mrf.mxu2  ;;  %v9247_v19 = vor.u32 %v10039_v6, %v9246_v5  ;;  %v9995_v5 = vld [vmem:[%s15000_s1 + $0x1714] sm:$0xf0]  ;;  %v9198_v6 = vld [vmem:[%s15000_s1 + $0x1808] sm:$0xf] }
 0x241   :  { %5707 = vmatpush.bf16.msrb.mxu2 %v8735_v59  ;;  %v5467_v59 = vpop.f32.mrf.mxu3  ;;  %v6227_v48 = vor.u32 %v9281_v29, %v6224_v45  ;;  %v9269_v29 = vld [vmem:[%s15000_s1 + $0x6c] sm:$0xf]  ;;  %v6176_v45 = vld [vmem:[%s15000_s1 + $0x78] sm:$0xf0] }
 0x242   :  { %5720 = vmatpush.bf16.msrb.mxu3 %v8863_v62  ;;  %v8990_v62 = vld [vmem:[%s15000_s1 + $0x1668] sm:$0xf]  ;;  %v13706_v3 = vadd.f32 %v5491_v52, %v5479_v51  ;;  %v9967_v51 = vld [vmem:[%s15000_s1 + $0x1634] sm:$0xf0] }
 0x243   :  { %5730 = vmatpush.bf16.msra.mxu0 %v9039_v55  ;;  %v9975_v55 = vld [vmem:[%s15000_s1 + $0x1674] sm:$0xf0]  ;;  %v9086_v52 = vld [vmem:[%s15000_s1 + $0x1728] sm:$0xf] }
 0x244   :  { %5743 = vmatpush.bf16.msra.mxu1 %v9167_v8  ;;  %v8687_v8 = vor.u32 %v9899_v46, %v8686_v50  ;;  %v8991_v15 = vor.u32 %v9975_v55, %v8990_v62  ;;  %v5493_v43 = vpop.f32.mrf.mxu1  ;;  %v8958_v50 = vld [vmem:[%s15000_s1 + $0x1628] sm:$0xf]  ;;  %v10031_v46 = vld [vmem:[%s15000_s1 + $0x1834] sm:$0xf0] }
 0x245   :  { %5708 = vmatpush.bf16.msrb.mxu2 %v8719_v23  ;;  %v8974_v23 = vld [vmem:[%s15000_s1 + $0x1648] sm:$0xf]  ;;  %v8959_v59 = vor.u32 %v9967_v51, %v8958_v50  ;;  %v9963_v62 = vld [vmem:[%s15000_s1 + $0x1614] sm:$0xf0]  ;;  %v9345_v50 = vld [vmem:[%s15000_s1 + $0x2cc] sm:$0xf] }
 0x246   :  { %5721 = vmatpush.bf16.msrb.mxu3 %v8847_v24  ;;  %v9971_v24 = vld [vmem:[%s15000_s1 + $0x1654] sm:$0xf0]  ;;  %v6480_v51 = vld [vmem:[%s15000_s1 + $0x2d8] sm:$0xf0] }
 0x247   :  { %5731 = vmatpush.bf16.msra.mxu0 %v9023_v30  ;;  %v9102_v30 = vld [vmem:[%s15000_s1 + $0x1748] sm:$0xf]  ;;  %v5480_v39 = vpop.f32.mrf.mxu0  ;;  %v8975_v47 = vor.u32 %v9971_v24, %v8974_v23  ;;  %v6496_v24 = vld [vmem:[%s15000_s1 + $0x2f8] sm:$0xf0] }
 0x248   :  { %5744 = vmatpush.bf16.msra.mxu1 %v9151_v38  ;;  %v10035_v38 = vld [vmem:[%s15000_s1 + $0x1854] sm:$0xf0]  ;;  %v9103_v49 = vor.u32 %v10003_v35, %v9102_v30  ;;  %v9381_v30 = vld [vmem:[%s15000_s1 + $0x3ec] sm:$0xf]  ;;  %v9071_v35 = vor.u32 %v9995_v5, %v9070_v4  ;;  %v6336_v4 = vld [vmem:[%s15000_s1 + $0x1b8] sm:$0xf0] }
 0x249   :  { %5709 = vmatpush.bf16.msrb.mxu2 %v8703_v56  ;;  %v9231_v56 = vor.u32 %v10035_v38, %v9230_v36  ;;  %v9199_v36 = vor.u32 %v10027_v10, %v9198_v6  ;;  %v9341_v5 = vld [vmem:[%s15000_s1 + $0x2ac] sm:$0xf] }
 0x24a   :  { %5722 = vmatpush.bf16.msrb.mxu3 %v8831_v53  ;;  %v9999_v53 = vld [vmem:[%s15000_s1 + $0x1734] sm:$0xf0]  ;;  %v9373_v6 = vld [vmem:[%s15000_s1 + $0x3ac] sm:$0xf] }
 0x24b   :  { %5732 = vmatpush.bf16.msra.mxu0 %v9007_v54  ;;  %v9214_v54 = vld [vmem:[%s15000_s1 + $0x1828] sm:$0xf]  ;;  %v9087_v55 = vor.u32 %v9999_v53, %v9086_v52  ;;  %v9377_v52 = vld [vmem:[%s15000_s1 + $0x3cc] sm:$0xf] }
 0x24c   :  { %5745 = vmatpush.bf16.msra.mxu1 %v9135_v60  ;;  %v8942_v60 = vld [vmem:[%s15000_s1 + $0x1608] sm:$0xf]  ;;  %v9215_v63 = vor.u32 %v10031_v46, %v9214_v54  ;;  %v6179_v54 = vor.u32 %v9269_v29, %v6176_v45  ;;  %v6576_v29 = vld [vmem:[%s15000_s1 + $0x398] sm:$0xf0] }
 0x24d   :  { %5710 = vmatpush.bf16.msrb.mxu2 %v8687_v8  ;;  %v6211_v8 = vor.u32 %v9277_v57, %v6208_v27  ;;  %v8943_v23 = vor.u32 %v9963_v62, %v8942_v60  ;;  %v9265_v57 = vld [vmem:[%s15000_s1 + $0x4c] sm:$0xf]  ;;  %v6160_v27 = vld [vmem:[%s15000_s1 + $0x58] sm:$0xf0]  ;;  %v6483_v62 = vor.u32 %v9345_v50, %v6480_v51 }
 0x24e   :  { %5723 = vmatpush.bf16.msrb.mxu3 %v8815_v14  ;;  %v6192_v14 = vld [vmem:[%s15000_s1 + $0x98] sm:$0xf0]  ;;  %v9257_v50 = vld [vmem:[%s15000_s1 + $0xc] sm:$0xf] }
 0x24f   :  { %5733 = vmatpush.bf16.msra.mxu0 %v8991_v15  ;;  %v9317_v15 = vld [vmem:[%s15000_s1 + $0x1ec] sm:$0xf]  ;;  %v6195_v38 = vor.u32 %v9273_v11, %v6192_v14  ;;  %v6163_v11 = vor.u32 %v9265_v57, %v6160_v27  ;;  %v6128_v51 = vld [vmem:[%s15000_s1 + $0x18] sm:$0xf0] }
 0x250   :  { %5746 = vmatpush.bf16.msra.mxu1 %v9119_v44  ;;  %5711 = vmatmul.bf16.vlgmr.msrb.gmra.mxu2 %v11154_v37  ;;  %v6368_v44 = vld [vmem:[%s15000_s1 + $0x1f8] sm:$0xf0]  ;;  %v9333_v27 = vld [vmem:[%s15000_s1 + $0x26c] sm:$0xf] }
 0x251   :  { %5759 = vmatpush.bf16.msra.mxu2 %v9247_v19  ;;  %5724 = vmatmul.bf16.vlgmr.msrb.gmra.mxu3 %v11158_v41  ;;  %v9349_v19 = vld [vmem:[%s15000_s1 + $0x2ec] sm:$0xf]  ;;  %v6371_v39 = vor.u32 %v9317_v15, %v6368_v44  ;;  %v6144_v44 = vld [vmem:[%s15000_s1 + $0x38] sm:$0xf0] }
 0x252   :  { %5768 = vmatpush.bf16.msra.mxu3 %v6243_v34  ;;  %v6624_v34 = vld [vmem:[%s15000_s1 + $0x3f8] sm:$0xf0]  ;;  %v6499_v43 = vor.u32 %v9349_v19, %v6496_v24  ;;  %v9261_v15 = vld [vmem:[%s15000_s1 + $0x2c] sm:$0xf] }
 0x253   :  { %5734 = vmatpush.bf16.msra.mxu0 %v8975_v47  ;;  %v6627_v47 = vor.u32 %v9381_v30, %v6624_v34  ;;  %v5504_v53 = vpop.f32.mrf.mxu2  ;;  %v9305_v24 = vld [vmem:[%s15000_s1 + $0x18c] sm:$0xf]  ;;  %v6320_v30 = vld [vmem:[%s15000_s1 + $0x198] sm:$0xf0] }
 0x254   :  { %5747 = vmatpush.bf16.msra.mxu1 %v9103_v49  ;;  %v9313_v49 = vld [vmem:[%s15000_s1 + $0x1cc] sm:$0xf]  ;;  %v5517_v60 = vpop.f32.mrf.mxu3  ;;  %v6304_v57 = vld [vmem:[%s15000_s1 + $0x178] sm:$0xf0] }
 0x255   :  { %5760 = vmatpush.bf16.msra.mxu2 %v9231_v56  ;;  %v6352_v56 = vld [vmem:[%s15000_s1 + $0x1d8] sm:$0xf0]  ;;  %v9337_v34 = vld [vmem:[%s15000_s1 + $0x28c] sm:$0xf] }
 0x256   :  { %5769 = vmatpush.bf16.msra.mxu3 %v6227_v48  ;;  %v6608_v48 = vld [vmem:[%s15000_s1 + $0x3d8] sm:$0xf0]  ;;  %v6355_v46 = vor.u32 %v9313_v49, %v6352_v56  ;;  %v6147_v49 = vor.u32 %v9261_v15, %v6144_v44  ;;  %v6323_v56 = vor.u32 %v9305_v24, %v6320_v30  ;;  %v9361_v44 = vld [vmem:[%s15000_s1 + $0x34c] sm:$0xf] }
 0x257   :  { %5735 = vmatpush.bf16.msra.mxu0 %v8959_v59  ;;  %v5505_v59 = vadd.f32 %v5504_v53, %v13706_v3  ;;  %v6464_v3 = vld [vmem:[%s15000_s1 + $0x2b8] sm:$0xf0]  ;;  %v9409_v24 = vld [vmem:[%s15000_s1 + $0x4cc] sm:$0xf] }
 0x258   :  { %5748 = vmatpush.bf16.msra.mxu1 %v9087_v55  ;;  %v6611_v55 = vor.u32 %v9377_v52, %v6608_v48  ;;  %v6467_v19 = vor.u32 %v9341_v5, %v6464_v3  ;;  %v6416_v15 = vld [vmem:[%s15000_s1 + $0x258] sm:$0xf0] }
 0x259   :  { %5761 = vmatpush.bf16.msra.mxu2 %v9215_v63  ;;  %v9309_v63 = vld [vmem:[%s15000_s1 + $0x1ac] sm:$0xf]  ;;  %v5518_v10 = vadd.f32 %v5517_v60, %v5505_v59  ;;  %v6432_v59 = vld [vmem:[%s15000_s1 + $0x278] sm:$0xf0] }
 0x25a   :  { %5770 = vmatpush.bf16.msra.mxu3 %v6211_v8  ;;  %v6592_v8 = vld [vmem:[%s15000_s1 + $0x3b8] sm:$0xf0]  ;;  %v6339_v14 = vor.u32 %v9309_v63, %v6336_v4  ;;  %v9365_v60 = vld [vmem:[%s15000_s1 + $0x36c] sm:$0xf]  ;;  %v6131_v4 = vor.u32 %v9257_v50, %v6128_v51  ;;  %v6435_v3 = vor.u32 %v9333_v27, %v6432_v59 }
 0x25b   :  { %5736 = vmatpush.bf16.msra.mxu0 %v8943_v23  ;;  %v6595_v23 = vor.u32 %v9373_v6, %v6592_v8  ;;  %v6752_v63 = vld [vmem:[%s15000_s1 + $0x4f8] sm:$0xf0]  ;;  %v9297_v8 = vld [vmem:[%s15000_s1 + $0x14c] sm:$0xf] }
 0x25c   :  { %5749 = vmatpush.bf16.msra.mxu1 %v9071_v35  ;;  %v10043_v35 = vld [vmem:[#allocation1] sm:$0xff]  ;;  %v5519_v52 = vpop.f32.mrf.mxu3  ;;  %v6736_v30 = vld [vmem:[%s15000_s1 + $0x4d8] sm:$0xf0]  ;;  %v9405_v50 = vld [vmem:[%s15000_s1 + $0x4ac] sm:$0xf] }
 0x25d   :  { %5762 = vmatpush.bf16.msra.mxu2 %v9199_v36  ;;  %v5530_v36 = vpop.f32.mrf.mxu0  ;;  %v6720_v51 = vld [vmem:[%s15000_s1 + $0x4b8] sm:$0xf0]  ;;  %v9321_v27 = vld [vmem:[%s15000_s1 + $0x20c] sm:$0xf] }
 0x25e   :  { %5771 = vmatpush.bf16.msra.mxu3 %v6195_v38  ;;  %5737 = vmatmul.bf16.vlgmr.msra.gmra.mxu0 %v11156_v40  ;;  %v6448_v38 = vld [vmem:[%s15000_s1 + $0x298] sm:$0xf0]  ;;  %v5531_v45 = vadd.f32 %v5530_v36, %v5518_v10  ;;  %v9353_v59 = vld [vmem:[%s15000_s1 + $0x30c] sm:$0xf] }
 0x25f   :  { %5781 = vmatpush.bf16.msrb.mxu0 %v6371_v39  ;;  %5750 = vmatmul.bf16.vlgmr.msra.gmra.mxu1 %v11160_v42  ;;  %v9369_v39 = vld [vmem:[%s15000_s1 + $0x38c] sm:$0xf]  ;;  %v6451_v48 = vor.u32 %v9337_v34, %v6448_v38  ;;  %v6288_v10 = vld [vmem:[%s15000_s1 + $0x158] sm:$0xf0] }
 0x260   :  { %5794 = vmatpush.bf16.msrb.mxu1 %v6499_v43  ;;  %9254 = vmatmul.msk.bf16.vlgmr.msra.gmra.mxu2 %vm4790_vm0, %v10043_v35  ;;  %v5543_v43 = vpop.f32.mrf.mxu1  ;;  %v6579_v53 = vor.u32 %v9369_v39, %v6576_v29  ;;  %v6291_v35 = vor.u32 %v9297_v8, %v6288_v10  ;;  %v9293_v39 = vld [vmem:[%s15000_s1 + $0x12c] sm:$0xf]  ;;  %v6272_v29 = vld [vmem:[%s15000_s1 + $0x138] sm:$0xf0] }
 0x261   :  { %5807 = vmatpush.bf16.msrb.mxu2 %v6627_v47  ;;  %v5506_v47 = vpop.f32.mrf.mxu2  ;;  %v6275_v52 = vor.u32 %v9293_v39, %v6272_v29  ;;  %v7008_v8 = vld [vmem:[%s15000_s1 + $0x6f8] sm:$0xf0]  ;;  %v9509_v10 = vld [vmem:[%s15000_s1 + $0x7ec] sm:$0xf] }
 0x262   :  { %5772 = vmatpush.bf16.msra.mxu3 %v6179_v54  ;;  %v13897_v54 = vadd.f32 %v5543_v43, %v5531_v45  ;;  %v9325_v45 = vld [vmem:[%s15000_s1 + $0x22c] sm:$0xf]  ;;  %v6739_v43 = vor.u32 %v9409_v24, %v6736_v30  ;;  %v6400_v47 = vld [vmem:[%s15000_s1 + $0x238] sm:$0xf0] }
 0x263   :  { %5782 = vmatpush.bf16.msrb.mxu0 %v6355_v46  ;;  %v9301_v46 = vld [vmem:[%s15000_s1 + $0x16c] sm:$0xf]  ;;  %v6688_v24 = vld [vmem:[%s15000_s1 + $0x478] sm:$0xf0] }
 0x264   :  { %5795 = vmatpush.bf16.msrb.mxu1 %v6483_v62  ;;  %v6560_v62 = vld [vmem:[%s15000_s1 + $0x378] sm:$0xf0]  ;;  %v6307_v5 = vor.u32 %v9301_v46, %v6304_v57  ;;  %v6403_v46 = vor.u32 %v9325_v45, %v6400_v47  ;;  %v9505_v29 = vld [vmem:[%s15000_s1 + $0x7cc] sm:$0xf] }
 0x265   :  { %5808 = vmatpush.bf16.msrb.mxu2 %v6611_v55  ;;  %v9413_v55 = vld [vmem:[%s15000_s1 + $0x4ec] sm:$0xf]  ;;  %v6563_v6 = vor.u32 %v9365_v60, %v6560_v62  ;;  %v6723_v60 = vor.u32 %v9405_v50, %v6720_v51  ;;  %v6512_v62 = vld [vmem:[%s15000_s1 + $0x318] sm:$0xf0] }
 0x266   :  { %5773 = vmatpush.bf16.msra.mxu3 %v6163_v11  ;;  %v9329_v11 = vld [vmem:[%s15000_s1 + $0x24c] sm:$0xf]  ;;  %v6992_v39 = vld [vmem:[%s15000_s1 + $0x6d8] sm:$0xf0] }
 0x267   :  { %5783 = vmatpush.bf16.msrb.mxu0 %v6339_v14  ;;  %v6755_v14 = vor.u32 %v9413_v55, %v6752_v63  ;;  %v6419_v36 = vor.u32 %v9329_v11, %v6416_v15  ;;  %v9401_v55 = vld [vmem:[%s15000_s1 + $0x48c] sm:$0xf]  ;;  %v6704_v63 = vld [vmem:[%s15000_s1 + $0x498] sm:$0xf0]  ;;  %v6515_v15 = vor.u32 %v9353_v59, %v6512_v62 }
 0x268   :  { %5796 = vmatpush.bf16.msrb.mxu1 %v6467_v19  ;;  %v6544_v19 = vld [vmem:[%s15000_s1 + $0x358] sm:$0xf0]  ;;  %v5545_v34 = vpop.f32.mrf.mxu1  ;;  %v9393_v51 = vld [vmem:[%s15000_s1 + $0x44c] sm:$0xf] }
 0x269   :  { %5809 = vmatpush.bf16.msrb.mxu2 %v6595_v23  ;;  %v5532_v23 = vpop.f32.mrf.mxu0  ;;  %v6547_v38 = vor.u32 %v9361_v44, %v6544_v19  ;;  %v7136_v11 = vld [vmem:[%s15000_s1 + $0x7f8] sm:$0xf0]  ;;  %v6707_v44 = vor.u32 %v9401_v55, %v6704_v63  ;;  %v9501_v59 = vld [vmem:[%s15000_s1 + $0x7ac] sm:$0xf] }
 0x26a   :  { %5774 = vmatpush.bf16.msra.mxu3 %v6147_v49  ;;  %v9357_v49 = vld [vmem:[%s15000_s1 + $0x32c] sm:$0xf]  ;;  %v7139_v34 = vor.u32 %v9509_v10, %v7136_v11  ;;  %v7120_v45 = vld [vmem:[%s15000_s1 + $0x7d8] sm:$0xf0] }
 0x26b   :  { %5784 = vmatpush.bf16.msrb.mxu0 %v6323_v56  ;;  %v6528_v56 = vld [vmem:[%s15000_s1 + $0x338] sm:$0xf0]  ;;  %v9397_v23 = vld [vmem:[%s15000_s1 + $0x46c] sm:$0xf] }
 0x26c   :  { %5797 = vmatpush.bf16.msrb.mxu1 %v6451_v48  ;;  %v9289_v48 = vld [vmem:[%s15000_s1 + $0x10c] sm:$0xf]  ;;  %v6531_v57 = vor.u32 %v9357_v49, %v6528_v56  ;;  %v6691_v47 = vor.u32 %v9397_v23, %v6688_v24  ;;  %v7088_v11 = vld [vmem:[%s15000_s1 + $0x798] sm:$0xf0] }
 0x26d   :  { %5810 = vmatpush.bf16.msrb.mxu2 %v6579_v53  ;;  %v6256_v53 = vld [vmem:[%s15000_s1 + $0x118] sm:$0xf0]  ;;  %v9389_v63 = vld [vmem:[%s15000_s1 + $0x42c] sm:$0xf] }
 0x26e   :  { %5775 = vmatpush.bf16.msra.mxu3 %v6131_v4  ;;  %v9445_v4 = vld [vmem:[%s15000_s1 + $0x5ec] sm:$0xf] }
 0x26f   :  { %5785 = vmatpush.bf16.msrb.mxu0 %v6307_v5  ;;  %v6880_v5 = vld [vmem:[%s15000_s1 + $0x5f8] sm:$0xf0]  ;;  %v9497_v10 = vld [vmem:[%s15000_s1 + $0x78c] sm:$0xf] }
 0x270   :  { %5798 = vmatpush.bf16.msrb.mxu1 %v6435_v3  ;;  %v9477_v3 = vld [vmem:[%s15000_s1 + $0x6ec] sm:$0xf]  ;;  %v6883_v19 = vor.u32 %v9445_v4, %v6880_v5  ;;  %v6656_v4 = vld [vmem:[%s15000_s1 + $0x438] sm:$0xf0] }
 0x271   :  { %5811 = vmatpush.bf16.msrb.mxu2 %v6563_v6  ;;  %5776 = vmatmul.bf16.vlgmr.msra.gmra.mxu3 %v10371_v21  ;;  %v6384_v21 = vld [vmem:[%s15000_s1 + $0x218] sm:$0xf0]  ;;  %v6259_v6 = vor.u32 %v9289_v48, %v6256_v53  ;;  %v7011_v30 = vor.u32 %v9477_v3, %v7008_v8  ;;  %v7123_v53 = vor.u32 %v9505_v29, %v7120_v45  ;;  %v9465_v3 = vld [vmem:[%s15000_s1 + $0x68c] sm:$0xf] }
 0x272   :  { %5820 = vmatpush.bf16.msrb.mxu3 %v6755_v14  ;;  %v6387_v14 = vor.u32 %v9321_v27, %v6384_v21  ;;  %v6976_v21 = vld [vmem:[%s15000_s1 + $0x6b8] sm:$0xf0]  ;;  %v9385_v24 = vld [vmem:[%s15000_s1 + $0x40c] sm:$0xf] }
 0x273   :  { %5786 = vmatpush.bf16.msrb.mxu0 %v6291_v35  ;;  %v9441_v35 = vld [vmem:[%s15000_s1 + $0x5cc] sm:$0xf]  ;;  %v6960_v8 = vld [vmem:[%s15000_s1 + $0x698] sm:$0xf0] }
 0x274   :  { %5799 = vmatpush.bf16.msrb.mxu1 %v6419_v36  ;;  %v6864_v36 = vld [vmem:[%s15000_s1 + $0x5d8] sm:$0xf0]  ;;  %v5569_v50 = vpop.f32.mrf.mxu3  ;;  %v9461_v45 = vld [vmem:[%s15000_s1 + $0x66c] sm:$0xf] }
 0x275   :  { %5812 = vmatpush.bf16.msrb.mxu2 %v6547_v38  ;;  %v9473_v38 = vld [vmem:[%s15000_s1 + $0x6cc] sm:$0xf]  ;;  %v6867_v56 = vor.u32 %v9441_v35, %v6864_v36  ;;  %v6963_v35 = vor.u32 %v9465_v3, %v6960_v8  ;;  %v7091_v36 = vor.u32 %v9497_v10, %v7088_v11  ;;  %v6816_v29 = vld [vmem:[%s15000_s1 + $0x578] sm:$0xf0] }
 0x276   :  { %5821 = vmatpush.bf16.msrb.mxu3 %v6739_v43  ;;  %v5556_v43 = vpop.f32.mrf.mxu2  ;;  %v6995_v48 = vor.u32 %v9473_v38, %v6992_v39  ;;  %v9429_v39 = vld [vmem:[%s15000_s1 + $0x56c] sm:$0xf]  ;;  %v6784_v3 = vld [vmem:[%s15000_s1 + $0x538] sm:$0xf0] }
 0x277   :  { %5787 = vmatpush.bf16.msrb.mxu0 %v6275_v52  ;;  %v5557_v49 = vadd.f32 %v5556_v43, %v13897_v54  ;;  %v6672_v52 = vld [vmem:[%s15000_s1 + $0x458] sm:$0xf0]  ;;  %v9485_v11 = vld [vmem:[%s15000_s1 + $0x72c] sm:$0xf] }
 0x278   :  { %5800 = vmatpush.bf16.msrb.mxu1 %v6403_v46  ;;  %v9437_v46 = vld [vmem:[%s15000_s1 + $0x5ac] sm:$0xf]  ;;  %v6848_v54 = vld [vmem:[%s15000_s1 + $0x5b8] sm:$0xf0]  ;;  %v6675_v62 = vor.u32 %v9393_v51, %v6672_v52  ;;  %v6819_v52 = vor.u32 %v9429_v39, %v6816_v29 }
 0x279   :  { %5813 = vmatpush.bf16.msrb.mxu2 %v6531_v57  ;;  %v9469_v57 = vld [vmem:[%s15000_s1 + $0x6ac] sm:$0xf]  ;;  %v5570_v27 = vadd.f32 %v5569_v50, %v5557_v49  ;;  %v6851_v55 = vor.u32 %v9437_v46, %v6848_v54  ;;  %v6944_v43 = vld [vmem:[%s15000_s1 + $0x678] sm:$0xf0] }
 0x27a   :  { %5822 = vmatpush.bf16.msrb.mxu3 %v6723_v60  ;;  %v7104_v60 = vld [vmem:[%s15000_s1 + $0x7b8] sm:$0xf0]  ;;  %v6979_v5 = vor.u32 %v9469_v57, %v6976_v21  ;;  %v9425_v46 = vld [vmem:[%s15000_s1 + $0x54c] sm:$0xf] }
 0x27b   :  { %5788 = vmatpush.bf16.msrb.mxu0 %v6259_v6  ;;  %v5582_v6 = vpop.f32.mrf.mxu0  ;;  %v7072_v49 = vld [vmem:[%s15000_s1 + $0x778] sm:$0xf0]  ;;  %v9457_v57 = vld [vmem:[%s15000_s1 + $0x64c] sm:$0xf] }
 0x27c   :  { %5801 = vmatpush.bf16.msrb.mxu1 %v6387_v14  ;;  %v5583_v14 = vadd.f32 %v5582_v6, %v5570_v27  ;;  %v7264_v50 = vld [vmem:[%s15000_s1 + $0x8f8] sm:$0xf0]  ;;  %v9453_v6 = vld [vmem:[%s15000_s1 + $0x62c] sm:$0xf] }
 0x27d   :  { %5814 = vmatpush.bf16.msrb.mxu2 %v6515_v15  ;;  %v5595_v15 = vpop.f32.mrf.mxu1  ;;  %v6800_v54 = vld [vmem:[%s15000_s1 + $0x558] sm:$0xf0] }
 0x27e   :  { %5823 = vmatpush.bf16.msrb.mxu3 %v6707_v44  ;;  %5789 = vmatmul.bf16.vlgmr.msrb.gmra.mxu0 %v10382_v26  ;;  %v6832_v26 = vld [vmem:[%s15000_s1 + $0x598] sm:$0xf0]  ;;  %v5558_v44 = vpop.f32.mrf.mxu2  ;;  %v14096_v38 = vadd.f32 %v5595_v15, %v5583_v14  ;;  %v9533_v15 = vld [vmem:[%s15000_s1 + $0x8ac] sm:$0xf] }
 0x27f   :  { %5833 = vmatpush.bf16.msra.mxu0 %v6883_v19  ;;  %5802 = vmatmul.bf16.vlgmr.msrb.gmra.mxu1 %v10369_v20  ;;  %v9433_v20 = vld [vmem:[%s15000_s1 + $0x58c] sm:$0xf]  ;;  %v6659_v19 = vor.u32 %v9389_v63, %v6656_v4  ;;  %v6928_v21 = vld [vmem:[%s15000_s1 + $0x658] sm:$0xf0] }
 0x280   :  { %5846 = vmatpush.bf16.msra.mxu1 %v7011_v30  ;;  %5815 = vmatmul.bf16.vlgmr.msrb.gmra.mxu2 %v10373_v22  ;;  %v7107_v22 = vor.u32 %v9501_v59, %v7104_v60  ;;  %v6835_v23 = vor.u32 %v9433_v20, %v6832_v26  ;;  %v6640_v30 = vld [vmem:[%s15000_s1 + $0x418] sm:$0xf0]  ;;  %v9489_v59 = vld [vmem:[%s15000_s1 + $0x74c] sm:$0xf] }
 0x281   :  { %5859 = vmatpush.bf16.msra.mxu2 %v7139_v34  ;;  %v5571_v34 = vpop.f32.mrf.mxu3  ;;  %v6643_v51 = vor.u32 %v9385_v24, %v6640_v30  ;;  %v7056_v60 = vld [vmem:[%s15000_s1 + $0x758] sm:$0xf0]  ;;  %v9421_v26 = vld [vmem:[%s15000_s1 + $0x52c] sm:$0xf] }
 0x282   :  { %5824 = vmatpush.bf16.msrb.mxu3 %v6691_v47  ;;  %v9493_v47 = vld [vmem:[%s15000_s1 + $0x76c] sm:$0xf]  ;;  %v7248_v63 = vld [vmem:[%s15000_s1 + $0x8d8] sm:$0xf0]  ;;  %v7059_v20 = vor.u32 %v9489_v59, %v7056_v60 }
 0x283   :  { %5834 = vmatpush.bf16.msra.mxu0 %v6867_v56  ;;  %v9541_v56 = vld [vmem:[%s15000_s1 + $0x8ec] sm:$0xf]  ;;  %v6912_v10 = vld [vmem:[%s15000_s1 + $0x638] sm:$0xf0] }
 0x284   :  { %5847 = vmatpush.bf16.msra.mxu1 %v6995_v48  ;;  %v6947_v48 = vor.u32 %v9461_v45, %v6944_v43  ;;  %v7267_v27 = vor.u32 %v9541_v56, %v7264_v50  ;;  %v7040_v14 = vld [vmem:[%s15000_s1 + $0x738] sm:$0xf0]  ;;  %v9449_v34 = vld [vmem:[%s15000_s1 + $0x60c] sm:$0xf] }
 0x285   :  { %5860 = vmatpush.bf16.msra.mxu2 %v7123_v53  ;;  %v7075_v53 = vor.u32 %v9493_v47, %v7072_v49  ;;  %v5597_v4 = vpop.f32.mrf.mxu1  ;;  %v7232_v44 = vld [vmem:[%s15000_s1 + $0x8b8] sm:$0xf0]  ;;  %v7043_v30 = vor.u32 %v9485_v11, %v7040_v14  ;;  %v9529_v45 = vld [vmem:[%s15000_s1 + $0x88c] sm:$0xf] }
 0x286   :  { %5825 = vmatpush.bf16.msrb.mxu3 %v6675_v62  ;;  %v5584_v62 = vpop.f32.mrf.mxu0  ;;  %v6768_v24 = vld [vmem:[%s15000_s1 + $0x518] sm:$0xf0]  ;;  %v7235_v39 = vor.u32 %v9533_v15, %v7232_v44  ;;  %v9573_v47 = vld [vmem:[%s15000_s1 + $0x9ec] sm:$0xf] }
 0x287   :  { %5835 = vmatpush.bf16.msra.mxu0 %v6851_v55  ;;  %v9537_v55 = vld [vmem:[%s15000_s1 + $0x8cc] sm:$0xf]  ;;  %v7024_v29 = vld [vmem:[%s15000_s1 + $0x718] sm:$0xf0] }
 0x288   :  { %5848 = vmatpush.bf16.msra.mxu1 %v6979_v5  ;;  %v6803_v5 = vor.u32 %v9425_v46, %v6800_v54  ;;  %v7251_v8 = vor.u32 %v9537_v55, %v7248_v63  ;;  %v7216_v43 = vld [vmem:[%s15000_s1 + $0x898] sm:$0xf0]  ;;  %v9605_v56 = vld [vmem:[%s15000_s1 + $0xaec] sm:$0xf] }
 0x289   :  { %5861 = vmatpush.bf16.msra.mxu2 %v7107_v22  ;;  %v6931_v22 = vor.u32 %v9457_v57, %v6928_v21  ;;  %v7392_v49 = vld [vmem:[%s15000_s1 + $0x9f8] sm:$0xf0]  ;;  %v7219_v54 = vor.u32 %v9529_v45, %v7216_v43  ;;  %v9569_v62 = vld [vmem:[%s15000_s1 + $0x9cc] sm:$0xf] }
 0x28a   :  { %5826 = vmatpush.bf16.msrb.mxu3 %v6659_v19  ;;  %v6787_v19 = vor.u32 %v9421_v26, %v6784_v3  ;;  %v7395_v57 = vor.u32 %v9573_v47, %v7392_v49  ;;  %v7200_v21 = vld [vmem:[%s15000_s1 + $0x878] sm:$0xf0]  ;;  %v9601_v63 = vld [vmem:[%s15000_s1 + $0xacc] sm:$0xf] }
 0x28b   :  { %5836 = vmatpush.bf16.msra.mxu0 %v6835_v23  ;;  %v9417_v23 = vld [vmem:[%s15000_s1 + $0x50c] sm:$0xf]  ;;  %v7376_v55 = vld [vmem:[%s15000_s1 + $0x9d8] sm:$0xf0] }
 0x28c   :  { %5849 = vmatpush.bf16.msra.mxu1 %v6963_v35  ;;  %v6896_v35 = vld [vmem:[%s15000_s1 + $0x618] sm:$0xf0]  ;;  %v6771_v50 = vor.u32 %v9417_v23, %v6768_v24  ;;  %v9565_v44 = vld [vmem:[%s15000_s1 + $0x9ac] sm:$0xf] }
 0x28d   :  { %5862 = vmatpush.bf16.msra.mxu2 %v7091_v36  ;;  %v9481_v36 = vld [vmem:[%s15000_s1 + $0x70c] sm:$0xf]  ;;  %v7504_v4 = vld [vmem:[%s15000_s1 + $0xad8] sm:$0xf0] }
 0x28e   :  { %5827 = vmatpush.bf16.msrb.mxu3 %v6643_v51  ;;  %v7520_v51 = vld [vmem:[%s15000_s1 + $0xaf8] sm:$0xf0]  ;;  %v7027_v46 = vor.u32 %v9481_v36, %v7024_v29  ;;  %v7507_v14 = vor.u32 %v9601_v63, %v7504_v4  ;;  %v9593_v45 = vld [vmem:[%s15000_s1 + $0xa8c] sm:$0xf] }
 0x28f   :  { %5837 = vmatpush.bf16.msra.mxu0 %v6819_v52  ;;  %v9637_v52 = vld [vmem:[%s15000_s1 + $0xbec] sm:$0xf]  ;;  %v7523_v59 = vor.u32 %v9605_v56, %v7520_v51  ;;  %v7184_v11 = vld [vmem:[%s15000_s1 + $0x858] sm:$0xf0] }
 0x290   :  { %5850 = vmatpush.bf16.msra.mxu1 %v6947_v48  ;;  %v7648_v48 = vld [vmem:[%s15000_s1 + $0xbf8] sm:$0xf0]  ;;  %v9625_v49 = vld [vmem:[%s15000_s1 + $0xb8c] sm:$0xf] }
 0x291   :  { %5863 = vmatpush.bf16.msra.mxu2 %v7075_v53  ;;  %5828 = vmatmul.bf16.vlgmr.msrb.gmra.mxu3 %v10464_v0  ;;  %v6915_v0 = vor.u32 %v9453_v6, %v6912_v10  ;;  %v6899_v53 = vor.u32 %v9449_v34, %v6896_v35  ;;  %v7651_v60 = vor.u32 %v9637_v52, %v7648_v48  ;;  %v9521_v10 = vld [vmem:[%s15000_s1 + $0x84c] sm:$0xf]  ;;  %v7488_v24 = vld [vmem:[%s15000_s1 + $0xab8] sm:$0xf0] }
 0x292   :  { %5872 = vmatpush.bf16.msra.mxu3 %v7267_v27  ;;  %v9525_v27 = vld [vmem:[%s15000_s1 + $0x86c] sm:$0xf]  ;;  %v7379_v6 = vor.u32 %v9569_v62, %v7376_v55  ;;  %v7168_v35 = vld [vmem:[%s15000_s1 + $0x838] sm:$0xf0] }
 0x293   :  { %5838 = vmatpush.bf16.msra.mxu0 %v6803_v5  ;;  %v9633_v5 = vld [vmem:[%s15000_s1 + $0xbcc] sm:$0xf]  ;;  %v7203_v26 = vor.u32 %v9525_v27, %v7200_v21  ;;  %v7344_v29 = vld [vmem:[%s15000_s1 + $0x998] sm:$0xf0] }
 0x294   :  { %5851 = vmatpush.bf16.msra.mxu1 %v6931_v22  ;;  %v7632_v22 = vld [vmem:[%s15000_s1 + $0xbd8] sm:$0xf0]  ;;  %v9589_v55 = vld [vmem:[%s15000_s1 + $0xa6c] sm:$0xf] }
 0x295   :  { %5864 = vmatpush.bf16.msra.mxu2 %v7059_v20  ;;  %v5608_v20 = vpop.f32.mrf.mxu2  ;;  %v7635_v15 = vor.u32 %v9633_v5, %v7632_v22  ;;  %v7472_v47 = vld [vmem:[%s15000_s1 + $0xa98] sm:$0xf0]  ;;  %v9621_v4 = vld [vmem:[%s15000_s1 + $0xb6c] sm:$0xf] }
 0x296   :  { %5873 = vmatpush.bf16.msra.mxu3 %v7251_v8  ;;  %v5609_v3 = vadd.f32 %v5608_v20, %v14096_v38  ;;  %v5621_v8 = vpop.f32.mrf.mxu3  ;;  %v7360_v38 = vld [vmem:[%s15000_s1 + $0x9b8] sm:$0xf0]  ;;  %v7475_v27 = vor.u32 %v9593_v45, %v7472_v47  ;;  %v9669_v22 = vld [vmem:[%s15000_s1 + $0xcec] sm:$0xf] }
 0x297   :  { %5839 = vmatpush.bf16.msra.mxu0 %v6787_v19  ;;  %v9597_v19 = vld [vmem:[%s15000_s1 + $0xaac] sm:$0xf]  ;;  %v7363_v34 = vor.u32 %v9565_v44, %v7360_v38  ;;  %v7600_v56 = vld [vmem:[%s15000_s1 + $0xb98] sm:$0xf0] }
 0x298   :  { %5852 = vmatpush.bf16.msra.mxu1 %v6915_v0  ;;  %v5622_v23 = vadd.f32 %v5621_v8, %v5609_v3  ;;  %v9629_v0 = vld [vmem:[%s15000_s1 + $0xbac] sm:$0xf]  ;;  %v7491_v36 = vor.u32 %v9597_v19, %v7488_v24  ;;  %v7603_v21 = vor.u32 %v9625_v49, %v7600_v56  ;;  %v7328_v62 = vld [vmem:[%s15000_s1 + $0x978] sm:$0xf0] }
 0x299   :  { %5865 = vmatpush.bf16.msra.mxu2 %v7043_v30  ;;  %v7616_v30 = vld [vmem:[%s15000_s1 + $0xbb8] sm:$0xf0]  ;;  %v9617_v38 = vld [vmem:[%s15000_s1 + $0xb4c] sm:$0xf] }
 0x29a   :  { %5874 = vmatpush.bf16.msra.mxu3 %v7235_v39  ;;  %v7619_v39 = vor.u32 %v9629_v0, %v7616_v30  ;;  %v7456_v63 = vld [vmem:[%s15000_s1 + $0xa78] sm:$0xf0]  ;;  %v9665_v24 = vld [vmem:[%s15000_s1 + $0xccc] sm:$0xf] }
 0x29b   :  { %5840 = vmatpush.bf16.msra.mxu0 %v6771_v50  ;;  %v5634_v43 = vpop.f32.mrf.mxu0  ;;  %v7584_v5 = vld [vmem:[%s15000_s1 + $0xb78] sm:$0xf0]  ;;  %v9613_v45 = vld [vmem:[%s15000_s1 + $0xb2c] sm:$0xf] }
 0x29c   :  { %5853 = vmatpush.bf16.msra.mxu1 %v6899_v53  ;;  %v5635_v50 = vadd.f32 %v5634_v43, %v5622_v23  ;;  %v5647_v51 = vpop.f32.mrf.mxu1  ;;  %v7776_v20 = vld [vmem:[%s15000_s1 + $0xcf8] sm:$0xf0]  ;;  %v7587_v8 = vor.u32 %v9621_v4, %v7584_v5  ;;  %v9661_v47 = vld [vmem:[%s15000_s1 + $0xcac] sm:$0xf] }
 0x29d   :  { %5866 = vmatpush.bf16.msra.mxu2 %v7027_v46  ;;  %v5610_v52 = vpop.f32.mrf.mxu2  ;;  %v9513_v46 = vld [vmem:[%s15000_s1 + $0x80c] sm:$0xf]  ;;  %v7440_v44 = vld [vmem:[%s15000_s1 + $0xa58] sm:$0xf0] }
 0x29e   :  { %5875 = vmatpush.bf16.msra.mxu3 %v7219_v54  ;;  %5841 = vmatmul.bf16.vlgmr.msra.gmra.mxu0 %v10468_v2  ;;  %v9517_v2 = vld [vmem:[%s15000_s1 + $0x82c] sm:$0xf]  ;;  %v7152_v54 = vld [vmem:[%s15000_s1 + $0x818] sm:$0xf0] }
 0x29f   :  { %5885 = vmatpush.bf16.msrb.mxu0 %v7395_v57  ;;  %5854 = vmatmul.bf16.vlgmr.msra.gmra.mxu1 %v10462_v61  ;;  %v9561_v61 = vld [vmem:[%s15000_s1 + $0x98c] sm:$0xf]  ;;  %v7171_v48 = vor.u32 %v9517_v2, %v7168_v35  ;;  %v5623_v57 = vpop.f32.mrf.mxu3  ;;  %v7568_v19 = vld [vmem:[%s15000_s1 + $0xb58] sm:$0xf0] }
 0x2a0   :  { %5898 = vmatpush.bf16.msrb.mxu1 %v7523_v59  ;;  %5867 = vmatmul.bf16.vlgmr.msra.gmra.mxu2 %v10466_v1  ;;  %v7187_v1 = vor.u32 %v9521_v10, %v7184_v11  ;;  %v7347_v53 = vor.u32 %v9561_v61, %v7344_v29  ;;  %v14295_v59 = vadd.f32 %v5647_v51, %v5635_v50  ;;  %v9553_v10 = vld [vmem:[%s15000_s1 + $0x94c] sm:$0xf]  ;;  %v7312_v11 = vld [vmem:[%s15000_s1 + $0x958] sm:$0xf0] }
 0x2a1   :  { %5911 = vmatpush.bf16.msrb.mxu2 %v7651_v60  ;;  %v9557_v60 = vld [vmem:[%s15000_s1 + $0x96c] sm:$0xf]  ;;  %v7760_v0 = vld [vmem:[%s15000_s1 + $0xcd8] sm:$0xf0]  ;;  %v7571_v2 = vor.u32 %v9617_v38, %v7568_v19 }
 0x2a2   :  { %5876 = vmatpush.bf16.msra.mxu3 %v7203_v26  ;;  %v7155_v26 = vor.u32 %v9513_v46, %v7152_v54  ;;  %v7331_v3 = vor.u32 %v9557_v60, %v7328_v62  ;;  %v9549_v35 = vld [vmem:[%s15000_s1 + $0x92c] sm:$0xf]  ;;  %v7763_v61 = vor.u32 %v9665_v24, %v7760_v0  ;;  %v7424_v29 = vld [vmem:[%s15000_s1 + $0xa38] sm:$0xf0] }
 0x2a3   :  { %5886 = vmatpush.bf16.msrb.mxu0 %v7379_v6  ;;  %v7459_v6 = vor.u32 %v9589_v55, %v7456_v63  ;;  %v5636_v23 = vpop.f32.mrf.mxu0  ;;  %v7552_v43 = vld [vmem:[%s15000_s1 + $0xb38] sm:$0xf0]  ;;  %v9545_v50 = vld [vmem:[%s15000_s1 + $0x90c] sm:$0xf] }
 0x2a4   :  { %5899 = vmatpush.bf16.msrb.mxu1 %v7507_v14  ;;  %v9585_v14 = vld [vmem:[%s15000_s1 + $0xa4c] sm:$0xf]  ;;  %v5649_v30 = vpop.f32.mrf.mxu1  ;;  %v7744_v49 = vld [vmem:[%s15000_s1 + $0xcb8] sm:$0xf0]  ;;  %v7555_v52 = vor.u32 %v9613_v45, %v7552_v43 }
 0x2a5   :  { %5912 = vmatpush.bf16.msrb.mxu2 %v7635_v15  ;;  %v7779_v15 = vor.u32 %v9669_v22, %v7776_v20  ;;  %v7280_v51 = vld [vmem:[%s15000_s1 + $0x918] sm:$0xf0]  ;;  %v9609_v46 = vld [vmem:[%s15000_s1 + $0xb0c] sm:$0xf]  ;;  %v7747_v54 = vor.u32 %v9661_v47, %v7744_v49 }
 0x2a6   :  { %5877 = vmatpush.bf16.msra.mxu3 %v7187_v1  ;;  %v7315_v1 = vor.u32 %v9553_v10, %v7312_v11  ;;  %v7536_v57 = vld [vmem:[%s15000_s1 + $0xb18] sm:$0xf0]  ;;  %v9701_v60 = vld [vmem:[%s15000_s1 + $0xdec] sm:$0xf]  ;;  %v7283_v63 = vor.u32 %v9545_v50, %v7280_v51 }
 0x2a7   :  { %5887 = vmatpush.bf16.msrb.mxu0 %v7363_v34  ;;  %v7443_v34 = vor.u32 %v9585_v14, %v7440_v44  ;;  %v7904_v62 = vld [vmem:[%s15000_s1 + $0xdf8] sm:$0xf0]  ;;  %v9733_v55 = vld [vmem:[%s15000_s1 + $0xeec] sm:$0xf] }
 0x2a8   :  { %5900 = vmatpush.bf16.msrb.mxu1 %v7491_v36  ;;  %v7296_v36 = vld [vmem:[%s15000_s1 + $0x938] sm:$0xf0]  ;;  %v9765_v5 = vld [vmem:[%s15000_s1 + $0xfec] sm:$0xf] }
 0x2a9   :  { %5913 = vmatpush.bf16.msrb.mxu2 %v7619_v39  ;;  %v9581_v39 = vld [vmem:[%s15000_s1 + $0xa2c] sm:$0xf]  ;;  %v7299_v56 = vor.u32 %v9549_v35, %v7296_v36  ;;  %v8032_v4 = vld [vmem:[%s15000_s1 + $0xef8] sm:$0xf0] }
 0x2aa   :  { %5878 = vmatpush.bf16.msra.mxu3 %v7171_v48  ;;  %v9577_v48 = vld [vmem:[%s15000_s1 + $0xa0c] sm:$0xf]  ;;  %v8160_v22 = vld [vmem:[%s15000_s1 + $0xff8] sm:$0xf0]  ;;  %v8035_v11 = vor.u32 %v9733_v55, %v8032_v4 }
 0x2ab   :  { %5888 = vmatpush.bf16.msrb.mxu0 %v7347_v53  ;;  %v7408_v53 = vld [vmem:[%s15000_s1 + $0xa18] sm:$0xf0]  ;;  %v8163_v14 = vor.u32 %v9765_v5, %v8160_v22  ;;  %v9729_v38 = vld [vmem:[%s15000_s1 + $0xecc] sm:$0xf] }
 0x2ac   :  { %5901 = vmatpush.bf16.msrb.mxu1 %v7475_v27  ;;  %v9657_v27 = vld [vmem:[%s15000_s1 + $0xc8c] sm:$0xf]  ;;  %v7411_v20 = vor.u32 %v9577_v48, %v7408_v53  ;;  %v7712_v10 = vld [vmem:[%s15000_s1 + $0xc78] sm:$0xf0] }
 0x2ad   :  { %5914 = vmatpush.bf16.msrb.mxu2 %v7603_v21  ;;  %v7728_v21 = vld [vmem:[%s15000_s1 + $0xc98] sm:$0xf0]  ;;  %v9761_v23 = vld [vmem:[%s15000_s1 + $0xfcc] sm:$0xf] }
 0x2ae   :  { %5879 = vmatpush.bf16.msra.mxu3 %v7155_v26  ;;  %v7539_v26 = vor.u32 %v9609_v46, %v7536_v57  ;;  %v7888_v44 = vld [vmem:[%s15000_s1 + $0xdd8] sm:$0xf0]  ;;  %v9649_v35 = vld [vmem:[%s15000_s1 + $0xc4c] sm:$0xf] }
 0x2af   :  { %5889 = vmatpush.bf16.msrb.mxu0 %v7331_v3  ;;  %v7731_v3 = vor.u32 %v9657_v27, %v7728_v21  ;;  %v8016_v19 = vld [vmem:[%s15000_s1 + $0xed8] sm:$0xf0]  ;;  %v9725_v45 = vld [vmem:[%s15000_s1 + $0xeac] sm:$0xf] }
 0x2b0   :  { %5902 = vmatpush.bf16.msrb.mxu1 %v7459_v6  ;;  %v7907_v6 = vor.u32 %v9701_v60, %v7904_v62  ;;  %v8144_v24 = vld [vmem:[%s15000_s1 + $0xfd8] sm:$0xf0]  ;;  %v9757_v49 = vld [vmem:[%s15000_s1 + $0xfac] sm:$0xf] }
 0x2b1   :  { %5915 = vmatpush.bf16.msrb.mxu2 %v7587_v8  ;;  %5880 = vmatmul.bf16.vlgmr.msra.gmra.mxu3 %v10702_v7  ;;  %v7427_v7 = vor.u32 %v9581_v39, %v7424_v29  ;;  %v9653_v8 = vld [vmem:[%s15000_s1 + $0xc6c] sm:$0xf]  ;;  %v7696_v36 = vld [vmem:[%s15000_s1 + $0xc58] sm:$0xf0]  ;;  %v8019_v39 = vor.u32 %v9729_v38, %v8016_v19 }
 0x2b2   :  { %5924 = vmatpush.bf16.msrb.mxu3 %v7779_v15  ;;  %v9697_v15 = vld [vmem:[%s15000_s1 + $0xdcc] sm:$0xf]  ;;  %v7715_v30 = vor.u32 %v9653_v8, %v7712_v10  ;;  %v8000_v47 = vld [vmem:[%s15000_s1 + $0xeb8] sm:$0xf0] }
 0x2b3   :  { %5890 = vmatpush.bf16.msrb.mxu0 %v7315_v1  ;;  %v5660_v0 = vpop.f32.mrf.mxu2  ;;  %v9693_v29 = vld [vmem:[%s15000_s1 + $0xdac] sm:$0xf]  ;;  %v7680_v51 = vld [vmem:[%s15000_s1 + $0xc38] sm:$0xf0] }
 0x2b4   :  { %5903 = vmatpush.bf16.msrb.mxu1 %v7443_v34  ;;  %v5661_v1 = vadd.f32 %v5660_v0, %v14295_v59  ;;  %v7891_v34 = vor.u32 %v9697_v15, %v7888_v44  ;;  %v7872_v59 = vld [vmem:[%s15000_s1 + $0xdb8] sm:$0xf0]  ;;  %v9721_v53 = vld [vmem:[%s15000_s1 + $0xe8c] sm:$0xf] }
 0x2b5   :  { %5916 = vmatpush.bf16.msrb.mxu2 %v7571_v2  ;;  %v5673_v2 = vpop.f32.mrf.mxu3  ;;  %v7875_v50 = vor.u32 %v9693_v29, %v7872_v59  ;;  %v7856_v48 = vld [vmem:[%s15000_s1 + $0xd98] sm:$0xf0]  ;;  %v9753_v57 = vld [vmem:[%s15000_s1 + $0xf8c] sm:$0xf] }
 0x2b6   :  { %5925 = vmatpush.bf16.msrb.mxu3 %v7763_v61  ;;  %v8147_v61 = vor.u32 %v9761_v23, %v8144_v24  ;;  %v5674_v43 = vadd.f32 %v5673_v2, %v5661_v1  ;;  %v8112_v27 = vld [vmem:[%s15000_s1 + $0xf98] sm:$0xf0]  ;;  %v9641_v4 = vld [vmem:[%s15000_s1 + $0xc0c] sm:$0xf] }
 0x2b7   :  { %5891 = vmatpush.bf16.msrb.mxu0 %v7299_v56  ;;  %v8128_v56 = vld [vmem:[%s15000_s1 + $0xfb8] sm:$0xf0]  ;;  %v9717_v10 = vld [vmem:[%s15000_s1 + $0xe6c] sm:$0xf] }
 0x2b8   :  { %5904 = vmatpush.bf16.msrb.mxu1 %v7427_v7  ;;  %v8003_v7 = vor.u32 %v9725_v45, %v8000_v47  ;;  %v7664_v5 = vld [vmem:[%s15000_s1 + $0xc18] sm:$0xf0]  ;;  %v9797_v44 = vld [vmem:[%s15000_s1 + $0x10ec] sm:$0xf] }
 0x2b9   :  { %5917 = vmatpush.bf16.msrb.mxu2 %v7555_v52  ;;  %v8131_v52 = vor.u32 %v9757_v49, %v8128_v56  ;;  %v7840_v8 = vld [vmem:[%s15000_s1 + $0xd78] sm:$0xf0]  ;;  %v7667_v19 = vor.u32 %v9641_v4, %v7664_v5  ;;  %v9793_v29 = vld [vmem:[%s15000_s1 + $0x10cc] sm:$0xf] }
 0x2ba   :  { %5926 = vmatpush.bf16.msrb.mxu3 %v7747_v54  ;;  %v7984_v54 = vld [vmem:[%s15000_s1 + $0xe98] sm:$0xf0]  ;;  %v9677_v56 = vld [vmem:[%s15000_s1 + $0xd2c] sm:$0xf] }
 0x2bb   :  { %5892 = vmatpush.bf16.msrb.mxu0 %v7283_v63  ;;  %v5686_v46 = vpop.f32.mrf.mxu0  ;;  %v5662_v62 = vpop.f32.mrf.mxu2  ;;  %v8096_v15 = vld [vmem:[%s15000_s1 + $0xf78] sm:$0xf0]  ;;  %v9829_v5 = vld [vmem:[%s15000_s1 + $0x11ec] sm:$0xf] }
 0x2bc   :  { %5905 = vmatpush.bf16.msrb.mxu1 %v7411_v20  ;;  %v5687_v21 = vadd.f32 %v5686_v46, %v5674_v43  ;;  %v5699_v60 = vpop.f32.mrf.mxu1  ;;  %v7987_v20 = vor.u32 %v9721_v53, %v7984_v54  ;;  %v8288_v38 = vld [vmem:[%s15000_s1 + $0x10f8] sm:$0xf0]  ;;  %v9673_v46 = vld [vmem:[%s15000_s1 + $0xd0c] sm:$0xf] }
 0x2bd   :  { %5918 = vmatpush.bf16.msrb.mxu2 %v7539_v26  ;;  %v5675_v22 = vpop.f32.mrf.mxu3  ;;  %v8115_v26 = vor.u32 %v9753_v57, %v8112_v27  ;;  %v7824_v1 = vld [vmem:[%s15000_s1 + $0xd58] sm:$0xf0]  ;;  %v8291_v2 = vor.u32 %v9797_v44, %v8288_v38  ;;  %v9705_v27 = vld [vmem:[%s15000_s1 + $0xe0c] sm:$0xf] }
 0x2be   :  { %5927 = vmatpush.bf16.msrb.mxu3 %v7731_v3  ;;  %5893 = vmatmul.bf16.vlgmr.msrb.gmra.mxu0 %v10715_v13  ;;  %v7699_v13 = vor.u32 %v9649_v35, %v7696_v36  ;;  %v14494_v3 = vadd.f32 %v5699_v60, %v5687_v21  ;;  %v7952_v35 = vld [vmem:[%s15000_s1 + $0xe58] sm:$0xf0]  ;;  %v9745_v36 = vld [vmem:[%s15000_s1 + $0xf4c] sm:$0xf] }
 0x2bf   :  { %5937 = vmatpush.bf16.msra.mxu0 %v7907_v6  ;;  %5906 = vmatmul.bf16.vlgmr.msrb.gmra.mxu1 %v10713_v12  ;;  %v9689_v12 = vld [vmem:[%s15000_s1 + $0xd8c] sm:$0xf]  ;;  %v8272_v59 = vld [vmem:[%s15000_s1 + $0x10d8] sm:$0xf0] }
 0x2c0   :  { %5950 = vmatpush.bf16.msra.mxu1 %v8035_v11  ;;  %5919 = vmatmul.bf16.vlgmr.msrb.gmra.mxu2 %v10726_v17  ;;  %v9645_v17 = vld [vmem:[%s15000_s1 + $0xc2c] sm:$0xf]  ;;  %v7859_v63 = vor.u32 %v9689_v12, %v7856_v48  ;;  %v7968_v11 = vld [vmem:[%s15000_s1 + $0xe78] sm:$0xf0] }
 0x2c1   :  { %5963 = vmatpush.bf16.msra.mxu2 %v8163_v14  ;;  %v7683_v55 = vor.u32 %v9645_v17, %v7680_v51  ;;  %v9685_v6 = vld [vmem:[%s15000_s1 + $0xd6c] sm:$0xf]  ;;  %v7971_v24 = vor.u32 %v9717_v10, %v7968_v11  ;;  %v8275_v17 = vor.u32 %v9793_v29, %v8272_v59  ;;  %v7936_v51 = vld [vmem:[%s15000_s1 + $0xe38] sm:$0xf0] }
 0x2c2   :  { %5928 = vmatpush.bf16.msrb.mxu3 %v7715_v30  ;;  %v9749_v14 = vld [vmem:[%s15000_s1 + $0xf6c] sm:$0xf]  ;;  %v7843_v23 = vor.u32 %v9685_v6, %v7840_v8  ;;  %v8256_v48 = vld [vmem:[%s15000_s1 + $0x10b8] sm:$0xf0] }
 0x2c3   :  { %5938 = vmatpush.bf16.msra.mxu0 %v7891_v34  ;;  %v8099_v0 = vor.u32 %v9749_v14, %v8096_v15  ;;  %v9681_v30 = vld [vmem:[%s15000_s1 + $0xd4c] sm:$0xf]  ;;  %v7792_v54 = vld [vmem:[%s15000_s1 + $0xd18] sm:$0xf0] }
 0x2c4   :  { %5951 = vmatpush.bf16.msra.mxu1 %v8019_v39  ;;  %v9713_v34 = vld [vmem:[%s15000_s1 + $0xe4c] sm:$0xf]  ;;  %v8080_v39 = vld [vmem:[%s15000_s1 + $0xf58] sm:$0xf0]  ;;  %v5701_v45 = vpop.f32.mrf.mxu1  ;;  %v7827_v43 = vor.u32 %v9681_v30, %v7824_v1 }
 0x2c5   :  { %5964 = vmatpush.bf16.msra.mxu2 %v8147_v61  ;;  %v5688_v61 = vpop.f32.mrf.mxu0  ;;  %v7955_v47 = vor.u32 %v9713_v34, %v7952_v35  ;;  %v8083_v49 = vor.u32 %v9745_v36, %v8080_v39  ;;  %v9789_v12 = vld [vmem:[%s15000_s1 + $0x10ac] sm:$0xf]  ;;  %v7920_v21 = vld [vmem:[%s15000_s1 + $0xe18] sm:$0xf0] }
 0x2c6   :  { %5929 = vmatpush.bf16.msrb.mxu3 %v7699_v13  ;;  %v7808_v13 = vld [vmem:[%s15000_s1 + $0xd38] sm:$0xf0]  ;;  %v9737_v60 = vld [vmem:[%s15000_s1 + $0xf0c] sm:$0xf]  ;;  %v8259_v62 = vor.u32 %v9789_v12, %v8256_v48  ;;  %v7923_v11 = vor.u32 %v9705_v27, %v7920_v21 }
 0x2c7   :  { %5939 = vmatpush.bf16.msra.mxu0 %v7875_v50  ;;  %v9709_v50 = vld [vmem:[%s15000_s1 + $0xe2c] sm:$0xf]  ;;  %v7811_v53 = vor.u32 %v9677_v56, %v7808_v13  ;;  %v8240_v4 = vld [vmem:[%s15000_s1 + $0x1098] sm:$0xf0] }
 0x2c8   :  { %5952 = vmatpush.bf16.msra.mxu1 %v8003_v7  ;;  %v9741_v7 = vld [vmem:[%s15000_s1 + $0xf2c] sm:$0xf]  ;;  %v8416_v22 = vld [vmem:[%s15000_s1 + $0x11f8] sm:$0xf0] }
 0x2c9   :  { %5965 = vmatpush.bf16.msra.mxu2 %v8131_v52  ;;  %v8064_v52 = vld [vmem:[%s15000_s1 + $0xf38] sm:$0xf0]  ;;  %v9893_v8 = vld [vmem:[%s15000_s1 + $0x13ec] sm:$0xf]  ;;  %v8419_v44 = vor.u32 %v9829_v5, %v8416_v22 }
 0x2ca   :  { %5930 = vmatpush.bf16.msrb.mxu3 %v7683_v55  ;;  %v8067_v57 = vor.u32 %v9741_v7, %v8064_v52  ;;  %v8048_v55 = vld [vmem:[%s15000_s1 + $0xf18] sm:$0xf0]  ;;  %v9781_v38 = vld [vmem:[%s15000_s1 + $0x106c] sm:$0xf] }
 0x2cb   :  { %5940 = vmatpush.bf16.msra.mxu0 %v7859_v63  ;;  %v9785_v63 = vld [vmem:[%s15000_s1 + $0x108c] sm:$0xf]  ;;  %v8544_v6 = vld [vmem:[%s15000_s1 + $0x12f8] sm:$0xf0]  ;;  %v8051_v14 = vor.u32 %v9737_v60, %v8048_v55 }
 0x2cc   :  { %5953 = vmatpush.bf16.msra.mxu1 %v7987_v20  ;;  %v9861_v20 = vld [vmem:[%s15000_s1 + $0x12ec] sm:$0xf]  ;;  %v8672_v10 = vld [vmem:[%s15000_s1 + $0x13f8] sm:$0xf0]  ;;  %v8243_v15 = vor.u32 %v9785_v63, %v8240_v4 }
 0x2cd   :  { %5966 = vmatpush.bf16.msra.mxu2 %v8115_v26  ;;  %v7795_v26 = vor.u32 %v9673_v46, %v7792_v54  ;;  %v8400_v30 = vld [vmem:[%s15000_s1 + $0x11d8] sm:$0xf0]  ;;  %v9857_v1 = vld [vmem:[%s15000_s1 + $0x12cc] sm:$0xf] }
 0x2ce   :  { %5931 = vmatpush.bf16.msrb.mxu3 %v7667_v19  ;;  %v8224_v19 = vld [vmem:[%s15000_s1 + $0x1078] sm:$0xf0]  ;;  %v9777_v45 = vld [vmem:[%s15000_s1 + $0x104c] sm:$0xf] }
 0x2cf   :  { %5941 = vmatpush.bf16.msra.mxu0 %v7843_v23  ;;  %v8547_v23 = vor.u32 %v9861_v20, %v8544_v6  ;;  %v8528_v34 = vld [vmem:[%s15000_s1 + $0x12d8] sm:$0xf0]  ;;  %v8227_v39 = vor.u32 %v9781_v38, %v8224_v19  ;;  %v9821_v56 = vld [vmem:[%s15000_s1 + $0x11ac] sm:$0xf] }
 0x2d0   :  { %5954 = vmatpush.bf16.msra.mxu1 %v7971_v24  ;;  %v8675_v24 = vor.u32 %v9893_v8, %v8672_v10  ;;  %v8656_v35 = vld [vmem:[%s15000_s1 + $0x13d8] sm:$0xf0]  ;;  %v9853_v13 = vld [vmem:[%s15000_s1 + $0x12ac] sm:$0xf] }
 0x2d1   :  { %5967 = vmatpush.bf16.msra.mxu2 %v8099_v0  ;;  %5932 = vmatmul.bf16.vlgmr.msrb.gmra.mxu3 %v10743_v28  ;;  %v7939_v28 = vor.u32 %v9709_v50, %v7936_v51  ;;  %v9825_v0 = vld [vmem:[%s15000_s1 + $0x11cc] sm:$0xf]  ;;  %v8640_v7 = vld [vmem:[%s15000_s1 + $0x13b8] sm:$0xf0] }
 0x2d2   :  { %5976 = vmatpush.bf16.msra.mxu3 %v8291_v2  ;;  %v9889_v2 = vld [vmem:[%s15000_s1 + $0x13cc] sm:$0xf]  ;;  %v8403_v29 = vor.u32 %v9825_v0, %v8400_v30  ;;  %v8192_v12 = vld [vmem:[%s15000_s1 + $0x1038] sm:$0xf0] }
 0x2d3   :  { %5942 = vmatpush.bf16.msra.mxu0 %v7827_v43  ;;  %v5712_v36 = vpop.f32.mrf.mxu2  ;;  %v8208_v43 = vld [vmem:[%s15000_s1 + $0x1058] sm:$0xf0]  ;;  %v9885_v51 = vld [vmem:[%s15000_s1 + $0x13ac] sm:$0xf] }
 0x2d4   :  { %5955 = vmatpush.bf16.msra.mxu1 %v7955_v47  ;;  %v5713_v61 = vadd.f32 %v5712_v36, %v14494_v3  ;;  %v5725_v59 = vpop.f32.mrf.mxu3  ;;  %v8531_v47 = vor.u32 %v9857_v1, %v8528_v34  ;;  %v8384_v3 = vld [vmem:[%s15000_s1 + $0x11b8] sm:$0xf0]  ;;  %v9849_v54 = vld [vmem:[%s15000_s1 + $0x128c] sm:$0xf] }
 0x2d5   :  { %5968 = vmatpush.bf16.msra.mxu2 %v8083_v49  ;;  %v8659_v49 = vor.u32 %v9889_v2, %v8656_v35  ;;  %v8387_v52 = vor.u32 %v9821_v56, %v8384_v3  ;;  %v8368_v46 = vld [vmem:[%s15000_s1 + $0x1198] sm:$0xf0]  ;;  %v9769_v5 = vld [vmem:[%s15000_s1 + $0x100c] sm:$0xf] }
 0x2d6   :  { %5977 = vmatpush.bf16.msra.mxu3 %v8275_v17  ;;  %v5726_v50 = vadd.f32 %v5725_v59, %v5713_v61  ;;  %v8512_v17 = vld [vmem:[%s15000_s1 + $0x12b8] sm:$0xf0]  ;;  %v9813_v8 = vld [vmem:[%s15000_s1 + $0x116c] sm:$0xf] }
 0x2d7   :  { %5943 = vmatpush.bf16.msra.mxu0 %v7811_v53  ;;  %v8515_v48 = vor.u32 %v9853_v13, %v8512_v17  ;;  %v8643_v53 = vor.u32 %v9885_v51, %v8640_v7  ;;  %v8624_v27 = vld [vmem:[%s15000_s1 + $0x1398] sm:$0xf0]  ;;  %v9925_v19 = vld [vmem:[%s15000_s1 + $0x14ec] sm:$0xf] }
 0x2d8   :  { %5956 = vmatpush.bf16.msra.mxu1 %v7939_v28  ;;  %v8496_v28 = vld [vmem:[%s15000_s1 + $0x1298] sm:$0xf0]  ;;  %v9809_v34 = vld [vmem:[%s15000_s1 + $0x114c] sm:$0xf] }
 0x2d9   :  { %5969 = vmatpush.bf16.msra.mxu2 %v8067_v57  ;;  %v9881_v57 = vld [vmem:[%s15000_s1 + $0x138c] sm:$0xf]  ;;  %v8176_v22 = vld [vmem:[%s15000_s1 + $0x1018] sm:$0xf0] }
 0x2da   :  { %5978 = vmatpush.bf16.msra.mxu3 %v8259_v62  ;;  %v8627_v6 = vor.u32 %v9881_v57, %v8624_v27  ;;  %v8352_v10 = vld [vmem:[%s15000_s1 + $0x1178] sm:$0xf0]  ;;  %v9841_v35 = vld [vmem:[%s15000_s1 + $0x124c] sm:$0xf] }
 0x2db   :  { %5944 = vmatpush.bf16.msra.mxu0 %v7795_v26  ;;  %v5738_v21 = vpop.f32.mrf.mxu0  ;;  %v5714_v60 = vpop.f32.mrf.mxu2  ;;  %v8499_v26 = vor.u32 %v9849_v54, %v8496_v28  ;;  %v8608_v38 = vld [vmem:[%s15000_s1 + $0x1378] sm:$0xf0]  ;;  %v8355_v0 = vor.u32 %v9813_v8, %v8352_v10  ;;  %v9873_v61 = vld [vmem:[%s15000_s1 + $0x134c] sm:$0xf] }
 0x2dc   :  { %5957 = vmatpush.bf16.msra.mxu1 %v7923_v11  ;;  %v5739_v62 = vadd.f32 %v5738_v21, %v5726_v50  ;;  %v5751_v4 = vpop.f32.mrf.mxu1  ;;  %v5727_v20 = vpop.f32.mrf.mxu3  ;;  %v9845_v11 = vld [vmem:[%s15000_s1 + $0x126c] sm:$0xf]  ;;  %v8336_v2 = vld [vmem:[%s15000_s1 + $0x1158] sm:$0xf0] }
 0x2dd   :  { %5970 = vmatpush.bf16.msra.mxu2 %v8051_v14  ;;  %v9921_v59 = vld [vmem:[%s15000_s1 + $0x14cc] sm:$0xf]  ;;  %v8320_v17 = vld [vmem:[%s15000_s1 + $0x1138] sm:$0xf0] }
 0x2de   :  { %5979 = vmatpush.bf16.msra.mxu3 %v8243_v15  ;;  %5945 = vmatmul.bf16.vlgmr.msra.gmra.mxu0 %v10747_v32  ;;  %v8211_v32 = vor.u32 %v9777_v45, %v8208_v43  ;;  %v5752_v14 = vadd.f32 %v5751_v4, %v5739_v62  ;;  %v8480_v15 = vld [vmem:[%s15000_s1 + $0x1278] sm:$0xf0]  ;;  %v9805_v50 = vld [vmem:[%s15000_s1 + $0x112c] sm:$0xf] }
 0x2df   :  { %5989 = vmatpush.bf16.msrb.mxu0 %v8419_v44  ;;  %5958 = vmatmul.bf16.vlgmr.msra.gmra.mxu1 %v10745_v31  ;;  %v9817_v31 = vld [vmem:[%s15000_s1 + $0x118c] sm:$0xf]  ;;  %v8483_v30 = vor.u32 %v9845_v11, %v8480_v15  ;;  %v8784_v45 = vld [vmem:[%s15000_s1 + $0x14d8] sm:$0xf0] }
 0x2e0   :  { %6002 = vmatpush.bf16.msrb.mxu1 %v8547_v23  ;;  %5971 = vmatmul.bf16.vlgmr.msra.gmra.mxu2 %v10749_v33  ;;  %v9773_v33 = vld [vmem:[%s15000_s1 + $0x102c] sm:$0xf]  ;;  %v8371_v63 = vor.u32 %v9817_v31, %v8368_v46  ;;  %v8800_v23 = vld [vmem:[%s15000_s1 + $0x14f8] sm:$0xf0]  ;;  %v8323_v31 = vor.u32 %v9805_v50, %v8320_v17 }
 0x2e1   :  { %6015 = vmatpush.bf16.msrb.mxu2 %v8675_v24  ;;  %v8195_v55 = vor.u32 %v9773_v33, %v8192_v12  ;;  %v9877_v44 = vld [vmem:[%s15000_s1 + $0x136c] sm:$0xf]  ;;  %v8179_v24 = vor.u32 %v9769_v5, %v8176_v22  ;;  %v8803_v36 = vor.u32 %v9925_v19, %v8800_v23  ;;  %v8576_v12 = vld [vmem:[%s15000_s1 + $0x1338] sm:$0xf0] }
 0x2e2   :  { %5980 = vmatpush.bf16.msra.mxu3 %v8227_v39  ;;  %v8611_v1 = vor.u32 %v9877_v44, %v8608_v38  ;;  %v8464_v39 = vld [vmem:[%s15000_s1 + $0x1258] sm:$0xf0]  ;;  %v9837_v51 = vld [vmem:[%s15000_s1 + $0x122c] sm:$0xf] }
 0x2e3   :  { %5990 = vmatpush.bf16.msrb.mxu0 %v8403_v29  ;;  %v8592_v29 = vld [vmem:[%s15000_s1 + $0x1358] sm:$0xf0]  ;;  %v5740_v43 = vpop.f32.mrf.mxu0  ;;  %v5764_v56 = vpop.f32.mrf.mxu2  ;;  %v8467_v3 = vor.u32 %v9841_v35, %v8464_v39  ;;  %v9869_v33 = vld [vmem:[%s15000_s1 + $0x132c] sm:$0xf] }
 0x2e4   :  { %6003 = vmatpush.bf16.msrb.mxu1 %v8531_v47  ;;  %v8339_v47 = vor.u32 %v9809_v34, %v8336_v2  ;;  %v8595_v13 = vor.u32 %v9873_v61, %v8592_v29  ;;  %v14750_v7 = vadd.f32 %v5764_v56, %v5752_v14  ;;  %v9801_v46 = vld [vmem:[%s15000_s1 + $0x110c] sm:$0xf]  ;;  %v8304_v54 = vld [vmem:[%s15000_s1 + $0x1118] sm:$0xf0]  ;;  %v8579_v28 = vor.u32 %v9869_v33, %v8576_v12 }
 0x2e5   :  { %6016 = vmatpush.bf16.msrb.mxu2 %v8659_v49  ;;  %v5753_v49 = vpop.f32.mrf.mxu1  ;;  %v9833_v57 = vld [vmem:[%s15000_s1 + $0x120c] sm:$0xf]  ;;  %v8432_v27 = vld [vmem:[%s15000_s1 + $0x1218] sm:$0xf0]  ;;  %v8307_v20 = vor.u32 %v9801_v46, %v8304_v54 }
 0x2e6   :  { %5981 = vmatpush.bf16.msra.mxu3 %v8211_v32  ;;  %v8787_v32 = vor.u32 %v9921_v59, %v8784_v45  ;;  %v9865_v21 = vld [vmem:[%s15000_s1 + $0x130c] sm:$0xf]  ;;  %v8560_v62 = vld [vmem:[%s15000_s1 + $0x1318] sm:$0xf0]  ;;  %v8435_v10 = vor.u32 %v9833_v57, %v8432_v27  ;;  %v10044_v59 = vld [vmem:[%s15002_s2] sm:$0xf] }
 0x2e7   :  { %5991 = vmatpush.bf16.msrb.mxu0 %v8387_v52  ;;  %v8448_v52 = vld [vmem:[%s15000_s1 + $0x1238] sm:$0xf0]  ;;  %v9957_v4 = vld [vmem:[%s15000_s1 + $0x15ec] sm:$0xf]  ;;  %v8563_v11 = vor.u32 %v9865_v21, %v8560_v62  ;;  %v808_v45 = vperm.slane %v10044_v59, 3 }
 0x2e8   :  { %6004 = vmatpush.bf16.msrb.mxu1 %v8515_v48  ;;  %v9917_v48 = vld [vmem:[%s15000_s1 + $0x14ac] sm:$0xf]  ;;  %v8928_v5 = vld [vmem:[%s15000_s1 + $0x15f8] sm:$0xf0] }
 0x2e9   :  { %6017 = vmatpush.bf16.msrb.mxu2 %v8643_v53  ;;  %v8768_v53 = vld [vmem:[%s15000_s1 + $0x14b8] sm:$0xf0]  ;;  %v9989_v22 = vld [vmem:[%s15000_s1 + $0x16ec] sm:$0xf]  ;;  %v8931_v44 = vor.u32 %v9957_v4, %v8928_v5 }
 0x2ea   :  { %5982 = vmatpush.bf16.msra.mxu3 %v8195_v55  ;;  %v8771_v60 = vor.u32 %v9917_v48, %v8768_v53  ;;  %v9913_v55 = vld [vmem:[%s15000_s1 + $0x148c] sm:$0xf]  ;;  %v9184_v8 = vld [vmem:[%s15000_s1 + $0x17f8] sm:$0xf0] }
 0x2eb   :  { %5992 = vmatpush.bf16.msrb.mxu0 %v8371_v63  ;;  %v8752_v63 = vld [vmem:[%s15000_s1 + $0x1498] sm:$0xf0]  ;;  %v5766_v14 = vpop.f32.mrf.mxu2  ;;  %v9909_v38 = vld [vmem:[%s15000_s1 + $0x146c] sm:$0xf] }
 0x2ec   :  { %6005 = vmatpush.bf16.msrb.mxu1 %v8499_v26  ;;  %v9056_v26 = vld [vmem:[%s15000_s1 + $0x16f8] sm:$0xf0]  ;;  %v8755_v15 = vor.u32 %v9913_v55, %v8752_v63  ;;  %v10017_v2 = vld [vmem:[%s15000_s1 + $0x17cc] sm:$0xf] }
 0x2ed   :  { %6018 = vmatpush.bf16.msrb.mxu2 %v8627_v6  ;;  %v10021_v6 = vld [vmem:[%s15000_s1 + $0x17ec] sm:$0xf]  ;;  %v8736_v19 = vld [vmem:[%s15000_s1 + $0x1478] sm:$0xf0]  ;;  %v9059_v23 = vor.u32 %v9989_v22, %v9056_v26 }
 0x2ee   :  { %5983 = vmatpush.bf16.msra.mxu3 %v8179_v24  ;;  %v9187_v24 = vor.u32 %v10021_v6, %v9184_v8  ;;  %v9040_v34 = vld [vmem:[%s15000_s1 + $0x16d8] sm:$0xf0]  ;;  %v9905_v61 = vld [vmem:[%s15000_s1 + $0x144c] sm:$0xf] }
 0x2ef   :  { %5993 = vmatpush.bf16.msrb.mxu0 %v8355_v0  ;;  %v9953_v0 = vld [vmem:[%s15000_s1 + $0x15cc] sm:$0xf]  ;;  %v9168_v35 = vld [vmem:[%s15000_s1 + $0x17d8] sm:$0xf0] }
 0x2f0   :  { %6006 = vmatpush.bf16.msrb.mxu1 %v8483_v30  ;;  %v8912_v30 = vld [vmem:[%s15000_s1 + $0x15d8] sm:$0xf0]  ;;  %v9171_v49 = vor.u32 %v10017_v2, %v9168_v35  ;;  %v9949_v56 = vld [vmem:[%s15000_s1 + $0x15ac] sm:$0xf] }
 0x2f1   :  { %6019 = vmatpush.bf16.msrb.mxu2 %v8611_v1  ;;  %5984 = vmatmul.bf16.vlgmr.msra.gmra.mxu3 %v11113_v9  ;;  %v8451_v9 = vor.u32 %v9837_v51, %v8448_v52  ;;  %v9985_v1 = vld [vmem:[%s15000_s1 + $0x16cc] sm:$0xf]  ;;  %v8915_v39 = vor.u32 %v9953_v0, %v8912_v30  ;;  %v8720_v29 = vld [vmem:[%s15000_s1 + $0x1458] sm:$0xf0] }
 0x2f2   :  { %6028 = vmatpush.bf16.msrb.mxu3 %v8803_v36  ;;  %v8739_v36 = vor.u32 %v9909_v38, %v8736_v19  ;;  %v9024_v50 = vld [vmem:[%s15000_s1 + $0x16b8] sm:$0xf0]  ;;  %v10013_v17 = vld [vmem:[%s15000_s1 + $0x17ac] sm:$0xf] }
 0x2f3   :  { %5994 = vmatpush.bf16.msrb.mxu0 %v8339_v47  ;;  %v9043_v47 = vor.u32 %v9985_v1, %v9040_v34  ;;  %v9152_v51 = vld [vmem:[%s15000_s1 + $0x17b8] sm:$0xf0]  ;;  %v10009_v54 = vld [vmem:[%s15000_s1 + $0x178c] sm:$0xf] }
 0x2f4   :  { %6007 = vmatpush.bf16.msrb.mxu1 %v8467_v3  ;;  %v5777_v43 = vpop.f32.mrf.mxu3  ;;  %v8896_v3 = vld [vmem:[%s15000_s1 + $0x15b8] sm:$0xf0]  ;;  %v9155_v48 = vor.u32 %v10013_v17, %v9152_v51  ;;  %v9897_v21 = vld [vmem:[%s15000_s1 + $0x140c] sm:$0xf] }
 0x2f5   :  { %6020 = vmatpush.bf16.msrb.mxu2 %v8595_v13  ;;  %v9981_v13 = vld [vmem:[%s15000_s1 + $0x16ac] sm:$0xf]  ;;  %v8704_v52 = vld [vmem:[%s15000_s1 + $0x1438] sm:$0xf0]  ;;  %v5778_v33 = vadd.f32 %v5777_v43, %v808_v45 }
 0x2f6   :  { %6029 = vmatpush.bf16.msrb.mxu3 %v8787_v32  ;;  %v8723_v32 = vor.u32 %v9905_v61, %v8720_v29  ;;  %v9027_v12 = vor.u32 %v9981_v13, %v9024_v50  ;;  %v8880_v53 = vld [vmem:[%s15000_s1 + $0x1598] sm:$0xf0]  ;;  %v9941_v22 = vld [vmem:[%s15000_s1 + $0x156c] sm:$0xf] }
 0x2f7   :  { %5995 = vmatpush.bf16.msrb.mxu0 %v8323_v31  ;;  %v9977_v31 = vld [vmem:[%s15000_s1 + $0x168c] sm:$0xf]  ;;  %v9008_v46 = vld [vmem:[%s15000_s1 + $0x1698] sm:$0xf0] }
 0x2f8   :  { %6008 = vmatpush.bf16.msrb.mxu1 %v8451_v9  ;;  %v9136_v9 = vld [vmem:[%s15000_s1 + $0x1798] sm:$0xf0]  ;;  %v9011_v4 = vor.u32 %v9977_v31, %v9008_v46  ;;  %v9973_v26 = vld [vmem:[%s15000_s1 + $0x166c] sm:$0xf] }
 0x2f9   :  { %6021 = vmatpush.bf16.msrb.mxu2 %v8579_v28  ;;  %v9139_v5 = vor.u32 %v10009_v54, %v9136_v9  ;;  %v8992_v6 = vld [vmem:[%s15000_s1 + $0x1678] sm:$0xf0]  ;;  %v10005_v8 = vld [vmem:[%s15000_s1 + $0x176c] sm:$0xf] }
 0x2fa   :  { %6030 = vmatpush.bf16.msrb.mxu3 %v8771_v60  ;;  %v8688_v60 = vld [vmem:[%s15000_s1 + $0x1418] sm:$0xf0]  ;;  %v10037_v14 = vld [vmem:[%s15000_s1 + $0x186c] sm:$0xf]  ;;  %v8995_v19 = vor.u32 %v9973_v26, %v8992_v6 }
 0x2fb   :  { %5996 = vmatpush.bf16.msrb.mxu0 %v8307_v20  ;;  %v5790_v28 = vpop.f32.mrf.mxu0  ;;  %v8864_v20 = vld [vmem:[%s15000_s1 + $0x1578] sm:$0xf0]  ;;  %v9969_v30 = vld [vmem:[%s15000_s1 + $0x164c] sm:$0xf] }
 0x2fc   :  { %6009 = vmatpush.bf16.msrb.mxu1 %v8435_v10  ;;  %v5791_v62 = vadd.f32 %v5790_v28, %v5778_v33  ;;  %v5803_v55 = vpop.f32.mrf.mxu1  ;;  %v5779_v63 = vpop.f32.mrf.mxu3  ;;  %v9120_v10 = vld [vmem:[%s15000_s1 + $0x1778] sm:$0xf0]  ;;  %v8867_v38 = vor.u32 %v9941_v22, %v8864_v20  ;;  %v10001_v35 = vld [vmem:[%s15000_s1 + $0x174c] sm:$0xf] }
 0x2fd   :  { %6022 = vmatpush.bf16.msrb.mxu2 %v8563_v11  ;;  %v8848_v0 = vld [vmem:[%s15000_s1 + $0x1558] sm:$0xf0]  ;;  %v10033_v61 = vld [vmem:[%s15000_s1 + $0x184c] sm:$0xf] }
 0x2fe   :  { %6031 = vmatpush.bf16.msrb.mxu3 %v8755_v15  ;;  %5997 = vmatmul.bf16.vlgmr.msrb.gmra.mxu0 %v11126_v18  ;;  %v8899_v18 = vor.u32 %v9949_v56, %v8896_v3  ;;  %v5804_v11 = vadd.f32 %v5803_v55, %v5791_v62  ;;  %v9248_v15 = vld [vmem:[%s15000_s1 + $0x1878] sm:$0xf0]  ;;  %v9933_v56 = vld [vmem:[%s15000_s1 + $0x152c] sm:$0xf] }
 0x2ff   :  { %6041 = vmatpush.bf16.msra.mxu0 %v8931_v44  ;;  %6010 = vmatmul.bf16.vlgmr.msrb.gmra.mxu1 %v11124_v16  ;;  %v9945_v16 = vld [vmem:[%s15000_s1 + $0x158c] sm:$0xf]  ;;  %v8691_v44 = vor.u32 %v9897_v21, %v8688_v60  ;;  %v9251_v34 = vor.u32 %v10037_v14, %v9248_v15  ;;  %v8976_v2 = vld [vmem:[%s15000_s1 + $0x1658] sm:$0xf0] }
 0x300   :  { %6054 = vmatpush.bf16.msra.mxu1 %v9059_v23  ;;  %6023 = vmatmul.bf16.vlgmr.msrb.gmra.mxu2 %v11137_v25  ;;  %v9901_v25 = vld [vmem:[%s15000_s1 + $0x142c] sm:$0xf]  ;;  %v8883_v27 = vor.u32 %v9945_v16, %v8880_v53  ;;  %v9123_v23 = vor.u32 %v10005_v8, %v9120_v10  ;;  %v9232_v29 = vld [vmem:[%s15000_s1 + $0x1858] sm:$0xf0] }
 0x301   :  { %6067 = vmatpush.bf16.msra.mxu2 %v9187_v24  ;;  %v8707_v57 = vor.u32 %v9901_v25, %v8704_v52  ;;  %v9937_v24 = vld [vmem:[%s15000_s1 + $0x154c] sm:$0xf]  ;;  %v8832_v3 = vld [vmem:[%s15000_s1 + $0x1538] sm:$0xf0]  ;;  %v9235_v50 = vor.u32 %v10033_v61, %v9232_v29 }
 0x302   :  { %6032 = vmatpush.bf16.msrb.mxu3 %v8739_v36  ;;  %v9104_v36 = vld [vmem:[%s15000_s1 + $0x1758] sm:$0xf0]  ;;  %v8851_v45 = vor.u32 %v9937_v24, %v8848_v0  ;;  %v9965_v13 = vld [vmem:[%s15000_s1 + $0x162c] sm:$0xf]  ;;  %v8835_v52 = vor.u32 %v9933_v56, %v8832_v3 }
 0x303   :  { %6042 = vmatpush.bf16.msra.mxu0 %v8915_v39  ;;  %v5816_v1 = vpop.f32.mrf.mxu2  ;;  %v5792_v59 = vpop.f32.mrf.mxu0  ;;  %v8960_v17 = vld [vmem:[%s15000_s1 + $0x1638] sm:$0xf0]  ;;  %v9997_v51 = vld [vmem:[%s15000_s1 + $0x172c] sm:$0xf] }
 0x304   :  { %6055 = vmatpush.bf16.msra.mxu1 %v9043_v47  ;;  %v5817_v39 = vadd.f32 %v5816_v1, %v5804_v11  ;;  %v5805_v43 = vpop.f32.mrf.mxu1  ;;  %v8979_v47 = vor.u32 %v9969_v30, %v8976_v2  ;;  %v9216_v25 = vld [vmem:[%s15000_s1 + $0x1838] sm:$0xf0]  ;;  %v8963_v33 = vor.u32 %v9965_v13, %v8960_v17  ;;  %v9961_v16 = vld [vmem:[%s15000_s1 + $0x160c] sm:$0xf] }
 0x305   :  { %6068 = vmatpush.bf16.msra.mxu2 %v9171_v49  ;;  %v9107_v49 = vor.u32 %v10001_v35, %v9104_v36  ;;  %v8944_v46 = vld [vmem:[%s15000_s1 + $0x1618] sm:$0xf0]  ;;  %v9993_v54 = vld [vmem:[%s15000_s1 + $0x170c] sm:$0xf] }
 0x306   :  { %6033 = vmatpush.bf16.msrb.mxu3 %v8723_v32  ;;  %v9088_v32 = vld [vmem:[%s15000_s1 + $0x1738] sm:$0xf0]  ;;  %v10025_v28 = vld [vmem:[%s15000_s1 + $0x180c] sm:$0xf]  ;;  %v8947_v21 = vor.u32 %v9961_v16, %v8944_v46 }
 0x307   :  { %6043 = vmatpush.bf16.msra.mxu0 %v8899_v18  ;;  %v10029_v18 = vld [vmem:[%s15000_s1 + $0x182c] sm:$0xf]  ;;  %v9072_v9 = vld [vmem:[%s15000_s1 + $0x1718] sm:$0xf0] }
 0x308   :  { %6056 = vmatpush.bf16.msra.mxu1 %v9027_v12  ;;  %v9091_v12 = vor.u32 %v9997_v51, %v9088_v32  ;;  %v9219_v31 = vor.u32 %v10029_v18, %v9216_v25  ;;  %v9075_v60 = vor.u32 %v9993_v54, %v9072_v9 }
 0x309   :  { %6069 = vmatpush.bf16.msra.mxu2 %v9155_v48  ;;  %v9929_v48 = vld [vmem:[%s15000_s1 + $0x150c] sm:$0xf] }
 0x30a   :  { %6034 = vmatpush.bf16.msrb.mxu3 %v8707_v57  ;;  %v9200_v57 = vld [vmem:[%s15000_s1 + $0x1818] sm:$0xf0] }
 0x30b   :  { %6044 = vmatpush.bf16.msra.mxu0 %v8883_v27  ;;  %v5818_v53 = vpop.f32.mrf.mxu2  ;;  %v9203_v62 = vor.u32 %v10025_v28, %v9200_v57 }
 0x30c   :  { %6057 = vmatpush.bf16.msra.mxu1 %v9011_v4  ;;  %v10045_v4 = vld [vmem:[#allocation1] sm:$0xff] }
 0x30d   :  { %6070 = vmatpush.bf16.msra.mxu2 %v9139_v5 }
 0x30e   :  { %6035 = vmatpush.bf16.msrb.mxu3 %v8691_v44 }
 0x30f   :  { %6045 = vmatpush.bf16.msra.mxu0 %v8867_v38 }
 0x310   :  { %6058 = vmatpush.bf16.msra.mxu1 %v8995_v19 }
 0x311   :  { %6071 = vmatpush.bf16.msra.mxu2 %v9123_v23  ;;  %6036 = vmatmul.bf16.vlgmr.msrb.gmra.mxu3 %v11154_v37  ;;  %v8816_v37 = vld [vmem:[%s15000_s1 + $0x1518] sm:$0xf0] }
 0x312   :  { %6084 = vmatpush.bf16.msra.mxu3 %v9251_v34  ;;  %v8819_v27 = vor.u32 %v9929_v48, %v8816_v37 }
 0x313   :  { %6046 = vmatpush.bf16.msra.mxu0 %v8851_v45 }
 0x314   :  { %6059 = vmatpush.bf16.msra.mxu1 %v8979_v47  ;;  %v5829_v55 = vpop.f32.mrf.mxu3 }
 0x315   :  { %6072 = vmatpush.bf16.msra.mxu2 %v9107_v49  ;;  %v5830_v63 = vadd.f32 %v5829_v55, %v5817_v39 }
 0x316   :  { %6085 = vmatpush.bf16.msra.mxu3 %v9235_v50 }
 0x317   :  { %6047 = vmatpush.bf16.msra.mxu0 %v8835_v52 }
 0x318   :  { %6060 = vmatpush.bf16.msra.mxu1 %v8963_v33 }
 0x319   :  { %6073 = vmatpush.bf16.msra.mxu2 %v9091_v12 }
 0x31a   :  { %6086 = vmatpush.bf16.msra.mxu3 %v9219_v31 }
 0x31b   :  { %6048 = vmatpush.bf16.msra.mxu0 %v8819_v27  ;;  %v5842_v5 = vpop.f32.mrf.mxu0 }
 0x31c   :  { %6061 = vmatpush.bf16.msra.mxu1 %v8947_v21  ;;  %v5843_v22 = vadd.f32 %v5842_v5, %v5830_v63  ;;  %v5855_v20 = vpop.f32.mrf.mxu1  ;;  %v5831_v26 = vpop.f32.mrf.mxu3 }
 0x31d   :  { %6074 = vmatpush.bf16.msra.mxu2 %v9075_v60 }
 0x31e   :  { %6087 = vmatpush.bf16.msra.mxu3 %v9203_v62  ;;  %6049 = vmatmul.bf16.vlgmr.msra.gmra.mxu0 %v11158_v41  ;;  %v5856_v6 = vadd.f32 %v5855_v20, %v5843_v22  ;;  %v6095_v62 = vmax.f32 %v14750_v7, 0.0 }
 0x31f   :  { %6062 = vmatmul.bf16.vlgmr.msra.gmra.mxu1 %v11156_v40 }
 0x320   :  { %6075 = vmatmul.bf16.vlgmr.msra.gmra.mxu2 %v11160_v42 }
 0x321   :  { %9255 = vmatmul.msk.bf16.vlgmr.msra.gmra.mxu3 %vm4790_vm0, %v10045_v4  ;;  %v6102_v4 = vrot.slane %v6095_v62, 4 }
 0x323   :  { %v5868_v8 = vpop.f32.mrf.mxu2  ;;  %v5844_v11 = vpop.f32.mrf.mxu0 }
 0x324   :  { %v5869_v10 = vadd.f32 %v5868_v8, %v5856_v6  ;;  %v5857_v14 = vpop.f32.mrf.mxu1 }
 0x32b   :  { %v5870_v15 = vpop.f32.mrf.mxu2 }
 0x334   :  { %v5881_v44 = vpop.f32.mrf.mxu3 }
 0x335   :  { %v5882_v41 = vadd.f32 %v5881_v44, %v5869_v10 }
 0x33b   :  { %v5894_v38 = vpop.f32.mrf.mxu0 }
 0x33c   :  { %v5895_v19 = vadd.f32 %v5894_v38, %v5882_v41  ;;  %v5907_v40 = vpop.f32.mrf.mxu1  ;;  %v5883_v23 = vpop.f32.mrf.mxu3 }
 0x33e   :  { %v5908_v42 = vadd.f32 %v5907_v40, %v5895_v19 }
 0x343   :  { %v5920_v24 = vpop.f32.mrf.mxu2  ;;  %v5896_v30 = vpop.f32.mrf.mxu0 }
 0x344   :  { %v5921_v0 = vadd.f32 %v5920_v24, %v5908_v42  ;;  %v5909_v1 = vpop.f32.mrf.mxu1 }
 0x34b   :  { %v5922_v34 = vpop.f32.mrf.mxu2 }
 0x354   :  { %v5933_v2 = vpop.f32.mrf.mxu3 }
 0x355   :  { %v5934_v50 = vadd.f32 %v5933_v2, %v5921_v0 }
 0x35b   :  { %v5946_v35 = vpop.f32.mrf.mxu0 }
 0x35c   :  { %v5959_v36 = vpop.f32.mrf.mxu1  ;;  %v5935_v39 = vpop.f32.mrf.mxu3  ;;  %v5947_v51 = vadd.f32 %v5946_v35, %v5934_v50 }
 0x35e   :  { %v5960_v18 = vadd.f32 %v5959_v36, %v5947_v51 }
 0x363   :  { %v5972_v61 = vpop.f32.mrf.mxu2  ;;  %v5948_v29 = vpop.f32.mrf.mxu0 }
 0x364   :  { %v5961_v59 = vpop.f32.mrf.mxu1  ;;  %v5973_v25 = vadd.f32 %v5972_v61, %v5960_v18 }
 0x36b   :  { %v5974_v45 = vpop.f32.mrf.mxu2 }
 0x374   :  { %v5985_v43 = vpop.f32.mrf.mxu3 }
 0x375   :  { %v5986_v52 = vadd.f32 %v5985_v43, %v5973_v25 }
 0x37b   :  { %v5998_v47 = vpop.f32.mrf.mxu0 }
 0x37c   :  { %v6011_v49 = vpop.f32.mrf.mxu1  ;;  %v5987_v56 = vpop.f32.mrf.mxu3  ;;  %v5999_v33 = vadd.f32 %v5998_v47, %v5986_v52 }
 0x37e   :  { %v6012_v48 = vadd.f32 %v6011_v49, %v5999_v33 }
 0x383   :  { %v6024_v3 = vpop.f32.mrf.mxu2  ;;  %v6000_v13 = vpop.f32.mrf.mxu0 }
 0x384   :  { %v6013_v17 = vpop.f32.mrf.mxu1  ;;  %v6025_v37 = vadd.f32 %v6024_v3, %v6012_v48 }
 0x38b   :  { %v6026_v32 = vpop.f32.mrf.mxu2 }
 0x394   :  { %v6037_v12 = vpop.f32.mrf.mxu3 }
 0x395   :  { %v6038_v16 = vadd.f32 %v6037_v12, %v6025_v37 }
 0x39b   :  { %v6050_v53 = vpop.f32.mrf.mxu0 }
 0x39c   :  { %v6063_v31 = vpop.f32.mrf.mxu1  ;;  %v6051_v46 = vadd.f32 %v6050_v53, %v6038_v16  ;;  %v6039_v54 = vpop.f32.mrf.mxu3 }
 0x39e   :  { %v6064_v9 = vadd.f32 %v6063_v31, %v6051_v46 }
 0x3a3   :  { %v6076_v28 = vpop.f32.mrf.mxu2  ;;  %v6052_v27 = vpop.f32.mrf.mxu0 }
 0x3a4   :  { %v6077_v57 = vadd.f32 %v6076_v28, %v6064_v9  ;;  %v6065_v21 = vpop.f32.mrf.mxu1  ;;  %v6089_v60 = vpop.f32.mrf.mxu3 }
 0x3a6   :  { %v6090_v55 = vadd.f32 %v6089_v60, %v6077_v57 }
 0x3a8   :  { %v6096_v63 = vmax.f32 %v6090_v55, 0.0 }
 0x3aa   :  { %v6103_v5 = vrot.slane %v6096_v63, 2 }
 0x3ab   :  { %v6078_v22 = vpop.f32.mrf.mxu2 }
 0x3ac   :  { %v6107_v20 = vsel %vm6106_vm2, %v6102_v4, %v6103_v5  ;;  %v6091_v6 = vpop.f32.mrf.mxu3 }
 0x3ad   :  { %v6109_v26 = vsel %vm6108_vm3, %v13553_v58, %v6107_v20 }
 0x3ae   :  { %6111 = vst [vmem:[%s15003_s3] sm:$0xff] %v6109_v26 }

</bundles_post_ra>
